<compile_context>
chip_gen: v5e
topology: v5e:2x2
jax: 0.10.0
libtpu: 0.0.40
codegen_flags: <defaults>
</compile_context>

<pallas_src>
import functools

import jax
import jax.numpy as jnp
from jax import lax
from jax.experimental import pallas as pl
from jax.experimental.pallas import tpu as pltpu

_HALO_UNIT = 128  # lane-dense halo granularity


def _wave_block_kernel(*refs, stack_depth, num_stacks, tile_l, halo, fuse_taps):
    if halo:
        (xl_ref, xc_ref, xr_ref, in_w_ref, in_b_ref, net_w_ref, net_b_ref,
         out_w_ref, out_b_ref, o_ref) = refs
    else:
        (xc_ref, in_w_ref, in_b_ref, net_w_ref, net_b_ref,
         out_w_ref, out_b_ref, o_ref) = refs

    T = tile_l
    W = T + 2 * halo                  # local window = [left halo | center | right halo]
    H = in_w_ref.shape[0]             # hidden channels = dim * mult
    cdt = in_w_ref.dtype              # matmul compute dtype (bf16 or f32)

    li = pl.program_id(1)             # L-tile index
    is_first = li == 0
    is_last = li == pl.num_programs(1) - 1
    on_edge = jnp.logical_or(is_first, is_last)

    # (C, W) input window; cast to the matmul dtype only here (x stays f32 in HBM).
    if halo:
        x_win = jnp.concatenate([xl_ref[0], xc_ref[0], xr_ref[0]], axis=1)
    else:
        x_win = xc_ref[0]

    # in_net (1x1 conv).  h stays f32 end-to-end; only matmul operands go to cdt.
    h = jnp.dot(in_w_ref[...], x_win.astype(cdt),
                preferred_element_type=jnp.float32) + in_b_ref[...]      # (H, W) f32
    acc = h[:, halo:halo + T]                                            # residual sum (f32)

    # Hoisted edge masks: one (back, fwd) pair per distinct dilation p = 2**k.
    # Replicate values live at local index `halo` (global 0) / `halo+T-1` (global L-1).
    lane = lax.broadcasted_iota(jnp.int32, (1, W), 1)
    back_masks = [jnp.logical_and(is_first, lane < halo + 2 ** k)
                  for k in range(stack_depth)]
    fwd_masks = [jnp.logical_and(is_last, lane > halo + T - 1 - 2 ** k)
                 for k in range(stack_depth)]

    # TODO(synk): for production NL/H, use lax.fori_loop over stacks (inner
    # stack_depth unrolled) and stream net_w per layer instead of full unroll.
    for j in range(num_stacks * stack_depth):
        k = j % stack_depth
        p = 2 ** k

        # back[l] = h[l-p], fwd[l] = h[l+p].  XLU rotations; wrapped rim columns
        # are either masked below or fall in the discarded halo rim.
        if W % _HALO_UNIT == 0:
            back = pltpu.roll(h, p, axis=1)
            fwd = pltpu.roll(h, W - p, axis=1)
        else:  # tiny whole-L windows (lane dim < 128): plain slice+concat
            back = jnp.concatenate([h[:, :p], h[:, :W - p]], axis=1)
            fwd = jnp.concatenate([h[:, p:], h[:, W - p:]], axis=1)

        # Replicate-padding patch, applied only on the first / last L-tile.
        def _patch(b, f, _k=k, _h=h):
            b = jnp.where(back_masks[_k], _h[:, halo:halo + 1], b)
            f = jnp.where(fwd_masks[_k], _h[:, halo + T - 1:halo + T], f)
            return b, f

        back, fwd = lax.cond(on_edge, _patch, lambda b, f: (b, f), back, fwd)

        b_j = net_b_ref[j]                                               # (2H, 1) f32
        if fuse_taps:
            # Small H: one fused (2H, 2H) x (2H, W) MXU call.
            taps = jnp.concatenate([back.astype(cdt), fwd.astype(cdt)], axis=0)
            z = jnp.dot(net_w_ref[j], taps,
                        preferred_element_type=jnp.float32) + b_j        # (2H, W) f32
        else:
            # Production H: two dots, no (2H, W) taps copy through ld/st slots.
            z = (jnp.dot(net_w_ref[j, :, :H], back.astype(cdt),
                         preferred_element_type=jnp.float32)
                 + jnp.dot(net_w_ref[j, :, H:], fwd.astype(cdt),
                           preferred_element_type=jnp.float32) + b_j)

        h = z[:H] * jax.nn.sigmoid(z[H:])          # GLU along channels, f32
        acc = acc + h[:, halo:halo + T]

    # out_net (1x1 conv) on the center tile only.
    out = jnp.dot(out_w_ref[...], acc.astype(cdt),
                  preferred_element_type=jnp.float32) + out_b_ref[...]   # (C, T)
    o_ref[0] = out.astype(o_ref.dtype)


def _pick_tile_l(L, halo, n_batch, max_tile):
    """Largest lane-dense tile (multiple of the halo unit) dividing L; prefer
    >= 2 L-tiles when the batch alone cannot occupy both v7x TensorCores."""
    cands = [t for t in (2048, 1024, 512, 384, 256, 128)
             if t <= max_tile and L % t == 0 and t % halo == 0]
    if not cands:
        return L                                   # single whole-L tile, no halo
    if n_batch == 1:
        multi = [t for t in cands if L // t >= 2]
        if multi:
            return multi[0]
    return cands[0]


def _pack_params(params, compute_dtype):
    """PyTorch Conv1d layouts -> kernel matmul layouts.

    Weights in the matmul compute dtype, biases kept as f32 column vectors."""
    in_w, in_b, net_w, net_b, out_w, out_b = params
    H = in_w.shape[0]
    dim = out_w.shape[0]
    w_in = in_w[:, :, 0].astype(compute_dtype)                           # (H, C)
    # Fused two-tap weight: z = [W_tap0 | W_tap1] @ [back ; fwd]
    w_net = jnp.concatenate([net_w[:, :, :, 0], net_w[:, :, :, 1]],
                            axis=2).astype(compute_dtype)                # (NL, 2H, 2H)
    w_out = out_w[:, :, 0].astype(compute_dtype)                         # (C, H)
    return (w_in, in_b.reshape(H, 1).astype(jnp.float32),
            w_net, net_b[:, :, None].astype(jnp.float32),
            w_out, out_b.reshape(dim, 1).astype(jnp.float32))


def wave_block(x_ncl, params, *, stack_depth, num_stacks,
               compute_dtype=jnp.bfloat16, tile_l=None):
    """x_ncl: (N, C, L), exactly like the PyTorch module.  Returns (N, C, L)."""
    in_w, in_b, net_w, net_b, out_w, out_b = _pack_params(params, compute_dtype)
    N, C, L = x_ncl.shape
    H = in_w.shape[0]
    NL = num_stacks * stack_depth
    R = num_stacks * (2 ** stack_depth - 1)            # receptive radius per side
    halo = int(pl.cdiv(R, _HALO_UNIT)) * _HALO_UNIT    # lane-dense halo (>= R)

    # Generation-aware budgets (v7x: 64 MiB VMEM, v5e/v6e: 128 MiB).
    try:
        vmem_cap = pltpu.get_tpu_info().vmem_capacity_bytes
    except Exception:
        vmem_cap = 64 * 1024 * 1024
    vmem_limit = min(48 * 1024 * 1024, int(0.65 * vmem_cap))
    max_tile = 1024 if vmem_cap <= 64 * 1024 * 1024 else 2048

    if tile_l is None:
        tile_l = _pick_tile_l(L, halo, N, max_tile)
    T = tile_l
    assert L % T == 0, (L, T)
    n_lt = L // T
    use_halo = halo if n_lt > 1 else 0                 # single tile needs no halo
    if use_halo:
        assert T % halo == 0 and halo >= R, (T, halo, R)
    W = T + 2 * use_halo
    assert 2 ** (stack_depth - 1) < W, (stack_depth, W)  # shifts stay in-window

    kernel = functools.partial(
        _wave_block_kernel, stack_depth=stack_depth, num_stacks=num_stacks,
        tile_l=T, halo=use_halo, fuse_taps=(2 * H <= 128))

    # x BlockSpecs: T-wide center block plus (when tiled) two halo-unit-wide
    # neighbour blocks (not whole neighbour tiles).
    if use_halo:
        tph = T // halo                                # halo-units per tile
        n_hb = L // halo                               # halo-unit blocks in L
        x_specs = [
            pl.BlockSpec((1, C, halo),
                         lambda n, i: (n, 0, jnp.maximum(i * tph - 1, 0))),
            pl.BlockSpec((1, C, T), lambda n, i: (n, 0, i)),
            pl.BlockSpec((1, C, halo),
                         lambda n, i: (n, 0, jnp.minimum((i + 1) * tph, n_hb - 1))),
        ]
    else:
        x_specs = [pl.BlockSpec((1, C, T), lambda n, i: (n, 0, i))]

    itemsize = jnp.dtype(x_ncl.dtype).itemsize
    w_bytes = sum(int(a.size) * jnp.dtype(a.dtype).itemsize
                  for a in (in_w, in_b, net_w, net_b, out_w, out_b))
    cost = pl.CostEstimate(
        flops=int(N * n_lt * (2 * H * C * W
                              + NL * 2 * (2 * H) * (2 * H) * W
                              + 2 * C * H * T)),
        transcendentals=int(N * n_lt * NL * H * W),
        bytes_accessed=int(N * n_lt * C * W * itemsize     # x reads incl. halos
                           + N * C * L * itemsize          # output writeback
                           + w_bytes))

    def run(weight_mode):
        def w_spec(shape):
            zeros = (0,) * len(shape)
            if weight_mode is None:
                return pl.BlockSpec(shape, lambda n, i: zeros)
            return pl.BlockSpec(shape, lambda n, i: zeros, pipeline_mode=weight_mode)

        call = pl.pallas_call(
            kernel,
            out_shape=jax.ShapeDtypeStruct((N, C, L), x_ncl.dtype),
            grid_spec=pltpu.PrefetchScalarGridSpec(
                num_scalar_prefetch=0,
                grid=(N, n_lt),
                in_specs=x_specs + [
                    w_spec((H, C)),               # in_w
                    w_spec((H, 1)),               # in_b
                    w_spec((NL, 2 * H, 2 * H)),   # net_w (fused two-tap)
                    w_spec((NL, 2 * H, 1)),       # net_b
                    w_spec((C, H)),               # out_w
                    w_spec((C, 1)),               # out_b
                ],
                out_specs=pl.BlockSpec((1, C, T), lambda n, i: (n, 0, i)),
            ),
            compiler_params=pltpu.CompilerParams(
                dimension_semantics=("parallel", "parallel"),
                vmem_limit_bytes=vmem_limit),
            cost_estimate=cost,
        )
        x_args = (x_ncl,) * (3 if use_halo else 1)
        return call(*x_args, in_w, in_b, net_w, net_b, out_w, out_b)

    # Grid-invariant weights single-buffered (halves resident weight VMEM);
    # fall back to default double buffering if this JAX build does not support
    # per-operand buffer counts in pallas_call.
    try:
        return run(pl.Buffered(1))
    except Exception:
        return run(None)


def init_params(key, dim, stack_depth, num_stacks, mult=1):
    """Deterministic synthetic parameters in PyTorch Conv1d layouts."""
    H = dim * mult
    NL = num_stacks * stack_depth
    ks = jax.random.split(key, 6)
    in_w = jax.random.normal(ks[0], (H, dim, 1), jnp.float32) * 0.2        # Conv1d(dim, H, 1).weight
    in_b = jax.random.normal(ks[1], (H,), jnp.float32) * 0.1
    net_w = jax.random.normal(ks[2], (NL, 2 * H, H, 2), jnp.float32) * 0.2  # Conv1d(H, 2H, 2).weight
    net_b = jax.random.normal(ks[3], (NL, 2 * H), jnp.float32) * 0.1
    out_w = jax.random.normal(ks[4], (dim, H, 1), jnp.float32) * 0.2       # Conv1d(H, dim, 1).weight
    out_b = jax.random.normal(ks[5], (dim,), jnp.float32) * 0.1
    return (in_w, in_b, net_w, net_b, out_w, out_b)


def wave_block_ref(x_ncl, params, *, stack_depth, num_stacks):
    """Pure-JAX reference computed directly from the PyTorch conv-layout params."""
    in_w, in_b, net_w, net_b, out_w, out_b = params
    x = x_ncl.astype(jnp.float32)
    L = x.shape[2]
    H = in_w.shape[0]
    t = jnp.arange(L)
    acc = jnp.einsum('hc,ncl->nhl', in_w[:, :, 0], x) + in_b[None, :, None]
    h = acc
    for j in range(num_stacks * stack_depth):
        p = 2 ** (j % stack_depth)
        back = h[:, :, jnp.clip(t - p, 0, L - 1)]
        fwd = h[:, :, jnp.clip(t + p, 0, L - 1)]
        z = (jnp.einsum('oh,nhl->nol', net_w[j, :, :, 0], back)
             + jnp.einsum('oh,nhl->nol', net_w[j, :, :, 1], fwd)
             + net_b[j][None, :, None])
        h = z[:, :H] * jax.nn.sigmoid(z[:, H:])
        acc = acc + h
    return jnp.einsum('ch,nhl->ncl', out_w[:, :, 0], acc) + out_b[None, :, None]


if __name__ == "__main__":
    # WaveBlock(dim=8, stack_depth=3, num_stacks=2, mult=2): H=16, 6 layers,
    # receptive radius R = 2*(2**3 - 1) = 14 per side.
    N, dim = 2, 8
    stack_depth, num_stacks, mult = 3, 2, 2

    key = jax.random.PRNGKey(0)
    kx, kx2, kp = jax.random.split(key, 3)
    params = init_params(kp, dim, stack_depth, num_stacks, mult)

    L = 512
    x = jax.random.normal(kx, (N, dim, L), jnp.float32)        # (N, C, L), PyTorch layout
    ref = wave_block_ref(x, params, stack_depth=stack_depth, num_stacks=num_stacks)

    # 1) f32, multi-tile halo path (4 x 128 tiles with 128-lane halos): exact.
    out = wave_block(x, params, stack_depth=stack_depth, num_stacks=num_stacks,
                     compute_dtype=jnp.float32, tile_l=128)
    out = jax.block_until_ready(out)
    assert out.shape == (N, dim, L), out.shape
    assert jnp.allclose(out, ref, rtol=1e-3, atol=1e-3), \
        float(jnp.max(jnp.abs(out - ref)))

    # 2) f32, 2 x 256 tiles (halo block indexing with T != halo unit): exact.
    out = wave_block(x, params, stack_depth=stack_depth, num_stacks=num_stacks,
                     compute_dtype=jnp.float32, tile_l=256)
    out = jax.block_until_ready(out)
    assert jnp.allclose(out, ref, rtol=1e-3, atol=1e-3), \
        float(jnp.max(jnp.abs(out - ref)))

    # 3) bf16 matmuls / f32 activations+accumulation, default tiling
    #    (single 512-lane tile, no halo, roll path).
    out = wave_block(x, params, stack_depth=stack_depth, num_stacks=num_stacks,
                     compute_dtype=jnp.bfloat16)
    out = jax.block_until_ready(out)
    err = float(jnp.max(jnp.abs(out - ref)))
    scale = float(jnp.max(jnp.abs(ref)))
    assert err <= 0.05 * scale + 0.05, (err, scale)

    # 4) tiny-L fallback (single whole-L window, lane dim < 128), f32: exact.
    L2 = 16
    x2 = jax.random.normal(kx2, (N, dim, L2), jnp.float32)
    ref2 = wave_block_ref(x2, params, stack_depth=stack_depth, num_stacks=num_stacks)
    out2 = wave_block(x2, params, stack_depth=stack_depth, num_stacks=num_stacks,
                      compute_dtype=jnp.float32)
    out2 = jax.block_until_ready(out2)
    assert jnp.allclose(out2, ref2, rtol=1e-3, atol=1e-3), \
        float(jnp.max(jnp.abs(out2 - ref2)))

    print("KERNEL_OK")
</pallas_src>

<mosaic_0001>
module attributes {stable_mosaic.version = 11 : i64} {
  func.func @_wave_block_kernel(%arg0: i32, %arg1: i32, %arg2: memref<1x8x128xf32, #tpu.memory_space<vmem>>, %arg3: memref<1x8x128xf32, #tpu.memory_space<vmem>>, %arg4: memref<1x8x128xf32, #tpu.memory_space<vmem>>, %arg5: memref<16x8xf32, #tpu.memory_space<vmem>>, %arg6: memref<16x1xf32, #tpu.memory_space<vmem>>, %arg7: memref<6x32x32xf32, #tpu.memory_space<vmem>>, %arg8: memref<6x32x1xf32, #tpu.memory_space<vmem>>, %arg9: memref<8x16xf32, #tpu.memory_space<vmem>>, %arg10: memref<8x1xf32, #tpu.memory_space<vmem>>, %arg11: memref<1x8x128xf32, #tpu.memory_space<vmem>>) attributes {dimension_semantics = [#tpu.dimension_semantics<parallel>, #tpu.dimension_semantics<parallel>], iteration_bounds = array<i64: 2, 4>, scalar_prefetch = 0 : i64, scratch_operands = 0 : i64, tpu.core_type = #tpu.core_type<tc>, window_params = [{transform_indices = @transform_0, window_bounds = array<i64: 1, 8, 128>}, {transform_indices = @transform_1, window_bounds = array<i64: 1, 8, 128>}, {transform_indices = @transform_2, window_bounds = array<i64: 1, 8, 128>}, {pipeline_mode = #tpu.pipeline_mode<synchronous>, transform_indices = @transform_3, window_bounds = array<i64: 16, 8>}, {pipeline_mode = #tpu.pipeline_mode<synchronous>, transform_indices = @transform_4, window_bounds = array<i64: 16, 1>}, {pipeline_mode = #tpu.pipeline_mode<synchronous>, transform_indices = @transform_5, window_bounds = array<i64: 6, 32, 32>}, {pipeline_mode = #tpu.pipeline_mode<synchronous>, transform_indices = @transform_6, window_bounds = array<i64: 6, 32, 1>}, {pipeline_mode = #tpu.pipeline_mode<synchronous>, transform_indices = @transform_7, window_bounds = array<i64: 8, 16>}, {pipeline_mode = #tpu.pipeline_mode<synchronous>, transform_indices = @transform_8, window_bounds = array<i64: 8, 1>}, {transform_indices = @transform_9, window_bounds = array<i64: 1, 8, 128>}]} {
    %c0_i32 = arith.constant 0 : i32
    %0 = arith.cmpi eq, %arg1, %c0_i32 : i32
    %c3_i32 = arith.constant 3 : i32
    %1 = arith.cmpi eq, %arg1, %c3_i32 : i32
    %2 = arith.ori %0, %1 : i1
    %c0 = arith.constant 0 : index
    %c0_0 = arith.constant 0 : index
    %c0_1 = arith.constant 0 : index
    %3 = vector.load %arg2[%c0, %c0_0, %c0_1] : memref<1x8x128xf32, #tpu.memory_space<vmem>>, vector<1x8x128xf32>
    %4 = vector.shape_cast %3 : vector<1x8x128xf32> to vector<8x128xf32>
    %c0_2 = arith.constant 0 : index
    %c0_3 = arith.constant 0 : index
    %c0_4 = arith.constant 0 : index
    %5 = vector.load %arg3[%c0_2, %c0_3, %c0_4] : memref<1x8x128xf32, #tpu.memory_space<vmem>>, vector<1x8x128xf32>
    %6 = vector.shape_cast %5 : vector<1x8x128xf32> to vector<8x128xf32>
    %c0_5 = arith.constant 0 : index
    %c0_6 = arith.constant 0 : index
    %c0_7 = arith.constant 0 : index
    %7 = vector.load %arg4[%c0_5, %c0_6, %c0_7] : memref<1x8x128xf32, #tpu.memory_space<vmem>>, vector<1x8x128xf32>
    %8 = vector.shape_cast %7 : vector<1x8x128xf32> to vector<8x128xf32>
    %9 = tpu.concatenate %4, %6, %8 in 1 : vector<8x128xf32>, vector<8x128xf32>, vector<8x128xf32> -> vector<8x384xf32>
    %c0_8 = arith.constant 0 : index
    %c0_9 = arith.constant 0 : index
    %10 = vector.load %arg5[%c0_8, %c0_9] : memref<16x8xf32, #tpu.memory_space<vmem>>, vector<16x8xf32>
    %cst = arith.constant dense<0.000000e+00> : vector<16x384xf32>
    %11 = tpu.matmul %10, %9, %cst {dimension_numbers = #tpu.dot_dimension_numbers<[1], [0], [0], [1], [0, 0, 1, 1], [], []>} : vector<16x8xf32>, vector<8x384xf32>, vector<16x384xf32> -> vector<16x384xf32>
    %c0_10 = arith.constant 0 : index
    %c0_11 = arith.constant 0 : index
    %12 = vector.load %arg6[%c0_10, %c0_11] : memref<16x1xf32, #tpu.memory_space<vmem>>, vector<16x1xf32>
    %13 = vector.broadcast %12 : vector<16x1xf32> to vector<16x384xf32>
    %14 = arith.addf %11, %13 : vector<16x384xf32>
    %15 = vector.extract_strided_slice %14 {offsets = [0, 128], sizes = [16, 128], strides = [1, 1]} : vector<16x384xf32> to vector<16x128xf32>
    %16 = tpu.iota {dimensions = array<i32: 1>} : vector<1x384xi32>
    %c129_i32 = arith.constant 129 : i32
    %17 = vector.broadcast %c129_i32 : i32 to vector<1x384xi32>
    %18 = arith.cmpi slt, %16, %17 : vector<1x384xi32>
    %19 = vector.broadcast %0 : i1 to vector<1x384xi1>
    %20 = arith.andi %19, %18 : vector<1x384xi1>
    %c130_i32 = arith.constant 130 : i32
    %21 = vector.broadcast %c130_i32 : i32 to vector<1x384xi32>
    %22 = arith.cmpi slt, %16, %21 : vector<1x384xi32>
    %23 = vector.broadcast %0 : i1 to vector<1x384xi1>
    %24 = arith.andi %23, %22 : vector<1x384xi1>
    %c132_i32 = arith.constant 132 : i32
    %25 = vector.broadcast %c132_i32 : i32 to vector<1x384xi32>
    %26 = arith.cmpi slt, %16, %25 : vector<1x384xi32>
    %27 = vector.broadcast %0 : i1 to vector<1x384xi1>
    %28 = arith.andi %27, %26 : vector<1x384xi1>
    %c254_i32 = arith.constant 254 : i32
    %29 = vector.broadcast %c254_i32 : i32 to vector<1x384xi32>
    %30 = arith.cmpi sgt, %16, %29 : vector<1x384xi32>
    %31 = vector.broadcast %1 : i1 to vector<1x384xi1>
    %32 = arith.andi %31, %30 : vector<1x384xi1>
    %c253_i32 = arith.constant 253 : i32
    %33 = vector.broadcast %c253_i32 : i32 to vector<1x384xi32>
    %34 = arith.cmpi sgt, %16, %33 : vector<1x384xi32>
    %35 = vector.broadcast %1 : i1 to vector<1x384xi1>
    %36 = arith.andi %35, %34 : vector<1x384xi1>
    %c251_i32 = arith.constant 251 : i32
    %37 = vector.broadcast %c251_i32 : i32 to vector<1x384xi32>
    %38 = arith.cmpi sgt, %16, %37 : vector<1x384xi32>
    %39 = vector.broadcast %1 : i1 to vector<1x384xi1>
    %40 = arith.andi %39, %38 : vector<1x384xi1>
    %c1_i32 = arith.constant 1 : i32
    %41 = tpu.dynamic_rotate %14 by %c1_i32 dim 1 : vector<16x384xf32>, i32 -> vector<16x384xf32>
    %c383_i32 = arith.constant 383 : i32
    %42 = tpu.dynamic_rotate %14 by %c383_i32 dim 1 : vector<16x384xf32>, i32 -> vector<16x384xf32>
    %43 = arith.extui %2 : i1 to i32
    %c0_i32_12 = arith.constant 0 : i32
    %44 = arith.cmpi ne, %43, %c0_i32_12 : i32
    %45:2 = scf.if %44 -> (vector<16x384xf32>, vector<16x384xf32>) {
      %187 = vector.extract_strided_slice %14 {offsets = [0, 128], sizes = [16, 1], strides = [1, 1]} : vector<16x384xf32> to vector<16x1xf32>
      %188 = vector.shape_cast %20 : vector<1x384xi1> to vector<1x384xi1>
      %189 = vector.broadcast %188 : vector<1x384xi1> to vector<16x384xi1>
      %190 = vector.shape_cast %187 : vector<16x1xf32> to vector<16x1xf32>
      %191 = vector.broadcast %190 : vector<16x1xf32> to vector<16x384xf32>
      %192 = arith.select %189, %191, %41 : vector<16x384xi1>, vector<16x384xf32>
      %193 = vector.extract_strided_slice %14 {offsets = [0, 255], sizes = [16, 1], strides = [1, 1]} : vector<16x384xf32> to vector<16x1xf32>
      %194 = vector.shape_cast %32 : vector<1x384xi1> to vector<1x384xi1>
      %195 = vector.broadcast %194 : vector<1x384xi1> to vector<16x384xi1>
      %196 = vector.shape_cast %193 : vector<16x1xf32> to vector<16x1xf32>
      %197 = vector.broadcast %196 : vector<16x1xf32> to vector<16x384xf32>
      %198 = arith.select %195, %197, %42 : vector<16x384xi1>, vector<16x384xf32>
      scf.yield %192, %198 : vector<16x384xf32>, vector<16x384xf32>
    } else {
      scf.yield %41, %42 : vector<16x384xf32>, vector<16x384xf32>
    }
    %c0_13 = arith.constant 0 : index
    %c0_14 = arith.constant 0 : index
    %c0_15 = arith.constant 0 : index
    %46 = vector.load %arg8[%c0_13, %c0_14, %c0_15] : memref<6x32x1xf32, #tpu.memory_space<vmem>>, vector<1x32x1xf32>
    %47 = vector.shape_cast %46 : vector<1x32x1xf32> to vector<32x1xf32>
    %48 = tpu.concatenate %45#0, %45#1 in 0 : vector<16x384xf32>, vector<16x384xf32> -> vector<32x384xf32>
    %c0_16 = arith.constant 0 : index
    %c0_17 = arith.constant 0 : index
    %c0_18 = arith.constant 0 : index
    %49 = vector.load %arg7[%c0_16, %c0_17, %c0_18] : memref<6x32x32xf32, #tpu.memory_space<vmem>>, vector<1x32x32xf32>
    %50 = vector.shape_cast %49 : vector<1x32x32xf32> to vector<32x32xf32>
    %cst_19 = arith.constant dense<0.000000e+00> : vector<32x384xf32>
    %51 = tpu.matmul %50, %48, %cst_19 {dimension_numbers = #tpu.dot_dimension_numbers<[1], [0], [0], [1], [0, 0, 1, 1], [], []>} : vector<32x32xf32>, vector<32x384xf32>, vector<32x384xf32> -> vector<32x384xf32>
    %52 = vector.broadcast %47 : vector<32x1xf32> to vector<32x384xf32>
    %53 = arith.addf %51, %52 : vector<32x384xf32>
    %54 = vector.extract_strided_slice %53 {offsets = [0, 0], sizes = [16, 384], strides = [1, 1]} : vector<32x384xf32> to vector<16x384xf32>
    %55 = vector.extract_strided_slice %53 {offsets = [16, 0], sizes = [16, 384], strides = [1, 1]} : vector<32x384xf32> to vector<16x384xf32>
    %56 = arith.negf %55 : vector<16x384xf32>
    %57 = math.exp %56 : vector<16x384xf32>
    %cst_20 = arith.constant 1.000000e+00 : f32
    %58 = vector.broadcast %cst_20 : f32 to vector<16x384xf32>
    %59 = arith.addf %58, %57 : vector<16x384xf32>
    %60 = arith.divf %58, %59 : vector<16x384xf32>
    %61 = arith.mulf %54, %60 : vector<16x384xf32>
    %62 = vector.extract_strided_slice %61 {offsets = [0, 128], sizes = [16, 128], strides = [1, 1]} : vector<16x384xf32> to vector<16x128xf32>
    %63 = arith.addf %15, %62 : vector<16x128xf32>
    %c2_i32 = arith.constant 2 : i32
    %64 = tpu.dynamic_rotate %61 by %c2_i32 dim 1 : vector<16x384xf32>, i32 -> vector<16x384xf32>
    %c382_i32 = arith.constant 382 : i32
    %65 = tpu.dynamic_rotate %61 by %c382_i32 dim 1 : vector<16x384xf32>, i32 -> vector<16x384xf32>
    %66 = arith.extui %2 : i1 to i32
    %c0_i32_21 = arith.constant 0 : i32
    %67 = arith.cmpi ne, %66, %c0_i32_21 : i32
    %68:2 = scf.if %67 -> (vector<16x384xf32>, vector<16x384xf32>) {
      %187 = vector.extract_strided_slice %61 {offsets = [0, 128], sizes = [16, 1], strides = [1, 1]} : vector<16x384xf32> to vector<16x1xf32>
      %188 = vector.shape_cast %24 : vector<1x384xi1> to vector<1x384xi1>
      %189 = vector.broadcast %188 : vector<1x384xi1> to vector<16x384xi1>
      %190 = vector.shape_cast %187 : vector<16x1xf32> to vector<16x1xf32>
      %191 = vector.broadcast %190 : vector<16x1xf32> to vector<16x384xf32>
      %192 = arith.select %189, %191, %64 : vector<16x384xi1>, vector<16x384xf32>
      %193 = vector.extract_strided_slice %61 {offsets = [0, 255], sizes = [16, 1], strides = [1, 1]} : vector<16x384xf32> to vector<16x1xf32>
      %194 = vector.shape_cast %36 : vector<1x384xi1> to vector<1x384xi1>
      %195 = vector.broadcast %194 : vector<1x384xi1> to vector<16x384xi1>
      %196 = vector.shape_cast %193 : vector<16x1xf32> to vector<16x1xf32>
      %197 = vector.broadcast %196 : vector<16x1xf32> to vector<16x384xf32>
      %198 = arith.select %195, %197, %65 : vector<16x384xi1>, vector<16x384xf32>
      scf.yield %192, %198 : vector<16x384xf32>, vector<16x384xf32>
    } else {
      scf.yield %64, %65 : vector<16x384xf32>, vector<16x384xf32>
    }
    %c1 = arith.constant 1 : index
    %c0_22 = arith.constant 0 : index
    %c0_23 = arith.constant 0 : index
    %69 = vector.load %arg8[%c1, %c0_22, %c0_23] : memref<6x32x1xf32, #tpu.memory_space<vmem>>, vector<1x32x1xf32>
    %70 = vector.shape_cast %69 : vector<1x32x1xf32> to vector<32x1xf32>
    %71 = tpu.concatenate %68#0, %68#1 in 0 : vector<16x384xf32>, vector<16x384xf32> -> vector<32x384xf32>
    %c1_24 = arith.constant 1 : index
    %c0_25 = arith.constant 0 : index
    %c0_26 = arith.constant 0 : index
    %72 = vector.load %arg7[%c1_24, %c0_25, %c0_26] : memref<6x32x32xf32, #tpu.memory_space<vmem>>, vector<1x32x32xf32>
    %73 = vector.shape_cast %72 : vector<1x32x32xf32> to vector<32x32xf32>
    %cst_27 = arith.constant dense<0.000000e+00> : vector<32x384xf32>
    %74 = tpu.matmul %73, %71, %cst_27 {dimension_numbers = #tpu.dot_dimension_numbers<[1], [0], [0], [1], [0, 0, 1, 1], [], []>} : vector<32x32xf32>, vector<32x384xf32>, vector<32x384xf32> -> vector<32x384xf32>
    %75 = vector.broadcast %70 : vector<32x1xf32> to vector<32x384xf32>
    %76 = arith.addf %74, %75 : vector<32x384xf32>
    %77 = vector.extract_strided_slice %76 {offsets = [0, 0], sizes = [16, 384], strides = [1, 1]} : vector<32x384xf32> to vector<16x384xf32>
    %78 = vector.extract_strided_slice %76 {offsets = [16, 0], sizes = [16, 384], strides = [1, 1]} : vector<32x384xf32> to vector<16x384xf32>
    %79 = arith.negf %78 : vector<16x384xf32>
    %80 = math.exp %79 : vector<16x384xf32>
    %cst_28 = arith.constant 1.000000e+00 : f32
    %81 = vector.broadcast %cst_28 : f32 to vector<16x384xf32>
    %82 = arith.addf %81, %80 : vector<16x384xf32>
    %83 = arith.divf %81, %82 : vector<16x384xf32>
    %84 = arith.mulf %77, %83 : vector<16x384xf32>
    %85 = vector.extract_strided_slice %84 {offsets = [0, 128], sizes = [16, 128], strides = [1, 1]} : vector<16x384xf32> to vector<16x128xf32>
    %86 = arith.addf %63, %85 : vector<16x128xf32>
    %c4_i32 = arith.constant 4 : i32
    %87 = tpu.dynamic_rotate %84 by %c4_i32 dim 1 : vector<16x384xf32>, i32 -> vector<16x384xf32>
    %c380_i32 = arith.constant 380 : i32
    %88 = tpu.dynamic_rotate %84 by %c380_i32 dim 1 : vector<16x384xf32>, i32 -> vector<16x384xf32>
    %89 = arith.extui %2 : i1 to i32
    %c0_i32_29 = arith.constant 0 : i32
    %90 = arith.cmpi ne, %89, %c0_i32_29 : i32
    %91:2 = scf.if %90 -> (vector<16x384xf32>, vector<16x384xf32>) {
      %187 = vector.extract_strided_slice %84 {offsets = [0, 128], sizes = [16, 1], strides = [1, 1]} : vector<16x384xf32> to vector<16x1xf32>
      %188 = vector.shape_cast %28 : vector<1x384xi1> to vector<1x384xi1>
      %189 = vector.broadcast %188 : vector<1x384xi1> to vector<16x384xi1>
      %190 = vector.shape_cast %187 : vector<16x1xf32> to vector<16x1xf32>
      %191 = vector.broadcast %190 : vector<16x1xf32> to vector<16x384xf32>
      %192 = arith.select %189, %191, %87 : vector<16x384xi1>, vector<16x384xf32>
      %193 = vector.extract_strided_slice %84 {offsets = [0, 255], sizes = [16, 1], strides = [1, 1]} : vector<16x384xf32> to vector<16x1xf32>
      %194 = vector.shape_cast %40 : vector<1x384xi1> to vector<1x384xi1>
      %195 = vector.broadcast %194 : vector<1x384xi1> to vector<16x384xi1>
      %196 = vector.shape_cast %193 : vector<16x1xf32> to vector<16x1xf32>
      %197 = vector.broadcast %196 : vector<16x1xf32> to vector<16x384xf32>
      %198 = arith.select %195, %197, %88 : vector<16x384xi1>, vector<16x384xf32>
      scf.yield %192, %198 : vector<16x384xf32>, vector<16x384xf32>
    } else {
      scf.yield %87, %88 : vector<16x384xf32>, vector<16x384xf32>
    }
    %c2 = arith.constant 2 : index
    %c0_30 = arith.constant 0 : index
    %c0_31 = arith.constant 0 : index
    %92 = vector.load %arg8[%c2, %c0_30, %c0_31] : memref<6x32x1xf32, #tpu.memory_space<vmem>>, vector<1x32x1xf32>
    %93 = vector.shape_cast %92 : vector<1x32x1xf32> to vector<32x1xf32>
    %94 = tpu.concatenate %91#0, %91#1 in 0 : vector<16x384xf32>, vector<16x384xf32> -> vector<32x384xf32>
    %c2_32 = arith.constant 2 : index
    %c0_33 = arith.constant 0 : index
    %c0_34 = arith.constant 0 : index
    %95 = vector.load %arg7[%c2_32, %c0_33, %c0_34] : memref<6x32x32xf32, #tpu.memory_space<vmem>>, vector<1x32x32xf32>
    %96 = vector.shape_cast %95 : vector<1x32x32xf32> to vector<32x32xf32>
    %cst_35 = arith.constant dense<0.000000e+00> : vector<32x384xf32>
    %97 = tpu.matmul %96, %94, %cst_35 {dimension_numbers = #tpu.dot_dimension_numbers<[1], [0], [0], [1], [0, 0, 1, 1], [], []>} : vector<32x32xf32>, vector<32x384xf32>, vector<32x384xf32> -> vector<32x384xf32>
    %98 = vector.broadcast %93 : vector<32x1xf32> to vector<32x384xf32>
    %99 = arith.addf %97, %98 : vector<32x384xf32>
    %100 = vector.extract_strided_slice %99 {offsets = [0, 0], sizes = [16, 384], strides = [1, 1]} : vector<32x384xf32> to vector<16x384xf32>
    %101 = vector.extract_strided_slice %99 {offsets = [16, 0], sizes = [16, 384], strides = [1, 1]} : vector<32x384xf32> to vector<16x384xf32>
    %102 = arith.negf %101 : vector<16x384xf32>
    %103 = math.exp %102 : vector<16x384xf32>
    %cst_36 = arith.constant 1.000000e+00 : f32
    %104 = vector.broadcast %cst_36 : f32 to vector<16x384xf32>
    %105 = arith.addf %104, %103 : vector<16x384xf32>
    %106 = arith.divf %104, %105 : vector<16x384xf32>
    %107 = arith.mulf %100, %106 : vector<16x384xf32>
    %108 = vector.extract_strided_slice %107 {offsets = [0, 128], sizes = [16, 128], strides = [1, 1]} : vector<16x384xf32> to vector<16x128xf32>
    %109 = arith.addf %86, %108 : vector<16x128xf32>
    %c1_i32_37 = arith.constant 1 : i32
    %110 = tpu.dynamic_rotate %107 by %c1_i32_37 dim 1 : vector<16x384xf32>, i32 -> vector<16x384xf32>
    %c383_i32_38 = arith.constant 383 : i32
    %111 = tpu.dynamic_rotate %107 by %c383_i32_38 dim 1 : vector<16x384xf32>, i32 -> vector<16x384xf32>
    %112 = arith.extui %2 : i1 to i32
    %c0_i32_39 = arith.constant 0 : i32
    %113 = arith.cmpi ne, %112, %c0_i32_39 : i32
    %114:2 = scf.if %113 -> (vector<16x384xf32>, vector<16x384xf32>) {
      %187 = vector.extract_strided_slice %107 {offsets = [0, 128], sizes = [16, 1], strides = [1, 1]} : vector<16x384xf32> to vector<16x1xf32>
      %188 = vector.shape_cast %20 : vector<1x384xi1> to vector<1x384xi1>
      %189 = vector.broadcast %188 : vector<1x384xi1> to vector<16x384xi1>
      %190 = vector.shape_cast %187 : vector<16x1xf32> to vector<16x1xf32>
      %191 = vector.broadcast %190 : vector<16x1xf32> to vector<16x384xf32>
      %192 = arith.select %189, %191, %110 : vector<16x384xi1>, vector<16x384xf32>
      %193 = vector.extract_strided_slice %107 {offsets = [0, 255], sizes = [16, 1], strides = [1, 1]} : vector<16x384xf32> to vector<16x1xf32>
      %194 = vector.shape_cast %32 : vector<1x384xi1> to vector<1x384xi1>
      %195 = vector.broadcast %194 : vector<1x384xi1> to vector<16x384xi1>
      %196 = vector.shape_cast %193 : vector<16x1xf32> to vector<16x1xf32>
      %197 = vector.broadcast %196 : vector<16x1xf32> to vector<16x384xf32>
      %198 = arith.select %195, %197, %111 : vector<16x384xi1>, vector<16x384xf32>
      scf.yield %192, %198 : vector<16x384xf32>, vector<16x384xf32>
    } else {
      scf.yield %110, %111 : vector<16x384xf32>, vector<16x384xf32>
    }
    %c3 = arith.constant 3 : index
    %c0_40 = arith.constant 0 : index
    %c0_41 = arith.constant 0 : index
    %115 = vector.load %arg8[%c3, %c0_40, %c0_41] : memref<6x32x1xf32, #tpu.memory_space<vmem>>, vector<1x32x1xf32>
    %116 = vector.shape_cast %115 : vector<1x32x1xf32> to vector<32x1xf32>
    %117 = tpu.concatenate %114#0, %114#1 in 0 : vector<16x384xf32>, vector<16x384xf32> -> vector<32x384xf32>
    %c3_42 = arith.constant 3 : index
    %c0_43 = arith.constant 0 : index
    %c0_44 = arith.constant 0 : index
    %118 = vector.load %arg7[%c3_42, %c0_43, %c0_44] : memref<6x32x32xf32, #tpu.memory_space<vmem>>, vector<1x32x32xf32>
    %119 = vector.shape_cast %118 : vector<1x32x32xf32> to vector<32x32xf32>
    %cst_45 = arith.constant dense<0.000000e+00> : vector<32x384xf32>
    %120 = tpu.matmul %119, %117, %cst_45 {dimension_numbers = #tpu.dot_dimension_numbers<[1], [0], [0], [1], [0, 0, 1, 1], [], []>} : vector<32x32xf32>, vector<32x384xf32>, vector<32x384xf32> -> vector<32x384xf32>
    %121 = vector.broadcast %116 : vector<32x1xf32> to vector<32x384xf32>
    %122 = arith.addf %120, %121 : vector<32x384xf32>
    %123 = vector.extract_strided_slice %122 {offsets = [0, 0], sizes = [16, 384], strides = [1, 1]} : vector<32x384xf32> to vector<16x384xf32>
    %124 = vector.extract_strided_slice %122 {offsets = [16, 0], sizes = [16, 384], strides = [1, 1]} : vector<32x384xf32> to vector<16x384xf32>
    %125 = arith.negf %124 : vector<16x384xf32>
    %126 = math.exp %125 : vector<16x384xf32>
    %cst_46 = arith.constant 1.000000e+00 : f32
    %127 = vector.broadcast %cst_46 : f32 to vector<16x384xf32>
    %128 = arith.addf %127, %126 : vector<16x384xf32>
    %129 = arith.divf %127, %128 : vector<16x384xf32>
    %130 = arith.mulf %123, %129 : vector<16x384xf32>
    %131 = vector.extract_strided_slice %130 {offsets = [0, 128], sizes = [16, 128], strides = [1, 1]} : vector<16x384xf32> to vector<16x128xf32>
    %132 = arith.addf %109, %131 : vector<16x128xf32>
    %c2_i32_47 = arith.constant 2 : i32
    %133 = tpu.dynamic_rotate %130 by %c2_i32_47 dim 1 : vector<16x384xf32>, i32 -> vector<16x384xf32>
    %c382_i32_48 = arith.constant 382 : i32
    %134 = tpu.dynamic_rotate %130 by %c382_i32_48 dim 1 : vector<16x384xf32>, i32 -> vector<16x384xf32>
    %135 = arith.extui %2 : i1 to i32
    %c0_i32_49 = arith.constant 0 : i32
    %136 = arith.cmpi ne, %135, %c0_i32_49 : i32
    %137:2 = scf.if %136 -> (vector<16x384xf32>, vector<16x384xf32>) {
      %187 = vector.extract_strided_slice %130 {offsets = [0, 128], sizes = [16, 1], strides = [1, 1]} : vector<16x384xf32> to vector<16x1xf32>
      %188 = vector.shape_cast %24 : vector<1x384xi1> to vector<1x384xi1>
      %189 = vector.broadcast %188 : vector<1x384xi1> to vector<16x384xi1>
      %190 = vector.shape_cast %187 : vector<16x1xf32> to vector<16x1xf32>
      %191 = vector.broadcast %190 : vector<16x1xf32> to vector<16x384xf32>
      %192 = arith.select %189, %191, %133 : vector<16x384xi1>, vector<16x384xf32>
      %193 = vector.extract_strided_slice %130 {offsets = [0, 255], sizes = [16, 1], strides = [1, 1]} : vector<16x384xf32> to vector<16x1xf32>
      %194 = vector.shape_cast %36 : vector<1x384xi1> to vector<1x384xi1>
      %195 = vector.broadcast %194 : vector<1x384xi1> to vector<16x384xi1>
      %196 = vector.shape_cast %193 : vector<16x1xf32> to vector<16x1xf32>
      %197 = vector.broadcast %196 : vector<16x1xf32> to vector<16x384xf32>
      %198 = arith.select %195, %197, %134 : vector<16x384xi1>, vector<16x384xf32>
      scf.yield %192, %198 : vector<16x384xf32>, vector<16x384xf32>
    } else {
      scf.yield %133, %134 : vector<16x384xf32>, vector<16x384xf32>
    }
    %c4 = arith.constant 4 : index
    %c0_50 = arith.constant 0 : index
    %c0_51 = arith.constant 0 : index
    %138 = vector.load %arg8[%c4, %c0_50, %c0_51] : memref<6x32x1xf32, #tpu.memory_space<vmem>>, vector<1x32x1xf32>
    %139 = vector.shape_cast %138 : vector<1x32x1xf32> to vector<32x1xf32>
    %140 = tpu.concatenate %137#0, %137#1 in 0 : vector<16x384xf32>, vector<16x384xf32> -> vector<32x384xf32>
    %c4_52 = arith.constant 4 : index
    %c0_53 = arith.constant 0 : index
    %c0_54 = arith.constant 0 : index
    %141 = vector.load %arg7[%c4_52, %c0_53, %c0_54] : memref<6x32x32xf32, #tpu.memory_space<vmem>>, vector<1x32x32xf32>
    %142 = vector.shape_cast %141 : vector<1x32x32xf32> to vector<32x32xf32>
    %cst_55 = arith.constant dense<0.000000e+00> : vector<32x384xf32>
    %143 = tpu.matmul %142, %140, %cst_55 {dimension_numbers = #tpu.dot_dimension_numbers<[1], [0], [0], [1], [0, 0, 1, 1], [], []>} : vector<32x32xf32>, vector<32x384xf32>, vector<32x384xf32> -> vector<32x384xf32>
    %144 = vector.broadcast %139 : vector<32x1xf32> to vector<32x384xf32>
    %145 = arith.addf %143, %144 : vector<32x384xf32>
    %146 = vector.extract_strided_slice %145 {offsets = [0, 0], sizes = [16, 384], strides = [1, 1]} : vector<32x384xf32> to vector<16x384xf32>
    %147 = vector.extract_strided_slice %145 {offsets = [16, 0], sizes = [16, 384], strides = [1, 1]} : vector<32x384xf32> to vector<16x384xf32>
    %148 = arith.negf %147 : vector<16x384xf32>
    %149 = math.exp %148 : vector<16x384xf32>
    %cst_56 = arith.constant 1.000000e+00 : f32
    %150 = vector.broadcast %cst_56 : f32 to vector<16x384xf32>
    %151 = arith.addf %150, %149 : vector<16x384xf32>
    %152 = arith.divf %150, %151 : vector<16x384xf32>
    %153 = arith.mulf %146, %152 : vector<16x384xf32>
    %154 = vector.extract_strided_slice %153 {offsets = [0, 128], sizes = [16, 128], strides = [1, 1]} : vector<16x384xf32> to vector<16x128xf32>
    %155 = arith.addf %132, %154 : vector<16x128xf32>
    %c4_i32_57 = arith.constant 4 : i32
    %156 = tpu.dynamic_rotate %153 by %c4_i32_57 dim 1 : vector<16x384xf32>, i32 -> vector<16x384xf32>
    %c380_i32_58 = arith.constant 380 : i32
    %157 = tpu.dynamic_rotate %153 by %c380_i32_58 dim 1 : vector<16x384xf32>, i32 -> vector<16x384xf32>
    %158 = arith.extui %2 : i1 to i32
    %c0_i32_59 = arith.constant 0 : i32
    %159 = arith.cmpi ne, %158, %c0_i32_59 : i32
    %160:2 = scf.if %159 -> (vector<16x384xf32>, vector<16x384xf32>) {
      %187 = vector.extract_strided_slice %153 {offsets = [0, 128], sizes = [16, 1], strides = [1, 1]} : vector<16x384xf32> to vector<16x1xf32>
      %188 = vector.shape_cast %28 : vector<1x384xi1> to vector<1x384xi1>
      %189 = vector.broadcast %188 : vector<1x384xi1> to vector<16x384xi1>
      %190 = vector.shape_cast %187 : vector<16x1xf32> to vector<16x1xf32>
      %191 = vector.broadcast %190 : vector<16x1xf32> to vector<16x384xf32>
      %192 = arith.select %189, %191, %156 : vector<16x384xi1>, vector<16x384xf32>
      %193 = vector.extract_strided_slice %153 {offsets = [0, 255], sizes = [16, 1], strides = [1, 1]} : vector<16x384xf32> to vector<16x1xf32>
      %194 = vector.shape_cast %40 : vector<1x384xi1> to vector<1x384xi1>
      %195 = vector.broadcast %194 : vector<1x384xi1> to vector<16x384xi1>
      %196 = vector.shape_cast %193 : vector<16x1xf32> to vector<16x1xf32>
      %197 = vector.broadcast %196 : vector<16x1xf32> to vector<16x384xf32>
      %198 = arith.select %195, %197, %157 : vector<16x384xi1>, vector<16x384xf32>
      scf.yield %192, %198 : vector<16x384xf32>, vector<16x384xf32>
    } else {
      scf.yield %156, %157 : vector<16x384xf32>, vector<16x384xf32>
    }
    %c5 = arith.constant 5 : index
    %c0_60 = arith.constant 0 : index
    %c0_61 = arith.constant 0 : index
    %161 = vector.load %arg8[%c5, %c0_60, %c0_61] : memref<6x32x1xf32, #tpu.memory_space<vmem>>, vector<1x32x1xf32>
    %162 = vector.shape_cast %161 : vector<1x32x1xf32> to vector<32x1xf32>
    %163 = tpu.concatenate %160#0, %160#1 in 0 : vector<16x384xf32>, vector<16x384xf32> -> vector<32x384xf32>
    %c5_62 = arith.constant 5 : index
    %c0_63 = arith.constant 0 : index
    %c0_64 = arith.constant 0 : index
    %164 = vector.load %arg7[%c5_62, %c0_63, %c0_64] : memref<6x32x32xf32, #tpu.memory_space<vmem>>, vector<1x32x32xf32>
    %165 = vector.shape_cast %164 : vector<1x32x32xf32> to vector<32x32xf32>
    %cst_65 = arith.constant dense<0.000000e+00> : vector<32x384xf32>
    %166 = tpu.matmul %165, %163, %cst_65 {dimension_numbers = #tpu.dot_dimension_numbers<[1], [0], [0], [1], [0, 0, 1, 1], [], []>} : vector<32x32xf32>, vector<32x384xf32>, vector<32x384xf32> -> vector<32x384xf32>
    %167 = vector.broadcast %162 : vector<32x1xf32> to vector<32x384xf32>
    %168 = arith.addf %166, %167 : vector<32x384xf32>
    %169 = vector.extract_strided_slice %168 {offsets = [0, 0], sizes = [16, 384], strides = [1, 1]} : vector<32x384xf32> to vector<16x384xf32>
    %170 = vector.extract_strided_slice %168 {offsets = [16, 0], sizes = [16, 384], strides = [1, 1]} : vector<32x384xf32> to vector<16x384xf32>
    %171 = arith.negf %170 : vector<16x384xf32>
    %172 = math.exp %171 : vector<16x384xf32>
    %cst_66 = arith.constant 1.000000e+00 : f32
    %173 = vector.broadcast %cst_66 : f32 to vector<16x384xf32>
    %174 = arith.addf %173, %172 : vector<16x384xf32>
    %175 = arith.divf %173, %174 : vector<16x384xf32>
    %176 = arith.mulf %169, %175 : vector<16x384xf32>
    %177 = vector.extract_strided_slice %176 {offsets = [0, 128], sizes = [16, 128], strides = [1, 1]} : vector<16x384xf32> to vector<16x128xf32>
    %178 = arith.addf %155, %177 : vector<16x128xf32>
    %c0_67 = arith.constant 0 : index
    %c0_68 = arith.constant 0 : index
    %179 = vector.load %arg9[%c0_67, %c0_68] : memref<8x16xf32, #tpu.memory_space<vmem>>, vector<8x16xf32>
    %cst_69 = arith.constant dense<0.000000e+00> : vector<8x128xf32>
    %180 = tpu.matmul %179, %178, %cst_69 {dimension_numbers = #tpu.dot_dimension_numbers<[1], [0], [0], [1], [0, 0, 1, 1], [], []>} : vector<8x16xf32>, vector<16x128xf32>, vector<8x128xf32> -> vector<8x128xf32>
    %c0_70 = arith.constant 0 : index
    %c0_71 = arith.constant 0 : index
    %181 = vector.load %arg10[%c0_70, %c0_71] : memref<8x1xf32, #tpu.memory_space<vmem>>, vector<8x1xf32>
    %182 = vector.broadcast %181 : vector<8x1xf32> to vector<8x128xf32>
    %183 = arith.addf %180, %182 : vector<8x128xf32>
    %c0_72 = arith.constant 0 : index
    %c0_73 = arith.constant 0 : index
    %c0_74 = arith.constant 0 : index
    %184 = vector.load %arg11[%c0_72, %c0_73, %c0_74] : memref<1x8x128xf32, #tpu.memory_space<vmem>>, vector<1x8x128xf32>
    %185 = vector.shape_cast %184 : vector<1x8x128xf32> to vector<8x128xf32>
    %186 = vector.shape_cast %183 : vector<8x128xf32> to vector<1x8x128xf32>
    tpu.vector_store %arg11[%c0_72, %c0_73, %c0_74], %186 {strides = array<i32>} : memref<1x8x128xf32, #tpu.memory_space<vmem>>, vector<1x8x128xf32>,
    return
  }
  func.func @transform_0(%arg0: i32, %arg1: i32) -> (i32, i32, i32) {
    %c1_i32 = arith.constant 1 : i32
    %0 = arith.muli %arg1, %c1_i32 : i32
    %c1_i32_0 = arith.constant 1 : i32
    %1 = arith.subi %0, %c1_i32_0 : i32
    %c0_i32 = arith.constant 0 : i32
    %2 = arith.maxsi %1, %c0_i32 : i32
    %c0_i32_1 = arith.constant 0 : i32
    %c0_i32_2 = arith.constant 0 : i32
    return %arg0, %c0_i32_1, %2 : i32, i32, i32
  }
  func.func @transform_1(%arg0: i32, %arg1: i32) -> (i32, i32, i32) {
    %c0_i32 = arith.constant 0 : i32
    %c0_i32_0 = arith.constant 0 : i32
    return %arg0, %c0_i32, %arg1 : i32, i32, i32
  }
  func.func @transform_2(%arg0: i32, %arg1: i32) -> (i32, i32, i32) {
    %c1_i32 = arith.constant 1 : i32
    %0 = arith.addi %arg1, %c1_i32 : i32
    %c1_i32_0 = arith.constant 1 : i32
    %1 = arith.muli %0, %c1_i32_0 : i32
    %c3_i32 = arith.constant 3 : i32
    %2 = arith.minsi %1, %c3_i32 : i32
    %c0_i32 = arith.constant 0 : i32
    %c0_i32_1 = arith.constant 0 : i32
    return %arg0, %c0_i32, %2 : i32, i32, i32
  }
  func.func @transform_3(%arg0: i32, %arg1: i32) -> (i32, i32) {
    %c0_i32 = arith.constant 0 : i32
    %c0_i32_0 = arith.constant 0 : i32
    %c0_i32_1 = arith.constant 0 : i32
    return %c0_i32, %c0_i32_0 : i32, i32
  }
  func.func @transform_4(%arg0: i32, %arg1: i32) -> (i32, i32) {
    %c0_i32 = arith.constant 0 : i32
    %c0_i32_0 = arith.constant 0 : i32
    %c0_i32_1 = arith.constant 0 : i32
    return %c0_i32, %c0_i32_0 : i32, i32
  }
  func.func @transform_5(%arg0: i32, %arg1: i32) -> (i32, i32, i32) {
    %c0_i32 = arith.constant 0 : i32
    %c0_i32_0 = arith.constant 0 : i32
    %c0_i32_1 = arith.constant 0 : i32
    %c0_i32_2 = arith.constant 0 : i32
    return %c0_i32, %c0_i32_0, %c0_i32_1 : i32, i32, i32
  }
  func.func @transform_6(%arg0: i32, %arg1: i32) -> (i32, i32, i32) {
    %c0_i32 = arith.constant 0 : i32
    %c0_i32_0 = arith.constant 0 : i32
    %c0_i32_1 = arith.constant 0 : i32
    %c0_i32_2 = arith.constant 0 : i32
    return %c0_i32, %c0_i32_0, %c0_i32_1 : i32, i32, i32
  }
  func.func @transform_7(%arg0: i32, %arg1: i32) -> (i32, i32) {
    %c0_i32 = arith.constant 0 : i32
    %c0_i32_0 = arith.constant 0 : i32
    %c0_i32_1 = arith.constant 0 : i32
    return %c0_i32, %c0_i32_0 : i32, i32
  }
  func.func @transform_8(%arg0: i32, %arg1: i32) -> (i32, i32) {
    %c0_i32 = arith.constant 0 : i32
    %c0_i32_0 = arith.constant 0 : i32
    %c0_i32_1 = arith.constant 0 : i32
    return %c0_i32, %c0_i32_0 : i32, i32
  }
  func.func @transform_9(%arg0: i32, %arg1: i32) -> (i32, i32, i32) {
    %c0_i32 = arith.constant 0 : i32
    %c0_i32_0 = arith.constant 0 : i32
    return %arg0, %c0_i32, %arg1 : i32, i32, i32
  }
}

module attributes {stable_mosaic.version = 11 : i64} {
  func.func @_wave_block_kernel(%arg0: i32, %arg1: i32, %arg2: memref<1x8x128xf32, #tpu.memory_space<vmem>>, %arg3: memref<1x8x128xf32, #tpu.memory_space<vmem>>, %arg4: memref<1x8x128xf32, #tpu.memory_space<vmem>>, %arg5: memref<16x8xf32, #tpu.memory_space<vmem>>, %arg6: memref<16x1xf32, #tpu.memory_space<vmem>>, %arg7: memref<6x32x32xf32, #tpu.memory_space<vmem>>, %arg8: memref<6x32x1xf32, #tpu.memory_space<vmem>>, %arg9: memref<8x16xf32, #tpu.memory_space<vmem>>, %arg10: memref<8x1xf32, #tpu.memory_space<vmem>>, %arg11: memref<1x8x128xf32, #tpu.memory_space<vmem>>) attributes {dimension_semantics = [#tpu.dimension_semantics<parallel>, #tpu.dimension_semantics<parallel>], iteration_bounds = array<i64: 2, 4>, scalar_prefetch = 0 : i64, scratch_operands = 0 : i64, tpu.core_type = #tpu.core_type<tc>, window_params = [{transform_indices = @transform_0, window_bounds = array<i64: 1, 8, 128>}, {transform_indices = @transform_1, window_bounds = array<i64: 1, 8, 128>}, {transform_indices = @transform_2, window_bounds = array<i64: 1, 8, 128>}, {pipeline_mode = #tpu.pipeline_mode<synchronous>, transform_indices = @transform_3, window_bounds = array<i64: 16, 8>}, {pipeline_mode = #tpu.pipeline_mode<synchronous>, transform_indices = @transform_4, window_bounds = array<i64: 16, 1>}, {pipeline_mode = #tpu.pipeline_mode<synchronous>, transform_indices = @transform_5, window_bounds = array<i64: 6, 32, 32>}, {pipeline_mode = #tpu.pipeline_mode<synchronous>, transform_indices = @transform_6, window_bounds = array<i64: 6, 32, 1>}, {pipeline_mode = #tpu.pipeline_mode<synchronous>, transform_indices = @transform_7, window_bounds = array<i64: 8, 16>}, {pipeline_mode = #tpu.pipeline_mode<synchronous>, transform_indices = @transform_8, window_bounds = array<i64: 8, 1>}, {transform_indices = @transform_9, window_bounds = array<i64: 1, 8, 128>}]} {
    %c0_i32 = arith.constant 0 : i32
    %0 = arith.cmpi eq, %arg1, %c0_i32 : i32
    %c3_i32 = arith.constant 3 : i32
    %1 = arith.cmpi eq, %arg1, %c3_i32 : i32
    %2 = arith.ori %0, %1 : i1
    %c0 = arith.constant 0 : index
    %c0_0 = arith.constant 0 : index
    %c0_1 = arith.constant 0 : index
    %3 = vector.load %arg2[%c0, %c0_0, %c0_1] : memref<1x8x128xf32, #tpu.memory_space<vmem>>, vector<1x8x128xf32>
    %4 = vector.shape_cast %3 : vector<1x8x128xf32> to vector<8x128xf32>
    %c0_2 = arith.constant 0 : index
    %c0_3 = arith.constant 0 : index
    %c0_4 = arith.constant 0 : index
    %5 = vector.load %arg3[%c0_2, %c0_3, %c0_4] : memref<1x8x128xf32, #tpu.memory_space<vmem>>, vector<1x8x128xf32>
    %6 = vector.shape_cast %5 : vector<1x8x128xf32> to vector<8x128xf32>
    %c0_5 = arith.constant 0 : index
    %c0_6 = arith.constant 0 : index
    %c0_7 = arith.constant 0 : index
    %7 = vector.load %arg4[%c0_5, %c0_6, %c0_7] : memref<1x8x128xf32, #tpu.memory_space<vmem>>, vector<1x8x128xf32>
    %8 = vector.shape_cast %7 : vector<1x8x128xf32> to vector<8x128xf32>
    %9 = tpu.concatenate %4, %6, %8 in 1 : vector<8x128xf32>, vector<8x128xf32>, vector<8x128xf32> -> vector<8x384xf32>
    %c0_8 = arith.constant 0 : index
    %c0_9 = arith.constant 0 : index
    %10 = vector.load %arg5[%c0_8, %c0_9] : memref<16x8xf32, #tpu.memory_space<vmem>>, vector<16x8xf32>
    %cst = arith.constant dense<0.000000e+00> : vector<16x384xf32>
    %11 = tpu.matmul %10, %9, %cst {dimension_numbers = #tpu.dot_dimension_numbers<[1], [0], [0], [1], [0, 0, 1, 1], [], []>} : vector<16x8xf32>, vector<8x384xf32>, vector<16x384xf32> -> vector<16x384xf32>
    %c0_10 = arith.constant 0 : index
    %c0_11 = arith.constant 0 : index
    %12 = vector.load %arg6[%c0_10, %c0_11] : memref<16x1xf32, #tpu.memory_space<vmem>>, vector<16x1xf32>
    %13 = vector.broadcast %12 : vector<16x1xf32> to vector<16x384xf32>
    %14 = arith.addf %11, %13 : vector<16x384xf32>
    %15 = vector.extract_strided_slice %14 {offsets = [0, 128], sizes = [16, 128], strides = [1, 1]} : vector<16x384xf32> to vector<16x128xf32>
    %16 = tpu.iota {dimensions = array<i32: 1>} : vector<1x384xi32>
    %c129_i32 = arith.constant 129 : i32
    %17 = vector.broadcast %c129_i32 : i32 to vector<1x384xi32>
    %18 = arith.cmpi slt, %16, %17 : vector<1x384xi32>
    %19 = vector.broadcast %0 : i1 to vector<1x384xi1>
    %20 = arith.andi %19, %18 : vector<1x384xi1>
    %c130_i32 = arith.constant 130 : i32
    %21 = vector.broadcast %c130_i32 : i32 to vector<1x384xi32>
    %22 = arith.cmpi slt, %16, %21 : vector<1x384xi32>
    %23 = vector.broadcast %0 : i1 to vector<1x384xi1>
    %24 = arith.andi %23, %22 : vector<1x384xi1>
    %c132_i32 = arith.constant 132 : i32
    %25 = vector.broadcast %c132_i32 : i32 to vector<1x384xi32>
    %26 = arith.cmpi slt, %16, %25 : vector<1x384xi32>
    %27 = vector.broadcast %0 : i1 to vector<1x384xi1>
    %28 = arith.andi %27, %26 : vector<1x384xi1>
    %c254_i32 = arith.constant 254 : i32
    %29 = vector.broadcast %c254_i32 : i32 to vector<1x384xi32>
    %30 = arith.cmpi sgt, %16, %29 : vector<1x384xi32>
    %31 = vector.broadcast %1 : i1 to vector<1x384xi1>
    %32 = arith.andi %31, %30 : vector<1x384xi1>
    %c253_i32 = arith.constant 253 : i32
    %33 = vector.broadcast %c253_i32 : i32 to vector<1x384xi32>
    %34 = arith.cmpi sgt, %16, %33 : vector<1x384xi32>
    %35 = vector.broadcast %1 : i1 to vector<1x384xi1>
    %36 = arith.andi %35, %34 : vector<1x384xi1>
    %c251_i32 = arith.constant 251 : i32
    %37 = vector.broadcast %c251_i32 : i32 to vector<1x384xi32>
    %38 = arith.cmpi sgt, %16, %37 : vector<1x384xi32>
    %39 = vector.broadcast %1 : i1 to vector<1x384xi1>
    %40 = arith.andi %39, %38 : vector<1x384xi1>
    %c1_i32 = arith.constant 1 : i32
    %41 = tpu.dynamic_rotate %14 by %c1_i32 dim 1 : vector<16x384xf32>, i32 -> vector<16x384xf32>
    %c383_i32 = arith.constant 383 : i32
    %42 = tpu.dynamic_rotate %14 by %c383_i32 dim 1 : vector<16x384xf32>, i32 -> vector<16x384xf32>
    %43 = arith.extui %2 : i1 to i32
    %c0_i32_12 = arith.constant 0 : i32
    %44 = arith.cmpi ne, %43, %c0_i32_12 : i32
    %45:2 = scf.if %44 -> (vector<16x384xf32>, vector<16x384xf32>) {
      %187 = vector.extract_strided_slice %14 {offsets = [0, 128], sizes = [16, 1], strides = [1, 1]} : vector<16x384xf32> to vector<16x1xf32>
      %188 = vector.shape_cast %20 : vector<1x384xi1> to vector<1x384xi1>
      %189 = vector.broadcast %188 : vector<1x384xi1> to vector<16x384xi1>
      %190 = vector.shape_cast %187 : vector<16x1xf32> to vector<16x1xf32>
      %191 = vector.broadcast %190 : vector<16x1xf32> to vector<16x384xf32>
      %192 = arith.select %189, %191, %41 : vector<16x384xi1>, vector<16x384xf32>
      %193 = vector.extract_strided_slice %14 {offsets = [0, 255], sizes = [16, 1], strides = [1, 1]} : vector<16x384xf32> to vector<16x1xf32>
      %194 = vector.shape_cast %32 : vector<1x384xi1> to vector<1x384xi1>
      %195 = vector.broadcast %194 : vector<1x384xi1> to vector<16x384xi1>
      %196 = vector.shape_cast %193 : vector<16x1xf32> to vector<16x1xf32>
      %197 = vector.broadcast %196 : vector<16x1xf32> to vector<16x384xf32>
      %198 = arith.select %195, %197, %42 : vector<16x384xi1>, vector<16x384xf32>
      scf.yield %192, %198 : vector<16x384xf32>, vector<16x384xf32>
    } else {
      scf.yield %41, %42 : vector<16x384xf32>, vector<16x384xf32>
    }
    %c0_13 = arith.constant 0 : index
    %c0_14 = arith.constant 0 : index
    %c0_15 = arith.constant 0 : index
    %46 = vector.load %arg8[%c0_13, %c0_14, %c0_15] : memref<6x32x1xf32, #tpu.memory_space<vmem>>, vector<1x32x1xf32>
    %47 = vector.shape_cast %46 : vector<1x32x1xf32> to vector<32x1xf32>
    %48 = tpu.concatenate %45#0, %45#1 in 0 : vector<16x384xf32>, vector<16x384xf32> -> vector<32x384xf32>
    %c0_16 = arith.constant 0 : index
    %c0_17 = arith.constant 0 : index
    %c0_18 = arith.constant 0 : index
    %49 = vector.load %arg7[%c0_16, %c0_17, %c0_18] : memref<6x32x32xf32, #tpu.memory_space<vmem>>, vector<1x32x32xf32>
    %50 = vector.shape_cast %49 : vector<1x32x32xf32> to vector<32x32xf32>
    %cst_19 = arith.constant dense<0.000000e+00> : vector<32x384xf32>
    %51 = tpu.matmul %50, %48, %cst_19 {dimension_numbers = #tpu.dot_dimension_numbers<[1], [0], [0], [1], [0, 0, 1, 1], [], []>} : vector<32x32xf32>, vector<32x384xf32>, vector<32x384xf32> -> vector<32x384xf32>
    %52 = vector.broadcast %47 : vector<32x1xf32> to vector<32x384xf32>
    %53 = arith.addf %51, %52 : vector<32x384xf32>
    %54 = vector.extract_strided_slice %53 {offsets = [0, 0], sizes = [16, 384], strides = [1, 1]} : vector<32x384xf32> to vector<16x384xf32>
    %55 = vector.extract_strided_slice %53 {offsets = [16, 0], sizes = [16, 384], strides = [1, 1]} : vector<32x384xf32> to vector<16x384xf32>
    %56 = arith.negf %55 : vector<16x384xf32>
    %57 = math.exp %56 : vector<16x384xf32>
    %cst_20 = arith.constant 1.000000e+00 : f32
    %58 = vector.broadcast %cst_20 : f32 to vector<16x384xf32>
    %59 = arith.addf %58, %57 : vector<16x384xf32>
    %60 = arith.divf %58, %59 : vector<16x384xf32>
    %61 = arith.mulf %54, %60 : vector<16x384xf32>
    %62 = vector.extract_strided_slice %61 {offsets = [0, 128], sizes = [16, 128], strides = [1, 1]} : vector<16x384xf32> to vector<16x128xf32>
    %63 = arith.addf %15, %62 : vector<16x128xf32>
    %c2_i32 = arith.constant 2 : i32
    %64 = tpu.dynamic_rotate %61 by %c2_i32 dim 1 : vector<16x384xf32>, i32 -> vector<16x384xf32>
    %c382_i32 = arith.constant 382 : i32
    %65 = tpu.dynamic_rotate %61 by %c382_i32 dim 1 : vector<16x384xf32>, i32 -> vector<16x384xf32>
    %66 = arith.extui %2 : i1 to i32
    %c0_i32_21 = arith.constant 0 : i32
    %67 = arith.cmpi ne, %66, %c0_i32_21 : i32
    %68:2 = scf.if %67 -> (vector<16x384xf32>, vector<16x384xf32>) {
      %187 = vector.extract_strided_slice %61 {offsets = [0, 128], sizes = [16, 1], strides = [1, 1]} : vector<16x384xf32> to vector<16x1xf32>
      %188 = vector.shape_cast %24 : vector<1x384xi1> to vector<1x384xi1>
      %189 = vector.broadcast %188 : vector<1x384xi1> to vector<16x384xi1>
      %190 = vector.shape_cast %187 : vector<16x1xf32> to vector<16x1xf32>
      %191 = vector.broadcast %190 : vector<16x1xf32> to vector<16x384xf32>
      %192 = arith.select %189, %191, %64 : vector<16x384xi1>, vector<16x384xf32>
      %193 = vector.extract_strided_slice %61 {offsets = [0, 255], sizes = [16, 1], strides = [1, 1]} : vector<16x384xf32> to vector<16x1xf32>
      %194 = vector.shape_cast %36 : vector<1x384xi1> to vector<1x384xi1>
      %195 = vector.broadcast %194 : vector<1x384xi1> to vector<16x384xi1>
      %196 = vector.shape_cast %193 : vector<16x1xf32> to vector<16x1xf32>
      %197 = vector.broadcast %196 : vector<16x1xf32> to vector<16x384xf32>
      %198 = arith.select %195, %197, %65 : vector<16x384xi1>, vector<16x384xf32>
      scf.yield %192, %198 : vector<16x384xf32>, vector<16x384xf32>
    } else {
      scf.yield %64, %65 : vector<16x384xf32>, vector<16x384xf32>
    }
    %c1 = arith.constant 1 : index
    %c0_22 = arith.constant 0 : index
    %c0_23 = arith.constant 0 : index
    %69 = vector.load %arg8[%c1, %c0_22, %c0_23] : memref<6x32x1xf32, #tpu.memory_space<vmem>>, vector<1x32x1xf32>
    %70 = vector.shape_cast %69 : vector<1x32x1xf32> to vector<32x1xf32>
    %71 = tpu.concatenate %68#0, %68#1 in 0 : vector<16x384xf32>, vector<16x384xf32> -> vector<32x384xf32>
    %c1_24 = arith.constant 1 : index
    %c0_25 = arith.constant 0 : index
    %c0_26 = arith.constant 0 : index
    %72 = vector.load %arg7[%c1_24, %c0_25, %c0_26] : memref<6x32x32xf32, #tpu.memory_space<vmem>>, vector<1x32x32xf32>
    %73 = vector.shape_cast %72 : vector<1x32x32xf32> to vector<32x32xf32>
    %cst_27 = arith.constant dense<0.000000e+00> : vector<32x384xf32>
    %74 = tpu.matmul %73, %71, %cst_27 {dimension_numbers = #tpu.dot_dimension_numbers<[1], [0], [0], [1], [0, 0, 1, 1], [], []>} : vector<32x32xf32>, vector<32x384xf32>, vector<32x384xf32> -> vector<32x384xf32>
    %75 = vector.broadcast %70 : vector<32x1xf32> to vector<32x384xf32>
    %76 = arith.addf %74, %75 : vector<32x384xf32>
    %77 = vector.extract_strided_slice %76 {offsets = [0, 0], sizes = [16, 384], strides = [1, 1]} : vector<32x384xf32> to vector<16x384xf32>
    %78 = vector.extract_strided_slice %76 {offsets = [16, 0], sizes = [16, 384], strides = [1, 1]} : vector<32x384xf32> to vector<16x384xf32>
    %79 = arith.negf %78 : vector<16x384xf32>
    %80 = math.exp %79 : vector<16x384xf32>
    %cst_28 = arith.constant 1.000000e+00 : f32
    %81 = vector.broadcast %cst_28 : f32 to vector<16x384xf32>
    %82 = arith.addf %81, %80 : vector<16x384xf32>
    %83 = arith.divf %81, %82 : vector<16x384xf32>
    %84 = arith.mulf %77, %83 : vector<16x384xf32>
    %85 = vector.extract_strided_slice %84 {offsets = [0, 128], sizes = [16, 128], strides = [1, 1]} : vector<16x384xf32> to vector<16x128xf32>
    %86 = arith.addf %63, %85 : vector<16x128xf32>
    %c4_i32 = arith.constant 4 : i32
    %87 = tpu.dynamic_rotate %84 by %c4_i32 dim 1 : vector<16x384xf32>, i32 -> vector<16x384xf32>
    %c380_i32 = arith.constant 380 : i32
    %88 = tpu.dynamic_rotate %84 by %c380_i32 dim 1 : vector<16x384xf32>, i32 -> vector<16x384xf32>
    %89 = arith.extui %2 : i1 to i32
    %c0_i32_29 = arith.constant 0 : i32
    %90 = arith.cmpi ne, %89, %c0_i32_29 : i32
    %91:2 = scf.if %90 -> (vector<16x384xf32>, vector<16x384xf32>) {
      %187 = vector.extract_strided_slice %84 {offsets = [0, 128], sizes = [16, 1], strides = [1, 1]} : vector<16x384xf32> to vector<16x1xf32>
      %188 = vector.shape_cast %28 : vector<1x384xi1> to vector<1x384xi1>
      %189 = vector.broadcast %188 : vector<1x384xi1> to vector<16x384xi1>
      %190 = vector.shape_cast %187 : vector<16x1xf32> to vector<16x1xf32>
      %191 = vector.broadcast %190 : vector<16x1xf32> to vector<16x384xf32>
      %192 = arith.select %189, %191, %87 : vector<16x384xi1>, vector<16x384xf32>
      %193 = vector.extract_strided_slice %84 {offsets = [0, 255], sizes = [16, 1], strides = [1, 1]} : vector<16x384xf32> to vector<16x1xf32>
      %194 = vector.shape_cast %40 : vector<1x384xi1> to vector<1x384xi1>
      %195 = vector.broadcast %194 : vector<1x384xi1> to vector<16x384xi1>
      %196 = vector.shape_cast %193 : vector<16x1xf32> to vector<16x1xf32>
      %197 = vector.broadcast %196 : vector<16x1xf32> to vector<16x384xf32>
      %198 = arith.select %195, %197, %88 : vector<16x384xi1>, vector<16x384xf32>
      scf.yield %192, %198 : vector<16x384xf32>, vector<16x384xf32>
    } else {
      scf.yield %87, %88 : vector<16x384xf32>, vector<16x384xf32>
    }
    %c2 = arith.constant 2 : index
    %c0_30 = arith.constant 0 : index
    %c0_31 = arith.constant 0 : index
    %92 = vector.load %arg8[%c2, %c0_30, %c0_31] : memref<6x32x1xf32, #tpu.memory_space<vmem>>, vector<1x32x1xf32>
    %93 = vector.shape_cast %92 : vector<1x32x1xf32> to vector<32x1xf32>
    %94 = tpu.concatenate %91#0, %91#1 in 0 : vector<16x384xf32>, vector<16x384xf32> -> vector<32x384xf32>
    %c2_32 = arith.constant 2 : index
    %c0_33 = arith.constant 0 : index
    %c0_34 = arith.constant 0 : index
    %95 = vector.load %arg7[%c2_32, %c0_33, %c0_34] : memref<6x32x32xf32, #tpu.memory_space<vmem>>, vector<1x32x32xf32>
    %96 = vector.shape_cast %95 : vector<1x32x32xf32> to vector<32x32xf32>
    %cst_35 = arith.constant dense<0.000000e+00> : vector<32x384xf32>
    %97 = tpu.matmul %96, %94, %cst_35 {dimension_numbers = #tpu.dot_dimension_numbers<[1], [0], [0], [1], [0, 0, 1, 1], [], []>} : vector<32x32xf32>, vector<32x384xf32>, vector<32x384xf32> -> vector<32x384xf32>
    %98 = vector.broadcast %93 : vector<32x1xf32> to vector<32x384xf32>
    %99 = arith.addf %97, %98 : vector<32x384xf32>
    %100 = vector.extract_strided_slice %99 {offsets = [0, 0], sizes = [16, 384], strides = [1, 1]} : vector<32x384xf32> to vector<16x384xf32>
    %101 = vector.extract_strided_slice %99 {offsets = [16, 0], sizes = [16, 384], strides = [1, 1]} : vector<32x384xf32> to vector<16x384xf32>
    %102 = arith.negf %101 : vector<16x384xf32>
    %103 = math.exp %102 : vector<16x384xf32>
    %cst_36 = arith.constant 1.000000e+00 : f32
    %104 = vector.broadcast %cst_36 : f32 to vector<16x384xf32>
    %105 = arith.addf %104, %103 : vector<16x384xf32>
    %106 = arith.divf %104, %105 : vector<16x384xf32>
    %107 = arith.mulf %100, %106 : vector<16x384xf32>
    %108 = vector.extract_strided_slice %107 {offsets = [0, 128], sizes = [16, 128], strides = [1, 1]} : vector<16x384xf32> to vector<16x128xf32>
    %109 = arith.addf %86, %108 : vector<16x128xf32>
    %c1_i32_37 = arith.constant 1 : i32
    %110 = tpu.dynamic_rotate %107 by %c1_i32_37 dim 1 : vector<16x384xf32>, i32 -> vector<16x384xf32>
    %c383_i32_38 = arith.constant 383 : i32
    %111 = tpu.dynamic_rotate %107 by %c383_i32_38 dim 1 : vector<16x384xf32>, i32 -> vector<16x384xf32>
    %112 = arith.extui %2 : i1 to i32
    %c0_i32_39 = arith.constant 0 : i32
    %113 = arith.cmpi ne, %112, %c0_i32_39 : i32
    %114:2 = scf.if %113 -> (vector<16x384xf32>, vector<16x384xf32>) {
      %187 = vector.extract_strided_slice %107 {offsets = [0, 128], sizes = [16, 1], strides = [1, 1]} : vector<16x384xf32> to vector<16x1xf32>
      %188 = vector.shape_cast %20 : vector<1x384xi1> to vector<1x384xi1>
      %189 = vector.broadcast %188 : vector<1x384xi1> to vector<16x384xi1>
      %190 = vector.shape_cast %187 : vector<16x1xf32> to vector<16x1xf32>
      %191 = vector.broadcast %190 : vector<16x1xf32> to vector<16x384xf32>
      %192 = arith.select %189, %191, %110 : vector<16x384xi1>, vector<16x384xf32>
      %193 = vector.extract_strided_slice %107 {offsets = [0, 255], sizes = [16, 1], strides = [1, 1]} : vector<16x384xf32> to vector<16x1xf32>
      %194 = vector.shape_cast %32 : vector<1x384xi1> to vector<1x384xi1>
      %195 = vector.broadcast %194 : vector<1x384xi1> to vector<16x384xi1>
      %196 = vector.shape_cast %193 : vector<16x1xf32> to vector<16x1xf32>
      %197 = vector.broadcast %196 : vector<16x1xf32> to vector<16x384xf32>
      %198 = arith.select %195, %197, %111 : vector<16x384xi1>, vector<16x384xf32>
      scf.yield %192, %198 : vector<16x384xf32>, vector<16x384xf32>
    } else {
      scf.yield %110, %111 : vector<16x384xf32>, vector<16x384xf32>
    }
    %c3 = arith.constant 3 : index
    %c0_40 = arith.constant 0 : index
    %c0_41 = arith.constant 0 : index
    %115 = vector.load %arg8[%c3, %c0_40, %c0_41] : memref<6x32x1xf32, #tpu.memory_space<vmem>>, vector<1x32x1xf32>
    %116 = vector.shape_cast %115 : vector<1x32x1xf32> to vector<32x1xf32>
    %117 = tpu.concatenate %114#0, %114#1 in 0 : vector<16x384xf32>, vector<16x384xf32> -> vector<32x384xf32>
    %c3_42 = arith.constant 3 : index
    %c0_43 = arith.constant 0 : index
    %c0_44 = arith.constant 0 : index
    %118 = vector.load %arg7[%c3_42, %c0_43, %c0_44] : memref<6x32x32xf32, #tpu.memory_space<vmem>>, vector<1x32x32xf32>
    %119 = vector.shape_cast %118 : vector<1x32x32xf32> to vector<32x32xf32>
    %cst_45 = arith.constant dense<0.000000e+00> : vector<32x384xf32>
    %120 = tpu.matmul %119, %117, %cst_45 {dimension_numbers = #tpu.dot_dimension_numbers<[1], [0], [0], [1], [0, 0, 1, 1], [], []>} : vector<32x32xf32>, vector<32x384xf32>, vector<32x384xf32> -> vector<32x384xf32>
    %121 = vector.broadcast %116 : vector<32x1xf32> to vector<32x384xf32>
    %122 = arith.addf %120, %121 : vector<32x384xf32>
    %123 = vector.extract_strided_slice %122 {offsets = [0, 0], sizes = [16, 384], strides = [1, 1]} : vector<32x384xf32> to vector<16x384xf32>
    %124 = vector.extract_strided_slice %122 {offsets = [16, 0], sizes = [16, 384], strides = [1, 1]} : vector<32x384xf32> to vector<16x384xf32>
    %125 = arith.negf %124 : vector<16x384xf32>
    %126 = math.exp %125 : vector<16x384xf32>
    %cst_46 = arith.constant 1.000000e+00 : f32
    %127 = vector.broadcast %cst_46 : f32 to vector<16x384xf32>
    %128 = arith.addf %127, %126 : vector<16x384xf32>
    %129 = arith.divf %127, %128 : vector<16x384xf32>
    %130 = arith.mulf %123, %129 : vector<16x384xf32>
    %131 = vector.extract_strided_slice %130 {offsets = [0, 128], sizes = [16, 128], strides = [1, 1]} : vector<16x384xf32> to vector<16x128xf32>
    %132 = arith.addf %109, %131 : vector<16x128xf32>
    %c2_i32_47 = arith.constant 2 : i32
    %133 = tpu.dynamic_rotate %130 by %c2_i32_47 dim 1 : vector<16x384xf32>, i32 -> vector<16x384xf32>
    %c382_i32_48 = arith.constant 382 : i32
    %134 = tpu.dynamic_rotate %130 by %c382_i32_48 dim 1 : vector<16x384xf32>, i32 -> vector<16x384xf32>
    %135 = arith.extui %2 : i1 to i32
    %c0_i32_49 = arith.constant 0 : i32
    %136 = arith.cmpi ne, %135, %c0_i32_49 : i32
    %137:2 = scf.if %136 -> (vector<16x384xf32>, vector<16x384xf32>) {
      %187 = vector.extract_strided_slice %130 {offsets = [0, 128], sizes = [16, 1], strides = [1, 1]} : vector<16x384xf32> to vector<16x1xf32>
      %188 = vector.shape_cast %24 : vector<1x384xi1> to vector<1x384xi1>
      %189 = vector.broadcast %188 : vector<1x384xi1> to vector<16x384xi1>
      %190 = vector.shape_cast %187 : vector<16x1xf32> to vector<16x1xf32>
      %191 = vector.broadcast %190 : vector<16x1xf32> to vector<16x384xf32>
      %192 = arith.select %189, %191, %133 : vector<16x384xi1>, vector<16x384xf32>
      %193 = vector.extract_strided_slice %130 {offsets = [0, 255], sizes = [16, 1], strides = [1, 1]} : vector<16x384xf32> to vector<16x1xf32>
      %194 = vector.shape_cast %36 : vector<1x384xi1> to vector<1x384xi1>
      %195 = vector.broadcast %194 : vector<1x384xi1> to vector<16x384xi1>
      %196 = vector.shape_cast %193 : vector<16x1xf32> to vector<16x1xf32>
      %197 = vector.broadcast %196 : vector<16x1xf32> to vector<16x384xf32>
      %198 = arith.select %195, %197, %134 : vector<16x384xi1>, vector<16x384xf32>
      scf.yield %192, %198 : vector<16x384xf32>, vector<16x384xf32>
    } else {
      scf.yield %133, %134 : vector<16x384xf32>, vector<16x384xf32>
    }
    %c4 = arith.constant 4 : index
    %c0_50 = arith.constant 0 : index
    %c0_51 = arith.constant 0 : index
    %138 = vector.load %arg8[%c4, %c0_50, %c0_51] : memref<6x32x1xf32, #tpu.memory_space<vmem>>, vector<1x32x1xf32>
    %139 = vector.shape_cast %138 : vector<1x32x1xf32> to vector<32x1xf32>
    %140 = tpu.concatenate %137#0, %137#1 in 0 : vector<16x384xf32>, vector<16x384xf32> -> vector<32x384xf32>
    %c4_52 = arith.constant 4 : index
    %c0_53 = arith.constant 0 : index
    %c0_54 = arith.constant 0 : index
    %141 = vector.load %arg7[%c4_52, %c0_53, %c0_54] : memref<6x32x32xf32, #tpu.memory_space<vmem>>, vector<1x32x32xf32>
    %142 = vector.shape_cast %141 : vector<1x32x32xf32> to vector<32x32xf32>
    %cst_55 = arith.constant dense<0.000000e+00> : vector<32x384xf32>
    %143 = tpu.matmul %142, %140, %cst_55 {dimension_numbers = #tpu.dot_dimension_numbers<[1], [0], [0], [1], [0, 0, 1, 1], [], []>} : vector<32x32xf32>, vector<32x384xf32>, vector<32x384xf32> -> vector<32x384xf32>
    %144 = vector.broadcast %139 : vector<32x1xf32> to vector<32x384xf32>
    %145 = arith.addf %143, %144 : vector<32x384xf32>
    %146 = vector.extract_strided_slice %145 {offsets = [0, 0], sizes = [16, 384], strides = [1, 1]} : vector<32x384xf32> to vector<16x384xf32>
    %147 = vector.extract_strided_slice %145 {offsets = [16, 0], sizes = [16, 384], strides = [1, 1]} : vector<32x384xf32> to vector<16x384xf32>
    %148 = arith.negf %147 : vector<16x384xf32>
    %149 = math.exp %148 : vector<16x384xf32>
    %cst_56 = arith.constant 1.000000e+00 : f32
    %150 = vector.broadcast %cst_56 : f32 to vector<16x384xf32>
    %151 = arith.addf %150, %149 : vector<16x384xf32>
    %152 = arith.divf %150, %151 : vector<16x384xf32>
    %153 = arith.mulf %146, %152 : vector<16x384xf32>
    %154 = vector.extract_strided_slice %153 {offsets = [0, 128], sizes = [16, 128], strides = [1, 1]} : vector<16x384xf32> to vector<16x128xf32>
    %155 = arith.addf %132, %154 : vector<16x128xf32>
    %c4_i32_57 = arith.constant 4 : i32
    %156 = tpu.dynamic_rotate %153 by %c4_i32_57 dim 1 : vector<16x384xf32>, i32 -> vector<16x384xf32>
    %c380_i32_58 = arith.constant 380 : i32
    %157 = tpu.dynamic_rotate %153 by %c380_i32_58 dim 1 : vector<16x384xf32>, i32 -> vector<16x384xf32>
    %158 = arith.extui %2 : i1 to i32
    %c0_i32_59 = arith.constant 0 : i32
    %159 = arith.cmpi ne, %158, %c0_i32_59 : i32
    %160:2 = scf.if %159 -> (vector<16x384xf32>, vector<16x384xf32>) {
      %187 = vector.extract_strided_slice %153 {offsets = [0, 128], sizes = [16, 1], strides = [1, 1]} : vector<16x384xf32> to vector<16x1xf32>
      %188 = vector.shape_cast %28 : vector<1x384xi1> to vector<1x384xi1>
      %189 = vector.broadcast %188 : vector<1x384xi1> to vector<16x384xi1>
      %190 = vector.shape_cast %187 : vector<16x1xf32> to vector<16x1xf32>
      %191 = vector.broadcast %190 : vector<16x1xf32> to vector<16x384xf32>
      %192 = arith.select %189, %191, %156 : vector<16x384xi1>, vector<16x384xf32>
      %193 = vector.extract_strided_slice %153 {offsets = [0, 255], sizes = [16, 1], strides = [1, 1]} : vector<16x384xf32> to vector<16x1xf32>
      %194 = vector.shape_cast %40 : vector<1x384xi1> to vector<1x384xi1>
      %195 = vector.broadcast %194 : vector<1x384xi1> to vector<16x384xi1>
      %196 = vector.shape_cast %193 : vector<16x1xf32> to vector<16x1xf32>
      %197 = vector.broadcast %196 : vector<16x1xf32> to vector<16x384xf32>
      %198 = arith.select %195, %197, %157 : vector<16x384xi1>, vector<16x384xf32>
      scf.yield %192, %198 : vector<16x384xf32>, vector<16x384xf32>
    } else {
      scf.yield %156, %157 : vector<16x384xf32>, vector<16x384xf32>
    }
    %c5 = arith.constant 5 : index
    %c0_60 = arith.constant 0 : index
    %c0_61 = arith.constant 0 : index
    %161 = vector.load %arg8[%c5, %c0_60, %c0_61] : memref<6x32x1xf32, #tpu.memory_space<vmem>>, vector<1x32x1xf32>
    %162 = vector.shape_cast %161 : vector<1x32x1xf32> to vector<32x1xf32>
    %163 = tpu.concatenate %160#0, %160#1 in 0 : vector<16x384xf32>, vector<16x384xf32> -> vector<32x384xf32>
    %c5_62 = arith.constant 5 : index
    %c0_63 = arith.constant 0 : index
    %c0_64 = arith.constant 0 : index
    %164 = vector.load %arg7[%c5_62, %c0_63, %c0_64] : memref<6x32x32xf32, #tpu.memory_space<vmem>>, vector<1x32x32xf32>
    %165 = vector.shape_cast %164 : vector<1x32x32xf32> to vector<32x32xf32>
    %cst_65 = arith.constant dense<0.000000e+00> : vector<32x384xf32>
    %166 = tpu.matmul %165, %163, %cst_65 {dimension_numbers = #tpu.dot_dimension_numbers<[1], [0], [0], [1], [0, 0, 1, 1], [], []>} : vector<32x32xf32>, vector<32x384xf32>, vector<32x384xf32> -> vector<32x384xf32>
    %167 = vector.broadcast %162 : vector<32x1xf32> to vector<32x384xf32>
    %168 = arith.addf %166, %167 : vector<32x384xf32>
    %169 = vector.extract_strided_slice %168 {offsets = [0, 0], sizes = [16, 384], strides = [1, 1]} : vector<32x384xf32> to vector<16x384xf32>
    %170 = vector.extract_strided_slice %168 {offsets = [16, 0], sizes = [16, 384], strides = [1, 1]} : vector<32x384xf32> to vector<16x384xf32>
    %171 = arith.negf %170 : vector<16x384xf32>
    %172 = math.exp %171 : vector<16x384xf32>
    %cst_66 = arith.constant 1.000000e+00 : f32
    %173 = vector.broadcast %cst_66 : f32 to vector<16x384xf32>
    %174 = arith.addf %173, %172 : vector<16x384xf32>
    %175 = arith.divf %173, %174 : vector<16x384xf32>
    %176 = arith.mulf %169, %175 : vector<16x384xf32>
    %177 = vector.extract_strided_slice %176 {offsets = [0, 128], sizes = [16, 128], strides = [1, 1]} : vector<16x384xf32> to vector<16x128xf32>
    %178 = arith.addf %155, %177 : vector<16x128xf32>
    %c0_67 = arith.constant 0 : index
    %c0_68 = arith.constant 0 : index
    %179 = vector.load %arg9[%c0_67, %c0_68] : memref<8x16xf32, #tpu.memory_space<vmem>>, vector<8x16xf32>
    %cst_69 = arith.constant dense<0.000000e+00> : vector<8x128xf32>
    %180 = tpu.matmul %179, %178, %cst_69 {dimension_numbers = #tpu.dot_dimension_numbers<[1], [0], [0], [1], [0, 0, 1, 1], [], []>} : vector<8x16xf32>, vector<16x128xf32>, vector<8x128xf32> -> vector<8x128xf32>
    %c0_70 = arith.constant 0 : index
    %c0_71 = arith.constant 0 : index
    %181 = vector.load %arg10[%c0_70, %c0_71] : memref<8x1xf32, #tpu.memory_space<vmem>>, vector<8x1xf32>
    %182 = vector.broadcast %181 : vector<8x1xf32> to vector<8x128xf32>
    %183 = arith.addf %180, %182 : vector<8x128xf32>
    %c0_72 = arith.constant 0 : index
    %c0_73 = arith.constant 0 : index
    %c0_74 = arith.constant 0 : index
    %184 = vector.load %arg11[%c0_72, %c0_73, %c0_74] : memref<1x8x128xf32, #tpu.memory_space<vmem>>, vector<1x8x128xf32>
    %185 = vector.shape_cast %184 : vector<1x8x128xf32> to vector<8x128xf32>
    %186 = vector.shape_cast %183 : vector<8x128xf32> to vector<1x8x128xf32>
    tpu.vector_store %arg11[%c0_72, %c0_73, %c0_74], %186 {strides = array<i32>} : memref<1x8x128xf32, #tpu.memory_space<vmem>>, vector<1x8x128xf32>,
    return
  }
  func.func @transform_0(%arg0: i32, %arg1: i32) -> (i32, i32, i32) {
    %c1_i32 = arith.constant 1 : i32
    %0 = arith.muli %arg1, %c1_i32 : i32
    %c1_i32_0 = arith.constant 1 : i32
    %1 = arith.subi %0, %c1_i32_0 : i32
    %c0_i32 = arith.constant 0 : i32
    %2 = arith.maxsi %1, %c0_i32 : i32
    %c0_i32_1 = arith.constant 0 : i32
    %c0_i32_2 = arith.constant 0 : i32
    return %arg0, %c0_i32_1, %2 : i32, i32, i32
  }
  func.func @transform_1(%arg0: i32, %arg1: i32) -> (i32, i32, i32) {
    %c0_i32 = arith.constant 0 : i32
    %c0_i32_0 = arith.constant 0 : i32
    return %arg0, %c0_i32, %arg1 : i32, i32, i32
  }
  func.func @transform_2(%arg0: i32, %arg1: i32) -> (i32, i32, i32) {
    %c1_i32 = arith.constant 1 : i32
    %0 = arith.addi %arg1, %c1_i32 : i32
    %c1_i32_0 = arith.constant 1 : i32
    %1 = arith.muli %0, %c1_i32_0 : i32
    %c3_i32 = arith.constant 3 : i32
    %2 = arith.minsi %1, %c3_i32 : i32
    %c0_i32 = arith.constant 0 : i32
    %c0_i32_1 = arith.constant 0 : i32
    return %arg0, %c0_i32, %2 : i32, i32, i32
  }
  func.func @transform_3(%arg0: i32, %arg1: i32) -> (i32, i32) {
    %c0_i32 = arith.constant 0 : i32
    %c0_i32_0 = arith.constant 0 : i32
    %c0_i32_1 = arith.constant 0 : i32
    return %c0_i32, %c0_i32_0 : i32, i32
  }
  func.func @transform_4(%arg0: i32, %arg1: i32) -> (i32, i32) {
    %c0_i32 = arith.constant 0 : i32
    %c0_i32_0 = arith.constant 0 : i32
    %c0_i32_1 = arith.constant 0 : i32
    return %c0_i32, %c0_i32_0 : i32, i32
  }
  func.func @transform_5(%arg0: i32, %arg1: i32) -> (i32, i32, i32) {
    %c0_i32 = arith.constant 0 : i32
    %c0_i32_0 = arith.constant 0 : i32
    %c0_i32_1 = arith.constant 0 : i32
    %c0_i32_2 = arith.constant 0 : i32
    return %c0_i32, %c0_i32_0, %c0_i32_1 : i32, i32, i32
  }
  func.func @transform_6(%arg0: i32, %arg1: i32) -> (i32, i32, i32) {
    %c0_i32 = arith.constant 0 : i32
    %c0_i32_0 = arith.constant 0 : i32
    %c0_i32_1 = arith.constant 0 : i32
    %c0_i32_2 = arith.constant 0 : i32
    return %c0_i32, %c0_i32_0, %c0_i32_1 : i32, i32, i32
  }
  func.func @transform_7(%arg0: i32, %arg1: i32) -> (i32, i32) {
    %c0_i32 = arith.constant 0 : i32
    %c0_i32_0 = arith.constant 0 : i32
    %c0_i32_1 = arith.constant 0 : i32
    return %c0_i32, %c0_i32_0 : i32, i32
  }
  func.func @transform_8(%arg0: i32, %arg1: i32) -> (i32, i32) {
    %c0_i32 = arith.constant 0 : i32
    %c0_i32_0 = arith.constant 0 : i32
    %c0_i32_1 = arith.constant 0 : i32
    return %c0_i32, %c0_i32_0 : i32, i32
  }
  func.func @transform_9(%arg0: i32, %arg1: i32) -> (i32, i32, i32) {
    %c0_i32 = arith.constant 0 : i32
    %c0_i32_0 = arith.constant 0 : i32
    return %arg0, %c0_i32, %arg1 : i32, i32, i32
  }
}

</mosaic_0001>

<bundles_post_ra>
// kernel: tpu_custom_call.1
= control target key start
LH: loop header
LB: loop body
LE: loop exit
PB: predicated region body
PF: predicated region fallthrough
CT: control target
= control target key end

     0   :  { %s6665_s0 = inlined_call_operand.hbm [shape: f32[2,8,512], index: 0, kind: input, shape index: {}]   ;;  %s6666_s1 = inlined_call_operand.hbm [shape: f32[2,8,512], index: 1, kind: input, shape index: {}]   ;;  %s6667_s2 = inlined_call_operand.hbm [shape: f32[2,8,512], index: 2, kind: input, shape index: {}]   ;;  %s6668_s3 = inlined_call_operand.vmem [shape: f32[16,8], index: 3, kind: input, shape index: {}]   ;;  %s6669_s4 = inlined_call_operand.vmem [shape: f32[16,1], index: 4, kind: input, shape index: {}]   ;;  %s6670_s5 = inlined_call_operand.vmem [shape: f32[6,32,32], index: 5, kind: input, shape index: {}]   ;;  %s6671_s6 = inlined_call_operand.vmem [shape: f32[6,32,1], index: 6, kind: input, shape index: {}]   ;;  %s6672_s7 = inlined_call_operand.vmem [shape: f32[8,16], index: 7, kind: input, shape index: {}]   ;;  %s6673_s8 = inlined_call_operand.vmem [shape: f32[8,1], index: 8, kind: input, shape index: {}]   ;;  %s6674_s9 = inlined_call_operand.hbm [shape: f32[2,8,512], index: 9, kind: output, shape index: {}]  }
   0x1   :  { %6718 = sst [smem:[#allocation24_spill]] %s6665_s0 }
   0x2   :  { %6719 = sst [smem:[#allocation25_spill]] %s6666_s1 }
   0x3   :  { %6720 = sst [smem:[#allocation26_spill]] %s6667_s2 }
   0x4   :  { %6721 = sst [smem:[#allocation27_spill]] %s6668_s3 }
   0x5   :  { %6722 = sst [smem:[#allocation28_spill]] %s6669_s4 }
   0x6   :  { %6723 = sst [smem:[#allocation29_spill]] %s6670_s5 }
   0x7   :  { %6724 = sst [smem:[#allocation30_spill]] %s6671_s6 }
   0x8   :  { %6725 = sst [smem:[#allocation31_spill]] %s6672_s7 }
   0x9   :  { %6726 = sst [smem:[#allocation32_spill]] %s6673_s8 }
   0xa   :  { %6727 = sst [smem:[#allocation33_spill]] %s6674_s9 }
   0xb   :  { %14 = vsyncpa [#allocation3], 0 }
   0xc   :  { %16 = vsyncpa [#allocation3 + $0x1], 0 }
   0xd   :  { %17 = vsyncpa [#allocation6], 0 }
   0xe   :  { %19 = vsyncpa [#allocation6 + $0x1], 0 }
   0xf   :  { %20 = vsyncpa [#allocation4], 0 }
  0x10   :  { %22 = vsyncpa [#allocation4 + $0x1], 0  ;;  %s4921_s30 = smov 0   ;;  %s4923_s10 = smov 0  }
  0x11   :  { %s4925_s11 = smov 0   ;;  %s4927_s12 = smov 0  }
  0x12   :  { %s4929_s13 = smov 0   ;;  %s4931_s14 = smov 0  }
  0x13   :  { %s4933_s15 = smov 0   ;;  %s4935_s16 = smov 0  }
  0x14   :  { %s4937_s17 = smov 0   ;;  %s4939_s18 = smov 0  }
  0x15   :  { %s4941_s19 = smov 0   ;;  %s4943_s20 = smov 0  }
  0x16   :  { %s4945_s21 = smov 0   ;;  %s4947_s22 = smov 0  }
  0x17 LB: > { %6728 = sst [smem:[#allocation13_spill]] %s4554_s12  ;;  %s4992_s23 = sadd.s32 4294967295, %s4594_s22   ;;  %s4594_s22 = sphi %s4947_s22, %s28_s22   ;;  %s4590_s21 = sphi %s4945_s21, %s6952_s21   ;;  %s4586_s20 = sphi %s4943_s20, %s6962_s20   ;;  %s4582_s19 = sphi %s4941_s19, %s6951_s19   ;;  %s4578_s18 = sphi %s4939_s18, %s6961_s18   ;;  %s4574_s17 = sphi %s4937_s17, %s6960_s17   ;;  %s4570_s16 = sphi %s4935_s16, %s6959_s16   ;;  %s4566_s15 = sphi %s4933_s15, %s6958_s15   ;;  %s4562_s14 = sphi %s4931_s14, %s6957_s14   ;;  %s4558_s13 = sphi %s4929_s13, %s6956_s13   ;;  %s4554_s12 = sphi %s4927_s12, %s6949_s12   ;;  %s4550_s11 = sphi %s4925_s11, %s6955_s11   ;;  %s4546_s10 = sphi %s4923_s10, %s6954_s10   ;;  %s4542_s30 = sphi %s4921_s30, %s6953_s30  }
  0x18   : > { %6729 = sst [smem:[#allocation14_spill]] %s4558_s13  ;;  %s2773_s24 = sadd.s32 4294967294, %s4594_s22  }
  0x19   : > { %6730 = sst [smem:[#allocation15_spill]] %s4578_s18  ;;  %s4996_s25 = sadd.s32 1, %s4586_s20 }
  0x1a   : > { %6731 = sst [smem:[#allocation16_spill]] %s4582_s19  ;;  %s40_s26 = sadd.s32 1, %s4590_s21 }
  0x1b   : > { %6732 = sst [smem:[#allocation17_spill]] %s4586_s20  ;;  %p38_p0 = scmp.ge.s32.totalorder %s4996_s25, 4 }
  0x1c   : > { %6733 = sst [smem:[#allocation18_spill]] %s4590_s21  ;;  %p63_p1 = scmp.eq.s32.totalorder %s4594_s22, 0 }
  0x1d   : > { %p69_p2 = scmp.eq.s32.totalorder %s4992_s23, 0  ;;  %s6964_s26 = smov (!%p38_p0, %s40_s26), %s4590_s21 }
  0x1e   : > { %s5004_s28 = scalar_select %p38_p0, 0, %s4996_s25  }
  0x1f   : > { %p90_p3 = scmp.ne.s32.totalorder %s4562_s14, %s4558_s13  ;;  %p96_p4 = scmp.ne.s32.totalorder %s4558_s13, %s4554_s12 }
  0x20   : > { %p282_p5 = scmp.eq.s32.totalorder %s4992_s23, 7  ;;  %p288_p7 = scmp.eq.s32.totalorder %s2773_s24, 7 }
  0x21   : > { %p5018_p6 = por %p90_p3, %p63_p1  ;;  %p5024_p8 = por %p96_p4, %p69_p2 }
  0x22   : > { %p5028_p9 = por %p282_p5, %p90_p3  ;;  %p5032_p10 = por %p288_p7, %p96_p4 }
  0x23   : > { %s6735_s27 = scalar_select %p5024_p8, 1, 0 }
  0x24   : > { %s6737_s7 = scalar_select %p5028_p9, 1, 0 }
  0x25   : > { %6736 = sst [smem:[#allocation19_spill]] %s6735_s27  ;;  %p6704_p11 = scmp.lt.s32.totalorder %s4594_s22, 8 }
  0x26   : > { %6738 = sst [smem:[#allocation20_spill]] %s6737_s7  ;;  %s5038_s12 = sshll.u32 %s4590_s21, 2 }
  0x27   : > { %s6739_s29 = scalar_select %p5032_p10, 1, 0 }
  0x28   : > { %s350_s24 = sand.u32 1, %s4594_s22   ;;  %s352_s19 = sand.u32 1, %s4562_s14  }
  0x29   : > { %6740 = sst [smem:[#allocation21_spill]] %s6739_s29  ;;  %s2782_s8 = sshll.u32 %s352_s19, 3 }
  0x2a   : > { %s358_s5 = sadd.s32 %s4586_s20, %s5038_s12  ;;  %s354_s7 = scalar_lea.vmem [#allocation5], %s2782_s8 }
  0x2b   : > { %s2784_s6 = sshll.u32 %s358_s5, 3  ;;  %s364_s4 = sshll.u32 %s354_s7, 4  ;;  %s365_s4 = int_to_ptr.vmem [resolvable:$true] %s364_s4 }
  0x2c   : > { %s6741_s1 = sld [smem:[#allocation25_spill]]  ;;  %p3215_p12 = pnand %p6704_p11, %p5018_p6 }
  0x2d   : > { %p2788_p13 = scmp.ge.s32.totalorder %s4594_s22, 1  ;;  %p393_p0 = scmp.lt.s32.totalorder %s4594_s22, 9 }
  0x2e   : > { %s5053_s5 = scalar_lea.sflag [#allocation6], %s350_s24  ;;  %p42_p4 = scmp.ge.s32.totalorder %s6964_s26, 2 }
  0x2f   : > { %p5056_p3 = pnand %p2788_p13, %p393_p0  ;;  %s2775_s7 = sadd.s32 4294967295, %s5004_s28 }
  0x30   : > { %s6966_s26 = smov (%p42_p4, %s6964_s26), 0  ;;  %p48_p6 = scmp.gt.s32.totalorder %s2775_s7, 0 }
  0x31   : > { %6743 = sst [smem:[#allocation22_spill]] %s6966_s26  ;;  %s5068_s8 = ssub.s32 %s4590_s21, %s6966_s26 }
  0x32   : > { %s360_s29 = scalar_lea.hbm %s6741_s1, %s2784_s6  ;;  %s2774_s6 = sadd.s32 4294967295, %s4586_s20 }
  0x33   : > { %s362_s27 = sshll.u32 %s360_s29, 4  ;;  %p45_p5 = scmp.gt.s32.totalorder %s2774_s6, 0  ;;  %s363_s27 = int_to_ptr.hbm [resolvable:$true] %s362_s27 }
  0x34   : > { %3217 = dma.hbm_to_vmem [thread:$0]  (!%p3215_p12), %s363_s27, 128, %s365_s4, %s5053_s5  }
  0x35   : > { %s55_s4 = sadd.s32 1, %s4574_s17  ;;  %s6968_s6 = smov (!%p45_p5, %s2774_s6), 0 }
  0x36   : > { %s6970_s7 = smov (!%p48_p6, %s2775_s7), 0  ;;  %p62_p7 = scmp.ne.s32.totalorder %s4574_s17, %s4570_s16 }
  0x37   : > { %p68_p12 = scmp.ne.s32.totalorder %s4570_s16, %s4566_s15  ;;  %s51_s9 = ssub.s32 %s6968_s6, %s6970_s7 }
  0x38   : > { %s6744_s18 = ssub.s32 %s4586_s20, %s5004_s28  ;;  %s52_s27 = sor.u32 %s51_s9, %s5068_s8 }
  0x39   : > { %s80_s19 = sor.u32 %s6744_s18, %s5068_s8  ;;  %p5082_p13 = por %p63_p1, %p62_p7 }
  0x3a   : > { %p53_p0 = scmp.eq.s32.totalorder %s52_s27, 0  ;;  %p5088_p4 = por %p69_p2, %p68_p12 }
  0x3b   : > { %p81_p5 = scmp.eq.s32.totalorder %s80_s19, 0  ;;  %s326_s15 = sand.u32 1, %s4574_s17  }
  0x3c   : > { %s6746_s24 = scalar_select %p5088_p4, 1, 0 }
  0x3d   : > { %s5094_s7 = scalar_select %p53_p0, %s4574_s17, %s55_s4  }
  0x3e   : > { %6747 = sst [smem:[#allocation23_spill]] %s6746_s24  ;;  %s6748_s9 = sadd.s32 1, %s4562_s14 }
  0x3f   : > { %s5099_s18 = scalar_select %p81_p5, %s4562_s14, %s6748_s9  }
  0x40   : > { %s2778_s1 = sshll.u32 %s326_s15, 3  ;;  %s337_s26 = sadd.s32 %s5038_s12, %s6968_s6 }
  0x41   : > { %s2781_s21 = sshll.u32 %s337_s26, 3  ;;  %s330_s27 = scalar_lea.vmem [#allocation2], %s2778_s1 }
  0x42   : > { %s343_s20 = sshll.u32 %s330_s27, 4  ;;  %s6749_s0 = sld [smem:[#allocation24_spill]]  ;;  %s344_s20 = int_to_ptr.vmem [resolvable:$true] %s343_s20 }
  0x43   : > { %p3212_p6 = pnand %p6704_p11, %p5082_p13  ;;  %s327_s26 = scalar_lea.sflag [#allocation3], %s326_s15 }
  0x44   : > { %p107_p7 = scmp.lt.s32.totalorder %s4996_s25, 3  ;;  %s109_s1 = sadd.s32 1, %s5004_s28 }
  0x45   : > { %p110_p12 = scmp.lt.s32.totalorder %s109_s1, 3  ;;  %s117_s6 = sadd.s32 1, %s4550_s11 }
  0x46   : > { %s6972_s25 = smov (!%p107_p7, %s4996_s25), 3  ;;  %p124_p0 = scmp.ne.s32.totalorder %s4550_s11, %s4546_s10 }
  0x47   : > { %s6974_s1 = smov (!%p110_p12, %s109_s1), 3  ;;  %p130_p5 = scmp.ne.s32.totalorder %s4546_s10, %s4542_s30 }
  0x48   : > { %s339_s24 = scalar_lea.hbm %s6749_s0, %s2781_s21  ;;  %s113_s13 = ssub.s32 %s6972_s25, %s6974_s1 }
  0x49   : > { %s341_s4 = sshll.u32 %s339_s24, 4  ;;  %s373_s21 = sand.u32 1, %s4550_s11   ;;  %s342_s4 = int_to_ptr.hbm [resolvable:$true] %s341_s4 }
  0x4a   : > { %3214 = dma.hbm_to_vmem [thread:$0]  (!%p3212_p6), %s342_s4, 128, %s344_s20, %s327_s26  }
  0x4b   : > { %s114_s29 = sor.u32 %s113_s13, %s5068_s8  ;;  %p5121_p13 = por %p124_p0, %p63_p1 }
  0x4c   : > { %p115_p6 = scmp.eq.s32.totalorder %s114_s29, 0  ;;  %p5127_p11 = por %p130_p5, %p69_p2 }
  0x4d   : > { %s2785_s15 = sshll.u32 %s373_s21, 3  ;;  %s382_s9 = sadd.s32 %s5038_s12, %s6972_s25 }
  0x4e   : > { %s5133_s30 = scalar_select %p115_p6, %s4550_s11, %s117_s6  }
  0x4f   : > { %s2787_s27 = sshll.u32 %s382_s9, 3  ;;  %s6752_s2 = sld [smem:[#allocation26_spill]] }
  0x50   : > { %s375_s26 = scalar_lea.vmem [#allocation7], %s2785_s15  ;;  %p6753_p1 = scmp.lt.s32.totalorder %s4594_s22, 8 }
  0x51   : > { %s388_s1 = sshll.u32 %s375_s26, 4  ;;  %s399_s25 = sand.u32 (!%p5056_p3), 1, %s4570_s16   ;;  %s389_s1 = int_to_ptr.vmem [resolvable:$true] %s388_s1 }
  0x52   : > { %p3218_p2 = pnand %p6753_p1, %p5121_p13  ;;  %s2789_s6 = sshll.u32 (!%p5056_p3), %s399_s25, 3 }
  0x53   : > { %397 = sbr.rel (%p5056_p3) target bundleno = 2462 (0x99e), region = 56  ;;  %s400_s21 = scalar_lea.sflag (!%p5056_p3), [#allocation3], %s399_s25 }
  0x54   : > { %s403_s29 = scalar_lea.vmem (!%p5056_p3), [#allocation2], %s2789_s6 }
  0x55   : > { %s384_s8 = scalar_lea.hbm %s6752_s2, %s2787_s27 }
  0x56   : > { %s386_s13 = sshll.u32 %s384_s8, 4  ;;  %s387_s13 = int_to_ptr.hbm [resolvable:$true] %s386_s13 }
  0x57   : > { %3220 = dma.hbm_to_vmem [thread:$0]  (!%p3218_p2), %s387_s13, 128, %s389_s1, %s5053_s5  }
  0x58   : > { %4525 = dma.done.wait (%p5088_p4), %s400_s21, 128  }
  0x59   : > { %4527 = vsyncadd (%p5088_p4), %s400_s21, 4294967168  ;;  %s6755_s15 = sld [smem:[#allocation14_spill]]  ;;  %s409_s9 = sand.u32 1, %s4992_s23  }
  0x5a   : > { %s410_s27 = scalar_lea.sflag [#allocation6], %s409_s9 }
  0x5f   : > { %s6713_s5 = sand.u32 1, %s6755_s15  }
  0x60   : > { %s5154_s3 = sshll.u32 %s6713_s5, 3 }
  0x61   : > { %s413_s19 = scalar_lea.vmem [#allocation5], %s5154_s3 }
  0x62   : > { %4529 = dma.done.wait (%p5024_p8), %s410_s27, 128  }
  0x63   : > { %4531 = vsyncadd (%p5024_p8), %s410_s27, 4294967168  ;;  %s421_s4 = sand.u32 1, %s4546_s10  }
  0x64   : > { %s2791_s8 = sshll.u32 %s421_s4, 3 }
  0x65   : > { %s423_s26 = scalar_lea.vmem [#allocation7], %s2791_s8 }
  0x66   : > { %4533 = dma.done.wait (%p5127_p11), %s410_s27, 128  }
  0x67   : > { %4535 = vsyncadd (%p5127_p11), %s410_s27, 4294967168  ;;  %v4852_v0 = vmov 0   ;;  %vm495_vm0 = vcmask 64512   ;;  %v478_v1 = vld [vmem:[%s403_s29] sm:$0xff]  ;;  %v479_v2 = vld [vmem:[%s413_s19] sm:$0xff]  ;;  %s6757_s23 = sld [smem:[#allocation15_spill]]  ;;  %v571_v22 = vlaneseq }
  0x68   : > { %3934 = vset.pattern.permute.xlu0 %v4852_v0  ;;  %v480_v3 = vld [vmem:[%s423_s26] sm:$0xff]  ;;  %517 = vmatpush.msra.mxu0 %v478_v1  ;;  %s6758_s12 = sld [smem:[#allocation27_spill]]  ;;  %s4853_s4 = smov 1   ;;  %v6765_v28 = vmov 0  ;;  %v6773_v32 = vmov 0  ;;  %v4596_v59 = vmov 0  }
  0x69   : > { %540 = vmatpush.msra.mxu1 %v479_v2  ;;  %s6760_s21 = sld [smem:[#allocation28_spill]]  ;;  %563 = vmatpush.msra.mxu2 %v480_v3  ;;  %s4854_s8 = smov 127   ;;  %v5219_v23 = vand.u32 127, %v571_v22  ;;  %v4600_v60 = vmov 0   ;;  %v4604_v61 = vmov 0   ;;  %v4608_v62 = vmov 0  }
  0x6a   : > { %v4612_v63 = vmov 0   ;;  %v4616_v1 = vmov 0   ;;  %v4620_v2 = vmov 0   ;;  %v4624_v3 = vmov 0  }
  0x6b   : > { %v573_v24 = vadd.s32 128, %v5219_v23  ;;  %vm6706_vm15 = vcmp.lt.s32.totalorder %v5219_v23, 1 }
  0x6d   : > { %p475_p8 = scmp.eq.s32.totalorder %s6757_s23, 0  ;;  %p476_p11 = scmp.eq.s32.totalorder %s6757_s23, 3  ;;  %vm576_vm2 = vcmp.lt.s32.totalorder %v573_v24, 129  ;;  %vm585_vm3 = vcmp.lt.s32.totalorder %v573_v24, 130  ;;  %vm591_vm4 = vcmp.lt.s32.totalorder %v573_v24, 132  ;;  %vm597_vm6 = vcmp.gt.s32.totalorder %v573_v24, 254 }
  0x6e   : > { %s6759_s25 = smov %s6758_s12  ;;  %v481_v4 = vld [vmem:[%s6758_s12] sm:$0xff]  ;;  %vm606_vm9 = vcmp.gt.s32.totalorder %v573_v24, 253  ;;  %vm612_vm11 = vcmp.gt.s32.totalorder %v573_v24, 251 }
  0x6f   : > { %s6761_s24 = smov %s6760_s21  ;;  %v483_v5 = vld [vmem:[%s6760_s21] sm:$0xff]  ;;  %2793 = vmatmul.msk.f32.vlgmr.msra.gmra.mxu0 %vm495_vm0, %v481_v4  ;;  %2795 = vmatmul.msk.f32.vlgmr.msra.gmra.mxu1 %vm495_vm0, %v481_v4  ;;  %v482_v6 = vld [vmem:[%s6759_s25 + $0x8] sm:$0xff]  ;;  %p5191_p3 = por %p476_p11, %p475_p8 }
  0x70   : > { %2797 = vmatmul.msk.f32.vlgmr.msra.gmra.mxu2 %vm495_vm0, %v481_v4  ;;  %487 = vperm.xlu0 %3934, %v483_v5   ;;  %v484_v7 = vld [vmem:[%s6761_s24 + $0x8] sm:$0xff]  ;;  %s578_s26 = scalar_select %p475_p8, 1, 0  ;;  %v4628_v4 = vmov 0   ;;  %v4632_v5 = vmov 0  }
  0x71   : > { %s599_s1 = scalar_select %p476_p11, 1, 0 }
  0x72   : > { %v579_v25 = vstv %s578_s26 }
  0x73   : > { %v600_v26 = vstv %s599_s1  ;;  %vm5222_vm1 = vcmp.eq.s32.totalorder %v579_v25, 1 }
  0x74   : > { %vm5228_vm5 = vmand %vm5222_vm1, %vm576_vm2  ;;  %vm5232_vm7 = vcmp.eq.s32.totalorder %v600_v26, 1 }
  0x75   : > { %v6766_v28 = vsel %vm5228_vm5, 4294967295, %v6765_v28  ;;  %vm5238_vm8 = vmand %vm5222_vm1, %vm585_vm3 }
  0x76   : > { %vm5244_vm10 = vmand %vm5222_vm1, %vm591_vm4 }
  0x77   : > { %2794 = vmatmul.msk.f32.gmra.mxu0 %vm495_vm0, %v482_v6  ;;  %2796 = vmatmul.msk.f32.gmra.mxu1 %vm495_vm0, %v482_v6  ;;  %vm5250_vm12 = vmand %vm5232_vm7, %vm597_vm6 }
  0x78   : > { %2798 = vmatmul.msk.f32.gmra.mxu2 %vm495_vm0, %v482_v6  ;;  %492 = vperm.xlu0 %3934, %v484_v7   ;;  %v6774_v32 = vsel %vm5250_vm12, 4294967295, %v6773_v32  ;;  %vm5256_vm13 = vmand %vm5232_vm7, %vm606_vm9  ;;  %vm6705_vm0 = vcmp.lt.s32.totalorder %v5219_v23, 127  ;;  %v4636_v6 = vmov 0   ;;  %v4640_v7 = vmov 0  }
  0x79   : > { %vm5262_vm14 = vmand %vm5232_vm7, %vm612_vm11 }
  0xe2   : > { %v488_v8 = vpop.permute.xlu0 %487 }
  0xea   : > { %v493_v16 = vpop.permute.xlu0 %492 }
  0xec   : > { %v519_v9 = vpop.f32.mrf.mxu0  ;;  %v542_v11 = vpop.f32.mrf.mxu1 }
  0xed   : > { %v520_v10 = vadd.f32 %v519_v9, %v488_v8  ;;  %v5195_v12 = vadd.f32 %v542_v11, %v488_v8  ;;  %v4856_v9 = vmov (%p5191_p3), 0  }
  0xee   : > { %3935 = vset.pattern.permute.xlu0 (%p5191_p3), %v4856_v9 }
  0xef   : > { %617 = vrot.lane.b32.xlu1 %v520_v10, %s4853_s4  ;;  %621 = vrot.lane.b32.xlu2 %v5195_v12, %s4853_s4 }
  0xf3   : > { %v565_v13 = vpop.f32.mrf.mxu2 }
  0xf4   : > { %v566_v14 = vadd.f32 %v565_v13, %v488_v8  ;;  %v522_v15 = vpop.f32.mrf.mxu0  ;;  %v545_v17 = vpop.f32.mrf.mxu1  ;;  %v4855_v8 = vmov (%p5191_p3), 127  }
  0xf5   : > { %v523_v18 = vadd.f32 %v522_v15, %v493_v16  ;;  %v5204_v19 = vadd.f32 %v545_v17, %v493_v16  ;;  %3936 = vset.pattern.permute.xlu1 (%p5191_p3), %v4855_v8 }
  0xf6   : > { %625 = vrot.lane.b32.xlu0 %v566_v14, %s4853_s4 }
  0xf7   : > { %640 = vrot.lane.b32.xlu1 %v5195_v12, %s4854_s8  ;;  %636 = vrot.lane.b32.xlu2 %v520_v10, %s4854_s8 }
  0xfb   : > { %v568_v20 = vpop.f32.mrf.mxu2 }
  0xfc   : > { %v569_v21 = vadd.f32 %v568_v20, %v493_v16 }
  0xfe   : > { %638 = vrot.lane.b32.xlu0 %v523_v18, %s4854_s8 }
  0xff   : > { %619 = vrot.lane.b32.xlu1 %v523_v18, %s4853_s4  ;;  %623 = vrot.lane.b32.xlu2 %v5204_v19, %s4853_s4 }
 0x106   : > { %644 = vrot.lane.b32.xlu0 %v566_v14, %s4854_s8 }
 0x107   : > { %627 = vrot.lane.b32.xlu1 %v569_v21, %s4853_s4  ;;  %642 = vrot.lane.b32.xlu2 %v5204_v19, %s4854_s8 }
 0x10e   : > { %666 = vperm.xlu0 (%p5191_p3), %3935, %v5195_v12  }
 0x10f   : > { %646 = vrot.lane.b32.xlu1 %v569_v21, %s4854_s8 }
 0x116   : > { %671 = vperm.xlu0 (%p5191_p3), %3935, %v5204_v19  }
 0x117   : > { %687 = vperm.xlu1 (%p5191_p3), %3936, %v5195_v12  }
 0x11e   : > { %3937 = vset.pattern.permute.xlu0 (%p5191_p3), %v4855_v8 }
 0x11f   : > { %691 = vperm.xlu1 (%p5191_p3), %3936, %v5204_v19  }
 0x149   : > { %v622_v35 = vpop.permute.xlu2 %621 }
 0x151   : > { %v637_v36 = vpop.permute.xlu2 %636 }
 0x159   : > { %v624_v39 = vpop.permute.xlu2 %623 }
 0x161   : > { %v618_v37 = vpop.permute.xlu1 %617  ;;  %v643_v45 = vpop.permute.xlu2 %642 }
 0x162   : > { %v5269_v38 = vsel %vm6706_vm15, %v618_v37, %v622_v35 }
 0x168   : > { %v626_v40 = vpop.permute.xlu0 %625 }
 0x169   : > { %v5274_v41 = vsel %vm6706_vm15, %v622_v35, %v626_v40   ;;  %v5278_v42 = vsel %vm6706_vm15, %v626_v40, %v618_v37  ;;  %v641_v43 = vpop.permute.xlu1 %640 }
 0x16a   : > { %v5282_v44 = vsel %vm6705_vm0, %v637_v36, %v641_v43   ;;  %v4633_v5 = vmov (%p5191_p3), %v5274_v41  }
 0x16b   : > { %v4617_v1 = vmov (%p5191_p3), %v5282_v44  }
 0x170   : > { %v639_v46 = vpop.permute.xlu0 %638 }
 0x171   : > { %v5286_v47 = vsel %vm6705_vm0, %v639_v46, %v643_v45   ;;  %v620_v48 = vpop.permute.xlu1 %619 }
 0x172   : > { %v5290_v49 = vsel %vm6706_vm15, %v620_v48, %v624_v39  ;;  %v4605_v61 = vmov (%p5191_p3), %v5286_v47  }
 0x178   : > { %v645_v50 = vpop.permute.xlu0 %644 }
 0x179   : > { %v5294_v51 = vsel %vm6705_vm0, %v641_v43, %v645_v50  ;;  %v5298_v52 = vsel %vm6705_vm0, %v645_v50, %v637_v36  ;;  %v628_v53 = vpop.permute.xlu1 %627 }
 0x17a   : > { %v5302_v54 = vsel %vm6706_vm15, %v624_v39, %v628_v53   ;;  %v5306_v55 = vsel %vm6706_vm15, %v628_v53, %v620_v48 }
 0x17b   : > { %v4621_v2 = vmov (%p5191_p3), %v5302_v54  }
 0x17e   : > { %657 = sbr.rel (!%p5191_p3) target bundleno = 403 (0x193), region = 72 }
 0x180   : > { %v667_v11 = vpop.permute.xlu0 (%p5191_p3), %666 }
 0x181   : > { %v647_v56 = vpop.permute.xlu1 %646  ;;  %v674_v7 = vsel (%p5191_p3), %vm5222_vm1, %v667_v11, %v5278_v42   ;;  %v675_v6 = vsel (%p5191_p3), %vm5228_vm5, %v667_v11, %v5269_v38  }
 0x182   : > { %v5310_v57 = vsel %vm6705_vm0, %v643_v45, %v647_v56  ;;  %v5314_v58 = vsel %vm6705_vm0, %v647_v56, %v639_v46 }
 0x188   : > { %v672_v14 = vpop.permute.xlu0 %671 }
 0x189   : > { %v688_v10 = vpop.permute.xlu1 %687  ;;  %v677_v4 = vsel %vm5222_vm1, %v672_v14, %v5306_v55   ;;  %v678_v3 = vsel %vm5228_vm5, %v672_v14, %v5290_v49  }
 0x18a   : > { %v695_v63 = vsel %vm5250_vm12, %v688_v10, %v5294_v51   ;;  %v696_v62 = vsel %vm5232_vm7, %v688_v10, %v5298_v52  }
 0x191   : > { %v692_v13 = vpop.permute.xlu1 %691 }
 0x192   : > { %v698_v60 = vsel %vm5250_vm12, %v692_v13, %v5310_v57   ;;  %v699_v59 = vsel %vm5232_vm7, %v692_v13, %v5314_v58  }
 0x193 PF: > { %3939 = vset.pattern.permute.xlu1 %v4852_v0  ;;  %s6779_s6 = sld [smem:[#allocation30_spill]]  ;;  %3938 = vset.pattern.permute.xlu0 %v4852_v0  ;;  %vm6707_vm3 = vcmask 261120   ;;  %s4857_s27 = smov 2   ;;  %v4642_v7 = vphi %v4640_v7, %v674_v7   ;;  %v4638_v6 = vphi %v4636_v6, %v675_v6   ;;  %v4634_v5 = vphi %v4632_v5, %v4633_v5   ;;  %v4630_v4 = vphi %v4628_v4, %v677_v4   ;;  %v4626_v3 = vphi %v4624_v3, %v678_v3   ;;  %v4622_v2 = vphi %v4620_v2, %v4621_v2   ;;  %v4618_v1 = vphi %v4616_v1, %v4617_v1   ;;  %v4614_v63 = vphi %v4612_v63, %v695_v63   ;;  %v4610_v62 = vphi %v4608_v62, %v696_v62   ;;  %v4606_v61 = vphi %v4604_v61, %v4605_v61   ;;  %v4602_v60 = vphi %v4600_v60, %v698_v60   ;;  %v4598_v59 = vphi %v4596_v59, %v699_v59  }
 0x194   : > { %s3226_s20 = scalar_select %p5191_p3, 0, 1 }
 0x195   : > { %s6780_s12 = sld [smem:[#allocation29_spill]]  ;;  %s4858_s26 = smov 126  }
 0x196   : > { %v5361_v17 = vstv %s3226_s20 }
 0x197   : > { %vm6708_vm2 = vcmp.ne.s32.totalorder %v5361_v17, 0 }
 0x198   : > { %v2987_v18 = vsel %vm6708_vm2, %v5286_v47, %v4606_v61  ;;  %v2991_v20 = vsel %vm6708_vm2, %v5310_v57, %v4602_v60  ;;  %v2995_v21 = vsel %vm6708_vm2, %v5314_v58, %v4598_v59  ;;  %v2975_v22 = vsel %vm6708_vm2, %v5282_v44, %v4618_v1 }
 0x199   : > { %v727_v15 = vld [vmem:[%s6779_s6] sm:$0xff]  ;;  %v729_v16 = vld [vmem:[%s6779_s6 + $0x10] sm:$0xff]  ;;  %780 = vmatpush.msra.mxu3 %v2987_v18  ;;  %809 = vmatpush.msrb.mxu0 %v2991_v20  ;;  %v2979_v24 = vsel %vm6708_vm2, %v5294_v51, %v4614_v63  ;;  %v2983_v25 = vsel %vm6708_vm2, %v5298_v52, %v4610_v62  ;;  %v728_v26 = vld [vmem:[%s6779_s6 + $0x8] sm:$0xff]  ;;  %v2963_v35 = vsel %vm6708_vm2, %v5306_v55, %v4630_v4 }
 0x19a   : > { %737 = vperm.xlu1 %3939, %v727_v15   ;;  %747 = vperm.xlu0 %3938, %v729_v16   ;;  %v2967_v36 = vsel %vm6708_vm2, %v5290_v49, %v4626_v3  ;;  %v2971_v37 = vsel %vm6708_vm2, %v5302_v54, %v4622_v2  ;;  %v730_v39 = vld [vmem:[%s6779_s6 + $0x18] sm:$0xff]  ;;  %v2951_v40 = vsel %vm6708_vm2, %v5278_v42, %v4642_v7 }
 0x19b   : > { %838 = vmatpush.msrb.mxu1 %v2995_v21  ;;  %781 = vmatpush.msra.mxu3 %v2975_v22  ;;  %v2955_v43 = vsel %vm6708_vm2, %v5269_v38, %v4638_v6  ;;  %v2959_v44 = vsel %vm6708_vm2, %v5274_v41, %v4634_v5  ;;  %v731_v45 = vld [vmem:[%s6780_s12] sm:$0xff]  ;;  %v732_v38 = vld [vmem:[%s6780_s12 + $0x8] sm:$0xff]  ;;  %v733_v41 = vld [vmem:[%s6780_s12 + $0x10] sm:$0xff] }
 0x19c   : > { %810 = vmatpush.msrb.mxu0 %v2979_v24  ;;  %v734_v42 = vld [vmem:[%s6780_s12 + $0x18] sm:$0xff] }
 0x19d   : > { %839 = vmatpush.msrb.mxu1 %v2983_v25  ;;  %782 = vmatpush.msra.mxu3 %v2963_v35 }
 0x19e   : > { %811 = vmatpush.msrb.mxu0 %v2967_v36 }
 0x19f   : > { %840 = vmatpush.msrb.mxu1 %v2971_v37  ;;  %783 = vmatpush.msra.mxu3 %v2951_v40 }
 0x1a0   : > { %812 = vmatpush.msrb.mxu0 %v2955_v43  ;;  %2799 = vmatmul.msk.f32.vlgmr.msra.gmra.mxu3 %vm6707_vm3, %v731_v45 }
 0x1a1   : > { %841 = vmatpush.msrb.mxu1 %v2959_v44  ;;  %2803 = vmatmul.msk.f32.vlgmr.msrb.gmra.mxu0 %vm6707_vm3, %v731_v45 }
 0x1a2   : > { %742 = vperm.xlu1 %3939, %v728_v26   ;;  %752 = vperm.xlu0 %3938, %v730_v39  }
 0x1a3   : > { %2807 = vmatmul.msk.f32.vlgmr.msrb.gmra.mxu1 %vm6707_vm3, %v731_v45 }
 0x1a8   : > { %2800 = vmatmul.msk.f32.gmra.mxu3 %vm6707_vm3, %v732_v38 }
 0x1a9   : > { %2804 = vmatmul.msk.f32.gmra.mxu0 %vm6707_vm3, %v732_v38 }
 0x1ab   : > { %2808 = vmatmul.msk.f32.gmra.mxu1 %vm6707_vm3, %v732_v38 }
 0x1b0   : > { %2801 = vmatmul.msk.f32.gmra.mxu3 %vm6707_vm3, %v733_v41 }
 0x1b1   : > { %2805 = vmatmul.msk.f32.gmra.mxu0 %vm6707_vm3, %v733_v41 }
 0x1b3   : > { %2809 = vmatmul.msk.f32.gmra.mxu1 %vm6707_vm3, %v733_v41 }
 0x1b8   : > { %2802 = vmatmul.msk.f32.gmra.mxu3 %vm6707_vm3, %v734_v42 }
 0x1b9   : > { %2806 = vmatmul.msk.f32.gmra.mxu0 %vm6707_vm3, %v734_v42 }
 0x1bb   : > { %2810 = vmatmul.msk.f32.gmra.mxu1 %vm6707_vm3, %v734_v42 }
 0x20c   : > { %v748_v51 = vpop.permute.xlu0 %747  ;;  %v738_v16 = vpop.permute.xlu1 %737 }
 0x214   : > { %v753_v61 = vpop.permute.xlu0 %752 }
 0x21e   : > { %v814_v46 = vpop.f32.mrf.mxu0 }
 0x21f   : > { %v815_v24 = vadd.f32 %v814_v46, %v738_v16 }
 0x220   : > { %v843_v47 = vpop.f32.mrf.mxu1 }
 0x221   : > { %v844_v25 = vadd.f32 %v843_v47, %v738_v16 }
 0x223   : > { %v785_v48 = vpop.f32.mrf.mxu3 }
 0x224   : > { %v5441_v36 = vadd.f32 %v785_v48, %v738_v16 }
 0x226   : > { %v5430_v49 = vpop.f32.mrf.mxu0 }
 0x228   : > { %v5432_v50 = vpop.f32.mrf.mxu1 }
 0x22b   : > { %v5434_v52 = vpop.f32.mrf.mxu3 }
 0x22e   : > { %v820_v53 = vpop.f32.mrf.mxu0 }
 0x22f   : > { %v821_v55 = vadd.f32 %v820_v53, %v748_v51 }
 0x230   : > { %v849_v54 = vpop.f32.mrf.mxu1 }
 0x231   : > { %v850_v56 = vadd.f32 %v849_v54, %v748_v51  ;;  %v2812_v57 = vmul.f32 -1.442695, %v821_v55 }
 0x233   : > { %v2813_v58 = vmul.f32 -1.442695, %v850_v56  ;;  %3940 = vpow2.f32 %v2812_v57  ;;  %v791_v59 = vpop.f32.mrf.mxu3 }
 0x234   : > { %v792_v60 = vadd.f32 %v791_v59, %v748_v51 }
 0x235   : > { %3942 = vpow2.f32 %v2813_v58 }
 0x236   : > { %v2811_v62 = vmul.f32 -1.442695, %v792_v60  ;;  %v823_v63 = vpop.f32.mrf.mxu0 }
 0x237   : > { %v824_v2 = vadd.f32 %v823_v63, %v753_v61 }
 0x238   : > { %v852_v1 = vpop.f32.mrf.mxu1  ;;  %3944 = vpow2.f32 %v2811_v62 }
 0x239   : > { %v853_v3 = vadd.f32 %v852_v1, %v753_v61  ;;  %v3941_v4 = vpop.eup %3940  ;;  %v2815_v5 = vmul.f32 -1.442695, %v824_v2 }
 0x23a   : > { %v874_v7 = vadd.f32 1.0, %v3941_v4 }
 0x23b   : > { %v3943_v6 = vpop.eup %3942  ;;  %v2816_v8 = vmul.f32 -1.442695, %v853_v3  ;;  %3946 = vpow2.f32 %v2815_v5  ;;  %v794_v10 = vpop.f32.mrf.mxu3 }
 0x23c   : > { %v875_v9 = vadd.f32 1.0, %v3943_v6  ;;  %3948 = vrcp.f32 %v874_v7  ;;  %v795_v11 = vadd.f32 %v794_v10, %v753_v61  ;;  %v903_v39 = vand.u32 2147483647, %v874_v7 }
 0x23d   : > { %vm899_vm4 = vweird.f32 %v874_v7  ;;  %v905_v42 = vand.u32 2147483648, %v874_v7 }
 0x23e   : > { %3950 = vrcp.f32 %v875_v9  ;;  %v3945_v13 = vpop.eup %3944  ;;  %v2814_v14 = vmul.f32 -1.442695, %v795_v11  ;;  %v918_v43 = vand.u32 2147483647, %v875_v9  ;;  %vm914_vm6 = vweird.f32 %v875_v9  ;;  %v743_v11 = vpop.permute.xlu1 %742 }
 0x23f   : > { %3952 = vpow2.f32 %v2816_v8  ;;  %v5436_v15 = vadd.f32 1.0, %v3945_v13  ;;  %v920_v41 = vand.u32 2147483648, %v875_v9  ;;  %vm5450_vm0 = vcmp.eq.f32.partialorder %v903_v39, 8.507059e+37 }
 0x240   : > { %3954 = vpow2.f32 %v2814_v14  ;;  %vm5455_vm15 = vcmp.eq.f32.partialorder %v918_v43, 8.507059e+37  ;;  %v906_v61 = vor.u32 1.1754944e-38, %v905_v42  ;;  %v818_v39 = vadd.f32 %v5430_v49, %v743_v11 }
 0x241   : > { %v3947_v18 = vpop.eup %3946  ;;  %3956 = vrcp.f32 %v5436_v15  ;;  %v890_v57 = vand.u32 2147483648, %v5436_v15  ;;  %v921_v60 = vor.u32 1.1754944e-38, %v920_v41  ;;  %vm884_vm5 = vweird.f32 %v5436_v15 }
 0x242   : > { %v3949_v20 = vpop.eup %3948  ;;  %v5439_v21 = vadd.f32 1.0, %v3947_v18  ;;  %v888_v2 = vand.u32 2147483647, %v5436_v15 }
 0x243   : > { %v895_v26 = vmul.f32 %v3949_v20, %v874_v7  ;;  %vm900_vm9 = vweird.f32 %v3949_v20  ;;  %v891_v10 = vor.u32 1.1754944e-38, %v890_v57 }
 0x244   : > { %v3951_v22 = vpop.eup %3950  ;;  %3958 = vrcp.f32 %v5439_v21  ;;  %vm901_vm3 = vmor %vm899_vm4, %vm900_vm9  ;;  %v950_v18 = vand.u32 2147483648, %v5439_v21 }
 0x245   : > { %v3953_v35 = vpop.eup %3952  ;;  %v910_v37 = vmul.f32 %v3951_v22, %v875_v9  ;;  %v896_v44 = vsub.f32 1.0, %v895_v26  ;;  %vm915_vm11 = vweird.f32 %v3951_v22 }
 0x246   : > { %v5444_v40 = vadd.f32 1.0, %v3953_v35  ;;  %v3955_v45 = vpop.eup %3954  ;;  %vm916_vm2 = vmor %vm914_vm6, %vm915_vm11 }
 0x247   : > { %v911_v38 = vsub.f32 1.0, %v910_v37  ;;  %v3957_v46 = vpop.eup %3956  ;;  %v5447_v47 = vadd.f32 1.0, %v3955_v45  ;;  %v897_v48 = vmul.f32 %v3949_v20, %v896_v44  ;;  %v951_v44 = vor.u32 1.1754944e-38, %v950_v18 }
 0x248   : > { %3960 = vrcp.f32 %v5444_v40  ;;  %v880_v51 = vmul.f32 %v3957_v46, %v5436_v15  ;;  %vm885_vm12 = vweird.f32 %v3957_v46  ;;  %v965_v42 = vand.u32 2147483648, %v5444_v40 }
 0x249   : > { %v912_v53 = vmul.f32 %v3951_v22, %v911_v38  ;;  %3962 = vrcp.f32 %v5447_v47  ;;  %v898_v56 = vadd.f32 %v3949_v20, %v897_v48  ;;  %vm959_vm9 = vweird.f32 %v5444_v40 }
 0x24a   : > { %v3959_v58 = vpop.eup %3958  ;;  %v881_v62 = vsub.f32 1.0, %v880_v51  ;;  %v933_v54 = vand.u32 2147483647, %v5447_v47 }
 0x24b   : > { %v913_v59 = vadd.f32 %v3951_v22, %v912_v53  ;;  %v940_v63 = vmul.f32 %v3959_v58, %v5439_v21  ;;  %v902_v1 = vsel %vm901_vm3, %v3949_v20, %v898_v56  ;;  %vm944_vm3 = vweird.f32 %v5439_v21 }
 0x24c   : > { %v907_v4 = vsel %vm5450_vm0, %v906_v61, %v902_v1  ;;  %v882_v5 = vmul.f32 %v3957_v46, %v881_v62  ;;  %vm945_vm0 = vweird.f32 %v3959_v58  ;;  %v789_v61 = vadd.f32 %v5434_v52, %v743_v11 }
 0x24d   : > { %v917_v3 = vsel %vm916_vm2, %v3951_v22, %v913_v59  ;;  %v5469_v8 = vmul.f32 %v907_v4, %v815_v24  ;;  %v941_v9 = vsub.f32 1.0, %v940_v63  ;;  %vm889_vm2 = vcmp.eq.f32.partialorder %v888_v2, 8.507059e+37 }
 0x24e   : > { %v3961_v6 = vpop.eup %3960  ;;  %v922_v7 = vsel %vm5455_vm15, %v921_v60, %v917_v3  ;;  %v883_v16 = vadd.f32 %v3957_v46, %v882_v5  ;;  %vm886_vm15 = vmor %vm884_vm5, %vm885_vm12  ;;  %v847_v60 = vadd.f32 %v5432_v50, %v743_v11 }
 0x24f   : > { %v955_v13 = vmul.f32 %v3961_v6, %v5444_v40  ;;  %v5472_v14 = vmul.f32 %v922_v7, %v844_v25  ;;  %v3963_v20 = vpop.eup %3962  ;;  %981 = vrot.lane.b32.xlu0 %v5469_v8, %s4857_s27  ;;  %v5479_v22 = vadd.f32 %v5469_v8, %v5195_v12  ;;  %v942_v24 = vmul.f32 %v3959_v58, %v941_v9  ;;  %vm946_vm5 = vmor %vm944_vm3, %vm945_vm0 }
 0x250   : > { %v948_v25 = vand.u32 2147483647, %v5439_v21  ;;  %v925_v26 = vmul.f32 %v3963_v20, %v5447_v47  ;;  %v887_v35 = vsel %vm886_vm15, %v3957_v46, %v883_v16  ;;  %vm960_vm4 = vweird.f32 %v3961_v6 }
 0x251   : > { %985 = vrot.lane.b32.xlu2 %v5472_v14, %s4857_s27  ;;  %v956_v37 = vsub.f32 1.0, %v955_v13  ;;  %v892_v12 = vsel %vm889_vm2, %v891_v10, %v887_v35  ;;  %v943_v43 = vadd.f32 %v3959_v58, %v942_v24  ;;  %vm930_vm6 = vweird.f32 %v3963_v20  ;;  %vm961_vm11 = vmor %vm959_vm9, %vm960_vm4 }
 0x252   : > { %v969_v15 = vmul.f32 %v892_v12, %v5441_v36  ;;  %v926_v38 = vsub.f32 1.0, %v925_v26  ;;  %vm949_vm12 = vcmp.eq.f32.partialorder %v948_v25, 8.507059e+37  ;;  %v963_v21 = vand.u32 2147483647, %v5444_v40 }
 0x253   : > { %v957_v45 = vmul.f32 %v3961_v6, %v956_v37  ;;  %v947_v41 = vsel %vm946_vm5, %v3959_v58, %v943_v43  ;;  %v935_v36 = vand.u32 2147483648, %v5447_v47  ;;  %vm929_vm15 = vweird.f32 %v5447_v47 }
 0x254   : > { %996 = vrot.lane.b32.xlu1 %v969_v15, %s4858_s26  ;;  %v952_v46 = vsel %vm949_vm12, %v951_v44, %v947_v41  ;;  %v927_v48 = vmul.f32 %v3963_v20, %v926_v38  ;;  %vm931_vm0 = vmor %vm929_vm15, %vm930_vm6  ;;  %v966_v40 = vor.u32 1.1754944e-38, %v965_v42  ;;  %vm964_vm2 = vcmp.eq.f32.partialorder %v963_v21, 8.507059e+37 }
 0x255   : > { %v958_v49 = vadd.f32 %v3961_v6, %v957_v45  ;;  %v5493_v51 = vmul.f32 %v952_v46, %v818_v39  ;;  %v936_v58 = vor.u32 1.1754944e-38, %v935_v36  ;;  %vm934_vm3 = vcmp.eq.f32.partialorder %v933_v54, 8.507059e+37 }
 0x256   : > { %v928_v53 = vadd.f32 %v3963_v20, %v927_v48  ;;  %vm6717_vm5 = vcmp.lt.s32.totalorder %v5219_v23, 2  ;;  %vm6716_vm12 = vcmp.lt.s32.totalorder %v5219_v23, 126  ;;  %v4644_v12 = vmov 0  }
 0x257   : > { %1000 = vrot.lane.b32.xlu0 %v5469_v8, %s4858_s26  ;;  %v5504_v55 = vadd.f32 %v5493_v51, %v5204_v19  ;;  %v962_v56 = vsel %vm961_vm11, %v3961_v6, %v958_v49  ;;  %v4648_v43 = vmov 0   ;;  %v4656_v44 = vmov 0  }
 0x258   : > { %v932_v57 = vsel %vm931_vm0, %v3963_v20, %v928_v53  ;;  %v967_v59 = vsel %vm964_vm2, %v966_v40, %v962_v56  ;;  %v4660_v45 = vmov 0   ;;  %v4664_v38 = vmov 0  }
 0x259   : > { %977 = vrot.lane.b32.xlu2 %v969_v15, %s4857_s27  ;;  %v937_v47 = vsel %vm934_vm3, %v936_v58, %v932_v57  ;;  %v974_v19 = vmul.f32 %v967_v59, %v847_v60  ;;  %v4652_v15 = vmov 0   ;;  %v4668_v41 = vmov 0  }
 0x25a   : > { %v972_v62 = vmul.f32 %v937_v47, %v789_v61  ;;  %v4672_v42 = vmov 0   ;;  %v4676_v46 = vmov 0   ;;  %v4680_v49 = vmov 0  }
 0x25b   : > { %v4684_v48 = vmov 0   ;;  %v4688_v21 = vmov 0   ;;  %v4859_v36 = vmov (%p5191_p3), 127   ;;  %v4860_v53 = vmov (%p5191_p3), 0  }
 0x25c   : > { %983 = vrot.lane.b32.xlu1 %v5493_v51, %s4857_s27  ;;  %3964 = vset.pattern.permute.xlu0 (%p5191_p3), %v4860_v53 }
 0x25d   : > { %3965 = vset.pattern.permute.xlu1 (%p5191_p3), %v4859_v36 }
 0x25f   : > { %987 = vrot.lane.b32.xlu0 %v974_v19, %s4857_s27 }
 0x261   : > { %979 = vrot.lane.b32.xlu2 %v972_v62, %s4857_s27 }
 0x264   : > { %1002 = vrot.lane.b32.xlu1 %v5493_v51, %s4858_s26 }
 0x267   : > { %1006 = vrot.lane.b32.xlu0 %v974_v19, %s4858_s26 }
 0x269   : > { %998 = vrot.lane.b32.xlu2 %v972_v62, %s4858_s26 }
 0x26c   : > { %1047 = vperm.xlu1 (%p5191_p3), %3965, %v5469_v8  }
 0x26f   : > { %1026 = vperm.xlu0 (%p5191_p3), %3964, %v5469_v8  }
 0x271   : > { %1004 = vrot.lane.b32.xlu2 %v5472_v14, %s4858_s26 }
 0x274   : > { %1051 = vperm.xlu1 (%p5191_p3), %3965, %v5493_v51  }
 0x277   : > { %1031 = vperm.xlu0 (%p5191_p3), %3964, %v5493_v51  }
 0x27f   : > { %3966 = vset.pattern.permute.xlu0 (%p5191_p3), %v4859_v36 }
 0x2ab   : > { %v986_v50 = vpop.permute.xlu2 %985 }
 0x2b3   : > { %v978_v52 = vpop.permute.xlu2 %977 }
 0x2b4   : > { %v5522_v63 = vsel %vm6717_vm5, %v986_v50, %v978_v52 }
 0x2bb   : > { %v980_v1 = vpop.permute.xlu2 %979 }
 0x2c1   : > { %v982_v2 = vpop.permute.xlu0 %981 }
 0x2c2   : > { %v5526_v3 = vsel %vm6717_vm5, %v982_v2, %v986_v50   ;;  %v5530_v4 = vsel %vm6717_vm5, %v978_v52, %v982_v2 }
 0x2c3   : > { %v999_v5 = vpop.permute.xlu2 %998  ;;  %v4681_v49 = vmov (%p5191_p3), %v5526_v3  }
 0x2c6   : > { %v997_v6 = vpop.permute.xlu1 %996 }
 0x2c9   : > { %v1001_v7 = vpop.permute.xlu0 %1000 }
 0x2ca   : > { %v5535_v10 = vsel %vm6716_vm12, %v997_v6, %v1001_v7  }
 0x2cb   : > { %v1005_v9 = vpop.permute.xlu2 %1004  ;;  %v4665_v38 = vmov (%p5191_p3), %v5535_v10  }
 0x2cc   : > { %v5539_v11 = vsel %vm6716_vm12, %v1001_v7, %v1005_v9  ;;  %v5543_v13 = vsel %vm6716_vm12, %v1005_v9, %v997_v6 }
 0x2ce   : > { %v984_v14 = vpop.permute.xlu1 %983 }
 0x2cf   : > { %v5547_v16 = vsel %vm6717_vm5, %v980_v1, %v984_v14 }
 0x2d1   : > { %v988_v18 = vpop.permute.xlu0 %987 }
 0x2d2   : > { %v5551_v20 = vsel %vm6717_vm5, %v984_v14, %v988_v18   ;;  %v5555_v24 = vsel %vm6717_vm5, %v988_v18, %v980_v1 }
 0x2d3   : > { %v4669_v41 = vmov (%p5191_p3), %v5551_v20  }
 0x2d6   : > { %v1003_v25 = vpop.permute.xlu1 %1002  ;;  %1017 = sbr.rel (!%p5191_p3) target bundleno = 747 (0x2eb), region = 80 }
 0x2d7   : > { %v5559_v26 = vsel %vm6716_vm12, %v999_v5, %v1003_v25  }
 0x2d8   : > { %v4653_v15 = vmov (%p5191_p3), %v5559_v26  }
 0x2d9   : > { %v1007_v35 = vpop.permute.xlu0 %1006 }
 0x2da   : > { %v5563_v37 = vsel %vm6716_vm12, %v1003_v25, %v1007_v35  ;;  %v5567_v39 = vsel %vm6716_vm12, %v1007_v35, %v999_v5 }
 0x2de   : > { %v1048_v54 = vpop.permute.xlu1 %1047 }
 0x2df   : > { %v1055_v45 = vsel %vm5256_vm13, %v1048_v54, %v5539_v11   ;;  %v1056_v44 = vsel %vm5232_vm7, %v1048_v54, %v5543_v13  }
 0x2e1   : > { %v1027_v56 = vpop.permute.xlu0 %1026 }
 0x2e2   : > { %v1034_v21 = vsel %vm5222_vm1, %v1027_v56, %v5522_v63   ;;  %v1035_v48 = vsel %vm5238_vm8, %v1027_v56, %v5530_v4  }
 0x2e6   : > { %v1052_v8 = vpop.permute.xlu1 %1051 }
 0x2e7   : > { %v1058_v43 = vsel %vm5256_vm13, %v1052_v8, %v5563_v37   ;;  %v1059_v12 = vsel %vm5232_vm7, %v1052_v8, %v5567_v39  }
 0x2e9   : > { %v1032_v51 = vpop.permute.xlu0 %1031 }
 0x2ea   : > { %v1037_v46 = vsel %vm5222_vm1, %v1032_v51, %v5555_v24   ;;  %v1038_v42 = vsel %vm5238_vm8, %v1032_v51, %v5547_v16  }
 0x2eb PF: > { %vm6785_vm4 = vcmp.ne.s32.totalorder %v5361_v17, 0  ;;  %3968 = vset.pattern.permute.xlu1 %v4852_v0  ;;  %s6791_s12 = sld [smem:[#allocation30_spill]]  ;;  %3967 = vset.pattern.permute.xlu0 %v4852_v0  ;;  %v4690_v21 = vphi %v4688_v21, %v1034_v21   ;;  %v4686_v48 = vphi %v4684_v48, %v1035_v48   ;;  %v4682_v49 = vphi %v4680_v49, %v4681_v49   ;;  %v4678_v46 = vphi %v4676_v46, %v1037_v46   ;;  %v4674_v42 = vphi %v4672_v42, %v1038_v42   ;;  %v4670_v41 = vphi %v4668_v41, %v4669_v41   ;;  %v4666_v38 = vphi %v4664_v38, %v4665_v38   ;;  %v4662_v45 = vphi %v4660_v45, %v1055_v45   ;;  %v4658_v44 = vphi %v4656_v44, %v1056_v44   ;;  %v4654_v15 = vphi %v4652_v15, %v4653_v15   ;;  %v4650_v43 = vphi %v4648_v43, %v1058_v43   ;;  %v4646_v12 = vphi %v4644_v12, %v1059_v12  }
 0x2ec   : > { %v3036_v40 = vsel %vm6785_vm4, %v5559_v26, %v4654_v15  ;;  %vm6786_vm6 = vmmov %vm6785_vm4  ;;  %s6798_s21 = sld [smem:[#allocation29_spill]] }
 0x2ed   : > { %v3040_v57 = vsel %vm6786_vm6, %v5563_v37, %v4650_v43  ;;  %vm6787_vm9 = vmmov %vm6785_vm4  ;;  %1141 = vmatpush.msrb.mxu2 %v3036_v40 }
 0x2ee   : > { %v3044_v58 = vsel %vm6787_vm9, %v5567_v39, %v4646_v12  ;;  %vm6788_vm11 = vmmov %vm6785_vm4  ;;  %1170 = vmatpush.msrb.mxu3 %v3040_v57 }
 0x2ef   : > { %v3024_v59 = vsel %vm6788_vm11, %v5535_v10, %v4666_v38  ;;  %vm6789_vm15 = vmmov %vm6785_vm4  ;;  %1199 = vmatpush.msra.mxu0 %v3044_v58 }
 0x2f0   : > { %v3028_v60 = vsel %vm6789_vm15, %v5539_v11, %v4662_v45  ;;  %vm6790_vm0 = vmmov %vm6785_vm4  ;;  %1142 = vmatpush.msrb.mxu2 %v3024_v59  ;;  %vm6799_vm15 = vcmask 261120  }
 0x2f1   : > { %v3032_v47 = vsel %vm6790_vm0, %v5543_v13, %v4658_v44  ;;  %v2817_v61 = vld [vmem:[%s6791_s12 + $0x20] sm:$0xff]  ;;  %vm6792_vm2 = vmmov %vm6790_vm0  ;;  %1171 = vmatpush.msrb.mxu3 %v3028_v60  ;;  %v2820_v6 = vld [vmem:[%s6791_s12 + $0x38] sm:$0xff] }
 0x2f2   : > { %v3012_v19 = vsel %vm6792_vm2, %v5555_v24, %v4678_v46  ;;  %vm6793_vm3 = vmmov %vm6790_vm0  ;;  %1200 = vmatpush.msra.mxu0 %v3032_v47  ;;  %1099 = vperm.xlu1 %3968, %v2817_v61   ;;  %v2821_v5 = vld [vmem:[%s6798_s21 + $0x20] sm:$0xff]  ;;  %v2823_v7 = vld [vmem:[%s6798_s21 + $0x30] sm:$0xff] }
 0x2f3   : > { %v3016_v62 = vsel %vm6793_vm3, %v5547_v16, %v4674_v42  ;;  %vm6794_vm4 = vmmov %vm6790_vm0  ;;  %1143 = vmatpush.msrb.mxu2 %v3012_v19  ;;  %v2824_v10 = vld [vmem:[%s6798_s21 + $0x38] sm:$0xff] }
 0x2f4   : > { %v3020_v50 = vsel %vm6794_vm4, %v5551_v20, %v4670_v41  ;;  %vm6795_vm6 = vmmov %vm6790_vm0  ;;  %1172 = vmatpush.msrb.mxu3 %v3016_v62 }
 0x2f5   : > { %v3000_v52 = vsel %vm6795_vm6, %v5522_v63, %v4690_v21  ;;  %vm6796_vm9 = vmmov %vm6790_vm0  ;;  %1201 = vmatpush.msra.mxu0 %v3020_v50  ;;  %v2819_v63 = vld [vmem:[%s6791_s12 + $0x30] sm:$0xff] }
 0x2f6   : > { %v3004_v1 = vsel %vm6796_vm9, %v5530_v4, %v4686_v48  ;;  %vm6797_vm11 = vmmov %vm6790_vm0  ;;  %1144 = vmatpush.msrb.mxu2 %v3000_v52  ;;  %1109 = vperm.xlu0 %3967, %v2819_v63   ;;  %v2822_v4 = vld [vmem:[%s6798_s21 + $0x28] sm:$0xff]  ;;  %s4862_s21 = smov 124  }
 0x2f7   : > { %v3008_v2 = vsel %vm6797_vm11, %v5526_v3, %v4682_v49  ;;  %1173 = vmatpush.msrb.mxu3 %v3004_v1  ;;  %2825 = vmatmul.msk.f32.vlgmr.msrb.gmra.mxu2 %vm6799_vm15, %v2821_v5  ;;  %vm6800_vm0 = vmmov %vm6799_vm15  ;;  %v2818_v3 = vld [vmem:[%s6791_s12 + $0x28] sm:$0xff]  ;;  %s4861_s12 = smov 4  }
 0x2f8   : > { %1202 = vmatpush.msra.mxu0 %v3008_v2  ;;  %2829 = vmatmul.msk.f32.vlgmr.msrb.gmra.mxu3 %vm6800_vm0, %v2821_v5  ;;  %vm6801_vm2 = vmmov %vm6800_vm0 }
 0x2f9   : > { %2833 = vmatmul.msk.f32.vlgmr.msra.gmra.mxu0 %vm6801_vm2, %v2821_v5  ;;  %vm6802_vm3 = vmmov %vm6800_vm0 }
 0x2fa   : > { %1104 = vperm.xlu1 %3968, %v2818_v3   ;;  %vm6803_vm4 = vmmov %vm6800_vm0 }
 0x2fb   : > { %vm6804_vm6 = vmmov %vm6800_vm0 }
 0x2fc   : > { %vm6805_vm9 = vmmov %vm6800_vm0 }
 0x2fd   : > { %vm6806_vm11 = vmmov %vm6800_vm0 }
 0x2fe   : > { %1114 = vperm.xlu0 %3967, %v2820_v6   ;;  %vm6807_vm15 = vmmov %vm6800_vm0 }
 0x2ff   : > { %2826 = vmatmul.msk.f32.gmra.mxu2 %vm6802_vm3, %v2822_v4  ;;  %vm6808_vm2 = vmmov %vm6800_vm0 }
 0x300   : > { %2830 = vmatmul.msk.f32.gmra.mxu3 %vm6803_vm4, %v2822_v4  ;;  %vm6809_vm3 = vmmov %vm6800_vm0 }
 0x301   : > { %2834 = vmatmul.msk.f32.gmra.mxu0 %vm6804_vm6, %v2822_v4 }
 0x307   : > { %2827 = vmatmul.msk.f32.gmra.mxu2 %vm6805_vm9, %v2823_v7 }
 0x308   : > { %2831 = vmatmul.msk.f32.gmra.mxu3 %vm6806_vm11, %v2823_v7 }
 0x309   : > { %2835 = vmatmul.msk.f32.gmra.mxu0 %vm6807_vm15, %v2823_v7 }
 0x30f   : > { %2828 = vmatmul.msk.f32.gmra.mxu2 %vm6800_vm0, %v2824_v10 }
 0x310   : > { %2832 = vmatmul.msk.f32.gmra.mxu3 %vm6808_vm2, %v2824_v10 }
 0x311   : > { %2836 = vmatmul.msk.f32.gmra.mxu0 %vm6809_vm3, %v2824_v10 }
 0x364   : > { %v1100_v52 = vpop.permute.xlu1 %1099 }
 0x368   : > { %v1110_v18 = vpop.permute.xlu0 %1109 }
 0x370   : > { %v1115_v43 = vpop.permute.xlu0 %1114 }
 0x376   : > { %v1204_v9 = vpop.f32.mrf.mxu0 }
 0x377   : > { %v1205_v3 = vadd.f32 %v1204_v9, %v1100_v52 }
 0x37a   : > { %v5677_v11 = vpop.f32.mrf.mxu2 }
 0x37b   : > { %v5679_v13 = vpop.f32.mrf.mxu3 }
 0x37e   : > { %v5681_v14 = vpop.f32.mrf.mxu0 }
 0x382   : > { %v5683_v16 = vpop.f32.mrf.mxu2 }
 0x383   : > { %v5685_v20 = vpop.f32.mrf.mxu3 }
 0x386   : > { %v1210_v24 = vpop.f32.mrf.mxu0 }
 0x387   : > { %v1211_v25 = vadd.f32 %v1210_v24, %v1110_v18 }
 0x389   : > { %v2839_v26 = vmul.f32 -1.442695, %v1211_v25 }
 0x38a   : > { %v1152_v35 = vpop.f32.mrf.mxu2 }
 0x38b   : > { %3969 = vpow2.f32 %v2839_v26  ;;  %v1153_v37 = vadd.f32 %v1152_v35, %v1110_v18  ;;  %v1181_v39 = vpop.f32.mrf.mxu3 }
 0x38c   : > { %v1182_v12 = vadd.f32 %v1181_v39, %v1110_v18 }
 0x38d   : > { %v2837_v15 = vmul.f32 -1.442695, %v1153_v37 }
 0x38e   : > { %v1213_v44 = vpop.f32.mrf.mxu0  ;;  %v2838_v45 = vmul.f32 -1.442695, %v1182_v12 }
 0x38f   : > { %v1214_v38 = vadd.f32 %v1213_v44, %v1115_v43  ;;  %3971 = vpow2.f32 %v2837_v15 }
 0x390   : > { %3973 = vpow2.f32 %v2838_v45 }
 0x391   : > { %v3970_v41 = vpop.eup %3969  ;;  %v2842_v42 = vmul.f32 -1.442695, %v1214_v38 }
 0x392   : > { %v1236_v46 = vadd.f32 1.0, %v3970_v41  ;;  %v1155_v49 = vpop.f32.mrf.mxu2 }
 0x393   : > { %3975 = vpow2.f32 %v2842_v42  ;;  %v1156_v48 = vadd.f32 %v1155_v49, %v1115_v43  ;;  %v1184_v21 = vpop.f32.mrf.mxu3  ;;  %v1147_v42 = vadd.f32 %v5677_v11, %v1100_v52 }
 0x394   : > { %3977 = vrcp.f32 %v1236_v46  ;;  %v1185_v36 = vadd.f32 %v1184_v21, %v1115_v43  ;;  %v1279_v47 = vand.u32 2147483647, %v1236_v46  ;;  %v1281_v19 = vand.u32 2147483648, %v1236_v46 }
 0x395   : > { %v3972_v53 = vpop.eup %3971  ;;  %v2840_v54 = vmul.f32 -1.442695, %v1156_v48  ;;  %vm1275_vm4 = vweird.f32 %v1236_v46  ;;  %v1176_v48 = vadd.f32 %v5679_v13, %v1100_v52 }
 0x396   : > { %v3974_v56 = vpop.eup %3973  ;;  %v5687_v8 = vadd.f32 1.0, %v3972_v53  ;;  %v2841_v51 = vmul.f32 -1.442695, %v1185_v36  ;;  %vm5699_vm9 = vcmp.eq.f32.partialorder %v1279_v47, 8.507059e+37  ;;  %v1282_v18 = vor.u32 1.1754944e-38, %v1281_v19 }
 0x397   : > { %v5689_v40 = vadd.f32 1.0, %v3974_v56  ;;  %3979 = vpow2.f32 %v2840_v54 }
 0x398   : > { %3981 = vrcp.f32 %v5687_v8  ;;  %v1249_v35 = vand.u32 2147483647, %v5687_v8  ;;  %v1251_v9 = vand.u32 2147483648, %v5687_v8  ;;  %vm1245_vm2 = vweird.f32 %v5687_v8 }
 0x399   : > { %v3976_v57 = vpop.eup %3975  ;;  %3983 = vrcp.f32 %v5689_v40  ;;  %v1264_v12 = vand.u32 2147483647, %v5689_v40  ;;  %v1266_v43 = vand.u32 2147483648, %v5689_v40  ;;  %vm1260_vm3 = vweird.f32 %v5689_v40 }
 0x39a   : > { %v3978_v58 = vpop.eup %3977  ;;  %v5693_v59 = vadd.f32 1.0, %v3976_v57  ;;  %3985 = vpow2.f32 %v2841_v51  ;;  %v1252_v36 = vor.u32 1.1754944e-38, %v1251_v9 }
 0x39b   : > { %v1271_v60 = vmul.f32 %v3978_v58, %v1236_v46  ;;  %vm1276_vm6 = vweird.f32 %v3978_v58  ;;  %v1267_v54 = vor.u32 1.1754944e-38, %v1266_v43 }
 0x39c   : > { %3987 = vrcp.f32 %v5693_v59  ;;  %vm1277_vm11 = vmor %vm1275_vm4, %vm1276_vm6 }
 0x39d   : > { %v1272_v61 = vsub.f32 1.0, %v1271_v60  ;;  %v3980_v62 = vpop.eup %3979 }
 0x39e   : > { %v3982_v50 = vpop.eup %3981  ;;  %v5696_v1 = vadd.f32 1.0, %v3980_v62 }
 0x39f   : > { %v1273_v2 = vmul.f32 %v3978_v58, %v1272_v61  ;;  %v3984_v5 = vpop.eup %3983  ;;  %v1241_v63 = vmul.f32 %v3982_v50, %v5687_v8  ;;  %vm1246_vm15 = vweird.f32 %v3982_v50 }
 0x3a0   : > { %v3986_v6 = vpop.eup %3985  ;;  %v1256_v7 = vmul.f32 %v3984_v5, %v5689_v40  ;;  %3989 = vrcp.f32 %v5696_v1  ;;  %vm1261_vm0 = vweird.f32 %v3984_v5  ;;  %vm1247_vm4 = vmor %vm1245_vm2, %vm1246_vm15  ;;  %v1296_v19 = vand.u32 2147483648, %v5696_v1 }
 0x3a1   : > { %v1274_v10 = vadd.f32 %v3978_v58, %v1273_v2  ;;  %v5707_v25 = vadd.f32 1.0, %v3986_v6  ;;  %v1242_v26 = vsub.f32 1.0, %v1241_v63  ;;  %vm1262_vm6 = vmor %vm1260_vm3, %vm1261_vm0  ;;  %v1294_v52 = vand.u32 2147483647, %v5696_v1 }
 0x3a2   : > { %v5705_v24 = vpop.eup %3987  ;;  %v1257_v39 = vsub.f32 1.0, %v1256_v7  ;;  %vm1290_vm0 = vweird.f32 %v5696_v1 }
 0x3a3   : > { %v1278_v37 = vsel %vm1277_vm11, %v3978_v58, %v1274_v10  ;;  %3991 = vrcp.f32 %v5707_v25  ;;  %v1243_v44 = vmul.f32 %v3982_v50, %v1242_v26  ;;  %v1316_v45 = vmul.f32 %v5705_v24, %v5693_v59 }
 0x3a4   : > { %v1283_v15 = vsel %vm5699_vm9, %v1282_v18, %v1278_v37  ;;  %v1258_v41 = vmul.f32 %v3984_v5, %v1257_v39  ;;  %vm1250_vm9 = vcmp.eq.f32.partialorder %v1249_v35, 8.507059e+37  ;;  %vm1265_vm11 = vcmp.eq.f32.partialorder %v1264_v12, 8.507059e+37 }
 0x3a5   : > { %v5718_v38 = vmul.f32 %v1283_v15, %v1205_v3  ;;  %v1244_v46 = vadd.f32 %v3982_v50, %v1243_v44  ;;  %v1317_v51 = vsub.f32 1.0, %v1316_v45  ;;  %v1105_v3 = vpop.permute.xlu1 %1104  ;;  %v1309_v6 = vand.u32 2147483647, %v5707_v25 }
 0x3a6   : > { %v3990_v49 = vpop.eup %3989  ;;  %v1259_v21 = vadd.f32 %v3984_v5, %v1258_v41  ;;  %v1297_v10 = vor.u32 1.1754944e-38, %v1296_v19  ;;  %v1326_v37 = vand.u32 2147483648, %v5693_v59 }
 0x3a7   : > { %1346 = vrot.lane.b32.xlu2 %v5718_v38, %s4861_s12  ;;  %v1286_v53 = vmul.f32 %v3990_v49, %v5696_v1  ;;  %v1248_v11 = vsel %vm1247_vm4, %v3982_v50, %v1244_v46  ;;  %vm1291_vm15 = vweird.f32 %v3990_v49  ;;  %v1318_v2 = vmul.f32 %v5705_v24, %v1317_v51 }
 0x3a8   : > { %v1263_v56 = vsel %vm1262_vm6, %v3984_v5, %v1259_v21  ;;  %v1253_v8 = vsel %vm1250_vm9, %v1252_v36, %v1248_v11  ;;  %v1311_v5 = vand.u32 2147483648, %v5707_v25  ;;  %vm1292_vm3 = vmor %vm1290_vm0, %vm1291_vm15  ;;  %vm1305_vm4 = vweird.f32 %v5707_v25 }
 0x3a9   : > { %v3992_v13 = vpop.eup %3991  ;;  %v1268_v57 = vsel %vm1265_vm11, %v1267_v54, %v1263_v56  ;;  %v1330_v58 = vmul.f32 %v1253_v8, %v1147_v42  ;;  %v1287_v60 = vsub.f32 1.0, %v1286_v53  ;;  %vm1295_vm6 = vcmp.eq.f32.partialorder %v1294_v52, 8.507059e+37 }
 0x3aa   : > { %v1301_v47 = vmul.f32 %v3992_v13, %v5707_v25  ;;  %v5728_v61 = vmul.f32 %v1268_v57, %v1176_v48  ;;  %vm1306_vm2 = vweird.f32 %v3992_v13  ;;  %v1319_v26 = vadd.f32 %v5705_v24, %v1318_v2 }
 0x3ab   : > { %1357 = vrot.lane.b32.xlu1 %v1330_v58, %s4862_s21  ;;  %v1288_v40 = vmul.f32 %v3990_v49, %v1287_v60  ;;  %vm1321_vm9 = vweird.f32 %v5705_v24  ;;  %v1179_v1 = vadd.f32 %v5685_v20, %v1105_v3  ;;  %vm1307_vm11 = vmor %vm1305_vm4, %vm1306_vm2  ;;  %v1312_v35 = vor.u32 1.1754944e-38, %v1311_v5 }
 0x3ac   : > { %1342 = vrot.lane.b32.xlu0 %v5728_v61, %s4861_s12  ;;  %v5736_v62 = vadd.f32 %v5728_v61, %v5479_v22  ;;  %v1302_v50 = vsub.f32 1.0, %v1301_v47  ;;  %v1150_v22 = vadd.f32 %v5683_v16, %v1105_v3  ;;  %vm1310_vm15 = vcmp.eq.f32.partialorder %v1309_v6, 8.507059e+37 }
 0x3ad   : > { %v1289_v63 = vadd.f32 %v3990_v49, %v1288_v40  ;;  %vm1320_vm0 = vweird.f32 %v5693_v59  ;;  %v1324_v16 = vand.u32 2147483647, %v5693_v59  ;;  %v1327_v15 = vor.u32 1.1754944e-38, %v1326_v37 }
 0x3ae   : > { %v1303_v4 = vmul.f32 %v3992_v13, %v1302_v50  ;;  %v1208_v59 = vadd.f32 %v5681_v14, %v1105_v3  ;;  %vm6715_vm4 = vcmp.lt.s32.totalorder %v5219_v23, 4  ;;  %v4692_v52 = vmov 0  }
 0x3af   : > { %1338 = vrot.lane.b32.xlu2 %v1330_v58, %s4861_s12  ;;  %v1293_v7 = vsel %vm1292_vm3, %v3990_v49, %v1289_v63  ;;  %vm1322_vm3 = vmor %vm1320_vm0, %vm1321_vm9  ;;  %vm1325_vm2 = vcmp.eq.f32.partialorder %v1324_v16, 8.507059e+37  ;;  %v4696_v2 = vmov 0   ;;  %v4700_v5 = vmov 0  }
 0x3b0   : > { %v1304_v18 = vadd.f32 %v3992_v13, %v1303_v4  ;;  %v1298_v9 = vsel %vm1295_vm6, %v1297_v10, %v1293_v7  ;;  %v1323_v20 = vsel %vm1322_vm3, %v5705_v24, %v1319_v26  ;;  %vm6714_vm6 = vcmp.lt.s32.totalorder %v5219_v23, 124 }
 0x3b1   : > { %v1333_v43 = vmul.f32 %v1298_v9, %v1150_v22  ;;  %v1328_v45 = vsel %vm1325_vm2, %v1327_v15, %v1323_v20  ;;  %v4704_v63 = vmov 0   ;;  %v4708_v3 = vmov 0  }
 0x3b2   : > { %v1308_v39 = vsel %vm1307_vm11, %v3992_v13, %v1304_v18  ;;  %v1335_v41 = vmul.f32 %v1328_v45, %v1208_v59  ;;  %v4712_v4 = vmov 0   ;;  %v4716_v6 = vmov 0  }
 0x3b3   : > { %v1313_v25 = vsel %vm1310_vm15, %v1312_v35, %v1308_v39  ;;  %v4720_v22 = vmov 0   ;;  %v4724_v7 = vmov 0   ;;  %v4728_v10 = vmov 0  }
 0x3b4   : > { %1361 = vrot.lane.b32.xlu0 %v5728_v61, %s4862_s21  ;;  %v1334_v12 = vmul.f32 %v1313_v25, %v1179_v1  ;;  %v4732_v18 = vmov 0   ;;  %v4736_v26 = vmov 0   ;;  %v4863_v1 = vmov (%p5191_p3), 127  }
 0x3b5   : > { %3994 = vset.pattern.permute.xlu1 (%p5191_p3), %v4863_v1  ;;  %v4864_v35 = vmov (%p5191_p3), 0  }
 0x3b6   : > { %v5757_v44 = vadd.f32 %v1334_v12, %v5504_v55  ;;  %1344 = vrot.lane.b32.xlu1 %v1334_v12, %s4861_s12  ;;  %3993 = vset.pattern.permute.xlu0 (%p5191_p3), %v4864_v35 }
 0x3b7   : > { %1340 = vrot.lane.b32.xlu2 %v1333_v43, %s4861_s12 }
 0x3bc   : > { %1348 = vrot.lane.b32.xlu0 %v1335_v41, %s4861_s12 }
 0x3be   : > { %1363 = vrot.lane.b32.xlu1 %v1334_v12, %s4862_s21 }
 0x3bf   : > { %1359 = vrot.lane.b32.xlu2 %v1333_v43, %s4862_s21 }
 0x3c4   : > { %1367 = vrot.lane.b32.xlu0 %v1335_v41, %s4862_s21 }
 0x3c6   : > { %1408 = vperm.xlu1 (%p5191_p3), %3994, %v5728_v61  }
 0x3c7   : > { %1365 = vrot.lane.b32.xlu2 %v5718_v38, %s4862_s21 }
 0x3cc   : > { %1387 = vperm.xlu0 (%p5191_p3), %3993, %v5728_v61  }
 0x3ce   : > { %1412 = vperm.xlu1 (%p5191_p3), %3994, %v1334_v12  }
 0x3d4   : > { %1392 = vperm.xlu0 (%p5191_p3), %3993, %v1334_v12  }
 0x3dc   : > { %3995 = vset.pattern.permute.xlu0 (%p5191_p3), %v4863_v1 }
 0x401   : > { %v1347_v55 = vpop.permute.xlu2 %1346 }
 0x409   : > { %v1339_v24 = vpop.permute.xlu2 %1338 }
 0x40a   : > { %v5771_v42 = vsel %vm6715_vm4, %v1347_v55, %v1339_v24 }
 0x411   : > { %v1341_v14 = vpop.permute.xlu2 %1340 }
 0x419   : > { %v1360_v46 = vpop.permute.xlu2 %1359 }
 0x41d   : > { %v1358_v48 = vpop.permute.xlu1 %1357 }
 0x41e   : > { %v1343_v49 = vpop.permute.xlu0 %1342 }
 0x41f   : > { %v5776_v21 = vsel %vm6715_vm4, %v1343_v49, %v1347_v55   ;;  %v5780_v38 = vsel %vm6715_vm4, %v1339_v24, %v1343_v49 }
 0x420   : > { %v4729_v10 = vmov (%p5191_p3), %v5776_v21  }
 0x421   : > { %v1366_v36 = vpop.permute.xlu2 %1365 }
 0x422   : > { %v5784_v53 = vsel %vm6714_vm6, %v1366_v36, %v1358_v48 }
 0x426   : > { %v1362_v54 = vpop.permute.xlu0 %1361 }
 0x427   : > { %v5788_v11 = vsel %vm6714_vm6, %v1362_v54, %v1366_v36  ;;  %v5792_v56 = vsel %vm6714_vm6, %v1358_v48, %v1362_v54  }
 0x428   : > { %v1345_v8 = vpop.permute.xlu1 %1344  ;;  %v4713_v4 = vmov (%p5191_p3), %v5792_v56  }
 0x429   : > { %v5796_v51 = vsel %vm6715_vm4, %v1341_v14, %v1345_v8 }
 0x42e   : > { %v1349_v13 = vpop.permute.xlu0 %1348 }
 0x42f   : > { %v5800_v57 = vsel %vm6715_vm4, %v1345_v8, %v1349_v13   ;;  %v5804_v58 = vsel %vm6715_vm4, %v1349_v13, %v1341_v14 }
 0x430   : > { %v1364_v60 = vpop.permute.xlu1 %1363  ;;  %v4717_v6 = vmov (%p5191_p3), %v5800_v57  }
 0x431   : > { %v5808_v47 = vsel %vm6714_vm6, %v1360_v46, %v1364_v60  }
 0x432   : > { %v4701_v5 = vmov (%p5191_p3), %v5808_v47  }
 0x433   : > { %1378 = sbr.rel (!%p5191_p3) target bundleno = 1096 (0x448), region = 88 }
 0x436   : > { %v1368_v40 = vpop.permute.xlu0 %1367 }
 0x437   : > { %v5812_v19 = vsel %vm6714_vm6, %v1364_v60, %v1368_v40  ;;  %v5816_v50 = vsel %vm6714_vm6, %v1368_v40, %v1360_v46 }
 0x438   : > { %v1409_v9 = vpop.permute.xlu1 %1408 }
 0x439   : > { %v1416_v3 = vsel %vm5262_vm14, %v1409_v9, %v5788_v11   ;;  %v1417_v63 = vsel %vm5232_vm7, %v1409_v9, %v5784_v53  }
 0x43e   : > { %v1388_v37 = vpop.permute.xlu0 %1387 }
 0x43f   : > { %v1395_v26 = vsel %vm5222_vm1, %v1388_v37, %v5771_v42   ;;  %v1396_v18 = vsel %vm5244_vm10, %v1388_v37, %v5780_v38  }
 0x440   : > { %v1413_v61 = vpop.permute.xlu1 %1412 }
 0x441   : > { %v1419_v2 = vsel %vm5262_vm14, %v1413_v61, %v5812_v19   ;;  %v1420_v52 = vsel %vm5232_vm7, %v1413_v61, %v5816_v50  }
 0x446   : > { %v1393_v39 = vpop.permute.xlu0 %1392 }
 0x447   : > { %v1398_v7 = vsel %vm5222_vm1, %v1393_v39, %v5804_v58   ;;  %v1399_v22 = vsel %vm5244_vm10, %v1393_v39, %v5796_v51  }
 0x448 PF: > { %vm6812_vm9 = vcmp.ne.s32.totalorder %v5361_v17, 0  ;;  %3997 = vset.pattern.permute.xlu1 %v4852_v0  ;;  %s6818_s29 = sld [smem:[#allocation30_spill]]  ;;  %3996 = vset.pattern.permute.xlu0 %v4852_v0  ;;  %v4738_v26 = vphi %v4736_v26, %v1395_v26   ;;  %v4734_v18 = vphi %v4732_v18, %v1396_v18   ;;  %v4730_v10 = vphi %v4728_v10, %v4729_v10   ;;  %v4726_v7 = vphi %v4724_v7, %v1398_v7   ;;  %v4722_v22 = vphi %v4720_v22, %v1399_v22   ;;  %v4718_v6 = vphi %v4716_v6, %v4717_v6   ;;  %v4714_v4 = vphi %v4712_v4, %v4713_v4   ;;  %v4710_v3 = vphi %v4708_v3, %v1416_v3   ;;  %v4706_v63 = vphi %v4704_v63, %v1417_v63   ;;  %v4702_v5 = vphi %v4700_v5, %v4701_v5   ;;  %v4698_v2 = vphi %v4696_v2, %v1419_v2   ;;  %v4694_v52 = vphi %v4692_v52, %v1420_v52  }
 0x449   : > { %v3085_v16 = vsel %vm6812_vm9, %v5808_v47, %v4702_v5  ;;  %vm6813_vm11 = vmmov %vm6812_vm9  ;;  %s6824_s1 = sld [smem:[#allocation29_spill]] }
 0x44a   : > { %v3089_v25 = vsel %vm6813_vm11, %v5812_v19, %v4698_v2  ;;  %vm6814_vm15 = vmmov %vm6812_vm9  ;;  %1502 = vmatpush.msra.mxu1 %v3085_v16 }
 0x44b   : > { %v3093_v12 = vsel %vm6814_vm15, %v5816_v50, %v4694_v52  ;;  %vm6815_vm0 = vmmov %vm6812_vm9  ;;  %1531 = vmatpush.msra.mxu2 %v3089_v25 }
 0x44c   : > { %v3073_v43 = vsel %vm6815_vm0, %v5792_v56, %v4714_v4  ;;  %vm6816_vm3 = vmmov %vm6815_vm0  ;;  %1560 = vmatpush.msra.mxu3 %v3093_v12  ;;  %v3049_v24 = vsel %vm6815_vm0, %v5771_v42, %v4738_v26 }
 0x44d   : > { %v3077_v20 = vsel %vm6816_vm3, %v5788_v11, %v4710_v3  ;;  %vm6817_vm2 = vmmov %vm6815_vm0  ;;  %1503 = vmatpush.msra.mxu1 %v3073_v43 }
 0x44e   : > { %v3081_v15 = vsel %vm6817_vm2, %v5784_v53, %v4706_v63  ;;  %v2843_v45 = vld [vmem:[%s6818_s29 + $0x40] sm:$0xff]  ;;  %vm6819_vm9 = vmmov %vm6815_vm0  ;;  %1532 = vmatpush.msra.mxu2 %v3077_v20  ;;  %v2845_v42 = vld [vmem:[%s6818_s29 + $0x50] sm:$0xff] }
 0x44f   : > { %v3061_v59 = vsel %vm6819_vm9, %v5804_v58, %v4726_v7  ;;  %vm6820_vm11 = vmmov %vm6815_vm0  ;;  %1561 = vmatpush.msra.mxu3 %v3081_v15  ;;  %1460 = vperm.xlu1 %3997, %v2843_v45   ;;  %v2847_v49 = vld [vmem:[%s6824_s1 + $0x40] sm:$0xff]  ;;  %vm6825_vm9 = vcmask 261120   ;;  %v2844_v48 = vld [vmem:[%s6818_s29 + $0x48] sm:$0xff] }
 0x450   : > { %v3065_v41 = vsel %vm6820_vm11, %v5796_v51, %v4722_v22  ;;  %vm6821_vm15 = vmmov %vm6815_vm0  ;;  %1504 = vmatpush.msra.mxu1 %v3061_v59  ;;  %1470 = vperm.xlu0 %3996, %v2845_v42   ;;  %v2849_v36 = vld [vmem:[%s6824_s1 + $0x50] sm:$0xff]  ;;  %v2850_v53 = vld [vmem:[%s6824_s1 + $0x58] sm:$0xff] }
 0x451   : > { %v3069_v55 = vsel %vm6821_vm15, %v5800_v57, %v4718_v6  ;;  %vm6822_vm3 = vmmov %vm6815_vm0  ;;  %1533 = vmatpush.msra.mxu2 %v3065_v41 }
 0x452   : > { %v3053_v14 = vsel %vm6822_vm3, %v5780_v38, %v4734_v18  ;;  %vm6823_vm2 = vmmov %vm6815_vm0  ;;  %1562 = vmatpush.msra.mxu3 %v3069_v55  ;;  %1505 = vmatpush.msra.mxu1 %v3049_v24  ;;  %v2846_v38 = vld [vmem:[%s6818_s29 + $0x58] sm:$0xff] }
 0x453   : > { %v3057_v46 = vsel %vm6823_vm2, %v5776_v21, %v4730_v10  ;;  %1534 = vmatpush.msra.mxu2 %v3053_v14  ;;  %2851 = vmatmul.msk.f32.vlgmr.msra.gmra.mxu1 %vm6825_vm9, %v2847_v49  ;;  %vm6826_vm11 = vmmov %vm6825_vm9  ;;  %v2848_v21 = vld [vmem:[%s6824_s1 + $0x48] sm:$0xff] }
 0x454   : > { %1563 = vmatpush.msra.mxu3 %v3057_v46  ;;  %2855 = vmatmul.msk.f32.vlgmr.msra.gmra.mxu2 %vm6826_vm11, %v2847_v49  ;;  %vm6827_vm15 = vmmov %vm6825_vm9 }
 0x455   : > { %2859 = vmatmul.msk.f32.vlgmr.msra.gmra.mxu3 %vm6827_vm15, %v2847_v49  ;;  %vm6828_vm0 = vmmov %vm6825_vm9 }
 0x456   : > { %vm6829_vm3 = vmmov %vm6828_vm0 }
 0x457   : > { %1465 = vperm.xlu1 %3997, %v2844_v48   ;;  %vm6830_vm2 = vmmov %vm6828_vm0 }
 0x458   : > { %1475 = vperm.xlu0 %3996, %v2846_v38   ;;  %vm6831_vm9 = vmmov %vm6828_vm0 }
 0x459   : > { %vm6832_vm11 = vmmov %vm6828_vm0 }
 0x45a   : > { %vm6833_vm15 = vmmov %vm6828_vm0 }
 0x45b   : > { %2852 = vmatmul.msk.f32.gmra.mxu1 %vm6828_vm0, %v2848_v21 }
 0x45c   : > { %2856 = vmatmul.msk.f32.gmra.mxu2 %vm6829_vm3, %v2848_v21  ;;  %vm6834_vm3 = vmmov %vm6828_vm0 }
 0x45d   : > { %2860 = vmatmul.msk.f32.gmra.mxu3 %vm6830_vm2, %v2848_v21  ;;  %vm6835_vm2 = vmmov %vm6828_vm0 }
 0x463   : > { %2853 = vmatmul.msk.f32.gmra.mxu1 %vm6831_vm9, %v2849_v36 }
 0x464   : > { %2857 = vmatmul.msk.f32.gmra.mxu2 %vm6832_vm11, %v2849_v36 }
 0x465   : > { %2861 = vmatmul.msk.f32.gmra.mxu3 %vm6833_vm15, %v2849_v36 }
 0x46b   : > { %2854 = vmatmul.msk.f32.gmra.mxu1 %vm6828_vm0, %v2850_v53 }
 0x46c   : > { %2858 = vmatmul.msk.f32.gmra.mxu2 %vm6834_vm3, %v2850_v53 }
 0x46d   : > { %2862 = vmatmul.msk.f32.gmra.mxu3 %vm6835_vm2, %v2850_v53 }
 0x4c1   : > { %v1461_v41 = vpop.permute.xlu1 %1460 }
 0x4c2   : > { %v1471_v51 = vpop.permute.xlu0 %1470 }
 0x4ca   : > { %v1476_v50 = vpop.permute.xlu0 %1475 }
 0x4d0   : > { %v1507_v54 = vpop.f32.mrf.mxu1 }
 0x4d1   : > { %v1508_v49 = vadd.f32 %v1507_v54, %v1461_v41 }
 0x4d7   : > { %v1536_v11 = vpop.f32.mrf.mxu2 }
 0x4d8   : > { %v5924_v56 = vpop.f32.mrf.mxu3  ;;  %v5926_v8 = vpop.f32.mrf.mxu1  ;;  %v1537_v21 = vadd.f32 %v1536_v11, %v1461_v41 }
 0x4df   : > { %v5928_v13 = vpop.f32.mrf.mxu2 }
 0x4e0   : > { %v5930_v57 = vpop.f32.mrf.mxu3  ;;  %v1513_v58 = vpop.f32.mrf.mxu1 }
 0x4e1   : > { %v1514_v60 = vadd.f32 %v1513_v58, %v1471_v51 }
 0x4e3   : > { %v2863_v47 = vmul.f32 -1.442695, %v1514_v60 }
 0x4e5   : > { %3998 = vpow2.f32 %v2863_v47 }
 0x4e7   : > { %v1542_v40 = vpop.f32.mrf.mxu2 }
 0x4e8   : > { %v1571_v19 = vpop.f32.mrf.mxu3  ;;  %v1543_v52 = vadd.f32 %v1542_v40, %v1471_v51  ;;  %v1516_v5 = vpop.f32.mrf.mxu1 }
 0x4e9   : > { %v1572_v2 = vadd.f32 %v1571_v19, %v1471_v51  ;;  %v1517_v63 = vadd.f32 %v1516_v5, %v1476_v50 }
 0x4ea   : > { %v2864_v3 = vmul.f32 -1.442695, %v1543_v52 }
 0x4eb   : > { %v2865_v4 = vmul.f32 -1.442695, %v1572_v2  ;;  %v3999_v6 = vpop.eup %3998  ;;  %v2866_v22 = vmul.f32 -1.442695, %v1517_v63 }
 0x4ec   : > { %v1595_v7 = vadd.f32 1.0, %v3999_v6  ;;  %4000 = vpow2.f32 %v2864_v3 }
 0x4ed   : > { %4002 = vpow2.f32 %v2865_v4  ;;  %v1566_v4 = vadd.f32 %v5924_v56, %v1461_v41 }
 0x4ee   : > { %4004 = vrcp.f32 %v1595_v7  ;;  %v1610_v45 = vand.u32 2147483647, %v1595_v7  ;;  %v1612_v59 = vand.u32 2147483648, %v1595_v7  ;;  %vm1606_vm9 = vweird.f32 %v1595_v7 }
 0x4ef   : > { %4006 = vpow2.f32 %v2866_v22  ;;  %v1545_v10 = vpop.f32.mrf.mxu2 }
 0x4f0   : > { %v1574_v18 = vpop.f32.mrf.mxu3  ;;  %v1546_v26 = vadd.f32 %v1545_v10, %v1476_v50  ;;  %vm1611_vm0 = vcmp.eq.f32.partialorder %v1610_v45, 8.507059e+37  ;;  %v1613_v36 = vor.u32 1.1754944e-38, %v1612_v59 }
 0x4f1   : > { %v1575_v1 = vadd.f32 %v1574_v18, %v1476_v50 }
 0x4f2   : > { %v4001_v35 = vpop.eup %4000  ;;  %v2867_v9 = vmul.f32 -1.442695, %v1546_v26 }
 0x4f3   : > { %v4003_v37 = vpop.eup %4002  ;;  %v1596_v61 = vadd.f32 1.0, %v4001_v35  ;;  %v2868_v39 = vmul.f32 -1.442695, %v1575_v1 }
 0x4f4   : > { %v4005_v16 = vpop.eup %4004  ;;  %v5932_v25 = vadd.f32 1.0, %v4003_v37  ;;  %4008 = vpow2.f32 %v2867_v9 }
 0x4f5   : > { %v4007_v12 = vpop.eup %4006  ;;  %4010 = vrcp.f32 %v1596_v61  ;;  %v1602_v43 = vmul.f32 %v4005_v16, %v1595_v7  ;;  %vm1607_vm11 = vweird.f32 %v4005_v16  ;;  %v1625_v58 = vand.u32 2147483647, %v1596_v61 }
 0x4f6   : > { %4012 = vrcp.f32 %v5932_v25  ;;  %v5935_v20 = vadd.f32 1.0, %v4007_v12  ;;  %vm1608_vm15 = vmor %vm1606_vm9, %vm1607_vm11  ;;  %v1627_v50 = vand.u32 2147483648, %v1596_v61  ;;  %v1640_v2 = vand.u32 2147483647, %v5932_v25 }
 0x4f7   : > { %4014 = vpow2.f32 %v2868_v39  ;;  %v1603_v15 = vsub.f32 1.0, %v1602_v43  ;;  %v1642_v5 = vand.u32 2147483648, %v5932_v25  ;;  %vm1621_vm2 = vweird.f32 %v1596_v61 }
 0x4f8   : > { %4016 = vrcp.f32 %v5935_v20  ;;  %vm1626_vm11 = vcmp.eq.f32.partialorder %v1625_v58, 8.507059e+37  ;;  %v1628_v18 = vor.u32 1.1754944e-38, %v1627_v50  ;;  %vm1641_vm6 = vcmp.eq.f32.partialorder %v1640_v2, 8.507059e+37 }
 0x4f9   : > { %v1604_v55 = vmul.f32 %v4005_v16, %v1603_v15  ;;  %vm1651_vm4 = vweird.f32 %v5935_v20  ;;  %v1643_v35 = vor.u32 1.1754944e-38, %v1642_v5  ;;  %v1657_v39 = vand.u32 2147483648, %v5935_v20 }
 0x4fa   : > { %v4009_v24 = vpop.eup %4008  ;;  %v1655_v41 = vand.u32 2147483647, %v5935_v20 }
 0x4fb   : > { %v4011_v14 = vpop.eup %4010  ;;  %v5938_v46 = vadd.f32 1.0, %v4009_v24  ;;  %v1605_v42 = vadd.f32 %v4005_v16, %v1604_v55  ;;  %v1466_v24 = vpop.permute.xlu1 %1465 }
 0x4fc   : > { %v4013_v48 = vpop.eup %4012  ;;  %v1617_v38 = vmul.f32 %v4011_v14, %v1596_v61  ;;  %vm1622_vm3 = vweird.f32 %v4011_v14 }
 0x4fd   : > { %v4015_v53 = vpop.eup %4014  ;;  %4018 = vrcp.f32 %v5938_v46  ;;  %v1609_v51 = vsel %vm1608_vm15, %v4005_v16, %v1605_v42  ;;  %v1632_v60 = vmul.f32 %v4013_v48, %v5932_v25  ;;  %vm1637_vm9 = vweird.f32 %v4013_v48 }
 0x4fe   : > { %v5942_v47 = vpop.eup %4016  ;;  %v5944_v40 = vadd.f32 1.0, %v4015_v53  ;;  %v1614_v19 = vsel %vm1611_vm0, %v1613_v36, %v1609_v51  ;;  %v1618_v54 = vsub.f32 1.0, %v1617_v38  ;;  %vm1636_vm15 = vweird.f32 %v5932_v25  ;;  %vm1623_vm0 = vmor %vm1621_vm2, %vm1622_vm3 }
 0x4ff   : > { %v1691_v52 = vmul.f32 %v1614_v19, %v1508_v49  ;;  %v1633_v11 = vsub.f32 1.0, %v1632_v60  ;;  %v1647_v3 = vmul.f32 %v5942_v47, %v5935_v20  ;;  %vm1638_vm12 = vmor %vm1636_vm15, %vm1637_vm9  ;;  %vm1652_vm5 = vweird.f32 %v5942_v47 }
 0x500   : > { %4020 = vrcp.f32 %v5944_v40  ;;  %v1619_v63 = vmul.f32 %v4011_v14, %v1618_v54  ;;  %v1672_v59 = vand.u32 2147483648, %v5938_v46  ;;  %v1670_v42 = vand.u32 2147483647, %v5938_v46 }
 0x501   : > { %1717 = vrot.lane.b32.xlu1 %v1691_v52, %s4854_s8  ;;  %1699 = vrot.lane.b32.xlu2 %v1691_v52, %s4853_s4  ;;  %v1634_v6 = vmul.f32 %v4013_v48, %v1633_v11  ;;  %v1648_v7 = vsub.f32 1.0, %v1647_v3  ;;  %vm1666_vm3 = vweird.f32 %v5938_v46  ;;  %v1658_v36 = vor.u32 1.1754944e-38, %v1657_v39 }
 0x502   : > { %v1620_v22 = vadd.f32 %v4011_v14, %v1619_v63  ;;  %v1673_v53 = vor.u32 1.1754944e-38, %v1672_v59  ;;  %vm1656_vm9 = vcmp.eq.f32.partialorder %v1655_v41, 8.507059e+37  ;;  %v1511_v19 = vadd.f32 %v5926_v8, %v1466_v24 }
 0x503   : > { %v4019_v10 = vpop.eup %4018  ;;  %v1635_v26 = vadd.f32 %v4013_v48, %v1634_v6  ;;  %v1649_v9 = vmul.f32 %v5942_v47, %v1648_v7  ;;  %v4740_v41 = vmov 0  }
 0x504   : > { %v1662_v56 = vmul.f32 %v4019_v10, %v5938_v46  ;;  %v1624_v1 = vsel %vm1623_vm0, %v4011_v14, %v1620_v22 }
 0x505   : > { %v1629_v37 = vsel %vm1626_vm11, %v1628_v18, %v1624_v1  ;;  %v1639_v61 = vsel %vm1638_vm12, %v4013_v48, %v1635_v26  ;;  %v1650_v15 = vadd.f32 %v5942_v47, %v1649_v9  ;;  %vm1667_vm12 = vweird.f32 %v4019_v10 }
 0x506   : > { %v4021_v16 = vpop.eup %4020  ;;  %v5960_v25 = vmul.f32 %v1629_v37, %v1537_v21  ;;  %v1644_v12 = vsel %vm1641_vm6, %v1643_v35, %v1639_v61  ;;  %v1663_v43 = vsub.f32 1.0, %v1662_v56  ;;  %vm1653_vm6 = vmor %vm1651_vm4, %vm1652_vm5  ;;  %vm1671_vm11 = vcmp.eq.f32.partialorder %v1670_v42, 8.507059e+37 }
 0x507   : > { %v1693_v45 = vmul.f32 %v1644_v12, %v1566_v4  ;;  %v1677_v55 = vmul.f32 %v4021_v16, %v5944_v40  ;;  %v1654_v48 = vsel %vm1653_vm6, %v5942_v47, %v1650_v15  ;;  %vm1668_vm2 = vmor %vm1666_vm3, %vm1667_vm12  ;;  %vm1682_vm15 = vweird.f32 %v4021_v16 }
 0x508   : > { %1703 = vrot.lane.b32.xlu0 %v5960_v25, %s4853_s4  ;;  %v5970_v14 = vadd.f32 %v5960_v25, %v5736_v62  ;;  %v1664_v49 = vmul.f32 %v4019_v10, %v1663_v43  ;;  %v1540_v62 = vadd.f32 %v5928_v13, %v1466_v24  ;;  %v1659_v60 = vsel %vm1656_vm9, %v1658_v36, %v1654_v48 }
 0x509   : > { %1707 = vrot.lane.b32.xlu2 %v1693_v45, %s4853_s4  ;;  %v1678_v21 = vsub.f32 1.0, %v1677_v55  ;;  %v1687_v47 = vand.u32 2147483648, %v5944_v40  ;;  %vm1681_vm5 = vweird.f32 %v5944_v40  ;;  %v1685_v13 = vand.u32 2147483647, %v5944_v40 }
 0x50a   : > { %v1665_v38 = vadd.f32 %v4019_v10, %v1664_v49  ;;  %v1694_v46 = vmul.f32 %v1659_v60, %v1511_v19  ;;  %vm1683_vm4 = vmor %vm1681_vm5, %vm1682_vm15  ;;  %v1569_v40 = vadd.f32 %v5930_v57, %v1466_v24  ;;  %vm6836_vm12 = vcmp.lt.s32.totalorder %v5219_v23, 1 }
 0x50b   : > { %v1679_v51 = vmul.f32 %v4021_v16, %v1678_v21  ;;  %v1688_v11 = vor.u32 1.1754944e-38, %v1687_v47  ;;  %vm1686_vm0 = vcmp.eq.f32.partialorder %v1685_v13, 8.507059e+37  ;;  %vm6837_vm6 = vmmov %vm6836_vm12  ;;  %v4744_v55 = vmov 0  }
 0x50c   : > { %v1669_v58 = vsel %vm1668_vm2, %v4019_v10, %v1665_v38  ;;  %vm6838_vm3 = vmmov %vm6837_vm6  ;;  %vm6839_vm2 = vcmp.lt.s32.totalorder %v5219_v23, 127  ;;  %v4748_v24 = vmov 0   ;;  %v4752_v49 = vmov 0  }
 0x50d   : > { %v1674_v20 = vsel %vm1671_vm11, %v1673_v53, %v1669_v58  ;;  %v1680_v54 = vadd.f32 %v4021_v16, %v1679_v51  ;;  %vm6840_vm9 = vmmov %vm6839_vm2  ;;  %v4756_v42 = vmov 0   ;;  %v4760_v48 = vmov 0  }
 0x50e   : > { %v5983_v50 = vmul.f32 %v1674_v20, %v1540_v62  ;;  %vm6841_vm11 = vmmov %vm6839_vm2  ;;  %v4764_v21 = vmov 0   ;;  %v4768_v38 = vmov 0   ;;  %v4772_v36 = vmov 0  }
 0x50f   : > { %v1684_v8 = vsel %vm1683_vm4, %v4021_v16, %v1680_v54  ;;  %vm6842_vm15 = vmmov %vm6838_vm3  ;;  %v4776_v62 = vmov 0   ;;  %v4780_v53 = vmov 0   ;;  %v4784_v51 = vmov 0  }
 0x510   : > { %1721 = vrot.lane.b32.xlu0 %v5960_v25, %s4854_s8  ;;  %v5991_v52 = vadd.f32 %v5983_v50, %v5757_v44  ;;  %1705 = vrot.lane.b32.xlu1 %v5983_v50, %s4853_s4  ;;  %v1689_v2 = vsel %vm1686_vm0, %v1688_v11, %v1684_v8  ;;  %vm6843_vm5 = vmmov %vm6838_vm3  ;;  %v4865_v58 = vmov (%p5191_p3), 127   ;;  %v4866_v60 = vmov (%p5191_p3), 0  }
 0x511   : > { %1701 = vrot.lane.b32.xlu2 %v1694_v46, %s4853_s4  ;;  %v1696_v5 = vmul.f32 %v1689_v2, %v1569_v40  ;;  %vm6844_vm4 = vmmov %vm6838_vm3  ;;  %4023 = vset.pattern.permute.xlu1 (%p5191_p3), %v4865_v58 }
 0x512   : > { %vm6845_vm0 = vmmov %vm6839_vm2  ;;  %4022 = vset.pattern.permute.xlu0 (%p5191_p3), %v4866_v60 }
 0x518   : > { %1709 = vrot.lane.b32.xlu0 %v1696_v5, %s4853_s4  ;;  %1723 = vrot.lane.b32.xlu1 %v5983_v50, %s4854_s8 }
 0x519   : > { %1719 = vrot.lane.b32.xlu2 %v1694_v46, %s4854_s8 }
 0x520   : > { %1727 = vrot.lane.b32.xlu0 %v1696_v5, %s4854_s8  ;;  %1767 = vperm.xlu1 (%p5191_p3), %4023, %v5960_v25  }
 0x521   : > { %1725 = vrot.lane.b32.xlu2 %v1693_v45, %s4854_s8 }
 0x528   : > { %1746 = vperm.xlu0 (%p5191_p3), %4022, %v5960_v25   ;;  %1771 = vperm.xlu1 (%p5191_p3), %4023, %v5983_v50  }
 0x530   : > { %1751 = vperm.xlu0 (%p5191_p3), %4022, %v5983_v50  }
 0x538   : > { %4024 = vset.pattern.permute.xlu0 (%p5191_p3), %v4865_v58 }
 0x55b   : > { %v1700_v44 = vpop.permute.xlu2 %1699 }
 0x563   : > { %v1708_v63 = vpop.permute.xlu2 %1707 }
 0x564   : > { %v6005_v3 = vsel %vm6836_vm12, %v1708_v63, %v1700_v44  ;;  %vm6846_vm12 = vmmov %vm6845_vm0 }
 0x56b   : > { %v1702_v4 = vpop.permute.xlu2 %1701 }
 0x573   : > { %v1720_v57 = vpop.permute.xlu2 %1719  ;;  %v1718_v6 = vpop.permute.xlu1 %1717 }
 0x57a   : > { %v1704_v22 = vpop.permute.xlu0 %1703 }
 0x57b   : > { %v6009_v7 = vsel %vm6837_vm6, %v1704_v22, %v1708_v63   ;;  %v6013_v10 = vsel %vm6838_vm3, %v1700_v44, %v1704_v22  ;;  %v1726_v18 = vpop.permute.xlu2 %1725  ;;  %vm6847_vm6 = vmmov %vm6845_vm0  ;;  %vm6848_vm3 = vnez (%p5191_p3), %v6774_v32 }
 0x57c   : > { %v6017_v26 = vsel %vm6839_vm2, %v1726_v18, %v1718_v6  ;;  %vm6849_vm2 = vnez (%p5191_p3), %v6766_v28  ;;  %v4777_v62 = vmov (%p5191_p3), %v6009_v7  }
 0x582   : > { %v1722_v56 = vpop.permute.xlu0 %1721  ;;  %v1706_v1 = vpop.permute.xlu1 %1705 }
 0x583   : > { %v6021_v35 = vsel %vm6840_vm9, %v1722_v56, %v1726_v18  ;;  %v6025_v9 = vsel %vm6841_vm11, %v1718_v6, %v1722_v56   ;;  %v6029_v37 = vsel %vm6842_vm15, %v1702_v4, %v1706_v1 }
 0x584   : > { %v4761_v48 = vmov (%p5191_p3), %v6025_v9  }
 0x58a   : > { %v1710_v61 = vpop.permute.xlu0 %1709  ;;  %v1724_v39 = vpop.permute.xlu1 %1723 }
 0x58b   : > { %v6033_v16 = vsel %vm6843_vm5, %v1706_v1, %v1710_v61   ;;  %v6037_v12 = vsel %vm6844_vm4, %v1710_v61, %v1702_v4  ;;  %v6041_v43 = vsel %vm6845_vm0, %v1720_v57, %v1724_v39  }
 0x58c   : > { %v4749_v24 = vmov (%p5191_p3), %v6041_v43   ;;  %v4765_v21 = vmov (%p5191_p3), %v6033_v16  }
 0x58f   : > { %1737 = sbr.rel (!%p5191_p3) target bundleno = 1444 (0x5a4), region = 96 }
 0x592   : > { %v1728_v15 = vpop.permute.xlu0 %1727  ;;  %v1768_v20 = vpop.permute.xlu1 (%p5191_p3), %1767 }
 0x593   : > { %v6045_v45 = vsel %vm6846_vm12, %v1724_v39, %v1728_v15  ;;  %v6049_v59 = vsel %vm6847_vm6, %v1728_v15, %v1720_v57  ;;  %v1775_v42 = vsel (%p5191_p3), %vm6848_vm3, %v1768_v20, %v6021_v35   ;;  %v1776_v49 = vsel (%p5191_p3), %vm5232_vm7, %v1768_v20, %v6017_v26  }
 0x59a   : > { %v1747_v19 = vpop.permute.xlu0 %1746  ;;  %v1772_v25 = vpop.permute.xlu1 %1771 }
 0x59b   : > { %v1754_v51 = vsel %vm5222_vm1, %v1747_v19, %v6005_v3   ;;  %v1755_v53 = vsel %vm6849_vm2, %v1747_v19, %v6013_v10   ;;  %v1778_v55 = vsel %vm6848_vm3, %v1772_v25, %v6045_v45   ;;  %v1779_v41 = vsel %vm5232_vm7, %v1772_v25, %v6049_v59  }
 0x5a2   : > { %v1752_v54 = vpop.permute.xlu0 %1751 }
 0x5a3   : > { %v1757_v36 = vsel %vm5222_vm1, %v1752_v54, %v6037_v12   ;;  %v1758_v38 = vsel %vm6849_vm2, %v1752_v54, %v6029_v37  }
 0x5a4 PF: > { %vm6850_vm9 = vcmp.ne.s32.totalorder %v5361_v17, 0  ;;  %4026 = vset.pattern.permute.xlu1 %v4852_v0  ;;  %s6856_s29 = sld [smem:[#allocation30_spill]]  ;;  %4025 = vset.pattern.permute.xlu0 %v4852_v0  ;;  %v4786_v51 = vphi %v4784_v51, %v1754_v51   ;;  %v4782_v53 = vphi %v4780_v53, %v1755_v53   ;;  %v4778_v62 = vphi %v4776_v62, %v4777_v62   ;;  %v4774_v36 = vphi %v4772_v36, %v1757_v36   ;;  %v4770_v38 = vphi %v4768_v38, %v1758_v38   ;;  %v4766_v21 = vphi %v4764_v21, %v4765_v21   ;;  %v4762_v48 = vphi %v4760_v48, %v4761_v48   ;;  %v4758_v42 = vphi %v4756_v42, %v1775_v42   ;;  %v4754_v49 = vphi %v4752_v49, %v1776_v49   ;;  %v4750_v24 = vphi %v4748_v24, %v4749_v24   ;;  %v4746_v55 = vphi %v4744_v55, %v1778_v55   ;;  %v4742_v41 = vphi %v4740_v41, %v1779_v41  }
 0x5a5   : > { %v3134_v28 = vsel %vm6850_vm9, %v6041_v43, %v4750_v24  ;;  %vm6851_vm11 = vmmov %vm6850_vm9  ;;  %s6863_s9 = sld [smem:[#allocation29_spill]] }
 0x5a6   : > { %v3138_v32 = vsel %vm6851_vm11, %v6045_v45, %v4746_v55  ;;  %vm6852_vm15 = vmmov %vm6850_vm9  ;;  %1861 = vmatpush.msrb.mxu0 %v3134_v28 }
 0x5a7   : > { %v3142_v47 = vsel %vm6852_vm15, %v6049_v59, %v4742_v41  ;;  %vm6853_vm5 = vmmov %vm6850_vm9  ;;  %1890 = vmatpush.msrb.mxu1 %v3138_v32  ;;  %vm6864_vm15 = vcmask 261120  }
 0x5a8   : > { %v3122_v50 = vsel %vm6853_vm5, %v6025_v9, %v4762_v48  ;;  %vm6854_vm4 = vmmov %vm6853_vm5  ;;  %1919 = vmatpush.msrb.mxu2 %v3142_v47 }
 0x5a9   : > { %v3126_v13 = vsel %vm6854_vm4, %v6021_v35, %v4758_v42  ;;  %vm6855_vm0 = vmmov %vm6854_vm4  ;;  %1862 = vmatpush.msrb.mxu0 %v3122_v50 }
 0x5aa   : > { %v3130_v46 = vsel %vm6855_vm0, %v6017_v26, %v4754_v49  ;;  %v2869_v8 = vld [vmem:[%s6856_s29 + $0x60] sm:$0xff]  ;;  %vm6857_vm12 = vmmov %vm6855_vm0  ;;  %1891 = vmatpush.msrb.mxu1 %v3126_v13  ;;  %v2870_v57 = vld [vmem:[%s6856_s29 + $0x68] sm:$0xff] }
 0x5ab   : > { %v3110_v11 = vsel %vm6857_vm12, %v6037_v12, %v4774_v36  ;;  %vm6858_vm6 = vmmov %vm6855_vm0  ;;  %1920 = vmatpush.msrb.mxu2 %v3130_v46  ;;  %1819 = vperm.xlu1 %4026, %v2869_v8   ;;  %v2873_v4 = vld [vmem:[%s6863_s9 + $0x60] sm:$0xff]  ;;  %v2874_v6 = vld [vmem:[%s6863_s9 + $0x68] sm:$0xff] }
 0x5ac   : > { %v3114_v2 = vsel %vm6858_vm6, %v6029_v37, %v4770_v38  ;;  %vm6859_vm3 = vmmov %vm6855_vm0  ;;  %1863 = vmatpush.msrb.mxu0 %v3110_v11  ;;  %v2872_v22 = vld [vmem:[%s6856_s29 + $0x78] sm:$0xff] }
 0x5ad   : > { %v3118_v40 = vsel %vm6859_vm3, %v6033_v16, %v4766_v21  ;;  %vm6860_vm2 = vmmov %vm6855_vm0  ;;  %1892 = vmatpush.msrb.mxu1 %v3114_v2 }
 0x5ae   : > { %v3098_v5 = vsel %vm6860_vm2, %v6005_v3, %v4786_v51  ;;  %vm6861_vm9 = vmmov %vm6855_vm0  ;;  %1921 = vmatpush.msrb.mxu2 %v3118_v40  ;;  %v2871_v3 = vld [vmem:[%s6856_s29 + $0x70] sm:$0xff] }
 0x5af   : > { %v3102_v44 = vsel %vm6861_vm9, %v6013_v10, %v4782_v53  ;;  %vm6862_vm11 = vmmov %vm6855_vm0  ;;  %1864 = vmatpush.msrb.mxu0 %v3098_v5  ;;  %1829 = vperm.xlu0 %4025, %v2871_v3   ;;  %v2876_v10 = vld [vmem:[%s6863_s9 + $0x78] sm:$0xff] }
 0x5b0   : > { %v3106_v63 = vsel %vm6862_vm11, %v6009_v7, %v4778_v62  ;;  %1893 = vmatpush.msrb.mxu1 %v3102_v44  ;;  %2877 = vmatmul.msk.f32.vlgmr.msrb.gmra.mxu0 %vm6864_vm15, %v2873_v4  ;;  %vm6865_vm5 = vmmov %vm6864_vm15  ;;  %v2875_v7 = vld [vmem:[%s6863_s9 + $0x70] sm:$0xff] }
 0x5b1   : > { %1922 = vmatpush.msrb.mxu2 %v3106_v63  ;;  %2881 = vmatmul.msk.f32.vlgmr.msrb.gmra.mxu1 %vm6865_vm5, %v2873_v4  ;;  %vm6866_vm4 = vmmov %vm6865_vm5 }
 0x5b2   : > { %2885 = vmatmul.msk.f32.vlgmr.msrb.gmra.mxu2 %vm6866_vm4, %v2873_v4  ;;  %vm6867_vm0 = vmmov %vm6866_vm4 }
 0x5b3   : > { %1824 = vperm.xlu1 %4026, %v2870_v57   ;;  %vm6868_vm12 = vmmov %vm6867_vm0 }
 0x5b4   : > { %vm6869_vm6 = vmmov %vm6867_vm0 }
 0x5b5   : > { %vm6870_vm3 = vmmov %vm6867_vm0 }
 0x5b6   : > { %vm6871_vm2 = vmmov %vm6867_vm0 }
 0x5b7   : > { %1834 = vperm.xlu0 %4025, %v2872_v22   ;;  %vm6872_vm9 = vmmov %vm6867_vm0 }
 0x5b8   : > { %2878 = vmatmul.msk.f32.gmra.mxu0 %vm6867_vm0, %v2874_v6  ;;  %vm6873_vm11 = vmmov %vm6867_vm0 }
 0x5b9   : > { %2882 = vmatmul.msk.f32.gmra.mxu1 %vm6868_vm12, %v2874_v6  ;;  %vm6874_vm15 = vmmov %vm6867_vm0 }
 0x5ba   : > { %2886 = vmatmul.msk.f32.gmra.mxu2 %vm6869_vm6, %v2874_v6  ;;  %vm6875_vm5 = vmmov %vm6867_vm0 }
 0x5c0   : > { %2879 = vmatmul.msk.f32.gmra.mxu0 %vm6870_vm3, %v2875_v7 }
 0x5c1   : > { %2883 = vmatmul.msk.f32.gmra.mxu1 %vm6871_vm2, %v2875_v7 }
 0x5c2   : > { %2887 = vmatmul.msk.f32.gmra.mxu2 %vm6872_vm9, %v2875_v7 }
 0x5c8   : > { %2880 = vmatmul.msk.f32.gmra.mxu0 %vm6873_vm11, %v2876_v10 }
 0x5c9   : > { %2884 = vmatmul.msk.f32.gmra.mxu1 %vm6874_vm15, %v2876_v10 }
 0x5ca   : > { %2888 = vmatmul.msk.f32.gmra.mxu2 %vm6875_vm5, %v2876_v10 }
 0x61d   : > { %v1820_v32 = vpop.permute.xlu1 %1819 }
 0x621   : > { %v1830_v9 = vpop.permute.xlu0 %1829 }
 0x629   : > { %v1835_v59 = vpop.permute.xlu0 %1834 }
 0x62d   : > { %v1866_v18 = vpop.f32.mrf.mxu0 }
 0x62e   : > { %v1895_v26 = vpop.f32.mrf.mxu1  ;;  %v1867_v11 = vadd.f32 %v1866_v18, %v1820_v32 }
 0x62f   : > { %v1896_v22 = vadd.f32 %v1895_v26, %v1820_v32 }
 0x635   : > { %v1924_v56 = vpop.f32.mrf.mxu2  ;;  %v6159_v1 = vpop.f32.mrf.mxu0 }
 0x636   : > { %v6161_v35 = vpop.f32.mrf.mxu1  ;;  %v6174_v7 = vadd.f32 %v1924_v56, %v1820_v32 }
 0x63d   : > { %v6163_v37 = vpop.f32.mrf.mxu2  ;;  %v1872_v61 = vpop.f32.mrf.mxu0 }
 0x63e   : > { %v1873_v39 = vadd.f32 %v1872_v61, %v1830_v9  ;;  %v1901_v16 = vpop.f32.mrf.mxu1 }
 0x63f   : > { %v1902_v12 = vadd.f32 %v1901_v16, %v1830_v9 }
 0x640   : > { %v2889_v43 = vmul.f32 -1.442695, %v1873_v39 }
 0x641   : > { %v2890_v15 = vmul.f32 -1.442695, %v1902_v12 }
 0x642   : > { %4027 = vpow2.f32 %v2889_v43 }
 0x643   : > { %4029 = vpow2.f32 %v2890_v15  ;;  %v6182_v15 = vpop.permute.xlu1 %1824 }
 0x645   : > { %v1930_v45 = vpop.f32.mrf.mxu2  ;;  %v1875_v55 = vpop.f32.mrf.mxu0 }
 0x646   : > { %v1931_v41 = vadd.f32 %v1930_v45, %v1830_v9  ;;  %v1876_v24 = vadd.f32 %v1875_v55, %v1835_v59  ;;  %v1904_v49 = vpop.f32.mrf.mxu1 }
 0x647   : > { %v1905_v48 = vadd.f32 %v1904_v49, %v1835_v59 }
 0x648   : > { %v2891_v42 = vmul.f32 -1.442695, %v1931_v41  ;;  %v4028_v21 = vpop.eup %4027  ;;  %v2892_v38 = vmul.f32 -1.442695, %v1876_v24 }
 0x649   : > { %v4030_v36 = vpop.eup %4029  ;;  %v1954_v62 = vadd.f32 1.0, %v4028_v21  ;;  %v2893_v53 = vmul.f32 -1.442695, %v1905_v48 }
 0x64a   : > { %4031 = vpow2.f32 %v2891_v42  ;;  %v1955_v51 = vadd.f32 1.0, %v4030_v36 }
 0x64b   : > { %4033 = vpow2.f32 %v2892_v38  ;;  %v1969_v63 = vand.u32 2147483647, %v1954_v62  ;;  %v1971_v4 = vand.u32 2147483648, %v1954_v62  ;;  %vm1965_vm6 = vweird.f32 %v1954_v62 }
 0x64c   : > { %4035 = vrcp.f32 %v1954_v62  ;;  %v1984_v44 = vand.u32 2147483647, %v1955_v51  ;;  %v1986_v3 = vand.u32 2147483648, %v1955_v51  ;;  %vm1980_vm12 = vweird.f32 %v1955_v51 }
 0x64d   : > { %4037 = vrcp.f32 %v1955_v51  ;;  %v1933_v58 = vpop.f32.mrf.mxu2  ;;  %vm1970_vm2 = vcmp.eq.f32.partialorder %v1969_v63, 8.507059e+37  ;;  %v1972_v12 = vor.u32 1.1754944e-38, %v1971_v4 }
 0x64e   : > { %4039 = vpow2.f32 %v2893_v53  ;;  %v1934_v60 = vadd.f32 %v1933_v58, %v1835_v59  ;;  %vm1985_vm11 = vcmp.eq.f32.partialorder %v1984_v44, 8.507059e+37  ;;  %v1987_v26 = vor.u32 1.1754944e-38, %v1986_v3 }
 0x64f   : > { %v1899_v53 = vadd.f32 %v6161_v35, %v6182_v15 }
 0x650   : > { %v4032_v20 = vpop.eup %4031  ;;  %v2894_v19 = vmul.f32 -1.442695, %v1934_v60 }
 0x651   : > { %v4034_v25 = vpop.eup %4033  ;;  %v6165_v54 = vadd.f32 1.0, %v4032_v20 }
 0x652   : > { %v4036_v28 = vpop.eup %4035  ;;  %v6167_v47 = vadd.f32 1.0, %v4034_v25  ;;  %4041 = vpow2.f32 %v2894_v19 }
 0x653   : > { %v4038_v50 = vpop.eup %4037  ;;  %4043 = vrcp.f32 %v6165_v54  ;;  %v1961_v13 = vmul.f32 %v4036_v28, %v1954_v62  ;;  %vm1966_vm4 = vweird.f32 %v4036_v28  ;;  %v1999_v55 = vand.u32 2147483647, %v6165_v54 }
 0x654   : > { %v4040_v46 = vpop.eup %4039  ;;  %v1976_v8 = vmul.f32 %v4038_v50, %v1955_v51  ;;  %4045 = vrcp.f32 %v6167_v47  ;;  %vm1981_vm0 = vweird.f32 %v4038_v50  ;;  %vm1967_vm3 = vmor %vm1965_vm6, %vm1966_vm4  ;;  %v2001_v48 = vand.u32 2147483648, %v6165_v54 }
 0x655   : > { %v6171_v2 = vadd.f32 1.0, %v4040_v46  ;;  %v1962_v40 = vsub.f32 1.0, %v1961_v13  ;;  %vm1982_vm9 = vmor %vm1980_vm12, %vm1981_vm0  ;;  %vm1995_vm5 = vweird.f32 %v6165_v54  ;;  %vm2010_vm4 = vweird.f32 %v6167_v47 }
 0x656   : > { %v1977_v5 = vsub.f32 1.0, %v1976_v8  ;;  %vm2000_vm0 = vcmp.eq.f32.partialorder %v1999_v55, 8.507059e+37  ;;  %v2014_v8 = vand.u32 2147483647, %v6167_v47 }
 0x657   : > { %4047 = vrcp.f32 %v6171_v2  ;;  %v1963_v57 = vmul.f32 %v4036_v28, %v1962_v40  ;;  %v2029_v19 = vand.u32 2147483647, %v6171_v2  ;;  %v2031_v25 = vand.u32 2147483648, %v6171_v2 }
 0x658   : > { %v4042_v6 = vpop.eup %4041  ;;  %v1978_v10 = vmul.f32 %v4038_v50, %v1977_v5  ;;  %v2016_v5 = vand.u32 2147483648, %v6167_v47 }
 0x659   : > { %v4044_v9 = vpop.eup %4043  ;;  %v6176_v18 = vadd.f32 1.0, %v4042_v6  ;;  %v1964_v61 = vadd.f32 %v4036_v28, %v1963_v57  ;;  %v2032_v44 = vor.u32 1.1754944e-38, %v2031_v25 }
 0x65a   : > { %v6178_v39 = vpop.eup %4045  ;;  %v1979_v16 = vadd.f32 %v4038_v50, %v1978_v10  ;;  %v1991_v43 = vmul.f32 %v4044_v9, %v6165_v54  ;;  %vm1996_vm15 = vweird.f32 %v4044_v9  ;;  %v2002_v54 = vor.u32 1.1754944e-38, %v2001_v48 }
 0x65b   : > { %4049 = vrcp.f32 %v6176_v18  ;;  %v1968_v56 = vsel %vm1967_vm3, %v4036_v28, %v1964_v61  ;;  %v2006_v21 = vmul.f32 %v6178_v39, %v6167_v47  ;;  %vm1997_vm12 = vmor %vm1995_vm5, %vm1996_vm15  ;;  %vm2011_vm3 = vweird.f32 %v6178_v39 }
 0x65c   : > { %v1983_v45 = vsel %vm1982_vm9, %v4038_v50, %v1979_v16  ;;  %v1973_v59 = vsel %vm1970_vm2, %v1972_v12, %v1968_v56  ;;  %v1992_v41 = vsub.f32 1.0, %v1991_v43  ;;  %vm2025_vm2 = vweird.f32 %v6171_v2  ;;  %vm6220_vm5 = vmor %vm2010_vm4, %vm2011_vm3 }
 0x65d   : > { %v4048_v24 = vpop.eup %4047  ;;  %v1988_v49 = vsel %vm1985_vm11, %v1987_v26, %v1983_v45  ;;  %v2050_v42 = vmul.f32 %v1973_v59, %v1867_v11  ;;  %v2007_v51 = vsub.f32 1.0, %v2006_v21  ;;  %vm2030_vm11 = vcmp.eq.f32.partialorder %v2029_v19, 8.507059e+37 }
 0x65e   : > { %v2021_v38 = vmul.f32 %v4048_v24, %v6171_v2  ;;  %v6189_v36 = vmul.f32 %v1988_v49, %v1896_v22  ;;  %v1993_v62 = vmul.f32 %v4044_v9, %v1992_v41  ;;  %vm2026_vm6 = vweird.f32 %v4048_v24 }
 0x65f   : > { %2076 = vrot.lane.b32.xlu1 %v2050_v42, %s4858_s26  ;;  %2058 = vrot.lane.b32.xlu2 %v2050_v42, %s4857_s27  ;;  %v2008_v28 = vmul.f32 %v6178_v39, %v2007_v51  ;;  %vm2027_vm9 = vmor %vm2025_vm2, %vm2026_vm6  ;;  %v2046_v4 = vand.u32 2147483648, %v6176_v18  ;;  %v2044_v6 = vand.u32 2147483647, %v6176_v18  ;;  %v2017_v47 = vor.u32 1.1754944e-38, %v2016_v5 }
 0x660   : > { %2062 = vrot.lane.b32.xlu0 %v6189_v36, %s4857_s27  ;;  %v6201_v58 = vadd.f32 %v6189_v36, %v5970_v14  ;;  %v2022_v60 = vsub.f32 1.0, %v2021_v38  ;;  %v1994_v20 = vadd.f32 %v4044_v9, %v1993_v62  ;;  %v1870_v43 = vadd.f32 %v6159_v1, %v6182_v15 }
 0x661   : > { %v4050_v35 = vpop.eup %4049  ;;  %v2009_v46 = vadd.f32 %v6178_v39, %v2008_v28  ;;  %v2047_v61 = vor.u32 1.1754944e-38, %v2046_v4  ;;  %vm2045_vm6 = vcmp.eq.f32.partialorder %v2044_v6, 8.507059e+37  ;;  %vm6878_vm3 = vcmp.lt.s32.totalorder %v5219_v23, 2 }
 0x662   : > { %v2023_v32 = vmul.f32 %v4048_v24, %v2022_v60  ;;  %v1998_v50 = vsel %vm1997_vm12, %v4044_v9, %v1994_v20  ;;  %v2036_v13 = vmul.f32 %v4050_v35, %v6176_v18  ;;  %vm2041_vm15 = vweird.f32 %v4050_v35  ;;  %vm6879_vm2 = vmmov %vm6878_vm3 }
 0x663   : > { %v2003_v14 = vsel %vm2000_vm0, %v2002_v54, %v1998_v50  ;;  %vm2040_vm0 = vweird.f32 %v6176_v18  ;;  %vm2015_vm12 = vcmp.eq.f32.partialorder %v2014_v8, 8.507059e+37  ;;  %v1928_v18 = vadd.f32 %v6163_v37, %v6182_v15 }
 0x664   : > { %v2024_v11 = vadd.f32 %v4048_v24, %v2023_v32  ;;  %v2037_v40 = vsub.f32 1.0, %v2036_v13  ;;  %v2052_v63 = vmul.f32 %v2003_v14, %v6174_v7  ;;  %v2013_v7 = vsel %vm6220_vm5, %v6178_v39, %v2009_v46  ;;  %vm2042_vm4 = vmor %vm2040_vm0, %vm2041_vm15 }
 0x665   : > { %v2018_v12 = vsel %vm2015_vm12, %v2017_v47, %v2013_v7  ;;  %vm6884_vm0 = vmmov %vm6879_vm2  ;;  %v4788_v50 = vmov 0   ;;  %v4792_v13 = vmov 0   ;;  %v4796_v14 = vmov 0  }
 0x666   : > { %v2028_v3 = vsel %vm2027_vm9, %v4048_v24, %v2024_v11  ;;  %v2038_v57 = vmul.f32 %v4050_v35, %v2037_v40  ;;  %v2053_v56 = vmul.f32 %v2018_v12, %v1870_v43  ;;  %vm6880_vm9 = vmmov %vm6879_vm2  ;;  %v4800_v46 = vmov 0  }
 0x667   : > { %v2033_v22 = vsel %vm2030_vm11, %v2032_v44, %v2028_v3  ;;  %2066 = vrot.lane.b32.xlu2 %v2052_v63, %s4857_s27  ;;  %vm6881_vm11 = vcmp.lt.s32.totalorder %v5219_v23, 126  ;;  %vm6886_vm12 = vmmov %vm6884_vm0  ;;  %v4804_v8 = vmov 0   ;;  %v4808_v11 = vmov 0  }
 0x668   : > { %2080 = vrot.lane.b32.xlu0 %v6189_v36, %s4858_s26  ;;  %v6230_v10 = vmul.f32 %v2033_v22, %v1899_v53  ;;  %v2039_v9 = vadd.f32 %v4050_v35, %v2038_v57  ;;  %vm6882_vm15 = vmmov %vm6881_vm11  ;;  %v4812_v40 = vmov 0   ;;  %v4816_v5 = vmov 0  }
 0x669   : > { %vm6883_vm5 = vmmov %vm6881_vm11  ;;  %v4820_v44 = vmov 0   ;;  %v4828_v4 = vmov 0   ;;  %v4832_v3 = vmov 0   ;;  %v4867_v57 = vmov (%p5191_p3), 127  }
 0x66a   : > { %v6235_v16 = vadd.f32 %v6230_v10, %v5991_v52  ;;  %2064 = vrot.lane.b32.xlu1 %v6230_v10, %s4857_s27  ;;  %v2043_v39 = vsel %vm2042_vm4, %v4050_v35, %v2039_v9  ;;  %vm6885_vm4 = vmmov %vm6884_vm0  ;;  %v4868_v6 = vmov (%p5191_p3), 0  }
 0x66b   : > { %v2048_v26 = vsel %vm2045_vm6, %v2047_v61, %v2043_v39  ;;  %vm6887_vm6 = vmmov %vm6883_vm5  ;;  %4052 = vset.pattern.permute.xlu1 (%p5191_p3), %v4867_v57  ;;  %4051 = vset.pattern.permute.xlu0 (%p5191_p3), %v4868_v6 }
 0x66c   : > { %v2055_v45 = vmul.f32 %v2048_v26, %v1928_v18 }
 0x66f   : > { %2060 = vrot.lane.b32.xlu2 %v2053_v56, %s4857_s27 }
 0x670   : > { %2068 = vrot.lane.b32.xlu0 %v2055_v45, %s4857_s27 }
 0x672   : > { %2082 = vrot.lane.b32.xlu1 %v6230_v10, %s4858_s26 }
 0x677   : > { %2078 = vrot.lane.b32.xlu2 %v2053_v56, %s4858_s26 }
 0x678   : > { %2086 = vrot.lane.b32.xlu0 %v2055_v45, %s4858_s26 }
 0x67a   : > { %2126 = vperm.xlu1 (%p5191_p3), %4052, %v6189_v36  }
 0x67f   : > { %2084 = vrot.lane.b32.xlu2 %v2052_v63, %s4858_s26  ;;  %v4824_v63 = vmov 0  }
 0x680   : > { %2105 = vperm.xlu0 (%p5191_p3), %4051, %v6189_v36  }
 0x682   : > { %2130 = vperm.xlu1 (%p5191_p3), %4052, %v6230_v10  }
 0x688   : > { %2110 = vperm.xlu0 (%p5191_p3), %4051, %v6230_v10  }
 0x690   : > { %4053 = vset.pattern.permute.xlu0 (%p5191_p3), %v4867_v57 }
 0x6b9   : > { %v2059_v52 = vpop.permute.xlu2 %2058 }
 0x6c1   : > { %v2067_v1 = vpop.permute.xlu2 %2066 }
 0x6c2   : > { %v6252_v37 = vsel %vm6878_vm3, %v2067_v1, %v2059_v52  ;;  %vm6888_vm3 = vmmov %vm6883_vm5 }
 0x6c9   : > { %v2061_v15 = vpop.permute.xlu2 %2060 }
 0x6d1   : > { %v2079_v59 = vpop.permute.xlu2 %2078  ;;  %v2077_v55 = vpop.permute.xlu1 %2076 }
 0x6d2   : > { %v2063_v41 = vpop.permute.xlu0 %2062 }
 0x6d3   : > { %v6256_v24 = vsel %vm6879_vm2, %v2063_v41, %v2067_v1   ;;  %v6260_v49 = vsel %vm6880_vm9, %v2059_v52, %v2063_v41  ;;  %vm6889_vm2 = vmmov %vm6888_vm3 }
 0x6d4   : > { %v4825_v63 = vmov (%p5191_p3), %v6256_v24  }
 0x6d9   : > { %v2085_v42 = vpop.permute.xlu2 %2084 }
 0x6da   : > { %v2081_v48 = vpop.permute.xlu0 %2080  ;;  %v6264_v21 = vsel %vm6881_vm11, %v2085_v42, %v2077_v55 }
 0x6db   : > { %v6268_v38 = vsel %vm6882_vm15, %v2077_v55, %v2081_v48   ;;  %v6272_v62 = vsel %vm6883_vm5, %v2081_v48, %v2085_v42 }
 0x6dc   : > { %v2065_v53 = vpop.permute.xlu1 %2064  ;;  %v4809_v11 = vmov (%p5191_p3), %v6268_v38  }
 0x6dd   : > { %v6276_v51 = vsel %vm6884_vm0, %v2061_v15, %v2065_v53 }
 0x6e2   : > { %v2069_v60 = vpop.permute.xlu0 %2068 }
 0x6e3   : > { %v6280_v20 = vsel %vm6885_vm4, %v2065_v53, %v2069_v60   ;;  %v6284_v35 = vsel %vm6886_vm12, %v2069_v60, %v2061_v15 }
 0x6e4   : > { %v2083_v19 = vpop.permute.xlu1 %2082  ;;  %v4813_v40 = vmov (%p5191_p3), %v6280_v20  }
 0x6e5   : > { %v6288_v25 = vsel %vm6887_vm6, %v2079_v59, %v2083_v19  }
 0x6e6   : > { %v4797_v14 = vmov (%p5191_p3), %v6288_v25  }
 0x6e7   : > { %2096 = sbr.rel (!%p5191_p3) target bundleno = 1788 (0x6fc), region = 104 }
 0x6ea   : > { %v2087_v54 = vpop.permute.xlu0 %2086 }
 0x6eb   : > { %v6292_v28 = vsel %vm6888_vm3, %v2083_v19, %v2087_v54  ;;  %v6296_v32 = vsel %vm6889_vm2, %v2087_v54, %v2079_v59 }
 0x6ec   : > { %v2127_v2 = vpop.permute.xlu1 %2126 }
 0x6ed   : > { %v2134_v8 = vsel %vm5256_vm13, %v2127_v2, %v6272_v62   ;;  %v2135_v46 = vsel %vm5232_vm7, %v2127_v2, %v6264_v21  }
 0x6f2   : > { %v2106_v22 = vpop.permute.xlu0 %2105 }
 0x6f3   : > { %v2113_v3 = vsel %vm5222_vm1, %v2106_v22, %v6252_v37   ;;  %v2114_v4 = vsel %vm5238_vm8, %v2106_v22, %v6260_v49  }
 0x6f4   : > { %v2131_v36 = vpop.permute.xlu1 %2130 }
 0x6f5   : > { %v2137_v13 = vsel %vm5256_vm13, %v2131_v36, %v6292_v28   ;;  %v2138_v50 = vsel %vm5232_vm7, %v2131_v36, %v6296_v32  }
 0x6fa   : > { %v2111_v7 = vpop.permute.xlu0 %2110 }
 0x6fb   : > { %v2116_v44 = vsel %vm5222_vm1, %v2111_v7, %v6284_v35   ;;  %v2117_v5 = vsel %vm5238_vm8, %v2111_v7, %v6276_v51  }
 0x6fc PF: > { %vm6890_vm1 = vcmp.ne.s32.totalorder %v5361_v17, 0  ;;  %4055 = vset.pattern.permute.xlu1 %v4852_v0  ;;  %s6896_s29 = sld [smem:[#allocation30_spill]]  ;;  %4054 = vset.pattern.permute.xlu0 %v4852_v0  ;;  %vm6904_vm3 = vcmask 261120   ;;  %v4834_v3 = vphi %v4832_v3, %v2113_v3   ;;  %v4830_v4 = vphi %v4828_v4, %v2114_v4   ;;  %v4826_v63 = vphi %v4824_v63, %v4825_v63   ;;  %v4822_v44 = vphi %v4820_v44, %v2116_v44   ;;  %v4818_v5 = vphi %v4816_v5, %v2117_v5   ;;  %v4814_v40 = vphi %v4812_v40, %v4813_v40   ;;  %v4810_v11 = vphi %v4808_v11, %v4809_v11   ;;  %v4806_v8 = vphi %v4804_v8, %v2134_v8   ;;  %v4802_v46 = vphi %v4800_v46, %v2135_v46   ;;  %v4798_v14 = vphi %v4796_v14, %v4797_v14   ;;  %v4794_v13 = vphi %v4792_v13, %v2137_v13   ;;  %v4790_v50 = vphi %v4788_v50, %v2138_v50  }
 0x6fd   : > { %v3183_v27 = vsel %vm6890_vm1, %v6288_v25, %v4798_v14  ;;  %vm6891_vm7 = vmmov %vm6890_vm1  ;;  %s6903_s23 = sld [smem:[#allocation29_spill]] }
 0x6fe   : > { %v3187_v29 = vsel %vm6891_vm7, %v6292_v28, %v4794_v13  ;;  %vm6892_vm8 = vmmov %vm6890_vm1  ;;  %2220 = vmatpush.msrb.mxu3 %v3183_v27 }
 0x6ff   : > { %v3191_v30 = vsel %vm6892_vm8, %v6296_v32, %v4790_v50  ;;  %vm6893_vm13 = vmmov %vm6890_vm1  ;;  %2249 = vmatpush.msra.mxu0 %v3187_v29 }
 0x700   : > { %v3171_v33 = vsel %vm6893_vm13, %v6268_v38, %v4810_v11  ;;  %vm6894_vm9 = vmmov %vm6890_vm1  ;;  %2278 = vmatpush.msra.mxu1 %v3191_v30 }
 0x701   : > { %v3175_v10 = vsel %vm6894_vm9, %v6272_v62, %v4806_v8  ;;  %vm6895_vm11 = vmmov %vm6890_vm1  ;;  %2221 = vmatpush.msrb.mxu3 %v3171_v33 }
 0x702   : > { %v3179_v9 = vsel %vm6895_vm11, %v6264_v21, %v4802_v46  ;;  %v2895_v47 = vld [vmem:[%s6896_s29 + $0x80] sm:$0xff]  ;;  %vm6897_vm15 = vmmov %vm6890_vm1  ;;  %2250 = vmatpush.msra.mxu0 %v3175_v10  ;;  %v2897_v45 = vld [vmem:[%s6896_s29 + $0x90] sm:$0xff] }
 0x703   : > { %v3159_v61 = vsel %vm6897_vm15, %v6284_v35, %v4822_v44  ;;  %vm6898_vm5 = vmmov %vm6890_vm1  ;;  %2279 = vmatpush.msra.mxu1 %v3179_v9  ;;  %2178 = vperm.xlu1 %4055, %v2895_v47   ;;  %v2899_v56 = vld [vmem:[%s6903_s23 + $0x80] sm:$0xff]  ;;  %v2896_v52 = vld [vmem:[%s6896_s29 + $0x88] sm:$0xff] }
 0x704   : > { %v3163_v39 = vsel %vm6898_vm5, %v6276_v51, %v4818_v5  ;;  %vm6899_vm0 = vmmov %vm6890_vm1  ;;  %2222 = vmatpush.msrb.mxu3 %v3159_v61  ;;  %2188 = vperm.xlu0 %4054, %v2897_v45   ;;  %v2900_v1 = vld [vmem:[%s6903_s23 + $0x88] sm:$0xff]  ;;  %v2901_v15 = vld [vmem:[%s6903_s23 + $0x90] sm:$0xff] }
 0x705   : > { %v3167_v12 = vsel %vm6899_vm0, %v6280_v20, %v4814_v40  ;;  %vm6900_vm4 = vmmov %vm6899_vm0  ;;  %2251 = vmatpush.msra.mxu0 %v3163_v39  ;;  %v2902_v59 = vld [vmem:[%s6903_s23 + $0x98] sm:$0xff] }
 0x706   : > { %v3147_v43 = vsel %vm6900_vm4, %v6252_v37, %v4834_v3  ;;  %vm6901_vm12 = vmmov %vm6899_vm0  ;;  %2280 = vmatpush.msra.mxu1 %v3167_v12  ;;  %v2898_v37 = vld [vmem:[%s6896_s29 + $0x98] sm:$0xff] }
 0x707   : > { %v3151_v26 = vsel %vm6901_vm12, %v6260_v49, %v4830_v4  ;;  %vm6902_vm6 = vmmov %vm6899_vm0  ;;  %2223 = vmatpush.msrb.mxu3 %v3147_v43 }
 0x708   : > { %v3155_v18 = vsel %vm6902_vm6, %v6256_v24, %v4826_v63  ;;  %2252 = vmatpush.msra.mxu0 %v3151_v26  ;;  %2903 = vmatmul.msk.f32.vlgmr.msrb.gmra.mxu3 %vm6904_vm3, %v2899_v56  ;;  %vm6905_vm2 = vmmov %vm6904_vm3 }
 0x709   : > { %2281 = vmatpush.msra.mxu1 %v3155_v18  ;;  %2907 = vmatmul.msk.f32.vlgmr.msra.gmra.mxu0 %vm6905_vm2, %v2899_v56  ;;  %vm6906_vm1 = vmmov %vm6905_vm2 }
 0x70a   : > { %2911 = vmatmul.msk.f32.vlgmr.msra.gmra.mxu1 %vm6906_vm1, %v2899_v56  ;;  %vm6907_vm7 = vmmov %vm6906_vm1 }
 0x70b   : > { %2183 = vperm.xlu1 %4055, %v2896_v52   ;;  %vm6908_vm8 = vmmov %vm6906_vm1 }
 0x70c   : > { %vm6909_vm13 = vmmov %vm6906_vm1  ;;  %2193 = vperm.xlu0 %4054, %v2898_v37  }
 0x70d   : > { %vm6910_vm9 = vmmov %vm6906_vm1 }
 0x70e   : > { %vm6911_vm11 = vmmov %vm6906_vm1 }
 0x70f   : > { %vm6912_vm15 = vmmov %vm6906_vm1 }
 0x710   : > { %2904 = vmatmul.msk.f32.gmra.mxu3 %vm6907_vm7, %v2900_v1  ;;  %vm6913_vm5 = vmmov %vm6906_vm1 }
 0x711   : > { %2908 = vmatmul.msk.f32.gmra.mxu0 %vm6908_vm8, %v2900_v1  ;;  %vm6914_vm0 = vmmov %vm6906_vm1 }
 0x712   : > { %2912 = vmatmul.msk.f32.gmra.mxu1 %vm6909_vm13, %v2900_v1  ;;  %vm6915_vm4 = vmmov %vm6914_vm0 }
 0x718   : > { %2905 = vmatmul.msk.f32.gmra.mxu3 %vm6910_vm9, %v2901_v15 }
 0x719   : > { %2909 = vmatmul.msk.f32.gmra.mxu0 %vm6911_vm11, %v2901_v15 }
 0x71a   : > { %2913 = vmatmul.msk.f32.gmra.mxu1 %vm6912_vm15, %v2901_v15 }
 0x720   : > { %2906 = vmatmul.msk.f32.gmra.mxu3 %vm6913_vm5, %v2902_v59 }
 0x721   : > { %2910 = vmatmul.msk.f32.gmra.mxu0 %vm6914_vm0, %v2902_v59 }
 0x722   : > { %2914 = vmatmul.msk.f32.gmra.mxu1 %vm6915_vm4, %v2902_v59 }
 0x775   : > { %v6428_v7 = vpop.permute.xlu1 %2178 }
 0x776   : > { %v2189_v48 = vpop.permute.xlu0 %2188 }
 0x77e   : > { %v2194_v25 = vpop.permute.xlu0 %2193 }
 0x786   : > { %v6406_v41 = vpop.f32.mrf.mxu0 }
 0x787   : > { %v6408_v55 = vpop.f32.mrf.mxu1  ;;  %v2255_v45 = vadd.f32 %v6406_v41, %v6428_v7 }
 0x78b   : > { %v6410_v24 = vpop.f32.mrf.mxu3 }
 0x78e   : > { %v6412_v49 = vpop.f32.mrf.mxu0 }
 0x78f   : > { %v6414_v42 = vpop.f32.mrf.mxu1 }
 0x793   : > { %v6416_v21 = vpop.f32.mrf.mxu3 }
 0x796   : > { %v2260_v38 = vpop.f32.mrf.mxu0 }
 0x797   : > { %v2289_v62 = vpop.f32.mrf.mxu1  ;;  %v2261_v53 = vadd.f32 %v2260_v38, %v2189_v48 }
 0x798   : > { %v2290_v51 = vadd.f32 %v2289_v62, %v2189_v48 }
 0x799   : > { %v2916_v60 = vmul.f32 -1.442695, %v2261_v53 }
 0x79a   : > { %v2917_v20 = vmul.f32 -1.442695, %v2290_v51  ;;  %v6447_v51 = vpop.permute.xlu1 %2183 }
 0x79b   : > { %4056 = vpow2.f32 %v2916_v60  ;;  %v2231_v35 = vpop.f32.mrf.mxu3 }
 0x79c   : > { %4058 = vpow2.f32 %v2917_v20  ;;  %v2232_v19 = vadd.f32 %v2231_v35, %v2189_v48  ;;  %v2226_v48 = vadd.f32 %v6410_v24, %v6428_v7 }
 0x79e   : > { %v2915_v54 = vmul.f32 -1.442695, %v2232_v19  ;;  %v2263_v28 = vpop.f32.mrf.mxu0 }
 0x79f   : > { %v2292_v32 = vpop.f32.mrf.mxu1  ;;  %v2264_v50 = vadd.f32 %v2263_v28, %v2194_v25 }
 0x7a0   : > { %v2293_v13 = vadd.f32 %v2292_v32, %v2194_v25  ;;  %4060 = vpow2.f32 %v2915_v54 }
 0x7a1   : > { %v4057_v14 = vpop.eup %4056  ;;  %v2919_v46 = vmul.f32 -1.442695, %v2264_v50  ;;  %v4840_v50 = vmov 0  }
 0x7a2   : > { %v4059_v8 = vpop.eup %4058  ;;  %v2314_v11 = vadd.f32 1.0, %v4057_v14  ;;  %v2920_v40 = vmul.f32 -1.442695, %v2293_v13  ;;  %v2258_v14 = vadd.f32 %v6412_v49, %v6447_v51 }
 0x7a3   : > { %v6418_v5 = vadd.f32 1.0, %v4059_v8  ;;  %4062 = vpow2.f32 %v2919_v46  ;;  %v2234_v44 = vpop.f32.mrf.mxu3 }
 0x7a4   : > { %4064 = vrcp.f32 %v2314_v11  ;;  %v2235_v63 = vadd.f32 %v2234_v44, %v2194_v25  ;;  %v2343_v9 = vand.u32 2147483647, %v2314_v11  ;;  %v2345_v47 = vand.u32 2147483648, %v2314_v11 }
 0x7a5   : > { %4066 = vrcp.f32 %v6418_v5  ;;  %vm2339_vm6 = vweird.f32 %v2314_v11  ;;  %v2360_v44 = vand.u32 2147483648, %v6418_v5 }
 0x7a6   : > { %v4061_v4 = vpop.eup %4060  ;;  %4068 = vpow2.f32 %v2920_v40  ;;  %v2918_v3 = vmul.f32 -1.442695, %v2235_v63  ;;  %v2346_v52 = vor.u32 1.1754944e-38, %v2345_v47  ;;  %vm2344_vm2 = vcmp.eq.f32.partialorder %v2343_v9, 8.507059e+37 }
 0x7a7   : > { %v6421_v57 = vadd.f32 1.0, %v4061_v4 }
 0x7a8   : > { %4070 = vpow2.f32 %v2918_v3 }
 0x7a9   : > { %v4063_v6 = vpop.eup %4062  ;;  %4072 = vrcp.f32 %v6421_v57  ;;  %vm2324_vm7 = vweird.f32 %v6421_v57  ;;  %v2330_v20 = vand.u32 2147483648, %v6421_v57  ;;  %v2328_v24 = vand.u32 2147483647, %v6421_v57 }
 0x7aa   : > { %v4065_v2 = vpop.eup %4064  ;;  %v6424_v22 = vadd.f32 1.0, %v4063_v6 }
 0x7ab   : > { %v6426_v36 = vpop.eup %4066  ;;  %v2335_v27 = vmul.f32 %v4065_v2, %v2314_v11  ;;  %vm2340_vm12 = vweird.f32 %v4065_v2  ;;  %v2331_v40 = vor.u32 1.1754944e-38, %v2330_v20  ;;  %vm2329_vm15 = vcmp.eq.f32.partialorder %v2328_v24, 8.507059e+37 }
 0x7ac   : > { %v4069_v29 = vpop.eup %4068  ;;  %4074 = vrcp.f32 %v6424_v22  ;;  %v2350_v43 = vmul.f32 %v6426_v36, %v6418_v5  ;;  %vm2341_vm3 = vmor %vm2339_vm6, %vm2340_vm12  ;;  %v2388_v35 = vand.u32 2147483647, %v6424_v22  ;;  %v2390_v19 = vand.u32 2147483648, %v6424_v22 }
 0x7ad   : > { %v6431_v30 = vadd.f32 1.0, %v4069_v29  ;;  %v2336_v33 = vsub.f32 1.0, %v2335_v27  ;;  %vm2384_vm9 = vweird.f32 %v6424_v22  ;;  %vm2355_vm5 = vweird.f32 %v6426_v36 }
 0x7ae   : > { %v4071_v10 = vpop.eup %4070  ;;  %v2351_v59 = vsub.f32 1.0, %v2350_v43  ;;  %v2391_v63 = vor.u32 1.1754944e-38, %v2390_v19  ;;  %vm2389_vm0 = vcmp.eq.f32.partialorder %v2388_v35, 8.507059e+37  ;;  %vm2354_vm12 = vweird.f32 %v6418_v5 }
 0x7af   : > { %v4073_v61 = vpop.eup %4072  ;;  %4076 = vrcp.f32 %v6431_v30  ;;  %v6434_v39 = vadd.f32 1.0, %v4071_v10  ;;  %v2337_v12 = vmul.f32 %v4065_v2, %v2336_v33  ;;  %vm6488_vm6 = vmor %vm2354_vm12, %vm2355_vm5  ;;  %v2361_v43 = vor.u32 1.1754944e-38, %v2360_v44 }
 0x7b0   : > { %v2320_v26 = vmul.f32 %v4073_v61, %v6421_v57  ;;  %vm2325_vm1 = vweird.f32 %v4073_v61  ;;  %v2352_v13 = vmul.f32 %v6426_v36, %v2351_v59  ;;  %v2403_v59 = vand.u32 2147483647, %v6431_v30 }
 0x7b1   : > { %4078 = vrcp.f32 %v6434_v39  ;;  %v2338_v18 = vadd.f32 %v4065_v2, %v2337_v12  ;;  %vm6465_vm13 = vmor %vm2324_vm7, %vm2325_vm1  ;;  %v2375_v33 = vand.u32 2147483648, %v6434_v39 }
 0x7b2   : > { %v4075_v56 = vpop.eup %4074  ;;  %v2321_v1 = vsub.f32 1.0, %v2320_v26  ;;  %v2353_v57 = vadd.f32 %v6426_v36, %v2352_v13  ;;  %v4844_v13 = vmov 0  }
 0x7b3   : > { %v2380_v37 = vmul.f32 %v4075_v56, %v6424_v22  ;;  %v2342_v15 = vsel %vm2341_vm3, %v4065_v2, %v2338_v18  ;;  %vm2385_vm8 = vweird.f32 %v4075_v56  ;;  %v2358_v22 = vand.u32 2147483647, %v6418_v5 }
 0x7b4   : > { %v2347_v38 = vsel %vm2344_vm2, %v2346_v52, %v2342_v15  ;;  %v2322_v62 = vmul.f32 %v4073_v61, %v2321_v1  ;;  %vm2386_vm11 = vmor %vm2384_vm9, %vm2385_vm8  ;;  %vm2369_vm3 = vweird.f32 %v6434_v39  ;;  %v2357_v12 = vsel %vm6488_vm6, %v6426_v36, %v2353_v57 }
 0x7b5   : > { %v6445_v53 = vpop.eup %4076  ;;  %v6449_v60 = vmul.f32 %v2347_v38, %v2255_v45  ;;  %v2381_v41 = vsub.f32 1.0, %v2380_v37  ;;  %vm2359_vm1 = vcmp.eq.f32.partialorder %v2358_v22, 8.507059e+37  ;;  %v2376_v18 = vor.u32 1.1754944e-38, %v2375_v33 }
 0x7b6   : > { %v2323_v25 = vadd.f32 %v4073_v61, %v2322_v62  ;;  %v2395_v8 = vmul.f32 %v6445_v53, %v6431_v30  ;;  %v2229_v52 = vadd.f32 %v6416_v21, %v6447_v51  ;;  %vm2400_vm8 = vweird.f32 %v6445_v53 }
 0x7b7   : > { %v4079_v54 = vpop.eup %4078  ;;  %2427 = vrot.lane.b32.xlu2 %v6449_v60, %s4862_s21  ;;  %v6460_v28 = vadd.f32 %v6449_v60, %v6201_v58  ;;  %2421 = vrot.lane.b32.xlu0 %v6449_v60, %s4861_s12  ;;  %v2382_v32 = vmul.f32 %v4075_v56, %v2381_v41  ;;  %v2405_v37 = vand.u32 2147483648, %v6431_v30 }
 0x7b8   : > { %v2327_v46 = vsel %vm6465_vm13, %v4073_v61, %v2323_v25  ;;  %v2365_v58 = vmul.f32 %v4079_v54, %v6434_v39  ;;  %vm2370_vm4 = vweird.f32 %v4079_v54  ;;  %v2396_v27 = vsub.f32 1.0, %v2395_v8 }
 0x7b9   : > { %v2383_v11 = vadd.f32 %v4075_v56, %v2382_v32  ;;  %v2332_v3 = vsel %vm2329_vm15, %v2331_v40, %v2327_v46  ;;  %v2373_v61 = vand.u32 2147483647, %v6434_v39  ;;  %vm2371_vm2 = vmor %vm2369_vm3, %vm2370_vm4  ;;  %vm2399_vm13 = vweird.f32 %v6431_v30 }
 0x7ba   : > { %v2366_v49 = vsub.f32 1.0, %v2365_v58  ;;  %v2409_v10 = vmul.f32 %v2332_v3, %v2226_v48  ;;  %v2397_v26 = vmul.f32 %v6445_v53, %v2396_v27  ;;  %vm2401_vm9 = vmor %vm2399_vm13, %vm2400_vm8  ;;  %v2406_v21 = vor.u32 1.1754944e-38, %v2405_v37 }
 0x7bb   : > { %v2387_v4 = vsel %vm2386_vm11, %v4075_v56, %v2383_v11  ;;  %v2362_v56 = vsel %vm2359_vm1, %v2361_v43, %v2357_v12  ;;  %vm2374_vm7 = vcmp.eq.f32.partialorder %v2373_v61, 8.507059e+37  ;;  %vm2404_vm11 = vcmp.eq.f32.partialorder %v2403_v59, 8.507059e+37 }
 0x7bc   : > { %v2392_v6 = vsel %vm2389_vm0, %v2391_v63, %v2387_v4  ;;  %v2367_v2 = vmul.f32 %v4079_v54, %v2366_v49  ;;  %v2398_v36 = vadd.f32 %v6445_v53, %v2397_v26  ;;  %v2287_v48 = vadd.f32 %v6414_v42, %v6447_v51 }
 0x7bd   : > { %v6481_v29 = vmul.f32 %v2392_v6, %v2258_v14  ;;  %vm6920_vm15 = vcmp.lt.s32.totalorder %v5219_v23, 4  ;;  %vm6922_vm0 = vcmp.lt.s32.totalorder %v5219_v23, 124  ;;  %v4836_v32 = vmov 0  }
 0x7be   : > { %v2368_v47 = vadd.f32 %v4079_v54, %v2367_v2  ;;  %vm6921_vm5 = vmmov %vm6920_vm15  ;;  %v4848_v14 = vmov 0   ;;  %v4869_v46 = vmov (%p5191_p3), 127   ;;  %v4870_v58 = vmov (%p5191_p3), 0  }
 0x7bf   : > { %2423 = vrot.lane.b32.xlu1 %v6481_v29, %s4861_s12  ;;  %v6498_v5 = vadd.f32 %v6481_v29, %v6235_v16  ;;  %2429 = vrot.lane.b32.xlu0 %v6481_v29, %s4862_s21  ;;  %v2284_v16 = vadd.f32 %v6408_v55, %v6428_v7  ;;  %v2402_v55 = vsel %vm2401_vm9, %v6445_v53, %v2398_v36  ;;  %vm6923_vm4 = vmmov %vm6922_vm0 }
 0x7c0   : > { %2417 = vrot.lane.b32.xlu2 %v2409_v10, %s4861_s12  ;;  %v2372_v39 = vsel %vm2371_vm2, %v4079_v54, %v2368_v47  ;;  %v2407_v7 = vsel %vm2404_vm11, %v2406_v21, %v2402_v55  ;;  %4081 = vset.pattern.permute.xlu1 (%p5191_p3), %v4869_v46 }
 0x7c1   : > { %v2377_v45 = vsel %vm2374_vm7, %v2376_v18, %v2372_v39  ;;  %v2411_v1 = vmul.f32 %v2362_v56, %v2284_v16  ;;  %v2414_v38 = vmul.f32 %v2407_v7, %v2287_v48  ;;  %4080 = vset.pattern.permute.xlu0 (%p5191_p3), %v4870_v58 }
 0x7c2   : > { %v2412_v15 = vmul.f32 %v2377_v45, %v2229_v52 }
 0x7c7   : > { %2431 = vrot.lane.b32.xlu1 %v2411_v1, %s4862_s21  ;;  %2444 = vperm.xlu0 (%p5191_p3), %4080, %v6449_v60  }
 0x7c8   : > { %2419 = vrot.lane.b32.xlu2 %v2412_v15, %s4861_s12 }
 0x7cf   : > { %2457 = vperm.xlu1 (%p5191_p3), %4081, %v6449_v60   ;;  %2449 = vperm.xlu0 (%p5191_p3), %4080, %v6481_v29  }
 0x7d0   : > { %2433 = vrot.lane.b32.xlu2 %v2414_v38, %s4862_s21 }
 0x7d7   : > { %2461 = vperm.xlu1 (%p5191_p3), %4081, %v6481_v29   ;;  %4082 = vset.pattern.permute.xlu0 (%p5191_p3), %v4869_v46 }
 0x811   : > { %v2428_v62 = vpop.permute.xlu2 %2427 }
 0x81a   : > { %v2418_v41 = vpop.permute.xlu2 %2417 }
 0x822   : > { %v2420_v20 = vpop.permute.xlu2 %2419 }
 0x829   : > { %v2422_v30 = vpop.permute.xlu0 %2421 }
 0x82a   : > { %v2425_v35 = vsel %vm6920_vm15, %v2418_v41, %v2422_v30  ;;  %v2434_v19 = vpop.permute.xlu2 %2433 }
 0x831   : > { %v2424_v25 = vpop.permute.xlu1 %2423  ;;  %v2430_v24 = vpop.permute.xlu0 %2429 }
 0x832   : > { %v2426_v53 = vsel %vm6921_vm5, %v2420_v20, %v2424_v25  ;;  %v2436_v54 = vsel %vm6922_vm0, %v2430_v24, %v2434_v19 }
 0x836   : > { %2439 = sbr.rel (!%p5191_p3) target bundleno = 2123 (0x84b), region = 112 }
 0x839   : > { %v2432_v42 = vpop.permute.xlu1 %2431  ;;  %v2445_v8 = vpop.permute.xlu0 (%p5191_p3), %2444 }
 0x83a   : > { %v2435_v51 = vsel %vm6923_vm4, %v2428_v62, %v2432_v42  ;;  %v2452_v14 = vsel (%p5191_p3), %vm5244_vm10, %v2445_v8, %v2425_v35  }
 0x841   : > { %v2458_v23 = vpop.permute.xlu1 %2457  ;;  %v2450_v40 = vpop.permute.xlu0 %2449 }
 0x842   : > { %v2464_v50 = vsel %vm5262_vm14, %v2458_v23, %v2435_v51   ;;  %v2453_v13 = vsel %vm5244_vm10, %v2450_v40, %v2426_v53  }
 0x849   : > { %v2462_v11 = vpop.permute.xlu1 %2461 }
 0x84a   : > { %v2465_v32 = vsel %vm5262_vm14, %v2462_v11, %v2436_v54  }
 0x84b PF: > { %vm6924_vm12 = vcmp.ne.s32.totalorder %v5361_v17, 0  ;;  %4084 = vset.pattern.permute.xlu1 %v4852_v0  ;;  %s6926_s21 = sld [smem:[#allocation30_spill]]  ;;  %4083 = vset.pattern.permute.xlu0 %v4852_v0  ;;  %vm6930_vm3 = vcmask 261120   ;;  %v4850_v14 = vphi %v4848_v14, %v2452_v14   ;;  %v4846_v13 = vphi %v4844_v13, %v2453_v13   ;;  %v4842_v50 = vphi %v4840_v50, %v2464_v50   ;;  %v4838_v32 = vphi %v4836_v32, %v2465_v32  }
 0x84c   : > { %v3208_v60 = vsel %vm6924_vm12, %v2436_v54, %v4838_v32  ;;  %vm6925_vm6 = vmmov %vm6924_vm12  ;;  %4085 = vset.pattern.permute.xlu2 %v4852_v0  ;;  %s6929_s15 = sld [smem:[#allocation29_spill]]  ;;  %vm2597_vm12 = vcmask 130048  }
 0x84d   : > { %v3204_v34 = vsel %vm6925_vm6, %v2435_v51, %v4842_v50  ;;  %2531 = vmatpush.msra.mxu2 %v3208_v60  ;;  %vm6927_vm10 = vmmov %vm6925_vm6  ;;  %s6934_s23 = sld [smem:[#allocation32_spill]] }
 0x84e   : > { %v3200_v44 = vsel %vm6927_vm10, %v2426_v53, %v4846_v13  ;;  %vm6928_vm14 = vmmov %vm6925_vm6  ;;  %s6935_s8 = sld [smem:[#allocation16_spill]] }
 0x84f   : > { %2532 = vmatpush.msra.mxu2 %v3204_v34  ;;  %v3196_v49 = vsel %vm6928_vm14, %v2425_v35, %v4850_v14  ;;  %vm6931_vm2 = vmmov %vm6930_vm3  ;;  %s6936_s1 = sld [smem:[#allocation15_spill]] }
 0x850   : > { %vm6932_vm1 = vmmov %vm6931_vm2  ;;  %s6937_s6 = sld [smem:[#allocation31_spill]] }
 0x851   : > { %v2922_v31 = vld [vmem:[%s6926_s21 + $0xa8] sm:$0xff]  ;;  %v2924_v63 = vld [vmem:[%s6926_s21 + $0xb8] sm:$0xff]  ;;  %2533 = vmatpush.msra.mxu2 %v3200_v44  ;;  %v2921_v3 = vld [vmem:[%s6926_s21 + $0xa0] sm:$0xff]  ;;  %s6938_s5 = sld [smem:[#allocation14_spill]] }
 0x852   : > { %2494 = vperm.xlu1 %4084, %v2922_v31   ;;  %2504 = vperm.xlu0 %4083, %v2924_v63   ;;  %v2925_v4 = vld [vmem:[%s6929_s15 + $0xa0] sm:$0xff]  ;;  %v2923_v0 = vld [vmem:[%s6926_s21 + $0xb0] sm:$0xff]  ;;  %v2926_v17 = vld [vmem:[%s6929_s15 + $0xa8] sm:$0xff]  ;;  %s6940_s12 = sld [smem:[#allocation33_spill]] }
 0x853   : > { %2534 = vmatpush.msra.mxu2 %v3196_v49  ;;  %v2927_v57 = vld [vmem:[%s6929_s15 + $0xb0] sm:$0xff]  ;;  %v2928_v6 = vld [vmem:[%s6929_s15 + $0xb8] sm:$0xff]  ;;  %vm6933_vm7 = vmmov %vm6932_vm1 }
 0x854   : > { %2929 = vmatmul.msk.f32.vlgmr.msra.gmra.mxu2 %vm6930_vm3, %v2925_v4  ;;  %v2591_v26 = vld [vmem:[%s6934_s23] sm:$0xff]  ;;  %s2937_s27 = sshll.u32 %s6935_s8, 2  ;;  %s6942_s23 = scalar_lea.vmem [#allocation8], %s5154_s3 }
 0x855   : > { %2594 = vperm.xlu2 %4085, %v2591_v26   ;;  %s2633_s26 = sadd.s32 %s6936_s1, %s2937_s27  ;;  %s2637_s0 = sshll.u32 %s6942_s23, 4  ;;  %s2638_s0 = int_to_ptr.vmem [resolvable:$true] %s2637_s0 }
 0x856   : > { %v2590_v14 = vld [vmem:[%s6937_s6] sm:$0xff]  ;;  %s2938_s20 = sshll.u32 %s2633_s26, 3  ;;  %s6943_s15 = smov %s6942_s23 }
 0x857   : > { %s6944_s13 = sand.u32 1, %s6938_s5  }
 0x858   : > { %s6941_s29 = smov %s6940_s12  ;;  %s2635_s21 = scalar_lea.hbm %s6940_s12, %s2938_s20 }
 0x859   : > { %s2639_s2 = sshll.u32 %s2635_s21, 4  ;;  %s2623_s6 = scalar_lea.sflag [#allocation4], %s6944_s13  ;;  %s2640_s2 = int_to_ptr.hbm [resolvable:$true] %s2639_s2 }
 0x85a   : > { %2489 = vperm.xlu1 %4084, %v2921_v3   ;;  %2499 = vperm.xlu0 %4083, %v2923_v0   ;;  %s4198_s8 = sshra.s32 %s2640_s2, 4  ;;  %s4204_s20 = scalar_lea.hbm %s6941_s29, 64  ;;  %s4199_s8 = int_to_ptr.hbm [resolvable:$true] %s4198_s8 }
 0x85b   : > { %s4200_s1 = scalar_lea.hbm %s4199_s8, 8  ;;  %p4205_p0 = scmp.lt.s32.totalorder %s4199_s8, %s6941_s29 }
 0x85c   : > { %2930 = vmatmul.msk.f32.gmra.mxu2 %vm6931_vm2, %v2926_v17  ;;  %p4201_p4 = scmp.ne.s32.totalorder %s4199_s8, %s4200_s1  ;;  %p4206_p5 = scmp.lt.s32.totalorder %s4204_s20, %s4200_s1 }
 0x85e   : > { %p4202_p7 = pnand %p4201_p4, %p5028_p9  ;;  %p4207_p13 = por %p4206_p5, %p4205_p0 }
 0x860   : > { %p4203_p12 = pneg %p4202_p7 }
 0x862   : > { %p4208_p6 = pnand %p4207_p13, %p4203_p12 }
 0x864   : > { %2931 = vmatmul.msk.f32.gmra.mxu2 %vm6932_vm1, %v2927_v57 }
 0x86c   : > { %2932 = vmatmul.msk.f32.gmra.mxu2 %vm6933_vm7, %v2928_v6 }
 0x8c4   : > { %v2505_v27 = vpop.permute.xlu0 %2504  ;;  %v2495_v36 = vpop.permute.xlu1 %2494 }
 0x8cc   : > { %v2500_v22 = vpop.permute.xlu0 %2499  ;;  %v2490_v20 = vpop.permute.xlu1 %2489 }
 0x8d7   : > { %v2536_v2 = vpop.f32.mrf.mxu2 }
 0x8d8   : > { %v2537_v24 = vadd.f32 %v2536_v2, %v2490_v20 }
 0x8df   : > { %v2539_v29 = vpop.f32.mrf.mxu2 }
 0x8e0   : > { %v2540_v53 = vadd.f32 %v2539_v29, %v2495_v36 }
 0x8e7   : > { %v2542_v33 = vpop.f32.mrf.mxu2 }
 0x8e8   : > { %v2543_v10 = vadd.f32 %v2542_v33, %v2500_v22 }
 0x8ea   : > { %v2933_v9 = vmul.f32 -1.442695, %v2543_v10 }
 0x8ec   : > { %4086 = vpow2.f32 %v2933_v9 }
 0x8ef   : > { %v2545_v47 = vpop.f32.mrf.mxu2 }
 0x8f0   : > { %v2546_v61 = vadd.f32 %v2545_v47, %v2505_v27 }
 0x8f2   : > { %v4087_v12 = vpop.eup %4086  ;;  %v2934_v43 = vmul.f32 -1.442695, %v2546_v61 }
 0x8f3   : > { %v2554_v39 = vadd.f32 1.0, %v4087_v12 }
 0x8f4   : > { %4088 = vpow2.f32 %v2934_v43 }
 0x8f5   : > { %4090 = vrcp.f32 %v2554_v39  ;;  %v2567_v55 = vand.u32 2147483648, %v2554_v39  ;;  %vm2561_vm13 = vweird.f32 %v2554_v39  ;;  %v2565_v7 = vand.u32 2147483647, %v2554_v39 }
 0x8f7   : > { %v2568_v30 = vor.u32 1.1754944e-38, %v2567_v55  ;;  %vm2566_vm5 = vcmp.eq.f32.partialorder %v2565_v7, 8.507059e+37 }
 0x8fa   : > { %v4089_v18 = vpop.eup %4088 }
 0x8fb   : > { %v4091_v56 = vpop.eup %4090  ;;  %v2555_v16 = vadd.f32 1.0, %v4089_v18 }
 0x8fc   : > { %v2557_v45 = vmul.f32 %v4091_v56, %v2554_v39  ;;  %vm2562_vm8 = vweird.f32 %v4091_v56 }
 0x8fd   : > { %4092 = vrcp.f32 %v2555_v16  ;;  %v2582_v48 = vand.u32 2147483648, %v2555_v16  ;;  %vm2563_vm9 = vmor %vm2561_vm13, %vm2562_vm8  ;;  %v2580_v62 = vand.u32 2147483647, %v2555_v16  ;;  %vm2576_vm15 = vweird.f32 %v2555_v16 }
 0x8fe   : > { %v2558_v52 = vsub.f32 1.0, %v2557_v45 }
 0x8ff   : > { %v2583_v19 = vor.u32 1.1754944e-38, %v2582_v48  ;;  %vm2581_vm4 = vcmp.eq.f32.partialorder %v2580_v62, 8.507059e+37 }
 0x900   : > { %v2559_v1 = vmul.f32 %v4091_v56, %v2558_v52 }
 0x902   : > { %v2560_v59 = vadd.f32 %v4091_v56, %v2559_v1 }
 0x903   : > { %v4093_v37 = vpop.eup %4092 }
 0x904   : > { %v2572_v15 = vmul.f32 %v4093_v37, %v2555_v16  ;;  %vm2577_vm11 = vweird.f32 %v4093_v37  ;;  %v2564_v41 = vsel %vm2563_vm9, %v4091_v56, %v2560_v59 }
 0x905   : > { %vm2578_vm0 = vmor %vm2576_vm15, %vm2577_vm11  ;;  %v2569_v25 = vsel %vm2566_vm5, %v2568_v30, %v2564_v41 }
 0x906   : > { %v2573_v21 = vsub.f32 1.0, %v2572_v15  ;;  %v2586_v32 = vmul.f32 %v2569_v25, %v2537_v24 }
 0x908   : > { %v2574_v38 = vmul.f32 %v4093_v37, %v2573_v21  ;;  %v2588_v13 = vadd.f32 %v2586_v32, %v6460_v28 }
 0x90a   : > { %v2575_v35 = vadd.f32 %v4093_v37, %v2574_v38 }
 0x90c   : > { %v2579_v54 = vsel %vm2578_vm0, %v4093_v37, %v2575_v35 }
 0x90d   : > { %v2584_v42 = vsel %vm2581_vm4, %v2583_v19, %v2579_v54 }
 0x90e   : > { %v2587_v51 = vmul.f32 %v2584_v42, %v2540_v53 }
 0x910   : > { %v2589_v50 = vadd.f32 %v2587_v51, %v6498_v5  ;;  %v2595_v5 = vpop.permute.xlu2 %2594 }
 0x912   : > { %2615 = vmatpush.msra.mxu3 %v2589_v50 }
 0x914   : > { %2616 = vmatpush.msra.mxu3 %v2588_v13 }
 0x915   : > { %2935 = vmatmul.msk.f32.vlgmr.msra.gmra.mxu3 %vm2597_vm12, %v2590_v14 }
 0x998   : > { %v2618_v28 = vpop.f32.mrf.mxu3 }
 0x999   : > { %v2619_v46 = vadd.f32 %v2618_v28, %v2595_v5 }
 0x99b   : > { %2621 = vst [vmem:[%s6943_s15] sm:$0xff] %v2619_v46 }
 0x99c   : > { %4211 = shalt.err (!%p4208_p6)
}
 0x99d   : > { %3209 = dma.vmem_to_hbm [thread:$0]  (%p5028_p9), %s2638_s0, 128, %s2640_s2, %s2623_s6  }
 0x99e PF: > { %s6945_s3 = sld [smem:[#allocation13_spill]]  ;;  %p3290_p1 = scmp.ge.s32.totalorder %s4594_s22, 2 }
 0x9a0   : > { %p3222_p2 = pnand %p3290_p1, %p5032_p10 }
 0x9a2   : > { %p3223_p8 = pneg %p3222_p2 }
 0x9a4   : > { %s2651_s12 = sand.u32 1, %s6945_s3  }
 0x9a5   : > { %s2652_s21 = scalar_lea.sflag [#allocation4], %s2651_s12 }
 0x9a6   : > { %4537 = dma.done.wait (%p3223_p8), %s2652_s21, 128  }
 0x9a7   : > { %4539 = vsyncadd (%p3223_p8), %s2652_s21, 4294967168  ;;  %s28_s22 = sadd.s32 1, %s4594_s22   ;;  %s6948_s0 = smov %s5133_s30 }
 0x9a8   : > { %p6618_p11 = scmp.ge.s32.totalorder %s28_s22, 10   ;;  %s6949_s12 = sld [smem:[#allocation14_spill]] }
 0x9a9   : > { %s6950_s2 = sld [smem:[#allocation17_spill]]  ;;  %s6953_s30 = smov %s4546_s10 }
 0x9aa   : > { %s6951_s19 = sld [smem:[#allocation18_spill]]  ;;  %s6954_s10 = smov %s4550_s11 }
 0x9ab   : > { %s6952_s21 = sld [smem:[#allocation22_spill]]  ;;  %s6955_s11 = smov %s6948_s0 }
 0x9ac   : > { %s6956_s13 = smov %s4562_s14  ;;  %s6957_s14 = smov %s5099_s18 }
 0x9ad   : > { %s6958_s15 = smov %s4570_s16  ;;  %s6959_s16 = smov %s4574_s17 }
 0x9ae   : > { %s6960_s17 = smov %s5094_s7  ;;  %s6962_s20 = smov %s5004_s28 }
 0x9af   : > { %s6961_s18 = smov %s6950_s2  ;;  %27 = sbr.rel (!%p6618_p11) target bundleno = 23 (0x17), region = 183 }
 0x9b4   :  { %2658 = vsyncpa [#allocation3], 1 }
 0x9b5   :  { %2660 = vsyncpa [#allocation3 + $0x1], 1 }
 0x9b6   :  { %2661 = vsyncpa [#allocation6], 1 }
 0x9b7   :  { %2663 = vsyncpa [#allocation6 + $0x1], 1 }
 0x9b8   :  { %2664 = vsyncpa [#allocation4], 1 }
 0x9b9   :  { %2666 = vsyncpa [#allocation4 + $0x1], 1 }

// kernel: tpu_custom_call.1
= control target key start
LH: loop header
LB: loop body
LE: loop exit
PB: predicated region body
PF: predicated region fallthrough
CT: control target
= control target key end

     0   :  { %s6665_s0 = inlined_call_operand.hbm [shape: f32[2,8,512], index: 0, kind: input, shape index: {}]   ;;  %s6666_s1 = inlined_call_operand.hbm [shape: f32[2,8,512], index: 1, kind: input, shape index: {}]   ;;  %s6667_s2 = inlined_call_operand.hbm [shape: f32[2,8,512], index: 2, kind: input, shape index: {}]   ;;  %s6668_s3 = inlined_call_operand.vmem [shape: f32[16,8], index: 3, kind: input, shape index: {}]   ;;  %s6669_s4 = inlined_call_operand.vmem [shape: f32[16,1], index: 4, kind: input, shape index: {}]   ;;  %s6670_s5 = inlined_call_operand.vmem [shape: f32[6,32,32], index: 5, kind: input, shape index: {}]   ;;  %s6671_s6 = inlined_call_operand.vmem [shape: f32[6,32,1], index: 6, kind: input, shape index: {}]   ;;  %s6672_s7 = inlined_call_operand.vmem [shape: f32[8,16], index: 7, kind: input, shape index: {}]   ;;  %s6673_s8 = inlined_call_operand.vmem [shape: f32[8,1], index: 8, kind: input, shape index: {}]   ;;  %s6674_s9 = inlined_call_operand.hbm [shape: f32[2,8,512], index: 9, kind: output, shape index: {}]  }
   0x1   :  { %6718 = sst [smem:[#allocation24_spill]] %s6665_s0 }
   0x2   :  { %6719 = sst [smem:[#allocation25_spill]] %s6666_s1 }
   0x3   :  { %6720 = sst [smem:[#allocation26_spill]] %s6667_s2 }
   0x4   :  { %6721 = sst [smem:[#allocation27_spill]] %s6668_s3 }
   0x5   :  { %6722 = sst [smem:[#allocation28_spill]] %s6669_s4 }
   0x6   :  { %6723 = sst [smem:[#allocation29_spill]] %s6670_s5 }
   0x7   :  { %6724 = sst [smem:[#allocation30_spill]] %s6671_s6 }
   0x8   :  { %6725 = sst [smem:[#allocation31_spill]] %s6672_s7 }
   0x9   :  { %6726 = sst [smem:[#allocation32_spill]] %s6673_s8 }
   0xa   :  { %6727 = sst [smem:[#allocation33_spill]] %s6674_s9 }
   0xb   :  { %14 = vsyncpa [#allocation3], 0 }
   0xc   :  { %16 = vsyncpa [#allocation3 + $0x1], 0 }
   0xd   :  { %17 = vsyncpa [#allocation6], 0 }
   0xe   :  { %19 = vsyncpa [#allocation6 + $0x1], 0 }
   0xf   :  { %20 = vsyncpa [#allocation4], 0 }
  0x10   :  { %22 = vsyncpa [#allocation4 + $0x1], 0  ;;  %s4921_s30 = smov 0   ;;  %s4923_s10 = smov 0  }
  0x11   :  { %s4925_s11 = smov 0   ;;  %s4927_s12 = smov 0  }
  0x12   :  { %s4929_s13 = smov 0   ;;  %s4931_s14 = smov 0  }
  0x13   :  { %s4933_s15 = smov 0   ;;  %s4935_s16 = smov 0  }
  0x14   :  { %s4937_s17 = smov 0   ;;  %s4939_s18 = smov 0  }
  0x15   :  { %s4941_s19 = smov 0   ;;  %s4943_s20 = smov 0  }
  0x16   :  { %s4945_s21 = smov 0   ;;  %s4947_s22 = smov 0  }
  0x17 LB: > { %6728 = sst [smem:[#allocation13_spill]] %s4554_s12  ;;  %s4992_s23 = sadd.s32 4294967295, %s4594_s22   ;;  %s4594_s22 = sphi %s4947_s22, %s28_s22   ;;  %s4590_s21 = sphi %s4945_s21, %s6952_s21   ;;  %s4586_s20 = sphi %s4943_s20, %s6962_s20   ;;  %s4582_s19 = sphi %s4941_s19, %s6951_s19   ;;  %s4578_s18 = sphi %s4939_s18, %s6961_s18   ;;  %s4574_s17 = sphi %s4937_s17, %s6960_s17   ;;  %s4570_s16 = sphi %s4935_s16, %s6959_s16   ;;  %s4566_s15 = sphi %s4933_s15, %s6958_s15   ;;  %s4562_s14 = sphi %s4931_s14, %s6957_s14   ;;  %s4558_s13 = sphi %s4929_s13, %s6956_s13   ;;  %s4554_s12 = sphi %s4927_s12, %s6949_s12   ;;  %s4550_s11 = sphi %s4925_s11, %s6955_s11   ;;  %s4546_s10 = sphi %s4923_s10, %s6954_s10   ;;  %s4542_s30 = sphi %s4921_s30, %s6953_s30  }
  0x18   : > { %6729 = sst [smem:[#allocation14_spill]] %s4558_s13  ;;  %s2773_s24 = sadd.s32 4294967294, %s4594_s22  }
  0x19   : > { %6730 = sst [smem:[#allocation15_spill]] %s4578_s18  ;;  %s4996_s25 = sadd.s32 1, %s4586_s20 }
  0x1a   : > { %6731 = sst [smem:[#allocation16_spill]] %s4582_s19  ;;  %s40_s26 = sadd.s32 1, %s4590_s21 }
  0x1b   : > { %6732 = sst [smem:[#allocation17_spill]] %s4586_s20  ;;  %p38_p0 = scmp.ge.s32.totalorder %s4996_s25, 4 }
  0x1c   : > { %6733 = sst [smem:[#allocation18_spill]] %s4590_s21  ;;  %p63_p1 = scmp.eq.s32.totalorder %s4594_s22, 0 }
  0x1d   : > { %p69_p2 = scmp.eq.s32.totalorder %s4992_s23, 0  ;;  %s6964_s26 = smov (!%p38_p0, %s40_s26), %s4590_s21 }
  0x1e   : > { %s5004_s28 = scalar_select %p38_p0, 0, %s4996_s25  }
  0x1f   : > { %p90_p3 = scmp.ne.s32.totalorder %s4562_s14, %s4558_s13  ;;  %p96_p4 = scmp.ne.s32.totalorder %s4558_s13, %s4554_s12 }
  0x20   : > { %p282_p5 = scmp.eq.s32.totalorder %s4992_s23, 7  ;;  %p288_p7 = scmp.eq.s32.totalorder %s2773_s24, 7 }
  0x21   : > { %p5018_p6 = por %p90_p3, %p63_p1  ;;  %p5024_p8 = por %p96_p4, %p69_p2 }
  0x22   : > { %p5028_p9 = por %p282_p5, %p90_p3  ;;  %p5032_p10 = por %p288_p7, %p96_p4 }
  0x23   : > { %s6735_s27 = scalar_select %p5024_p8, 1, 0 }
  0x24   : > { %s6737_s7 = scalar_select %p5028_p9, 1, 0 }
  0x25   : > { %6736 = sst [smem:[#allocation19_spill]] %s6735_s27  ;;  %p6704_p11 = scmp.lt.s32.totalorder %s4594_s22, 8 }
  0x26   : > { %6738 = sst [smem:[#allocation20_spill]] %s6737_s7  ;;  %s5038_s12 = sshll.u32 %s4590_s21, 2 }
  0x27   : > { %s6739_s29 = scalar_select %p5032_p10, 1, 0 }
  0x28   : > { %s350_s24 = sand.u32 1, %s4594_s22   ;;  %s352_s19 = sand.u32 1, %s4562_s14  }
  0x29   : > { %6740 = sst [smem:[#allocation21_spill]] %s6739_s29  ;;  %s2782_s8 = sshll.u32 %s352_s19, 3 }
  0x2a   : > { %s358_s5 = sadd.s32 %s4586_s20, %s5038_s12  ;;  %s354_s7 = scalar_lea.vmem [#allocation5], %s2782_s8 }
  0x2b   : > { %s2784_s6 = sshll.u32 %s358_s5, 3  ;;  %s364_s4 = sshll.u32 %s354_s7, 4  ;;  %s365_s4 = int_to_ptr.vmem [resolvable:$true] %s364_s4 }
  0x2c   : > { %s6741_s1 = sld [smem:[#allocation25_spill]]  ;;  %p3215_p12 = pnand %p6704_p11, %p5018_p6 }
  0x2d   : > { %p2788_p13 = scmp.ge.s32.totalorder %s4594_s22, 1  ;;  %p393_p0 = scmp.lt.s32.totalorder %s4594_s22, 9 }
  0x2e   : > { %s5053_s5 = scalar_lea.sflag [#allocation6], %s350_s24  ;;  %p42_p4 = scmp.ge.s32.totalorder %s6964_s26, 2 }
  0x2f   : > { %p5056_p3 = pnand %p2788_p13, %p393_p0  ;;  %s2775_s7 = sadd.s32 4294967295, %s5004_s28 }
  0x30   : > { %s6966_s26 = smov (%p42_p4, %s6964_s26), 0  ;;  %p48_p6 = scmp.gt.s32.totalorder %s2775_s7, 0 }
  0x31   : > { %6743 = sst [smem:[#allocation22_spill]] %s6966_s26  ;;  %s5068_s8 = ssub.s32 %s4590_s21, %s6966_s26 }
  0x32   : > { %s360_s29 = scalar_lea.hbm %s6741_s1, %s2784_s6  ;;  %s2774_s6 = sadd.s32 4294967295, %s4586_s20 }
  0x33   : > { %s362_s27 = sshll.u32 %s360_s29, 4  ;;  %p45_p5 = scmp.gt.s32.totalorder %s2774_s6, 0  ;;  %s363_s27 = int_to_ptr.hbm [resolvable:$true] %s362_s27 }
  0x34   : > { %3217 = dma.hbm_to_vmem [thread:$0]  (!%p3215_p12), %s363_s27, 128, %s365_s4, %s5053_s5  }
  0x35   : > { %s55_s4 = sadd.s32 1, %s4574_s17  ;;  %s6968_s6 = smov (!%p45_p5, %s2774_s6), 0 }
  0x36   : > { %s6970_s7 = smov (!%p48_p6, %s2775_s7), 0  ;;  %p62_p7 = scmp.ne.s32.totalorder %s4574_s17, %s4570_s16 }
  0x37   : > { %p68_p12 = scmp.ne.s32.totalorder %s4570_s16, %s4566_s15  ;;  %s51_s9 = ssub.s32 %s6968_s6, %s6970_s7 }
  0x38   : > { %s6744_s18 = ssub.s32 %s4586_s20, %s5004_s28  ;;  %s52_s27 = sor.u32 %s51_s9, %s5068_s8 }
  0x39   : > { %s80_s19 = sor.u32 %s6744_s18, %s5068_s8  ;;  %p5082_p13 = por %p63_p1, %p62_p7 }
  0x3a   : > { %p53_p0 = scmp.eq.s32.totalorder %s52_s27, 0  ;;  %p5088_p4 = por %p69_p2, %p68_p12 }
  0x3b   : > { %p81_p5 = scmp.eq.s32.totalorder %s80_s19, 0  ;;  %s326_s15 = sand.u32 1, %s4574_s17  }
  0x3c   : > { %s6746_s24 = scalar_select %p5088_p4, 1, 0 }
  0x3d   : > { %s5094_s7 = scalar_select %p53_p0, %s4574_s17, %s55_s4  }
  0x3e   : > { %6747 = sst [smem:[#allocation23_spill]] %s6746_s24  ;;  %s6748_s9 = sadd.s32 1, %s4562_s14 }
  0x3f   : > { %s5099_s18 = scalar_select %p81_p5, %s4562_s14, %s6748_s9  }
  0x40   : > { %s2778_s1 = sshll.u32 %s326_s15, 3  ;;  %s337_s26 = sadd.s32 %s5038_s12, %s6968_s6 }
  0x41   : > { %s2781_s21 = sshll.u32 %s337_s26, 3  ;;  %s330_s27 = scalar_lea.vmem [#allocation2], %s2778_s1 }
  0x42   : > { %s343_s20 = sshll.u32 %s330_s27, 4  ;;  %s6749_s0 = sld [smem:[#allocation24_spill]]  ;;  %s344_s20 = int_to_ptr.vmem [resolvable:$true] %s343_s20 }
  0x43   : > { %p3212_p6 = pnand %p6704_p11, %p5082_p13  ;;  %s327_s26 = scalar_lea.sflag [#allocation3], %s326_s15 }
  0x44   : > { %p107_p7 = scmp.lt.s32.totalorder %s4996_s25, 3  ;;  %s109_s1 = sadd.s32 1, %s5004_s28 }
  0x45   : > { %p110_p12 = scmp.lt.s32.totalorder %s109_s1, 3  ;;  %s117_s6 = sadd.s32 1, %s4550_s11 }
  0x46   : > { %s6972_s25 = smov (!%p107_p7, %s4996_s25), 3  ;;  %p124_p0 = scmp.ne.s32.totalorder %s4550_s11, %s4546_s10 }
  0x47   : > { %s6974_s1 = smov (!%p110_p12, %s109_s1), 3  ;;  %p130_p5 = scmp.ne.s32.totalorder %s4546_s10, %s4542_s30 }
  0x48   : > { %s339_s24 = scalar_lea.hbm %s6749_s0, %s2781_s21  ;;  %s113_s13 = ssub.s32 %s6972_s25, %s6974_s1 }
  0x49   : > { %s341_s4 = sshll.u32 %s339_s24, 4  ;;  %s373_s21 = sand.u32 1, %s4550_s11   ;;  %s342_s4 = int_to_ptr.hbm [resolvable:$true] %s341_s4 }
  0x4a   : > { %3214 = dma.hbm_to_vmem [thread:$0]  (!%p3212_p6), %s342_s4, 128, %s344_s20, %s327_s26  }
  0x4b   : > { %s114_s29 = sor.u32 %s113_s13, %s5068_s8  ;;  %p5121_p13 = por %p124_p0, %p63_p1 }
  0x4c   : > { %p115_p6 = scmp.eq.s32.totalorder %s114_s29, 0  ;;  %p5127_p11 = por %p130_p5, %p69_p2 }
  0x4d   : > { %s2785_s15 = sshll.u32 %s373_s21, 3  ;;  %s382_s9 = sadd.s32 %s5038_s12, %s6972_s25 }
  0x4e   : > { %s5133_s30 = scalar_select %p115_p6, %s4550_s11, %s117_s6  }
  0x4f   : > { %s2787_s27 = sshll.u32 %s382_s9, 3  ;;  %s6752_s2 = sld [smem:[#allocation26_spill]] }
  0x50   : > { %s375_s26 = scalar_lea.vmem [#allocation7], %s2785_s15  ;;  %p6753_p1 = scmp.lt.s32.totalorder %s4594_s22, 8 }
  0x51   : > { %s388_s1 = sshll.u32 %s375_s26, 4  ;;  %s399_s25 = sand.u32 (!%p5056_p3), 1, %s4570_s16   ;;  %s389_s1 = int_to_ptr.vmem [resolvable:$true] %s388_s1 }
  0x52   : > { %p3218_p2 = pnand %p6753_p1, %p5121_p13  ;;  %s2789_s6 = sshll.u32 (!%p5056_p3), %s399_s25, 3 }
  0x53   : > { %397 = sbr.rel (%p5056_p3) target bundleno = 2462 (0x99e), region = 56  ;;  %s400_s21 = scalar_lea.sflag (!%p5056_p3), [#allocation3], %s399_s25 }
  0x54   : > { %s403_s29 = scalar_lea.vmem (!%p5056_p3), [#allocation2], %s2789_s6 }
  0x55   : > { %s384_s8 = scalar_lea.hbm %s6752_s2, %s2787_s27 }
  0x56   : > { %s386_s13 = sshll.u32 %s384_s8, 4  ;;  %s387_s13 = int_to_ptr.hbm [resolvable:$true] %s386_s13 }
  0x57   : > { %3220 = dma.hbm_to_vmem [thread:$0]  (!%p3218_p2), %s387_s13, 128, %s389_s1, %s5053_s5  }
  0x58   : > { %4525 = dma.done.wait (%p5088_p4), %s400_s21, 128  }
  0x59   : > { %4527 = vsyncadd (%p5088_p4), %s400_s21, 4294967168  ;;  %s6755_s15 = sld [smem:[#allocation14_spill]]  ;;  %s409_s9 = sand.u32 1, %s4992_s23  }
  0x5a   : > { %s410_s27 = scalar_lea.sflag [#allocation6], %s409_s9 }
  0x5f   : > { %s6713_s5 = sand.u32 1, %s6755_s15  }
  0x60   : > { %s5154_s3 = sshll.u32 %s6713_s5, 3 }
  0x61   : > { %s413_s19 = scalar_lea.vmem [#allocation5], %s5154_s3 }
  0x62   : > { %4529 = dma.done.wait (%p5024_p8), %s410_s27, 128  }
  0x63   : > { %4531 = vsyncadd (%p5024_p8), %s410_s27, 4294967168  ;;  %s421_s4 = sand.u32 1, %s4546_s10  }
  0x64   : > { %s2791_s8 = sshll.u32 %s421_s4, 3 }
  0x65   : > { %s423_s26 = scalar_lea.vmem [#allocation7], %s2791_s8 }
  0x66   : > { %4533 = dma.done.wait (%p5127_p11), %s410_s27, 128  }
  0x67   : > { %4535 = vsyncadd (%p5127_p11), %s410_s27, 4294967168  ;;  %v4852_v0 = vmov 0   ;;  %vm495_vm0 = vcmask 64512   ;;  %v478_v1 = vld [vmem:[%s403_s29] sm:$0xff]  ;;  %v479_v2 = vld [vmem:[%s413_s19] sm:$0xff]  ;;  %s6757_s23 = sld [smem:[#allocation15_spill]]  ;;  %v571_v22 = vlaneseq }
  0x68   : > { %3934 = vset.pattern.permute.xlu0 %v4852_v0  ;;  %v480_v3 = vld [vmem:[%s423_s26] sm:$0xff]  ;;  %517 = vmatpush.msra.mxu0 %v478_v1  ;;  %s6758_s12 = sld [smem:[#allocation27_spill]]  ;;  %s4853_s4 = smov 1   ;;  %v6765_v28 = vmov 0  ;;  %v6773_v32 = vmov 0  ;;  %v4596_v59 = vmov 0  }
  0x69   : > { %540 = vmatpush.msra.mxu1 %v479_v2  ;;  %s6760_s21 = sld [smem:[#allocation28_spill]]  ;;  %563 = vmatpush.msra.mxu2 %v480_v3  ;;  %s4854_s8 = smov 127   ;;  %v5219_v23 = vand.u32 127, %v571_v22  ;;  %v4600_v60 = vmov 0   ;;  %v4604_v61 = vmov 0   ;;  %v4608_v62 = vmov 0  }
  0x6a   : > { %v4612_v63 = vmov 0   ;;  %v4616_v1 = vmov 0   ;;  %v4620_v2 = vmov 0   ;;  %v4624_v3 = vmov 0  }
  0x6b   : > { %v573_v24 = vadd.s32 128, %v5219_v23  ;;  %vm6706_vm15 = vcmp.lt.s32.totalorder %v5219_v23, 1 }
  0x6d   : > { %p475_p8 = scmp.eq.s32.totalorder %s6757_s23, 0  ;;  %p476_p11 = scmp.eq.s32.totalorder %s6757_s23, 3  ;;  %vm576_vm2 = vcmp.lt.s32.totalorder %v573_v24, 129  ;;  %vm585_vm3 = vcmp.lt.s32.totalorder %v573_v24, 130  ;;  %vm591_vm4 = vcmp.lt.s32.totalorder %v573_v24, 132  ;;  %vm597_vm6 = vcmp.gt.s32.totalorder %v573_v24, 254 }
  0x6e   : > { %s6759_s25 = smov %s6758_s12  ;;  %v481_v4 = vld [vmem:[%s6758_s12] sm:$0xff]  ;;  %vm606_vm9 = vcmp.gt.s32.totalorder %v573_v24, 253  ;;  %vm612_vm11 = vcmp.gt.s32.totalorder %v573_v24, 251 }
  0x6f   : > { %s6761_s24 = smov %s6760_s21  ;;  %v483_v5 = vld [vmem:[%s6760_s21] sm:$0xff]  ;;  %2793 = vmatmul.msk.f32.vlgmr.msra.gmra.mxu0 %vm495_vm0, %v481_v4  ;;  %2795 = vmatmul.msk.f32.vlgmr.msra.gmra.mxu1 %vm495_vm0, %v481_v4  ;;  %v482_v6 = vld [vmem:[%s6759_s25 + $0x8] sm:$0xff]  ;;  %p5191_p3 = por %p476_p11, %p475_p8 }
  0x70   : > { %2797 = vmatmul.msk.f32.vlgmr.msra.gmra.mxu2 %vm495_vm0, %v481_v4  ;;  %487 = vperm.xlu0 %3934, %v483_v5   ;;  %v484_v7 = vld [vmem:[%s6761_s24 + $0x8] sm:$0xff]  ;;  %s578_s26 = scalar_select %p475_p8, 1, 0  ;;  %v4628_v4 = vmov 0   ;;  %v4632_v5 = vmov 0  }
  0x71   : > { %s599_s1 = scalar_select %p476_p11, 1, 0 }
  0x72   : > { %v579_v25 = vstv %s578_s26 }
  0x73   : > { %v600_v26 = vstv %s599_s1  ;;  %vm5222_vm1 = vcmp.eq.s32.totalorder %v579_v25, 1 }
  0x74   : > { %vm5228_vm5 = vmand %vm5222_vm1, %vm576_vm2  ;;  %vm5232_vm7 = vcmp.eq.s32.totalorder %v600_v26, 1 }
  0x75   : > { %v6766_v28 = vsel %vm5228_vm5, 4294967295, %v6765_v28  ;;  %vm5238_vm8 = vmand %vm5222_vm1, %vm585_vm3 }
  0x76   : > { %vm5244_vm10 = vmand %vm5222_vm1, %vm591_vm4 }
  0x77   : > { %2794 = vmatmul.msk.f32.gmra.mxu0 %vm495_vm0, %v482_v6  ;;  %2796 = vmatmul.msk.f32.gmra.mxu1 %vm495_vm0, %v482_v6  ;;  %vm5250_vm12 = vmand %vm5232_vm7, %vm597_vm6 }
  0x78   : > { %2798 = vmatmul.msk.f32.gmra.mxu2 %vm495_vm0, %v482_v6  ;;  %492 = vperm.xlu0 %3934, %v484_v7   ;;  %v6774_v32 = vsel %vm5250_vm12, 4294967295, %v6773_v32  ;;  %vm5256_vm13 = vmand %vm5232_vm7, %vm606_vm9  ;;  %vm6705_vm0 = vcmp.lt.s32.totalorder %v5219_v23, 127  ;;  %v4636_v6 = vmov 0   ;;  %v4640_v7 = vmov 0  }
  0x79   : > { %vm5262_vm14 = vmand %vm5232_vm7, %vm612_vm11 }
  0xe2   : > { %v488_v8 = vpop.permute.xlu0 %487 }
  0xea   : > { %v493_v16 = vpop.permute.xlu0 %492 }
  0xec   : > { %v519_v9 = vpop.f32.mrf.mxu0  ;;  %v542_v11 = vpop.f32.mrf.mxu1 }
  0xed   : > { %v520_v10 = vadd.f32 %v519_v9, %v488_v8  ;;  %v5195_v12 = vadd.f32 %v542_v11, %v488_v8  ;;  %v4856_v9 = vmov (%p5191_p3), 0  }
  0xee   : > { %3935 = vset.pattern.permute.xlu0 (%p5191_p3), %v4856_v9 }
  0xef   : > { %617 = vrot.lane.b32.xlu1 %v520_v10, %s4853_s4  ;;  %621 = vrot.lane.b32.xlu2 %v5195_v12, %s4853_s4 }
  0xf3   : > { %v565_v13 = vpop.f32.mrf.mxu2 }
  0xf4   : > { %v566_v14 = vadd.f32 %v565_v13, %v488_v8  ;;  %v522_v15 = vpop.f32.mrf.mxu0  ;;  %v545_v17 = vpop.f32.mrf.mxu1  ;;  %v4855_v8 = vmov (%p5191_p3), 127  }
  0xf5   : > { %v523_v18 = vadd.f32 %v522_v15, %v493_v16  ;;  %v5204_v19 = vadd.f32 %v545_v17, %v493_v16  ;;  %3936 = vset.pattern.permute.xlu1 (%p5191_p3), %v4855_v8 }
  0xf6   : > { %625 = vrot.lane.b32.xlu0 %v566_v14, %s4853_s4 }
  0xf7   : > { %640 = vrot.lane.b32.xlu1 %v5195_v12, %s4854_s8  ;;  %636 = vrot.lane.b32.xlu2 %v520_v10, %s4854_s8 }
  0xfb   : > { %v568_v20 = vpop.f32.mrf.mxu2 }
  0xfc   : > { %v569_v21 = vadd.f32 %v568_v20, %v493_v16 }
  0xfe   : > { %638 = vrot.lane.b32.xlu0 %v523_v18, %s4854_s8 }
  0xff   : > { %619 = vrot.lane.b32.xlu1 %v523_v18, %s4853_s4  ;;  %623 = vrot.lane.b32.xlu2 %v5204_v19, %s4853_s4 }
 0x106   : > { %644 = vrot.lane.b32.xlu0 %v566_v14, %s4854_s8 }
 0x107   : > { %627 = vrot.lane.b32.xlu1 %v569_v21, %s4853_s4  ;;  %642 = vrot.lane.b32.xlu2 %v5204_v19, %s4854_s8 }
 0x10e   : > { %666 = vperm.xlu0 (%p5191_p3), %3935, %v5195_v12  }
 0x10f   : > { %646 = vrot.lane.b32.xlu1 %v569_v21, %s4854_s8 }
 0x116   : > { %671 = vperm.xlu0 (%p5191_p3), %3935, %v5204_v19  }
 0x117   : > { %687 = vperm.xlu1 (%p5191_p3), %3936, %v5195_v12  }
 0x11e   : > { %3937 = vset.pattern.permute.xlu0 (%p5191_p3), %v4855_v8 }
 0x11f   : > { %691 = vperm.xlu1 (%p5191_p3), %3936, %v5204_v19  }
 0x149   : > { %v622_v35 = vpop.permute.xlu2 %621 }
 0x151   : > { %v637_v36 = vpop.permute.xlu2 %636 }
 0x159   : > { %v624_v39 = vpop.permute.xlu2 %623 }
 0x161   : > { %v618_v37 = vpop.permute.xlu1 %617  ;;  %v643_v45 = vpop.permute.xlu2 %642 }
 0x162   : > { %v5269_v38 = vsel %vm6706_vm15, %v618_v37, %v622_v35 }
 0x168   : > { %v626_v40 = vpop.permute.xlu0 %625 }
 0x169   : > { %v5274_v41 = vsel %vm6706_vm15, %v622_v35, %v626_v40   ;;  %v5278_v42 = vsel %vm6706_vm15, %v626_v40, %v618_v37  ;;  %v641_v43 = vpop.permute.xlu1 %640 }
 0x16a   : > { %v5282_v44 = vsel %vm6705_vm0, %v637_v36, %v641_v43   ;;  %v4633_v5 = vmov (%p5191_p3), %v5274_v41  }
 0x16b   : > { %v4617_v1 = vmov (%p5191_p3), %v5282_v44  }
 0x170   : > { %v639_v46 = vpop.permute.xlu0 %638 }
 0x171   : > { %v5286_v47 = vsel %vm6705_vm0, %v639_v46, %v643_v45   ;;  %v620_v48 = vpop.permute.xlu1 %619 }
 0x172   : > { %v5290_v49 = vsel %vm6706_vm15, %v620_v48, %v624_v39  ;;  %v4605_v61 = vmov (%p5191_p3), %v5286_v47  }
 0x178   : > { %v645_v50 = vpop.permute.xlu0 %644 }
 0x179   : > { %v5294_v51 = vsel %vm6705_vm0, %v641_v43, %v645_v50  ;;  %v5298_v52 = vsel %vm6705_vm0, %v645_v50, %v637_v36  ;;  %v628_v53 = vpop.permute.xlu1 %627 }
 0x17a   : > { %v5302_v54 = vsel %vm6706_vm15, %v624_v39, %v628_v53   ;;  %v5306_v55 = vsel %vm6706_vm15, %v628_v53, %v620_v48 }
 0x17b   : > { %v4621_v2 = vmov (%p5191_p3), %v5302_v54  }
 0x17e   : > { %657 = sbr.rel (!%p5191_p3) target bundleno = 403 (0x193), region = 72 }
 0x180   : > { %v667_v11 = vpop.permute.xlu0 (%p5191_p3), %666 }
 0x181   : > { %v647_v56 = vpop.permute.xlu1 %646  ;;  %v674_v7 = vsel (%p5191_p3), %vm5222_vm1, %v667_v11, %v5278_v42   ;;  %v675_v6 = vsel (%p5191_p3), %vm5228_vm5, %v667_v11, %v5269_v38  }
 0x182   : > { %v5310_v57 = vsel %vm6705_vm0, %v643_v45, %v647_v56  ;;  %v5314_v58 = vsel %vm6705_vm0, %v647_v56, %v639_v46 }
 0x188   : > { %v672_v14 = vpop.permute.xlu0 %671 }
 0x189   : > { %v688_v10 = vpop.permute.xlu1 %687  ;;  %v677_v4 = vsel %vm5222_vm1, %v672_v14, %v5306_v55   ;;  %v678_v3 = vsel %vm5228_vm5, %v672_v14, %v5290_v49  }
 0x18a   : > { %v695_v63 = vsel %vm5250_vm12, %v688_v10, %v5294_v51   ;;  %v696_v62 = vsel %vm5232_vm7, %v688_v10, %v5298_v52  }
 0x191   : > { %v692_v13 = vpop.permute.xlu1 %691 }
 0x192   : > { %v698_v60 = vsel %vm5250_vm12, %v692_v13, %v5310_v57   ;;  %v699_v59 = vsel %vm5232_vm7, %v692_v13, %v5314_v58  }
 0x193 PF: > { %3939 = vset.pattern.permute.xlu1 %v4852_v0  ;;  %s6779_s6 = sld [smem:[#allocation30_spill]]  ;;  %3938 = vset.pattern.permute.xlu0 %v4852_v0  ;;  %vm6707_vm3 = vcmask 261120   ;;  %s4857_s27 = smov 2   ;;  %v4642_v7 = vphi %v4640_v7, %v674_v7   ;;  %v4638_v6 = vphi %v4636_v6, %v675_v6   ;;  %v4634_v5 = vphi %v4632_v5, %v4633_v5   ;;  %v4630_v4 = vphi %v4628_v4, %v677_v4   ;;  %v4626_v3 = vphi %v4624_v3, %v678_v3   ;;  %v4622_v2 = vphi %v4620_v2, %v4621_v2   ;;  %v4618_v1 = vphi %v4616_v1, %v4617_v1   ;;  %v4614_v63 = vphi %v4612_v63, %v695_v63   ;;  %v4610_v62 = vphi %v4608_v62, %v696_v62   ;;  %v4606_v61 = vphi %v4604_v61, %v4605_v61   ;;  %v4602_v60 = vphi %v4600_v60, %v698_v60   ;;  %v4598_v59 = vphi %v4596_v59, %v699_v59  }
 0x194   : > { %s3226_s20 = scalar_select %p5191_p3, 0, 1 }
 0x195   : > { %s6780_s12 = sld [smem:[#allocation29_spill]]  ;;  %s4858_s26 = smov 126  }
 0x196   : > { %v5361_v17 = vstv %s3226_s20 }
 0x197   : > { %vm6708_vm2 = vcmp.ne.s32.totalorder %v5361_v17, 0 }
 0x198   : > { %v2987_v18 = vsel %vm6708_vm2, %v5286_v47, %v4606_v61  ;;  %v2991_v20 = vsel %vm6708_vm2, %v5310_v57, %v4602_v60  ;;  %v2995_v21 = vsel %vm6708_vm2, %v5314_v58, %v4598_v59  ;;  %v2975_v22 = vsel %vm6708_vm2, %v5282_v44, %v4618_v1 }
 0x199   : > { %v727_v15 = vld [vmem:[%s6779_s6] sm:$0xff]  ;;  %v729_v16 = vld [vmem:[%s6779_s6 + $0x10] sm:$0xff]  ;;  %780 = vmatpush.msra.mxu3 %v2987_v18  ;;  %809 = vmatpush.msrb.mxu0 %v2991_v20  ;;  %v2979_v24 = vsel %vm6708_vm2, %v5294_v51, %v4614_v63  ;;  %v2983_v25 = vsel %vm6708_vm2, %v5298_v52, %v4610_v62  ;;  %v728_v26 = vld [vmem:[%s6779_s6 + $0x8] sm:$0xff]  ;;  %v2963_v35 = vsel %vm6708_vm2, %v5306_v55, %v4630_v4 }
 0x19a   : > { %737 = vperm.xlu1 %3939, %v727_v15   ;;  %747 = vperm.xlu0 %3938, %v729_v16   ;;  %v2967_v36 = vsel %vm6708_vm2, %v5290_v49, %v4626_v3  ;;  %v2971_v37 = vsel %vm6708_vm2, %v5302_v54, %v4622_v2  ;;  %v730_v39 = vld [vmem:[%s6779_s6 + $0x18] sm:$0xff]  ;;  %v2951_v40 = vsel %vm6708_vm2, %v5278_v42, %v4642_v7 }
 0x19b   : > { %838 = vmatpush.msrb.mxu1 %v2995_v21  ;;  %781 = vmatpush.msra.mxu3 %v2975_v22  ;;  %v2955_v43 = vsel %vm6708_vm2, %v5269_v38, %v4638_v6  ;;  %v2959_v44 = vsel %vm6708_vm2, %v5274_v41, %v4634_v5  ;;  %v731_v45 = vld [vmem:[%s6780_s12] sm:$0xff]  ;;  %v732_v38 = vld [vmem:[%s6780_s12 + $0x8] sm:$0xff]  ;;  %v733_v41 = vld [vmem:[%s6780_s12 + $0x10] sm:$0xff] }
 0x19c   : > { %810 = vmatpush.msrb.mxu0 %v2979_v24  ;;  %v734_v42 = vld [vmem:[%s6780_s12 + $0x18] sm:$0xff] }
 0x19d   : > { %839 = vmatpush.msrb.mxu1 %v2983_v25  ;;  %782 = vmatpush.msra.mxu3 %v2963_v35 }
 0x19e   : > { %811 = vmatpush.msrb.mxu0 %v2967_v36 }
 0x19f   : > { %840 = vmatpush.msrb.mxu1 %v2971_v37  ;;  %783 = vmatpush.msra.mxu3 %v2951_v40 }
 0x1a0   : > { %812 = vmatpush.msrb.mxu0 %v2955_v43  ;;  %2799 = vmatmul.msk.f32.vlgmr.msra.gmra.mxu3 %vm6707_vm3, %v731_v45 }
 0x1a1   : > { %841 = vmatpush.msrb.mxu1 %v2959_v44  ;;  %2803 = vmatmul.msk.f32.vlgmr.msrb.gmra.mxu0 %vm6707_vm3, %v731_v45 }
 0x1a2   : > { %742 = vperm.xlu1 %3939, %v728_v26   ;;  %752 = vperm.xlu0 %3938, %v730_v39  }
 0x1a3   : > { %2807 = vmatmul.msk.f32.vlgmr.msrb.gmra.mxu1 %vm6707_vm3, %v731_v45 }
 0x1a8   : > { %2800 = vmatmul.msk.f32.gmra.mxu3 %vm6707_vm3, %v732_v38 }
 0x1a9   : > { %2804 = vmatmul.msk.f32.gmra.mxu0 %vm6707_vm3, %v732_v38 }
 0x1ab   : > { %2808 = vmatmul.msk.f32.gmra.mxu1 %vm6707_vm3, %v732_v38 }
 0x1b0   : > { %2801 = vmatmul.msk.f32.gmra.mxu3 %vm6707_vm3, %v733_v41 }
 0x1b1   : > { %2805 = vmatmul.msk.f32.gmra.mxu0 %vm6707_vm3, %v733_v41 }
 0x1b3   : > { %2809 = vmatmul.msk.f32.gmra.mxu1 %vm6707_vm3, %v733_v41 }
 0x1b8   : > { %2802 = vmatmul.msk.f32.gmra.mxu3 %vm6707_vm3, %v734_v42 }
 0x1b9   : > { %2806 = vmatmul.msk.f32.gmra.mxu0 %vm6707_vm3, %v734_v42 }
 0x1bb   : > { %2810 = vmatmul.msk.f32.gmra.mxu1 %vm6707_vm3, %v734_v42 }
 0x20c   : > { %v748_v51 = vpop.permute.xlu0 %747  ;;  %v738_v16 = vpop.permute.xlu1 %737 }
 0x214   : > { %v753_v61 = vpop.permute.xlu0 %752 }
 0x21e   : > { %v814_v46 = vpop.f32.mrf.mxu0 }
 0x21f   : > { %v815_v24 = vadd.f32 %v814_v46, %v738_v16 }
 0x220   : > { %v843_v47 = vpop.f32.mrf.mxu1 }
 0x221   : > { %v844_v25 = vadd.f32 %v843_v47, %v738_v16 }
 0x223   : > { %v785_v48 = vpop.f32.mrf.mxu3 }
 0x224   : > { %v5441_v36 = vadd.f32 %v785_v48, %v738_v16 }
 0x226   : > { %v5430_v49 = vpop.f32.mrf.mxu0 }
 0x228   : > { %v5432_v50 = vpop.f32.mrf.mxu1 }
 0x22b   : > { %v5434_v52 = vpop.f32.mrf.mxu3 }
 0x22e   : > { %v820_v53 = vpop.f32.mrf.mxu0 }
 0x22f   : > { %v821_v55 = vadd.f32 %v820_v53, %v748_v51 }
 0x230   : > { %v849_v54 = vpop.f32.mrf.mxu1 }
 0x231   : > { %v850_v56 = vadd.f32 %v849_v54, %v748_v51  ;;  %v2812_v57 = vmul.f32 -1.442695, %v821_v55 }
 0x233   : > { %v2813_v58 = vmul.f32 -1.442695, %v850_v56  ;;  %3940 = vpow2.f32 %v2812_v57  ;;  %v791_v59 = vpop.f32.mrf.mxu3 }
 0x234   : > { %v792_v60 = vadd.f32 %v791_v59, %v748_v51 }
 0x235   : > { %3942 = vpow2.f32 %v2813_v58 }
 0x236   : > { %v2811_v62 = vmul.f32 -1.442695, %v792_v60  ;;  %v823_v63 = vpop.f32.mrf.mxu0 }
 0x237   : > { %v824_v2 = vadd.f32 %v823_v63, %v753_v61 }
 0x238   : > { %v852_v1 = vpop.f32.mrf.mxu1  ;;  %3944 = vpow2.f32 %v2811_v62 }
 0x239   : > { %v853_v3 = vadd.f32 %v852_v1, %v753_v61  ;;  %v3941_v4 = vpop.eup %3940  ;;  %v2815_v5 = vmul.f32 -1.442695, %v824_v2 }
 0x23a   : > { %v874_v7 = vadd.f32 1.0, %v3941_v4 }
 0x23b   : > { %v3943_v6 = vpop.eup %3942  ;;  %v2816_v8 = vmul.f32 -1.442695, %v853_v3  ;;  %3946 = vpow2.f32 %v2815_v5  ;;  %v794_v10 = vpop.f32.mrf.mxu3 }
 0x23c   : > { %v875_v9 = vadd.f32 1.0, %v3943_v6  ;;  %3948 = vrcp.f32 %v874_v7  ;;  %v795_v11 = vadd.f32 %v794_v10, %v753_v61  ;;  %v903_v39 = vand.u32 2147483647, %v874_v7 }
 0x23d   : > { %vm899_vm4 = vweird.f32 %v874_v7  ;;  %v905_v42 = vand.u32 2147483648, %v874_v7 }
 0x23e   : > { %3950 = vrcp.f32 %v875_v9  ;;  %v3945_v13 = vpop.eup %3944  ;;  %v2814_v14 = vmul.f32 -1.442695, %v795_v11  ;;  %v918_v43 = vand.u32 2147483647, %v875_v9  ;;  %vm914_vm6 = vweird.f32 %v875_v9  ;;  %v743_v11 = vpop.permute.xlu1 %742 }
 0x23f   : > { %3952 = vpow2.f32 %v2816_v8  ;;  %v5436_v15 = vadd.f32 1.0, %v3945_v13  ;;  %v920_v41 = vand.u32 2147483648, %v875_v9  ;;  %vm5450_vm0 = vcmp.eq.f32.partialorder %v903_v39, 8.507059e+37 }
 0x240   : > { %3954 = vpow2.f32 %v2814_v14  ;;  %vm5455_vm15 = vcmp.eq.f32.partialorder %v918_v43, 8.507059e+37  ;;  %v906_v61 = vor.u32 1.1754944e-38, %v905_v42  ;;  %v818_v39 = vadd.f32 %v5430_v49, %v743_v11 }
 0x241   : > { %v3947_v18 = vpop.eup %3946  ;;  %3956 = vrcp.f32 %v5436_v15  ;;  %v890_v57 = vand.u32 2147483648, %v5436_v15  ;;  %v921_v60 = vor.u32 1.1754944e-38, %v920_v41  ;;  %vm884_vm5 = vweird.f32 %v5436_v15 }
 0x242   : > { %v3949_v20 = vpop.eup %3948  ;;  %v5439_v21 = vadd.f32 1.0, %v3947_v18  ;;  %v888_v2 = vand.u32 2147483647, %v5436_v15 }
 0x243   : > { %v895_v26 = vmul.f32 %v3949_v20, %v874_v7  ;;  %vm900_vm9 = vweird.f32 %v3949_v20  ;;  %v891_v10 = vor.u32 1.1754944e-38, %v890_v57 }
 0x244   : > { %v3951_v22 = vpop.eup %3950  ;;  %3958 = vrcp.f32 %v5439_v21  ;;  %vm901_vm3 = vmor %vm899_vm4, %vm900_vm9  ;;  %v950_v18 = vand.u32 2147483648, %v5439_v21 }
 0x245   : > { %v3953_v35 = vpop.eup %3952  ;;  %v910_v37 = vmul.f32 %v3951_v22, %v875_v9  ;;  %v896_v44 = vsub.f32 1.0, %v895_v26  ;;  %vm915_vm11 = vweird.f32 %v3951_v22 }
 0x246   : > { %v5444_v40 = vadd.f32 1.0, %v3953_v35  ;;  %v3955_v45 = vpop.eup %3954  ;;  %vm916_vm2 = vmor %vm914_vm6, %vm915_vm11 }
 0x247   : > { %v911_v38 = vsub.f32 1.0, %v910_v37  ;;  %v3957_v46 = vpop.eup %3956  ;;  %v5447_v47 = vadd.f32 1.0, %v3955_v45  ;;  %v897_v48 = vmul.f32 %v3949_v20, %v896_v44  ;;  %v951_v44 = vor.u32 1.1754944e-38, %v950_v18 }
 0x248   : > { %3960 = vrcp.f32 %v5444_v40  ;;  %v880_v51 = vmul.f32 %v3957_v46, %v5436_v15  ;;  %vm885_vm12 = vweird.f32 %v3957_v46  ;;  %v965_v42 = vand.u32 2147483648, %v5444_v40 }
 0x249   : > { %v912_v53 = vmul.f32 %v3951_v22, %v911_v38  ;;  %3962 = vrcp.f32 %v5447_v47  ;;  %v898_v56 = vadd.f32 %v3949_v20, %v897_v48  ;;  %vm959_vm9 = vweird.f32 %v5444_v40 }
 0x24a   : > { %v3959_v58 = vpop.eup %3958  ;;  %v881_v62 = vsub.f32 1.0, %v880_v51  ;;  %v933_v54 = vand.u32 2147483647, %v5447_v47 }
 0x24b   : > { %v913_v59 = vadd.f32 %v3951_v22, %v912_v53  ;;  %v940_v63 = vmul.f32 %v3959_v58, %v5439_v21  ;;  %v902_v1 = vsel %vm901_vm3, %v3949_v20, %v898_v56  ;;  %vm944_vm3 = vweird.f32 %v5439_v21 }
 0x24c   : > { %v907_v4 = vsel %vm5450_vm0, %v906_v61, %v902_v1  ;;  %v882_v5 = vmul.f32 %v3957_v46, %v881_v62  ;;  %vm945_vm0 = vweird.f32 %v3959_v58  ;;  %v789_v61 = vadd.f32 %v5434_v52, %v743_v11 }
 0x24d   : > { %v917_v3 = vsel %vm916_vm2, %v3951_v22, %v913_v59  ;;  %v5469_v8 = vmul.f32 %v907_v4, %v815_v24  ;;  %v941_v9 = vsub.f32 1.0, %v940_v63  ;;  %vm889_vm2 = vcmp.eq.f32.partialorder %v888_v2, 8.507059e+37 }
 0x24e   : > { %v3961_v6 = vpop.eup %3960  ;;  %v922_v7 = vsel %vm5455_vm15, %v921_v60, %v917_v3  ;;  %v883_v16 = vadd.f32 %v3957_v46, %v882_v5  ;;  %vm886_vm15 = vmor %vm884_vm5, %vm885_vm12  ;;  %v847_v60 = vadd.f32 %v5432_v50, %v743_v11 }
 0x24f   : > { %v955_v13 = vmul.f32 %v3961_v6, %v5444_v40  ;;  %v5472_v14 = vmul.f32 %v922_v7, %v844_v25  ;;  %v3963_v20 = vpop.eup %3962  ;;  %981 = vrot.lane.b32.xlu0 %v5469_v8, %s4857_s27  ;;  %v5479_v22 = vadd.f32 %v5469_v8, %v5195_v12  ;;  %v942_v24 = vmul.f32 %v3959_v58, %v941_v9  ;;  %vm946_vm5 = vmor %vm944_vm3, %vm945_vm0 }
 0x250   : > { %v948_v25 = vand.u32 2147483647, %v5439_v21  ;;  %v925_v26 = vmul.f32 %v3963_v20, %v5447_v47  ;;  %v887_v35 = vsel %vm886_vm15, %v3957_v46, %v883_v16  ;;  %vm960_vm4 = vweird.f32 %v3961_v6 }
 0x251   : > { %985 = vrot.lane.b32.xlu2 %v5472_v14, %s4857_s27  ;;  %v956_v37 = vsub.f32 1.0, %v955_v13  ;;  %v892_v12 = vsel %vm889_vm2, %v891_v10, %v887_v35  ;;  %v943_v43 = vadd.f32 %v3959_v58, %v942_v24  ;;  %vm930_vm6 = vweird.f32 %v3963_v20  ;;  %vm961_vm11 = vmor %vm959_vm9, %vm960_vm4 }
 0x252   : > { %v969_v15 = vmul.f32 %v892_v12, %v5441_v36  ;;  %v926_v38 = vsub.f32 1.0, %v925_v26  ;;  %vm949_vm12 = vcmp.eq.f32.partialorder %v948_v25, 8.507059e+37  ;;  %v963_v21 = vand.u32 2147483647, %v5444_v40 }
 0x253   : > { %v957_v45 = vmul.f32 %v3961_v6, %v956_v37  ;;  %v947_v41 = vsel %vm946_vm5, %v3959_v58, %v943_v43  ;;  %v935_v36 = vand.u32 2147483648, %v5447_v47  ;;  %vm929_vm15 = vweird.f32 %v5447_v47 }
 0x254   : > { %996 = vrot.lane.b32.xlu1 %v969_v15, %s4858_s26  ;;  %v952_v46 = vsel %vm949_vm12, %v951_v44, %v947_v41  ;;  %v927_v48 = vmul.f32 %v3963_v20, %v926_v38  ;;  %vm931_vm0 = vmor %vm929_vm15, %vm930_vm6  ;;  %v966_v40 = vor.u32 1.1754944e-38, %v965_v42  ;;  %vm964_vm2 = vcmp.eq.f32.partialorder %v963_v21, 8.507059e+37 }
 0x255   : > { %v958_v49 = vadd.f32 %v3961_v6, %v957_v45  ;;  %v5493_v51 = vmul.f32 %v952_v46, %v818_v39  ;;  %v936_v58 = vor.u32 1.1754944e-38, %v935_v36  ;;  %vm934_vm3 = vcmp.eq.f32.partialorder %v933_v54, 8.507059e+37 }
 0x256   : > { %v928_v53 = vadd.f32 %v3963_v20, %v927_v48  ;;  %vm6717_vm5 = vcmp.lt.s32.totalorder %v5219_v23, 2  ;;  %vm6716_vm12 = vcmp.lt.s32.totalorder %v5219_v23, 126  ;;  %v4644_v12 = vmov 0  }
 0x257   : > { %1000 = vrot.lane.b32.xlu0 %v5469_v8, %s4858_s26  ;;  %v5504_v55 = vadd.f32 %v5493_v51, %v5204_v19  ;;  %v962_v56 = vsel %vm961_vm11, %v3961_v6, %v958_v49  ;;  %v4648_v43 = vmov 0   ;;  %v4656_v44 = vmov 0  }
 0x258   : > { %v932_v57 = vsel %vm931_vm0, %v3963_v20, %v928_v53  ;;  %v967_v59 = vsel %vm964_vm2, %v966_v40, %v962_v56  ;;  %v4660_v45 = vmov 0   ;;  %v4664_v38 = vmov 0  }
 0x259   : > { %977 = vrot.lane.b32.xlu2 %v969_v15, %s4857_s27  ;;  %v937_v47 = vsel %vm934_vm3, %v936_v58, %v932_v57  ;;  %v974_v19 = vmul.f32 %v967_v59, %v847_v60  ;;  %v4652_v15 = vmov 0   ;;  %v4668_v41 = vmov 0  }
 0x25a   : > { %v972_v62 = vmul.f32 %v937_v47, %v789_v61  ;;  %v4672_v42 = vmov 0   ;;  %v4676_v46 = vmov 0   ;;  %v4680_v49 = vmov 0  }
 0x25b   : > { %v4684_v48 = vmov 0   ;;  %v4688_v21 = vmov 0   ;;  %v4859_v36 = vmov (%p5191_p3), 127   ;;  %v4860_v53 = vmov (%p5191_p3), 0  }
 0x25c   : > { %983 = vrot.lane.b32.xlu1 %v5493_v51, %s4857_s27  ;;  %3964 = vset.pattern.permute.xlu0 (%p5191_p3), %v4860_v53 }
 0x25d   : > { %3965 = vset.pattern.permute.xlu1 (%p5191_p3), %v4859_v36 }
 0x25f   : > { %987 = vrot.lane.b32.xlu0 %v974_v19, %s4857_s27 }
 0x261   : > { %979 = vrot.lane.b32.xlu2 %v972_v62, %s4857_s27 }
 0x264   : > { %1002 = vrot.lane.b32.xlu1 %v5493_v51, %s4858_s26 }
 0x267   : > { %1006 = vrot.lane.b32.xlu0 %v974_v19, %s4858_s26 }
 0x269   : > { %998 = vrot.lane.b32.xlu2 %v972_v62, %s4858_s26 }
 0x26c   : > { %1047 = vperm.xlu1 (%p5191_p3), %3965, %v5469_v8  }
 0x26f   : > { %1026 = vperm.xlu0 (%p5191_p3), %3964, %v5469_v8  }
 0x271   : > { %1004 = vrot.lane.b32.xlu2 %v5472_v14, %s4858_s26 }
 0x274   : > { %1051 = vperm.xlu1 (%p5191_p3), %3965, %v5493_v51  }
 0x277   : > { %1031 = vperm.xlu0 (%p5191_p3), %3964, %v5493_v51  }
 0x27f   : > { %3966 = vset.pattern.permute.xlu0 (%p5191_p3), %v4859_v36 }
 0x2ab   : > { %v986_v50 = vpop.permute.xlu2 %985 }
 0x2b3   : > { %v978_v52 = vpop.permute.xlu2 %977 }
 0x2b4   : > { %v5522_v63 = vsel %vm6717_vm5, %v986_v50, %v978_v52 }
 0x2bb   : > { %v980_v1 = vpop.permute.xlu2 %979 }
 0x2c1   : > { %v982_v2 = vpop.permute.xlu0 %981 }
 0x2c2   : > { %v5526_v3 = vsel %vm6717_vm5, %v982_v2, %v986_v50   ;;  %v5530_v4 = vsel %vm6717_vm5, %v978_v52, %v982_v2 }
 0x2c3   : > { %v999_v5 = vpop.permute.xlu2 %998  ;;  %v4681_v49 = vmov (%p5191_p3), %v5526_v3  }
 0x2c6   : > { %v997_v6 = vpop.permute.xlu1 %996 }
 0x2c9   : > { %v1001_v7 = vpop.permute.xlu0 %1000 }
 0x2ca   : > { %v5535_v10 = vsel %vm6716_vm12, %v997_v6, %v1001_v7  }
 0x2cb   : > { %v1005_v9 = vpop.permute.xlu2 %1004  ;;  %v4665_v38 = vmov (%p5191_p3), %v5535_v10  }
 0x2cc   : > { %v5539_v11 = vsel %vm6716_vm12, %v1001_v7, %v1005_v9  ;;  %v5543_v13 = vsel %vm6716_vm12, %v1005_v9, %v997_v6 }
 0x2ce   : > { %v984_v14 = vpop.permute.xlu1 %983 }
 0x2cf   : > { %v5547_v16 = vsel %vm6717_vm5, %v980_v1, %v984_v14 }
 0x2d1   : > { %v988_v18 = vpop.permute.xlu0 %987 }
 0x2d2   : > { %v5551_v20 = vsel %vm6717_vm5, %v984_v14, %v988_v18   ;;  %v5555_v24 = vsel %vm6717_vm5, %v988_v18, %v980_v1 }
 0x2d3   : > { %v4669_v41 = vmov (%p5191_p3), %v5551_v20  }
 0x2d6   : > { %v1003_v25 = vpop.permute.xlu1 %1002  ;;  %1017 = sbr.rel (!%p5191_p3) target bundleno = 747 (0x2eb), region = 80 }
 0x2d7   : > { %v5559_v26 = vsel %vm6716_vm12, %v999_v5, %v1003_v25  }
 0x2d8   : > { %v4653_v15 = vmov (%p5191_p3), %v5559_v26  }
 0x2d9   : > { %v1007_v35 = vpop.permute.xlu0 %1006 }
 0x2da   : > { %v5563_v37 = vsel %vm6716_vm12, %v1003_v25, %v1007_v35  ;;  %v5567_v39 = vsel %vm6716_vm12, %v1007_v35, %v999_v5 }
 0x2de   : > { %v1048_v54 = vpop.permute.xlu1 %1047 }
 0x2df   : > { %v1055_v45 = vsel %vm5256_vm13, %v1048_v54, %v5539_v11   ;;  %v1056_v44 = vsel %vm5232_vm7, %v1048_v54, %v5543_v13  }
 0x2e1   : > { %v1027_v56 = vpop.permute.xlu0 %1026 }
 0x2e2   : > { %v1034_v21 = vsel %vm5222_vm1, %v1027_v56, %v5522_v63   ;;  %v1035_v48 = vsel %vm5238_vm8, %v1027_v56, %v5530_v4  }
 0x2e6   : > { %v1052_v8 = vpop.permute.xlu1 %1051 }
 0x2e7   : > { %v1058_v43 = vsel %vm5256_vm13, %v1052_v8, %v5563_v37   ;;  %v1059_v12 = vsel %vm5232_vm7, %v1052_v8, %v5567_v39  }
 0x2e9   : > { %v1032_v51 = vpop.permute.xlu0 %1031 }
 0x2ea   : > { %v1037_v46 = vsel %vm5222_vm1, %v1032_v51, %v5555_v24   ;;  %v1038_v42 = vsel %vm5238_vm8, %v1032_v51, %v5547_v16  }
 0x2eb PF: > { %vm6785_vm4 = vcmp.ne.s32.totalorder %v5361_v17, 0  ;;  %3968 = vset.pattern.permute.xlu1 %v4852_v0  ;;  %s6791_s12 = sld [smem:[#allocation30_spill]]  ;;  %3967 = vset.pattern.permute.xlu0 %v4852_v0  ;;  %v4690_v21 = vphi %v4688_v21, %v1034_v21   ;;  %v4686_v48 = vphi %v4684_v48, %v1035_v48   ;;  %v4682_v49 = vphi %v4680_v49, %v4681_v49   ;;  %v4678_v46 = vphi %v4676_v46, %v1037_v46   ;;  %v4674_v42 = vphi %v4672_v42, %v1038_v42   ;;  %v4670_v41 = vphi %v4668_v41, %v4669_v41   ;;  %v4666_v38 = vphi %v4664_v38, %v4665_v38   ;;  %v4662_v45 = vphi %v4660_v45, %v1055_v45   ;;  %v4658_v44 = vphi %v4656_v44, %v1056_v44   ;;  %v4654_v15 = vphi %v4652_v15, %v4653_v15   ;;  %v4650_v43 = vphi %v4648_v43, %v1058_v43   ;;  %v4646_v12 = vphi %v4644_v12, %v1059_v12  }
 0x2ec   : > { %v3036_v40 = vsel %vm6785_vm4, %v5559_v26, %v4654_v15  ;;  %vm6786_vm6 = vmmov %vm6785_vm4  ;;  %s6798_s21 = sld [smem:[#allocation29_spill]] }
 0x2ed   : > { %v3040_v57 = vsel %vm6786_vm6, %v5563_v37, %v4650_v43  ;;  %vm6787_vm9 = vmmov %vm6785_vm4  ;;  %1141 = vmatpush.msrb.mxu2 %v3036_v40 }
 0x2ee   : > { %v3044_v58 = vsel %vm6787_vm9, %v5567_v39, %v4646_v12  ;;  %vm6788_vm11 = vmmov %vm6785_vm4  ;;  %1170 = vmatpush.msrb.mxu3 %v3040_v57 }
 0x2ef   : > { %v3024_v59 = vsel %vm6788_vm11, %v5535_v10, %v4666_v38  ;;  %vm6789_vm15 = vmmov %vm6785_vm4  ;;  %1199 = vmatpush.msra.mxu0 %v3044_v58 }
 0x2f0   : > { %v3028_v60 = vsel %vm6789_vm15, %v5539_v11, %v4662_v45  ;;  %vm6790_vm0 = vmmov %vm6785_vm4  ;;  %1142 = vmatpush.msrb.mxu2 %v3024_v59  ;;  %vm6799_vm15 = vcmask 261120  }
 0x2f1   : > { %v3032_v47 = vsel %vm6790_vm0, %v5543_v13, %v4658_v44  ;;  %v2817_v61 = vld [vmem:[%s6791_s12 + $0x20] sm:$0xff]  ;;  %vm6792_vm2 = vmmov %vm6790_vm0  ;;  %1171 = vmatpush.msrb.mxu3 %v3028_v60  ;;  %v2820_v6 = vld [vmem:[%s6791_s12 + $0x38] sm:$0xff] }
 0x2f2   : > { %v3012_v19 = vsel %vm6792_vm2, %v5555_v24, %v4678_v46  ;;  %vm6793_vm3 = vmmov %vm6790_vm0  ;;  %1200 = vmatpush.msra.mxu0 %v3032_v47  ;;  %1099 = vperm.xlu1 %3968, %v2817_v61   ;;  %v2821_v5 = vld [vmem:[%s6798_s21 + $0x20] sm:$0xff]  ;;  %v2823_v7 = vld [vmem:[%s6798_s21 + $0x30] sm:$0xff] }
 0x2f3   : > { %v3016_v62 = vsel %vm6793_vm3, %v5547_v16, %v4674_v42  ;;  %vm6794_vm4 = vmmov %vm6790_vm0  ;;  %1143 = vmatpush.msrb.mxu2 %v3012_v19  ;;  %v2824_v10 = vld [vmem:[%s6798_s21 + $0x38] sm:$0xff] }
 0x2f4   : > { %v3020_v50 = vsel %vm6794_vm4, %v5551_v20, %v4670_v41  ;;  %vm6795_vm6 = vmmov %vm6790_vm0  ;;  %1172 = vmatpush.msrb.mxu3 %v3016_v62 }
 0x2f5   : > { %v3000_v52 = vsel %vm6795_vm6, %v5522_v63, %v4690_v21  ;;  %vm6796_vm9 = vmmov %vm6790_vm0  ;;  %1201 = vmatpush.msra.mxu0 %v3020_v50  ;;  %v2819_v63 = vld [vmem:[%s6791_s12 + $0x30] sm:$0xff] }
 0x2f6   : > { %v3004_v1 = vsel %vm6796_vm9, %v5530_v4, %v4686_v48  ;;  %vm6797_vm11 = vmmov %vm6790_vm0  ;;  %1144 = vmatpush.msrb.mxu2 %v3000_v52  ;;  %1109 = vperm.xlu0 %3967, %v2819_v63   ;;  %v2822_v4 = vld [vmem:[%s6798_s21 + $0x28] sm:$0xff]  ;;  %s4862_s21 = smov 124  }
 0x2f7   : > { %v3008_v2 = vsel %vm6797_vm11, %v5526_v3, %v4682_v49  ;;  %1173 = vmatpush.msrb.mxu3 %v3004_v1  ;;  %2825 = vmatmul.msk.f32.vlgmr.msrb.gmra.mxu2 %vm6799_vm15, %v2821_v5  ;;  %vm6800_vm0 = vmmov %vm6799_vm15  ;;  %v2818_v3 = vld [vmem:[%s6791_s12 + $0x28] sm:$0xff]  ;;  %s4861_s12 = smov 4  }
 0x2f8   : > { %1202 = vmatpush.msra.mxu0 %v3008_v2  ;;  %2829 = vmatmul.msk.f32.vlgmr.msrb.gmra.mxu3 %vm6800_vm0, %v2821_v5  ;;  %vm6801_vm2 = vmmov %vm6800_vm0 }
 0x2f9   : > { %2833 = vmatmul.msk.f32.vlgmr.msra.gmra.mxu0 %vm6801_vm2, %v2821_v5  ;;  %vm6802_vm3 = vmmov %vm6800_vm0 }
 0x2fa   : > { %1104 = vperm.xlu1 %3968, %v2818_v3   ;;  %vm6803_vm4 = vmmov %vm6800_vm0 }
 0x2fb   : > { %vm6804_vm6 = vmmov %vm6800_vm0 }
 0x2fc   : > { %vm6805_vm9 = vmmov %vm6800_vm0 }
 0x2fd   : > { %vm6806_vm11 = vmmov %vm6800_vm0 }
 0x2fe   : > { %1114 = vperm.xlu0 %3967, %v2820_v6   ;;  %vm6807_vm15 = vmmov %vm6800_vm0 }
 0x2ff   : > { %2826 = vmatmul.msk.f32.gmra.mxu2 %vm6802_vm3, %v2822_v4  ;;  %vm6808_vm2 = vmmov %vm6800_vm0 }
 0x300   : > { %2830 = vmatmul.msk.f32.gmra.mxu3 %vm6803_vm4, %v2822_v4  ;;  %vm6809_vm3 = vmmov %vm6800_vm0 }
 0x301   : > { %2834 = vmatmul.msk.f32.gmra.mxu0 %vm6804_vm6, %v2822_v4 }
 0x307   : > { %2827 = vmatmul.msk.f32.gmra.mxu2 %vm6805_vm9, %v2823_v7 }
 0x308   : > { %2831 = vmatmul.msk.f32.gmra.mxu3 %vm6806_vm11, %v2823_v7 }
 0x309   : > { %2835 = vmatmul.msk.f32.gmra.mxu0 %vm6807_vm15, %v2823_v7 }
 0x30f   : > { %2828 = vmatmul.msk.f32.gmra.mxu2 %vm6800_vm0, %v2824_v10 }
 0x310   : > { %2832 = vmatmul.msk.f32.gmra.mxu3 %vm6808_vm2, %v2824_v10 }
 0x311   : > { %2836 = vmatmul.msk.f32.gmra.mxu0 %vm6809_vm3, %v2824_v10 }
 0x364   : > { %v1100_v52 = vpop.permute.xlu1 %1099 }
 0x368   : > { %v1110_v18 = vpop.permute.xlu0 %1109 }
 0x370   : > { %v1115_v43 = vpop.permute.xlu0 %1114 }
 0x376   : > { %v1204_v9 = vpop.f32.mrf.mxu0 }
 0x377   : > { %v1205_v3 = vadd.f32 %v1204_v9, %v1100_v52 }
 0x37a   : > { %v5677_v11 = vpop.f32.mrf.mxu2 }
 0x37b   : > { %v5679_v13 = vpop.f32.mrf.mxu3 }
 0x37e   : > { %v5681_v14 = vpop.f32.mrf.mxu0 }
 0x382   : > { %v5683_v16 = vpop.f32.mrf.mxu2 }
 0x383   : > { %v5685_v20 = vpop.f32.mrf.mxu3 }
 0x386   : > { %v1210_v24 = vpop.f32.mrf.mxu0 }
 0x387   : > { %v1211_v25 = vadd.f32 %v1210_v24, %v1110_v18 }
 0x389   : > { %v2839_v26 = vmul.f32 -1.442695, %v1211_v25 }
 0x38a   : > { %v1152_v35 = vpop.f32.mrf.mxu2 }
 0x38b   : > { %3969 = vpow2.f32 %v2839_v26  ;;  %v1153_v37 = vadd.f32 %v1152_v35, %v1110_v18  ;;  %v1181_v39 = vpop.f32.mrf.mxu3 }
 0x38c   : > { %v1182_v12 = vadd.f32 %v1181_v39, %v1110_v18 }
 0x38d   : > { %v2837_v15 = vmul.f32 -1.442695, %v1153_v37 }
 0x38e   : > { %v1213_v44 = vpop.f32.mrf.mxu0  ;;  %v2838_v45 = vmul.f32 -1.442695, %v1182_v12 }
 0x38f   : > { %v1214_v38 = vadd.f32 %v1213_v44, %v1115_v43  ;;  %3971 = vpow2.f32 %v2837_v15 }
 0x390   : > { %3973 = vpow2.f32 %v2838_v45 }
 0x391   : > { %v3970_v41 = vpop.eup %3969  ;;  %v2842_v42 = vmul.f32 -1.442695, %v1214_v38 }
 0x392   : > { %v1236_v46 = vadd.f32 1.0, %v3970_v41  ;;  %v1155_v49 = vpop.f32.mrf.mxu2 }
 0x393   : > { %3975 = vpow2.f32 %v2842_v42  ;;  %v1156_v48 = vadd.f32 %v1155_v49, %v1115_v43  ;;  %v1184_v21 = vpop.f32.mrf.mxu3  ;;  %v1147_v42 = vadd.f32 %v5677_v11, %v1100_v52 }
 0x394   : > { %3977 = vrcp.f32 %v1236_v46  ;;  %v1185_v36 = vadd.f32 %v1184_v21, %v1115_v43  ;;  %v1279_v47 = vand.u32 2147483647, %v1236_v46  ;;  %v1281_v19 = vand.u32 2147483648, %v1236_v46 }
 0x395   : > { %v3972_v53 = vpop.eup %3971  ;;  %v2840_v54 = vmul.f32 -1.442695, %v1156_v48  ;;  %vm1275_vm4 = vweird.f32 %v1236_v46  ;;  %v1176_v48 = vadd.f32 %v5679_v13, %v1100_v52 }
 0x396   : > { %v3974_v56 = vpop.eup %3973  ;;  %v5687_v8 = vadd.f32 1.0, %v3972_v53  ;;  %v2841_v51 = vmul.f32 -1.442695, %v1185_v36  ;;  %vm5699_vm9 = vcmp.eq.f32.partialorder %v1279_v47, 8.507059e+37  ;;  %v1282_v18 = vor.u32 1.1754944e-38, %v1281_v19 }
 0x397   : > { %v5689_v40 = vadd.f32 1.0, %v3974_v56  ;;  %3979 = vpow2.f32 %v2840_v54 }
 0x398   : > { %3981 = vrcp.f32 %v5687_v8  ;;  %v1249_v35 = vand.u32 2147483647, %v5687_v8  ;;  %v1251_v9 = vand.u32 2147483648, %v5687_v8  ;;  %vm1245_vm2 = vweird.f32 %v5687_v8 }
 0x399   : > { %v3976_v57 = vpop.eup %3975  ;;  %3983 = vrcp.f32 %v5689_v40  ;;  %v1264_v12 = vand.u32 2147483647, %v5689_v40  ;;  %v1266_v43 = vand.u32 2147483648, %v5689_v40  ;;  %vm1260_vm3 = vweird.f32 %v5689_v40 }
 0x39a   : > { %v3978_v58 = vpop.eup %3977  ;;  %v5693_v59 = vadd.f32 1.0, %v3976_v57  ;;  %3985 = vpow2.f32 %v2841_v51  ;;  %v1252_v36 = vor.u32 1.1754944e-38, %v1251_v9 }
 0x39b   : > { %v1271_v60 = vmul.f32 %v3978_v58, %v1236_v46  ;;  %vm1276_vm6 = vweird.f32 %v3978_v58  ;;  %v1267_v54 = vor.u32 1.1754944e-38, %v1266_v43 }
 0x39c   : > { %3987 = vrcp.f32 %v5693_v59  ;;  %vm1277_vm11 = vmor %vm1275_vm4, %vm1276_vm6 }
 0x39d   : > { %v1272_v61 = vsub.f32 1.0, %v1271_v60  ;;  %v3980_v62 = vpop.eup %3979 }
 0x39e   : > { %v3982_v50 = vpop.eup %3981  ;;  %v5696_v1 = vadd.f32 1.0, %v3980_v62 }
 0x39f   : > { %v1273_v2 = vmul.f32 %v3978_v58, %v1272_v61  ;;  %v3984_v5 = vpop.eup %3983  ;;  %v1241_v63 = vmul.f32 %v3982_v50, %v5687_v8  ;;  %vm1246_vm15 = vweird.f32 %v3982_v50 }
 0x3a0   : > { %v3986_v6 = vpop.eup %3985  ;;  %v1256_v7 = vmul.f32 %v3984_v5, %v5689_v40  ;;  %3989 = vrcp.f32 %v5696_v1  ;;  %vm1261_vm0 = vweird.f32 %v3984_v5  ;;  %vm1247_vm4 = vmor %vm1245_vm2, %vm1246_vm15  ;;  %v1296_v19 = vand.u32 2147483648, %v5696_v1 }
 0x3a1   : > { %v1274_v10 = vadd.f32 %v3978_v58, %v1273_v2  ;;  %v5707_v25 = vadd.f32 1.0, %v3986_v6  ;;  %v1242_v26 = vsub.f32 1.0, %v1241_v63  ;;  %vm1262_vm6 = vmor %vm1260_vm3, %vm1261_vm0  ;;  %v1294_v52 = vand.u32 2147483647, %v5696_v1 }
 0x3a2   : > { %v5705_v24 = vpop.eup %3987  ;;  %v1257_v39 = vsub.f32 1.0, %v1256_v7  ;;  %vm1290_vm0 = vweird.f32 %v5696_v1 }
 0x3a3   : > { %v1278_v37 = vsel %vm1277_vm11, %v3978_v58, %v1274_v10  ;;  %3991 = vrcp.f32 %v5707_v25  ;;  %v1243_v44 = vmul.f32 %v3982_v50, %v1242_v26  ;;  %v1316_v45 = vmul.f32 %v5705_v24, %v5693_v59 }
 0x3a4   : > { %v1283_v15 = vsel %vm5699_vm9, %v1282_v18, %v1278_v37  ;;  %v1258_v41 = vmul.f32 %v3984_v5, %v1257_v39  ;;  %vm1250_vm9 = vcmp.eq.f32.partialorder %v1249_v35, 8.507059e+37  ;;  %vm1265_vm11 = vcmp.eq.f32.partialorder %v1264_v12, 8.507059e+37 }
 0x3a5   : > { %v5718_v38 = vmul.f32 %v1283_v15, %v1205_v3  ;;  %v1244_v46 = vadd.f32 %v3982_v50, %v1243_v44  ;;  %v1317_v51 = vsub.f32 1.0, %v1316_v45  ;;  %v1105_v3 = vpop.permute.xlu1 %1104  ;;  %v1309_v6 = vand.u32 2147483647, %v5707_v25 }
 0x3a6   : > { %v3990_v49 = vpop.eup %3989  ;;  %v1259_v21 = vadd.f32 %v3984_v5, %v1258_v41  ;;  %v1297_v10 = vor.u32 1.1754944e-38, %v1296_v19  ;;  %v1326_v37 = vand.u32 2147483648, %v5693_v59 }
 0x3a7   : > { %1346 = vrot.lane.b32.xlu2 %v5718_v38, %s4861_s12  ;;  %v1286_v53 = vmul.f32 %v3990_v49, %v5696_v1  ;;  %v1248_v11 = vsel %vm1247_vm4, %v3982_v50, %v1244_v46  ;;  %vm1291_vm15 = vweird.f32 %v3990_v49  ;;  %v1318_v2 = vmul.f32 %v5705_v24, %v1317_v51 }
 0x3a8   : > { %v1263_v56 = vsel %vm1262_vm6, %v3984_v5, %v1259_v21  ;;  %v1253_v8 = vsel %vm1250_vm9, %v1252_v36, %v1248_v11  ;;  %v1311_v5 = vand.u32 2147483648, %v5707_v25  ;;  %vm1292_vm3 = vmor %vm1290_vm0, %vm1291_vm15  ;;  %vm1305_vm4 = vweird.f32 %v5707_v25 }
 0x3a9   : > { %v3992_v13 = vpop.eup %3991  ;;  %v1268_v57 = vsel %vm1265_vm11, %v1267_v54, %v1263_v56  ;;  %v1330_v58 = vmul.f32 %v1253_v8, %v1147_v42  ;;  %v1287_v60 = vsub.f32 1.0, %v1286_v53  ;;  %vm1295_vm6 = vcmp.eq.f32.partialorder %v1294_v52, 8.507059e+37 }
 0x3aa   : > { %v1301_v47 = vmul.f32 %v3992_v13, %v5707_v25  ;;  %v5728_v61 = vmul.f32 %v1268_v57, %v1176_v48  ;;  %vm1306_vm2 = vweird.f32 %v3992_v13  ;;  %v1319_v26 = vadd.f32 %v5705_v24, %v1318_v2 }
 0x3ab   : > { %1357 = vrot.lane.b32.xlu1 %v1330_v58, %s4862_s21  ;;  %v1288_v40 = vmul.f32 %v3990_v49, %v1287_v60  ;;  %vm1321_vm9 = vweird.f32 %v5705_v24  ;;  %v1179_v1 = vadd.f32 %v5685_v20, %v1105_v3  ;;  %vm1307_vm11 = vmor %vm1305_vm4, %vm1306_vm2  ;;  %v1312_v35 = vor.u32 1.1754944e-38, %v1311_v5 }
 0x3ac   : > { %1342 = vrot.lane.b32.xlu0 %v5728_v61, %s4861_s12  ;;  %v5736_v62 = vadd.f32 %v5728_v61, %v5479_v22  ;;  %v1302_v50 = vsub.f32 1.0, %v1301_v47  ;;  %v1150_v22 = vadd.f32 %v5683_v16, %v1105_v3  ;;  %vm1310_vm15 = vcmp.eq.f32.partialorder %v1309_v6, 8.507059e+37 }
 0x3ad   : > { %v1289_v63 = vadd.f32 %v3990_v49, %v1288_v40  ;;  %vm1320_vm0 = vweird.f32 %v5693_v59  ;;  %v1324_v16 = vand.u32 2147483647, %v5693_v59  ;;  %v1327_v15 = vor.u32 1.1754944e-38, %v1326_v37 }
 0x3ae   : > { %v1303_v4 = vmul.f32 %v3992_v13, %v1302_v50  ;;  %v1208_v59 = vadd.f32 %v5681_v14, %v1105_v3  ;;  %vm6715_vm4 = vcmp.lt.s32.totalorder %v5219_v23, 4  ;;  %v4692_v52 = vmov 0  }
 0x3af   : > { %1338 = vrot.lane.b32.xlu2 %v1330_v58, %s4861_s12  ;;  %v1293_v7 = vsel %vm1292_vm3, %v3990_v49, %v1289_v63  ;;  %vm1322_vm3 = vmor %vm1320_vm0, %vm1321_vm9  ;;  %vm1325_vm2 = vcmp.eq.f32.partialorder %v1324_v16, 8.507059e+37  ;;  %v4696_v2 = vmov 0   ;;  %v4700_v5 = vmov 0  }
 0x3b0   : > { %v1304_v18 = vadd.f32 %v3992_v13, %v1303_v4  ;;  %v1298_v9 = vsel %vm1295_vm6, %v1297_v10, %v1293_v7  ;;  %v1323_v20 = vsel %vm1322_vm3, %v5705_v24, %v1319_v26  ;;  %vm6714_vm6 = vcmp.lt.s32.totalorder %v5219_v23, 124 }
 0x3b1   : > { %v1333_v43 = vmul.f32 %v1298_v9, %v1150_v22  ;;  %v1328_v45 = vsel %vm1325_vm2, %v1327_v15, %v1323_v20  ;;  %v4704_v63 = vmov 0   ;;  %v4708_v3 = vmov 0  }
 0x3b2   : > { %v1308_v39 = vsel %vm1307_vm11, %v3992_v13, %v1304_v18  ;;  %v1335_v41 = vmul.f32 %v1328_v45, %v1208_v59  ;;  %v4712_v4 = vmov 0   ;;  %v4716_v6 = vmov 0  }
 0x3b3   : > { %v1313_v25 = vsel %vm1310_vm15, %v1312_v35, %v1308_v39  ;;  %v4720_v22 = vmov 0   ;;  %v4724_v7 = vmov 0   ;;  %v4728_v10 = vmov 0  }
 0x3b4   : > { %1361 = vrot.lane.b32.xlu0 %v5728_v61, %s4862_s21  ;;  %v1334_v12 = vmul.f32 %v1313_v25, %v1179_v1  ;;  %v4732_v18 = vmov 0   ;;  %v4736_v26 = vmov 0   ;;  %v4863_v1 = vmov (%p5191_p3), 127  }
 0x3b5   : > { %3994 = vset.pattern.permute.xlu1 (%p5191_p3), %v4863_v1  ;;  %v4864_v35 = vmov (%p5191_p3), 0  }
 0x3b6   : > { %v5757_v44 = vadd.f32 %v1334_v12, %v5504_v55  ;;  %1344 = vrot.lane.b32.xlu1 %v1334_v12, %s4861_s12  ;;  %3993 = vset.pattern.permute.xlu0 (%p5191_p3), %v4864_v35 }
 0x3b7   : > { %1340 = vrot.lane.b32.xlu2 %v1333_v43, %s4861_s12 }
 0x3bc   : > { %1348 = vrot.lane.b32.xlu0 %v1335_v41, %s4861_s12 }
 0x3be   : > { %1363 = vrot.lane.b32.xlu1 %v1334_v12, %s4862_s21 }
 0x3bf   : > { %1359 = vrot.lane.b32.xlu2 %v1333_v43, %s4862_s21 }
 0x3c4   : > { %1367 = vrot.lane.b32.xlu0 %v1335_v41, %s4862_s21 }
 0x3c6   : > { %1408 = vperm.xlu1 (%p5191_p3), %3994, %v5728_v61  }
 0x3c7   : > { %1365 = vrot.lane.b32.xlu2 %v5718_v38, %s4862_s21 }
 0x3cc   : > { %1387 = vperm.xlu0 (%p5191_p3), %3993, %v5728_v61  }
 0x3ce   : > { %1412 = vperm.xlu1 (%p5191_p3), %3994, %v1334_v12  }
 0x3d4   : > { %1392 = vperm.xlu0 (%p5191_p3), %3993, %v1334_v12  }
 0x3dc   : > { %3995 = vset.pattern.permute.xlu0 (%p5191_p3), %v4863_v1 }
 0x401   : > { %v1347_v55 = vpop.permute.xlu2 %1346 }
 0x409   : > { %v1339_v24 = vpop.permute.xlu2 %1338 }
 0x40a   : > { %v5771_v42 = vsel %vm6715_vm4, %v1347_v55, %v1339_v24 }
 0x411   : > { %v1341_v14 = vpop.permute.xlu2 %1340 }
 0x419   : > { %v1360_v46 = vpop.permute.xlu2 %1359 }
 0x41d   : > { %v1358_v48 = vpop.permute.xlu1 %1357 }
 0x41e   : > { %v1343_v49 = vpop.permute.xlu0 %1342 }
 0x41f   : > { %v5776_v21 = vsel %vm6715_vm4, %v1343_v49, %v1347_v55   ;;  %v5780_v38 = vsel %vm6715_vm4, %v1339_v24, %v1343_v49 }
 0x420   : > { %v4729_v10 = vmov (%p5191_p3), %v5776_v21  }
 0x421   : > { %v1366_v36 = vpop.permute.xlu2 %1365 }
 0x422   : > { %v5784_v53 = vsel %vm6714_vm6, %v1366_v36, %v1358_v48 }
 0x426   : > { %v1362_v54 = vpop.permute.xlu0 %1361 }
 0x427   : > { %v5788_v11 = vsel %vm6714_vm6, %v1362_v54, %v1366_v36  ;;  %v5792_v56 = vsel %vm6714_vm6, %v1358_v48, %v1362_v54  }
 0x428   : > { %v1345_v8 = vpop.permute.xlu1 %1344  ;;  %v4713_v4 = vmov (%p5191_p3), %v5792_v56  }
 0x429   : > { %v5796_v51 = vsel %vm6715_vm4, %v1341_v14, %v1345_v8 }
 0x42e   : > { %v1349_v13 = vpop.permute.xlu0 %1348 }
 0x42f   : > { %v5800_v57 = vsel %vm6715_vm4, %v1345_v8, %v1349_v13   ;;  %v5804_v58 = vsel %vm6715_vm4, %v1349_v13, %v1341_v14 }
 0x430   : > { %v1364_v60 = vpop.permute.xlu1 %1363  ;;  %v4717_v6 = vmov (%p5191_p3), %v5800_v57  }
 0x431   : > { %v5808_v47 = vsel %vm6714_vm6, %v1360_v46, %v1364_v60  }
 0x432   : > { %v4701_v5 = vmov (%p5191_p3), %v5808_v47  }
 0x433   : > { %1378 = sbr.rel (!%p5191_p3) target bundleno = 1096 (0x448), region = 88 }
 0x436   : > { %v1368_v40 = vpop.permute.xlu0 %1367 }
 0x437   : > { %v5812_v19 = vsel %vm6714_vm6, %v1364_v60, %v1368_v40  ;;  %v5816_v50 = vsel %vm6714_vm6, %v1368_v40, %v1360_v46 }
 0x438   : > { %v1409_v9 = vpop.permute.xlu1 %1408 }
 0x439   : > { %v1416_v3 = vsel %vm5262_vm14, %v1409_v9, %v5788_v11   ;;  %v1417_v63 = vsel %vm5232_vm7, %v1409_v9, %v5784_v53  }
 0x43e   : > { %v1388_v37 = vpop.permute.xlu0 %1387 }
 0x43f   : > { %v1395_v26 = vsel %vm5222_vm1, %v1388_v37, %v5771_v42   ;;  %v1396_v18 = vsel %vm5244_vm10, %v1388_v37, %v5780_v38  }
 0x440   : > { %v1413_v61 = vpop.permute.xlu1 %1412 }
 0x441   : > { %v1419_v2 = vsel %vm5262_vm14, %v1413_v61, %v5812_v19   ;;  %v1420_v52 = vsel %vm5232_vm7, %v1413_v61, %v5816_v50  }
 0x446   : > { %v1393_v39 = vpop.permute.xlu0 %1392 }
 0x447   : > { %v1398_v7 = vsel %vm5222_vm1, %v1393_v39, %v5804_v58   ;;  %v1399_v22 = vsel %vm5244_vm10, %v1393_v39, %v5796_v51  }
 0x448 PF: > { %vm6812_vm9 = vcmp.ne.s32.totalorder %v5361_v17, 0  ;;  %3997 = vset.pattern.permute.xlu1 %v4852_v0  ;;  %s6818_s29 = sld [smem:[#allocation30_spill]]  ;;  %3996 = vset.pattern.permute.xlu0 %v4852_v0  ;;  %v4738_v26 = vphi %v4736_v26, %v1395_v26   ;;  %v4734_v18 = vphi %v4732_v18, %v1396_v18   ;;  %v4730_v10 = vphi %v4728_v10, %v4729_v10   ;;  %v4726_v7 = vphi %v4724_v7, %v1398_v7   ;;  %v4722_v22 = vphi %v4720_v22, %v1399_v22   ;;  %v4718_v6 = vphi %v4716_v6, %v4717_v6   ;;  %v4714_v4 = vphi %v4712_v4, %v4713_v4   ;;  %v4710_v3 = vphi %v4708_v3, %v1416_v3   ;;  %v4706_v63 = vphi %v4704_v63, %v1417_v63   ;;  %v4702_v5 = vphi %v4700_v5, %v4701_v5   ;;  %v4698_v2 = vphi %v4696_v2, %v1419_v2   ;;  %v4694_v52 = vphi %v4692_v52, %v1420_v52  }
 0x449   : > { %v3085_v16 = vsel %vm6812_vm9, %v5808_v47, %v4702_v5  ;;  %vm6813_vm11 = vmmov %vm6812_vm9  ;;  %s6824_s1 = sld [smem:[#allocation29_spill]] }
 0x44a   : > { %v3089_v25 = vsel %vm6813_vm11, %v5812_v19, %v4698_v2  ;;  %vm6814_vm15 = vmmov %vm6812_vm9  ;;  %1502 = vmatpush.msra.mxu1 %v3085_v16 }
 0x44b   : > { %v3093_v12 = vsel %vm6814_vm15, %v5816_v50, %v4694_v52  ;;  %vm6815_vm0 = vmmov %vm6812_vm9  ;;  %1531 = vmatpush.msra.mxu2 %v3089_v25 }
 0x44c   : > { %v3073_v43 = vsel %vm6815_vm0, %v5792_v56, %v4714_v4  ;;  %vm6816_vm3 = vmmov %vm6815_vm0  ;;  %1560 = vmatpush.msra.mxu3 %v3093_v12  ;;  %v3049_v24 = vsel %vm6815_vm0, %v5771_v42, %v4738_v26 }
 0x44d   : > { %v3077_v20 = vsel %vm6816_vm3, %v5788_v11, %v4710_v3  ;;  %vm6817_vm2 = vmmov %vm6815_vm0  ;;  %1503 = vmatpush.msra.mxu1 %v3073_v43 }
 0x44e   : > { %v3081_v15 = vsel %vm6817_vm2, %v5784_v53, %v4706_v63  ;;  %v2843_v45 = vld [vmem:[%s6818_s29 + $0x40] sm:$0xff]  ;;  %vm6819_vm9 = vmmov %vm6815_vm0  ;;  %1532 = vmatpush.msra.mxu2 %v3077_v20  ;;  %v2845_v42 = vld [vmem:[%s6818_s29 + $0x50] sm:$0xff] }
 0x44f   : > { %v3061_v59 = vsel %vm6819_vm9, %v5804_v58, %v4726_v7  ;;  %vm6820_vm11 = vmmov %vm6815_vm0  ;;  %1561 = vmatpush.msra.mxu3 %v3081_v15  ;;  %1460 = vperm.xlu1 %3997, %v2843_v45   ;;  %v2847_v49 = vld [vmem:[%s6824_s1 + $0x40] sm:$0xff]  ;;  %vm6825_vm9 = vcmask 261120   ;;  %v2844_v48 = vld [vmem:[%s6818_s29 + $0x48] sm:$0xff] }
 0x450   : > { %v3065_v41 = vsel %vm6820_vm11, %v5796_v51, %v4722_v22  ;;  %vm6821_vm15 = vmmov %vm6815_vm0  ;;  %1504 = vmatpush.msra.mxu1 %v3061_v59  ;;  %1470 = vperm.xlu0 %3996, %v2845_v42   ;;  %v2849_v36 = vld [vmem:[%s6824_s1 + $0x50] sm:$0xff]  ;;  %v2850_v53 = vld [vmem:[%s6824_s1 + $0x58] sm:$0xff] }
 0x451   : > { %v3069_v55 = vsel %vm6821_vm15, %v5800_v57, %v4718_v6  ;;  %vm6822_vm3 = vmmov %vm6815_vm0  ;;  %1533 = vmatpush.msra.mxu2 %v3065_v41 }
 0x452   : > { %v3053_v14 = vsel %vm6822_vm3, %v5780_v38, %v4734_v18  ;;  %vm6823_vm2 = vmmov %vm6815_vm0  ;;  %1562 = vmatpush.msra.mxu3 %v3069_v55  ;;  %1505 = vmatpush.msra.mxu1 %v3049_v24  ;;  %v2846_v38 = vld [vmem:[%s6818_s29 + $0x58] sm:$0xff] }
 0x453   : > { %v3057_v46 = vsel %vm6823_vm2, %v5776_v21, %v4730_v10  ;;  %1534 = vmatpush.msra.mxu2 %v3053_v14  ;;  %2851 = vmatmul.msk.f32.vlgmr.msra.gmra.mxu1 %vm6825_vm9, %v2847_v49  ;;  %vm6826_vm11 = vmmov %vm6825_vm9  ;;  %v2848_v21 = vld [vmem:[%s6824_s1 + $0x48] sm:$0xff] }
 0x454   : > { %1563 = vmatpush.msra.mxu3 %v3057_v46  ;;  %2855 = vmatmul.msk.f32.vlgmr.msra.gmra.mxu2 %vm6826_vm11, %v2847_v49  ;;  %vm6827_vm15 = vmmov %vm6825_vm9 }
 0x455   : > { %2859 = vmatmul.msk.f32.vlgmr.msra.gmra.mxu3 %vm6827_vm15, %v2847_v49  ;;  %vm6828_vm0 = vmmov %vm6825_vm9 }
 0x456   : > { %vm6829_vm3 = vmmov %vm6828_vm0 }
 0x457   : > { %1465 = vperm.xlu1 %3997, %v2844_v48   ;;  %vm6830_vm2 = vmmov %vm6828_vm0 }
 0x458   : > { %1475 = vperm.xlu0 %3996, %v2846_v38   ;;  %vm6831_vm9 = vmmov %vm6828_vm0 }
 0x459   : > { %vm6832_vm11 = vmmov %vm6828_vm0 }
 0x45a   : > { %vm6833_vm15 = vmmov %vm6828_vm0 }
 0x45b   : > { %2852 = vmatmul.msk.f32.gmra.mxu1 %vm6828_vm0, %v2848_v21 }
 0x45c   : > { %2856 = vmatmul.msk.f32.gmra.mxu2 %vm6829_vm3, %v2848_v21  ;;  %vm6834_vm3 = vmmov %vm6828_vm0 }
 0x45d   : > { %2860 = vmatmul.msk.f32.gmra.mxu3 %vm6830_vm2, %v2848_v21  ;;  %vm6835_vm2 = vmmov %vm6828_vm0 }
 0x463   : > { %2853 = vmatmul.msk.f32.gmra.mxu1 %vm6831_vm9, %v2849_v36 }
 0x464   : > { %2857 = vmatmul.msk.f32.gmra.mxu2 %vm6832_vm11, %v2849_v36 }
 0x465   : > { %2861 = vmatmul.msk.f32.gmra.mxu3 %vm6833_vm15, %v2849_v36 }
 0x46b   : > { %2854 = vmatmul.msk.f32.gmra.mxu1 %vm6828_vm0, %v2850_v53 }
 0x46c   : > { %2858 = vmatmul.msk.f32.gmra.mxu2 %vm6834_vm3, %v2850_v53 }
 0x46d   : > { %2862 = vmatmul.msk.f32.gmra.mxu3 %vm6835_vm2, %v2850_v53 }
 0x4c1   : > { %v1461_v41 = vpop.permute.xlu1 %1460 }
 0x4c2   : > { %v1471_v51 = vpop.permute.xlu0 %1470 }
 0x4ca   : > { %v1476_v50 = vpop.permute.xlu0 %1475 }
 0x4d0   : > { %v1507_v54 = vpop.f32.mrf.mxu1 }
 0x4d1   : > { %v1508_v49 = vadd.f32 %v1507_v54, %v1461_v41 }
 0x4d7   : > { %v1536_v11 = vpop.f32.mrf.mxu2 }
 0x4d8   : > { %v5924_v56 = vpop.f32.mrf.mxu3  ;;  %v5926_v8 = vpop.f32.mrf.mxu1  ;;  %v1537_v21 = vadd.f32 %v1536_v11, %v1461_v41 }
 0x4df   : > { %v5928_v13 = vpop.f32.mrf.mxu2 }
 0x4e0   : > { %v5930_v57 = vpop.f32.mrf.mxu3  ;;  %v1513_v58 = vpop.f32.mrf.mxu1 }
 0x4e1   : > { %v1514_v60 = vadd.f32 %v1513_v58, %v1471_v51 }
 0x4e3   : > { %v2863_v47 = vmul.f32 -1.442695, %v1514_v60 }
 0x4e5   : > { %3998 = vpow2.f32 %v2863_v47 }
 0x4e7   : > { %v1542_v40 = vpop.f32.mrf.mxu2 }
 0x4e8   : > { %v1571_v19 = vpop.f32.mrf.mxu3  ;;  %v1543_v52 = vadd.f32 %v1542_v40, %v1471_v51  ;;  %v1516_v5 = vpop.f32.mrf.mxu1 }
 0x4e9   : > { %v1572_v2 = vadd.f32 %v1571_v19, %v1471_v51  ;;  %v1517_v63 = vadd.f32 %v1516_v5, %v1476_v50 }
 0x4ea   : > { %v2864_v3 = vmul.f32 -1.442695, %v1543_v52 }
 0x4eb   : > { %v2865_v4 = vmul.f32 -1.442695, %v1572_v2  ;;  %v3999_v6 = vpop.eup %3998  ;;  %v2866_v22 = vmul.f32 -1.442695, %v1517_v63 }
 0x4ec   : > { %v1595_v7 = vadd.f32 1.0, %v3999_v6  ;;  %4000 = vpow2.f32 %v2864_v3 }
 0x4ed   : > { %4002 = vpow2.f32 %v2865_v4  ;;  %v1566_v4 = vadd.f32 %v5924_v56, %v1461_v41 }
 0x4ee   : > { %4004 = vrcp.f32 %v1595_v7  ;;  %v1610_v45 = vand.u32 2147483647, %v1595_v7  ;;  %v1612_v59 = vand.u32 2147483648, %v1595_v7  ;;  %vm1606_vm9 = vweird.f32 %v1595_v7 }
 0x4ef   : > { %4006 = vpow2.f32 %v2866_v22  ;;  %v1545_v10 = vpop.f32.mrf.mxu2 }
 0x4f0   : > { %v1574_v18 = vpop.f32.mrf.mxu3  ;;  %v1546_v26 = vadd.f32 %v1545_v10, %v1476_v50  ;;  %vm1611_vm0 = vcmp.eq.f32.partialorder %v1610_v45, 8.507059e+37  ;;  %v1613_v36 = vor.u32 1.1754944e-38, %v1612_v59 }
 0x4f1   : > { %v1575_v1 = vadd.f32 %v1574_v18, %v1476_v50 }
 0x4f2   : > { %v4001_v35 = vpop.eup %4000  ;;  %v2867_v9 = vmul.f32 -1.442695, %v1546_v26 }
 0x4f3   : > { %v4003_v37 = vpop.eup %4002  ;;  %v1596_v61 = vadd.f32 1.0, %v4001_v35  ;;  %v2868_v39 = vmul.f32 -1.442695, %v1575_v1 }
 0x4f4   : > { %v4005_v16 = vpop.eup %4004  ;;  %v5932_v25 = vadd.f32 1.0, %v4003_v37  ;;  %4008 = vpow2.f32 %v2867_v9 }
 0x4f5   : > { %v4007_v12 = vpop.eup %4006  ;;  %4010 = vrcp.f32 %v1596_v61  ;;  %v1602_v43 = vmul.f32 %v4005_v16, %v1595_v7  ;;  %vm1607_vm11 = vweird.f32 %v4005_v16  ;;  %v1625_v58 = vand.u32 2147483647, %v1596_v61 }
 0x4f6   : > { %4012 = vrcp.f32 %v5932_v25  ;;  %v5935_v20 = vadd.f32 1.0, %v4007_v12  ;;  %vm1608_vm15 = vmor %vm1606_vm9, %vm1607_vm11  ;;  %v1627_v50 = vand.u32 2147483648, %v1596_v61  ;;  %v1640_v2 = vand.u32 2147483647, %v5932_v25 }
 0x4f7   : > { %4014 = vpow2.f32 %v2868_v39  ;;  %v1603_v15 = vsub.f32 1.0, %v1602_v43  ;;  %v1642_v5 = vand.u32 2147483648, %v5932_v25  ;;  %vm1621_vm2 = vweird.f32 %v1596_v61 }
 0x4f8   : > { %4016 = vrcp.f32 %v5935_v20  ;;  %vm1626_vm11 = vcmp.eq.f32.partialorder %v1625_v58, 8.507059e+37  ;;  %v1628_v18 = vor.u32 1.1754944e-38, %v1627_v50  ;;  %vm1641_vm6 = vcmp.eq.f32.partialorder %v1640_v2, 8.507059e+37 }
 0x4f9   : > { %v1604_v55 = vmul.f32 %v4005_v16, %v1603_v15  ;;  %vm1651_vm4 = vweird.f32 %v5935_v20  ;;  %v1643_v35 = vor.u32 1.1754944e-38, %v1642_v5  ;;  %v1657_v39 = vand.u32 2147483648, %v5935_v20 }
 0x4fa   : > { %v4009_v24 = vpop.eup %4008  ;;  %v1655_v41 = vand.u32 2147483647, %v5935_v20 }
 0x4fb   : > { %v4011_v14 = vpop.eup %4010  ;;  %v5938_v46 = vadd.f32 1.0, %v4009_v24  ;;  %v1605_v42 = vadd.f32 %v4005_v16, %v1604_v55  ;;  %v1466_v24 = vpop.permute.xlu1 %1465 }
 0x4fc   : > { %v4013_v48 = vpop.eup %4012  ;;  %v1617_v38 = vmul.f32 %v4011_v14, %v1596_v61  ;;  %vm1622_vm3 = vweird.f32 %v4011_v14 }
 0x4fd   : > { %v4015_v53 = vpop.eup %4014  ;;  %4018 = vrcp.f32 %v5938_v46  ;;  %v1609_v51 = vsel %vm1608_vm15, %v4005_v16, %v1605_v42  ;;  %v1632_v60 = vmul.f32 %v4013_v48, %v5932_v25  ;;  %vm1637_vm9 = vweird.f32 %v4013_v48 }
 0x4fe   : > { %v5942_v47 = vpop.eup %4016  ;;  %v5944_v40 = vadd.f32 1.0, %v4015_v53  ;;  %v1614_v19 = vsel %vm1611_vm0, %v1613_v36, %v1609_v51  ;;  %v1618_v54 = vsub.f32 1.0, %v1617_v38  ;;  %vm1636_vm15 = vweird.f32 %v5932_v25  ;;  %vm1623_vm0 = vmor %vm1621_vm2, %vm1622_vm3 }
 0x4ff   : > { %v1691_v52 = vmul.f32 %v1614_v19, %v1508_v49  ;;  %v1633_v11 = vsub.f32 1.0, %v1632_v60  ;;  %v1647_v3 = vmul.f32 %v5942_v47, %v5935_v20  ;;  %vm1638_vm12 = vmor %vm1636_vm15, %vm1637_vm9  ;;  %vm1652_vm5 = vweird.f32 %v5942_v47 }
 0x500   : > { %4020 = vrcp.f32 %v5944_v40  ;;  %v1619_v63 = vmul.f32 %v4011_v14, %v1618_v54  ;;  %v1672_v59 = vand.u32 2147483648, %v5938_v46  ;;  %v1670_v42 = vand.u32 2147483647, %v5938_v46 }
 0x501   : > { %1717 = vrot.lane.b32.xlu1 %v1691_v52, %s4854_s8  ;;  %1699 = vrot.lane.b32.xlu2 %v1691_v52, %s4853_s4  ;;  %v1634_v6 = vmul.f32 %v4013_v48, %v1633_v11  ;;  %v1648_v7 = vsub.f32 1.0, %v1647_v3  ;;  %vm1666_vm3 = vweird.f32 %v5938_v46  ;;  %v1658_v36 = vor.u32 1.1754944e-38, %v1657_v39 }
 0x502   : > { %v1620_v22 = vadd.f32 %v4011_v14, %v1619_v63  ;;  %v1673_v53 = vor.u32 1.1754944e-38, %v1672_v59  ;;  %vm1656_vm9 = vcmp.eq.f32.partialorder %v1655_v41, 8.507059e+37  ;;  %v1511_v19 = vadd.f32 %v5926_v8, %v1466_v24 }
 0x503   : > { %v4019_v10 = vpop.eup %4018  ;;  %v1635_v26 = vadd.f32 %v4013_v48, %v1634_v6  ;;  %v1649_v9 = vmul.f32 %v5942_v47, %v1648_v7  ;;  %v4740_v41 = vmov 0  }
 0x504   : > { %v1662_v56 = vmul.f32 %v4019_v10, %v5938_v46  ;;  %v1624_v1 = vsel %vm1623_vm0, %v4011_v14, %v1620_v22 }
 0x505   : > { %v1629_v37 = vsel %vm1626_vm11, %v1628_v18, %v1624_v1  ;;  %v1639_v61 = vsel %vm1638_vm12, %v4013_v48, %v1635_v26  ;;  %v1650_v15 = vadd.f32 %v5942_v47, %v1649_v9  ;;  %vm1667_vm12 = vweird.f32 %v4019_v10 }
 0x506   : > { %v4021_v16 = vpop.eup %4020  ;;  %v5960_v25 = vmul.f32 %v1629_v37, %v1537_v21  ;;  %v1644_v12 = vsel %vm1641_vm6, %v1643_v35, %v1639_v61  ;;  %v1663_v43 = vsub.f32 1.0, %v1662_v56  ;;  %vm1653_vm6 = vmor %vm1651_vm4, %vm1652_vm5  ;;  %vm1671_vm11 = vcmp.eq.f32.partialorder %v1670_v42, 8.507059e+37 }
 0x507   : > { %v1693_v45 = vmul.f32 %v1644_v12, %v1566_v4  ;;  %v1677_v55 = vmul.f32 %v4021_v16, %v5944_v40  ;;  %v1654_v48 = vsel %vm1653_vm6, %v5942_v47, %v1650_v15  ;;  %vm1668_vm2 = vmor %vm1666_vm3, %vm1667_vm12  ;;  %vm1682_vm15 = vweird.f32 %v4021_v16 }
 0x508   : > { %1703 = vrot.lane.b32.xlu0 %v5960_v25, %s4853_s4  ;;  %v5970_v14 = vadd.f32 %v5960_v25, %v5736_v62  ;;  %v1664_v49 = vmul.f32 %v4019_v10, %v1663_v43  ;;  %v1540_v62 = vadd.f32 %v5928_v13, %v1466_v24  ;;  %v1659_v60 = vsel %vm1656_vm9, %v1658_v36, %v1654_v48 }
 0x509   : > { %1707 = vrot.lane.b32.xlu2 %v1693_v45, %s4853_s4  ;;  %v1678_v21 = vsub.f32 1.0, %v1677_v55  ;;  %v1687_v47 = vand.u32 2147483648, %v5944_v40  ;;  %vm1681_vm5 = vweird.f32 %v5944_v40  ;;  %v1685_v13 = vand.u32 2147483647, %v5944_v40 }
 0x50a   : > { %v1665_v38 = vadd.f32 %v4019_v10, %v1664_v49  ;;  %v1694_v46 = vmul.f32 %v1659_v60, %v1511_v19  ;;  %vm1683_vm4 = vmor %vm1681_vm5, %vm1682_vm15  ;;  %v1569_v40 = vadd.f32 %v5930_v57, %v1466_v24  ;;  %vm6836_vm12 = vcmp.lt.s32.totalorder %v5219_v23, 1 }
 0x50b   : > { %v1679_v51 = vmul.f32 %v4021_v16, %v1678_v21  ;;  %v1688_v11 = vor.u32 1.1754944e-38, %v1687_v47  ;;  %vm1686_vm0 = vcmp.eq.f32.partialorder %v1685_v13, 8.507059e+37  ;;  %vm6837_vm6 = vmmov %vm6836_vm12  ;;  %v4744_v55 = vmov 0  }
 0x50c   : > { %v1669_v58 = vsel %vm1668_vm2, %v4019_v10, %v1665_v38  ;;  %vm6838_vm3 = vmmov %vm6837_vm6  ;;  %vm6839_vm2 = vcmp.lt.s32.totalorder %v5219_v23, 127  ;;  %v4748_v24 = vmov 0   ;;  %v4752_v49 = vmov 0  }
 0x50d   : > { %v1674_v20 = vsel %vm1671_vm11, %v1673_v53, %v1669_v58  ;;  %v1680_v54 = vadd.f32 %v4021_v16, %v1679_v51  ;;  %vm6840_vm9 = vmmov %vm6839_vm2  ;;  %v4756_v42 = vmov 0   ;;  %v4760_v48 = vmov 0  }
 0x50e   : > { %v5983_v50 = vmul.f32 %v1674_v20, %v1540_v62  ;;  %vm6841_vm11 = vmmov %vm6839_vm2  ;;  %v4764_v21 = vmov 0   ;;  %v4768_v38 = vmov 0   ;;  %v4772_v36 = vmov 0  }
 0x50f   : > { %v1684_v8 = vsel %vm1683_vm4, %v4021_v16, %v1680_v54  ;;  %vm6842_vm15 = vmmov %vm6838_vm3  ;;  %v4776_v62 = vmov 0   ;;  %v4780_v53 = vmov 0   ;;  %v4784_v51 = vmov 0  }
 0x510   : > { %1721 = vrot.lane.b32.xlu0 %v5960_v25, %s4854_s8  ;;  %v5991_v52 = vadd.f32 %v5983_v50, %v5757_v44  ;;  %1705 = vrot.lane.b32.xlu1 %v5983_v50, %s4853_s4  ;;  %v1689_v2 = vsel %vm1686_vm0, %v1688_v11, %v1684_v8  ;;  %vm6843_vm5 = vmmov %vm6838_vm3  ;;  %v4865_v58 = vmov (%p5191_p3), 127   ;;  %v4866_v60 = vmov (%p5191_p3), 0  }
 0x511   : > { %1701 = vrot.lane.b32.xlu2 %v1694_v46, %s4853_s4  ;;  %v1696_v5 = vmul.f32 %v1689_v2, %v1569_v40  ;;  %vm6844_vm4 = vmmov %vm6838_vm3  ;;  %4023 = vset.pattern.permute.xlu1 (%p5191_p3), %v4865_v58 }
 0x512   : > { %vm6845_vm0 = vmmov %vm6839_vm2  ;;  %4022 = vset.pattern.permute.xlu0 (%p5191_p3), %v4866_v60 }
 0x518   : > { %1709 = vrot.lane.b32.xlu0 %v1696_v5, %s4853_s4  ;;  %1723 = vrot.lane.b32.xlu1 %v5983_v50, %s4854_s8 }
 0x519   : > { %1719 = vrot.lane.b32.xlu2 %v1694_v46, %s4854_s8 }
 0x520   : > { %1727 = vrot.lane.b32.xlu0 %v1696_v5, %s4854_s8  ;;  %1767 = vperm.xlu1 (%p5191_p3), %4023, %v5960_v25  }
 0x521   : > { %1725 = vrot.lane.b32.xlu2 %v1693_v45, %s4854_s8 }
 0x528   : > { %1746 = vperm.xlu0 (%p5191_p3), %4022, %v5960_v25   ;;  %1771 = vperm.xlu1 (%p5191_p3), %4023, %v5983_v50  }
 0x530   : > { %1751 = vperm.xlu0 (%p5191_p3), %4022, %v5983_v50  }
 0x538   : > { %4024 = vset.pattern.permute.xlu0 (%p5191_p3), %v4865_v58 }
 0x55b   : > { %v1700_v44 = vpop.permute.xlu2 %1699 }
 0x563   : > { %v1708_v63 = vpop.permute.xlu2 %1707 }
 0x564   : > { %v6005_v3 = vsel %vm6836_vm12, %v1708_v63, %v1700_v44  ;;  %vm6846_vm12 = vmmov %vm6845_vm0 }
 0x56b   : > { %v1702_v4 = vpop.permute.xlu2 %1701 }
 0x573   : > { %v1720_v57 = vpop.permute.xlu2 %1719  ;;  %v1718_v6 = vpop.permute.xlu1 %1717 }
 0x57a   : > { %v1704_v22 = vpop.permute.xlu0 %1703 }
 0x57b   : > { %v6009_v7 = vsel %vm6837_vm6, %v1704_v22, %v1708_v63   ;;  %v6013_v10 = vsel %vm6838_vm3, %v1700_v44, %v1704_v22  ;;  %v1726_v18 = vpop.permute.xlu2 %1725  ;;  %vm6847_vm6 = vmmov %vm6845_vm0  ;;  %vm6848_vm3 = vnez (%p5191_p3), %v6774_v32 }
 0x57c   : > { %v6017_v26 = vsel %vm6839_vm2, %v1726_v18, %v1718_v6  ;;  %vm6849_vm2 = vnez (%p5191_p3), %v6766_v28  ;;  %v4777_v62 = vmov (%p5191_p3), %v6009_v7  }
 0x582   : > { %v1722_v56 = vpop.permute.xlu0 %1721  ;;  %v1706_v1 = vpop.permute.xlu1 %1705 }
 0x583   : > { %v6021_v35 = vsel %vm6840_vm9, %v1722_v56, %v1726_v18  ;;  %v6025_v9 = vsel %vm6841_vm11, %v1718_v6, %v1722_v56   ;;  %v6029_v37 = vsel %vm6842_vm15, %v1702_v4, %v1706_v1 }
 0x584   : > { %v4761_v48 = vmov (%p5191_p3), %v6025_v9  }
 0x58a   : > { %v1710_v61 = vpop.permute.xlu0 %1709  ;;  %v1724_v39 = vpop.permute.xlu1 %1723 }
 0x58b   : > { %v6033_v16 = vsel %vm6843_vm5, %v1706_v1, %v1710_v61   ;;  %v6037_v12 = vsel %vm6844_vm4, %v1710_v61, %v1702_v4  ;;  %v6041_v43 = vsel %vm6845_vm0, %v1720_v57, %v1724_v39  }
 0x58c   : > { %v4749_v24 = vmov (%p5191_p3), %v6041_v43   ;;  %v4765_v21 = vmov (%p5191_p3), %v6033_v16  }
 0x58f   : > { %1737 = sbr.rel (!%p5191_p3) target bundleno = 1444 (0x5a4), region = 96 }
 0x592   : > { %v1728_v15 = vpop.permute.xlu0 %1727  ;;  %v1768_v20 = vpop.permute.xlu1 (%p5191_p3), %1767 }
 0x593   : > { %v6045_v45 = vsel %vm6846_vm12, %v1724_v39, %v1728_v15  ;;  %v6049_v59 = vsel %vm6847_vm6, %v1728_v15, %v1720_v57  ;;  %v1775_v42 = vsel (%p5191_p3), %vm6848_vm3, %v1768_v20, %v6021_v35   ;;  %v1776_v49 = vsel (%p5191_p3), %vm5232_vm7, %v1768_v20, %v6017_v26  }
 0x59a   : > { %v1747_v19 = vpop.permute.xlu0 %1746  ;;  %v1772_v25 = vpop.permute.xlu1 %1771 }
 0x59b   : > { %v1754_v51 = vsel %vm5222_vm1, %v1747_v19, %v6005_v3   ;;  %v1755_v53 = vsel %vm6849_vm2, %v1747_v19, %v6013_v10   ;;  %v1778_v55 = vsel %vm6848_vm3, %v1772_v25, %v6045_v45   ;;  %v1779_v41 = vsel %vm5232_vm7, %v1772_v25, %v6049_v59  }
 0x5a2   : > { %v1752_v54 = vpop.permute.xlu0 %1751 }
 0x5a3   : > { %v1757_v36 = vsel %vm5222_vm1, %v1752_v54, %v6037_v12   ;;  %v1758_v38 = vsel %vm6849_vm2, %v1752_v54, %v6029_v37  }
 0x5a4 PF: > { %vm6850_vm9 = vcmp.ne.s32.totalorder %v5361_v17, 0  ;;  %4026 = vset.pattern.permute.xlu1 %v4852_v0  ;;  %s6856_s29 = sld [smem:[#allocation30_spill]]  ;;  %4025 = vset.pattern.permute.xlu0 %v4852_v0  ;;  %v4786_v51 = vphi %v4784_v51, %v1754_v51   ;;  %v4782_v53 = vphi %v4780_v53, %v1755_v53   ;;  %v4778_v62 = vphi %v4776_v62, %v4777_v62   ;;  %v4774_v36 = vphi %v4772_v36, %v1757_v36   ;;  %v4770_v38 = vphi %v4768_v38, %v1758_v38   ;;  %v4766_v21 = vphi %v4764_v21, %v4765_v21   ;;  %v4762_v48 = vphi %v4760_v48, %v4761_v48   ;;  %v4758_v42 = vphi %v4756_v42, %v1775_v42   ;;  %v4754_v49 = vphi %v4752_v49, %v1776_v49   ;;  %v4750_v24 = vphi %v4748_v24, %v4749_v24   ;;  %v4746_v55 = vphi %v4744_v55, %v1778_v55   ;;  %v4742_v41 = vphi %v4740_v41, %v1779_v41  }
 0x5a5   : > { %v3134_v28 = vsel %vm6850_vm9, %v6041_v43, %v4750_v24  ;;  %vm6851_vm11 = vmmov %vm6850_vm9  ;;  %s6863_s9 = sld [smem:[#allocation29_spill]] }
 0x5a6   : > { %v3138_v32 = vsel %vm6851_vm11, %v6045_v45, %v4746_v55  ;;  %vm6852_vm15 = vmmov %vm6850_vm9  ;;  %1861 = vmatpush.msrb.mxu0 %v3134_v28 }
 0x5a7   : > { %v3142_v47 = vsel %vm6852_vm15, %v6049_v59, %v4742_v41  ;;  %vm6853_vm5 = vmmov %vm6850_vm9  ;;  %1890 = vmatpush.msrb.mxu1 %v3138_v32  ;;  %vm6864_vm15 = vcmask 261120  }
 0x5a8   : > { %v3122_v50 = vsel %vm6853_vm5, %v6025_v9, %v4762_v48  ;;  %vm6854_vm4 = vmmov %vm6853_vm5  ;;  %1919 = vmatpush.msrb.mxu2 %v3142_v47 }
 0x5a9   : > { %v3126_v13 = vsel %vm6854_vm4, %v6021_v35, %v4758_v42  ;;  %vm6855_vm0 = vmmov %vm6854_vm4  ;;  %1862 = vmatpush.msrb.mxu0 %v3122_v50 }
 0x5aa   : > { %v3130_v46 = vsel %vm6855_vm0, %v6017_v26, %v4754_v49  ;;  %v2869_v8 = vld [vmem:[%s6856_s29 + $0x60] sm:$0xff]  ;;  %vm6857_vm12 = vmmov %vm6855_vm0  ;;  %1891 = vmatpush.msrb.mxu1 %v3126_v13  ;;  %v2870_v57 = vld [vmem:[%s6856_s29 + $0x68] sm:$0xff] }
 0x5ab   : > { %v3110_v11 = vsel %vm6857_vm12, %v6037_v12, %v4774_v36  ;;  %vm6858_vm6 = vmmov %vm6855_vm0  ;;  %1920 = vmatpush.msrb.mxu2 %v3130_v46  ;;  %1819 = vperm.xlu1 %4026, %v2869_v8   ;;  %v2873_v4 = vld [vmem:[%s6863_s9 + $0x60] sm:$0xff]  ;;  %v2874_v6 = vld [vmem:[%s6863_s9 + $0x68] sm:$0xff] }
 0x5ac   : > { %v3114_v2 = vsel %vm6858_vm6, %v6029_v37, %v4770_v38  ;;  %vm6859_vm3 = vmmov %vm6855_vm0  ;;  %1863 = vmatpush.msrb.mxu0 %v3110_v11  ;;  %v2872_v22 = vld [vmem:[%s6856_s29 + $0x78] sm:$0xff] }
 0x5ad   : > { %v3118_v40 = vsel %vm6859_vm3, %v6033_v16, %v4766_v21  ;;  %vm6860_vm2 = vmmov %vm6855_vm0  ;;  %1892 = vmatpush.msrb.mxu1 %v3114_v2 }
 0x5ae   : > { %v3098_v5 = vsel %vm6860_vm2, %v6005_v3, %v4786_v51  ;;  %vm6861_vm9 = vmmov %vm6855_vm0  ;;  %1921 = vmatpush.msrb.mxu2 %v3118_v40  ;;  %v2871_v3 = vld [vmem:[%s6856_s29 + $0x70] sm:$0xff] }
 0x5af   : > { %v3102_v44 = vsel %vm6861_vm9, %v6013_v10, %v4782_v53  ;;  %vm6862_vm11 = vmmov %vm6855_vm0  ;;  %1864 = vmatpush.msrb.mxu0 %v3098_v5  ;;  %1829 = vperm.xlu0 %4025, %v2871_v3   ;;  %v2876_v10 = vld [vmem:[%s6863_s9 + $0x78] sm:$0xff] }
 0x5b0   : > { %v3106_v63 = vsel %vm6862_vm11, %v6009_v7, %v4778_v62  ;;  %1893 = vmatpush.msrb.mxu1 %v3102_v44  ;;  %2877 = vmatmul.msk.f32.vlgmr.msrb.gmra.mxu0 %vm6864_vm15, %v2873_v4  ;;  %vm6865_vm5 = vmmov %vm6864_vm15  ;;  %v2875_v7 = vld [vmem:[%s6863_s9 + $0x70] sm:$0xff] }
 0x5b1   : > { %1922 = vmatpush.msrb.mxu2 %v3106_v63  ;;  %2881 = vmatmul.msk.f32.vlgmr.msrb.gmra.mxu1 %vm6865_vm5, %v2873_v4  ;;  %vm6866_vm4 = vmmov %vm6865_vm5 }
 0x5b2   : > { %2885 = vmatmul.msk.f32.vlgmr.msrb.gmra.mxu2 %vm6866_vm4, %v2873_v4  ;;  %vm6867_vm0 = vmmov %vm6866_vm4 }
 0x5b3   : > { %1824 = vperm.xlu1 %4026, %v2870_v57   ;;  %vm6868_vm12 = vmmov %vm6867_vm0 }
 0x5b4   : > { %vm6869_vm6 = vmmov %vm6867_vm0 }
 0x5b5   : > { %vm6870_vm3 = vmmov %vm6867_vm0 }
 0x5b6   : > { %vm6871_vm2 = vmmov %vm6867_vm0 }
 0x5b7   : > { %1834 = vperm.xlu0 %4025, %v2872_v22   ;;  %vm6872_vm9 = vmmov %vm6867_vm0 }
 0x5b8   : > { %2878 = vmatmul.msk.f32.gmra.mxu0 %vm6867_vm0, %v2874_v6  ;;  %vm6873_vm11 = vmmov %vm6867_vm0 }
 0x5b9   : > { %2882 = vmatmul.msk.f32.gmra.mxu1 %vm6868_vm12, %v2874_v6  ;;  %vm6874_vm15 = vmmov %vm6867_vm0 }
 0x5ba   : > { %2886 = vmatmul.msk.f32.gmra.mxu2 %vm6869_vm6, %v2874_v6  ;;  %vm6875_vm5 = vmmov %vm6867_vm0 }
 0x5c0   : > { %2879 = vmatmul.msk.f32.gmra.mxu0 %vm6870_vm3, %v2875_v7 }
 0x5c1   : > { %2883 = vmatmul.msk.f32.gmra.mxu1 %vm6871_vm2, %v2875_v7 }
 0x5c2   : > { %2887 = vmatmul.msk.f32.gmra.mxu2 %vm6872_vm9, %v2875_v7 }
 0x5c8   : > { %2880 = vmatmul.msk.f32.gmra.mxu0 %vm6873_vm11, %v2876_v10 }
 0x5c9   : > { %2884 = vmatmul.msk.f32.gmra.mxu1 %vm6874_vm15, %v2876_v10 }
 0x5ca   : > { %2888 = vmatmul.msk.f32.gmra.mxu2 %vm6875_vm5, %v2876_v10 }
 0x61d   : > { %v1820_v32 = vpop.permute.xlu1 %1819 }
 0x621   : > { %v1830_v9 = vpop.permute.xlu0 %1829 }
 0x629   : > { %v1835_v59 = vpop.permute.xlu0 %1834 }
 0x62d   : > { %v1866_v18 = vpop.f32.mrf.mxu0 }
 0x62e   : > { %v1895_v26 = vpop.f32.mrf.mxu1  ;;  %v1867_v11 = vadd.f32 %v1866_v18, %v1820_v32 }
 0x62f   : > { %v1896_v22 = vadd.f32 %v1895_v26, %v1820_v32 }
 0x635   : > { %v1924_v56 = vpop.f32.mrf.mxu2  ;;  %v6159_v1 = vpop.f32.mrf.mxu0 }
 0x636   : > { %v6161_v35 = vpop.f32.mrf.mxu1  ;;  %v6174_v7 = vadd.f32 %v1924_v56, %v1820_v32 }
 0x63d   : > { %v6163_v37 = vpop.f32.mrf.mxu2  ;;  %v1872_v61 = vpop.f32.mrf.mxu0 }
 0x63e   : > { %v1873_v39 = vadd.f32 %v1872_v61, %v1830_v9  ;;  %v1901_v16 = vpop.f32.mrf.mxu1 }
 0x63f   : > { %v1902_v12 = vadd.f32 %v1901_v16, %v1830_v9 }
 0x640   : > { %v2889_v43 = vmul.f32 -1.442695, %v1873_v39 }
 0x641   : > { %v2890_v15 = vmul.f32 -1.442695, %v1902_v12 }
 0x642   : > { %4027 = vpow2.f32 %v2889_v43 }
 0x643   : > { %4029 = vpow2.f32 %v2890_v15  ;;  %v6182_v15 = vpop.permute.xlu1 %1824 }
 0x645   : > { %v1930_v45 = vpop.f32.mrf.mxu2  ;;  %v1875_v55 = vpop.f32.mrf.mxu0 }
 0x646   : > { %v1931_v41 = vadd.f32 %v1930_v45, %v1830_v9  ;;  %v1876_v24 = vadd.f32 %v1875_v55, %v1835_v59  ;;  %v1904_v49 = vpop.f32.mrf.mxu1 }
 0x647   : > { %v1905_v48 = vadd.f32 %v1904_v49, %v1835_v59 }
 0x648   : > { %v2891_v42 = vmul.f32 -1.442695, %v1931_v41  ;;  %v4028_v21 = vpop.eup %4027  ;;  %v2892_v38 = vmul.f32 -1.442695, %v1876_v24 }
 0x649   : > { %v4030_v36 = vpop.eup %4029  ;;  %v1954_v62 = vadd.f32 1.0, %v4028_v21  ;;  %v2893_v53 = vmul.f32 -1.442695, %v1905_v48 }
 0x64a   : > { %4031 = vpow2.f32 %v2891_v42  ;;  %v1955_v51 = vadd.f32 1.0, %v4030_v36 }
 0x64b   : > { %4033 = vpow2.f32 %v2892_v38  ;;  %v1969_v63 = vand.u32 2147483647, %v1954_v62  ;;  %v1971_v4 = vand.u32 2147483648, %v1954_v62  ;;  %vm1965_vm6 = vweird.f32 %v1954_v62 }
 0x64c   : > { %4035 = vrcp.f32 %v1954_v62  ;;  %v1984_v44 = vand.u32 2147483647, %v1955_v51  ;;  %v1986_v3 = vand.u32 2147483648, %v1955_v51  ;;  %vm1980_vm12 = vweird.f32 %v1955_v51 }
 0x64d   : > { %4037 = vrcp.f32 %v1955_v51  ;;  %v1933_v58 = vpop.f32.mrf.mxu2  ;;  %vm1970_vm2 = vcmp.eq.f32.partialorder %v1969_v63, 8.507059e+37  ;;  %v1972_v12 = vor.u32 1.1754944e-38, %v1971_v4 }
 0x64e   : > { %4039 = vpow2.f32 %v2893_v53  ;;  %v1934_v60 = vadd.f32 %v1933_v58, %v1835_v59  ;;  %vm1985_vm11 = vcmp.eq.f32.partialorder %v1984_v44, 8.507059e+37  ;;  %v1987_v26 = vor.u32 1.1754944e-38, %v1986_v3 }
 0x64f   : > { %v1899_v53 = vadd.f32 %v6161_v35, %v6182_v15 }
 0x650   : > { %v4032_v20 = vpop.eup %4031  ;;  %v2894_v19 = vmul.f32 -1.442695, %v1934_v60 }
 0x651   : > { %v4034_v25 = vpop.eup %4033  ;;  %v6165_v54 = vadd.f32 1.0, %v4032_v20 }
 0x652   : > { %v4036_v28 = vpop.eup %4035  ;;  %v6167_v47 = vadd.f32 1.0, %v4034_v25  ;;  %4041 = vpow2.f32 %v2894_v19 }
 0x653   : > { %v4038_v50 = vpop.eup %4037  ;;  %4043 = vrcp.f32 %v6165_v54  ;;  %v1961_v13 = vmul.f32 %v4036_v28, %v1954_v62  ;;  %vm1966_vm4 = vweird.f32 %v4036_v28  ;;  %v1999_v55 = vand.u32 2147483647, %v6165_v54 }
 0x654   : > { %v4040_v46 = vpop.eup %4039  ;;  %v1976_v8 = vmul.f32 %v4038_v50, %v1955_v51  ;;  %4045 = vrcp.f32 %v6167_v47  ;;  %vm1981_vm0 = vweird.f32 %v4038_v50  ;;  %vm1967_vm3 = vmor %vm1965_vm6, %vm1966_vm4  ;;  %v2001_v48 = vand.u32 2147483648, %v6165_v54 }
 0x655   : > { %v6171_v2 = vadd.f32 1.0, %v4040_v46  ;;  %v1962_v40 = vsub.f32 1.0, %v1961_v13  ;;  %vm1982_vm9 = vmor %vm1980_vm12, %vm1981_vm0  ;;  %vm1995_vm5 = vweird.f32 %v6165_v54  ;;  %vm2010_vm4 = vweird.f32 %v6167_v47 }
 0x656   : > { %v1977_v5 = vsub.f32 1.0, %v1976_v8  ;;  %vm2000_vm0 = vcmp.eq.f32.partialorder %v1999_v55, 8.507059e+37  ;;  %v2014_v8 = vand.u32 2147483647, %v6167_v47 }
 0x657   : > { %4047 = vrcp.f32 %v6171_v2  ;;  %v1963_v57 = vmul.f32 %v4036_v28, %v1962_v40  ;;  %v2029_v19 = vand.u32 2147483647, %v6171_v2  ;;  %v2031_v25 = vand.u32 2147483648, %v6171_v2 }
 0x658   : > { %v4042_v6 = vpop.eup %4041  ;;  %v1978_v10 = vmul.f32 %v4038_v50, %v1977_v5  ;;  %v2016_v5 = vand.u32 2147483648, %v6167_v47 }
 0x659   : > { %v4044_v9 = vpop.eup %4043  ;;  %v6176_v18 = vadd.f32 1.0, %v4042_v6  ;;  %v1964_v61 = vadd.f32 %v4036_v28, %v1963_v57  ;;  %v2032_v44 = vor.u32 1.1754944e-38, %v2031_v25 }
 0x65a   : > { %v6178_v39 = vpop.eup %4045  ;;  %v1979_v16 = vadd.f32 %v4038_v50, %v1978_v10  ;;  %v1991_v43 = vmul.f32 %v4044_v9, %v6165_v54  ;;  %vm1996_vm15 = vweird.f32 %v4044_v9  ;;  %v2002_v54 = vor.u32 1.1754944e-38, %v2001_v48 }
 0x65b   : > { %4049 = vrcp.f32 %v6176_v18  ;;  %v1968_v56 = vsel %vm1967_vm3, %v4036_v28, %v1964_v61  ;;  %v2006_v21 = vmul.f32 %v6178_v39, %v6167_v47  ;;  %vm1997_vm12 = vmor %vm1995_vm5, %vm1996_vm15  ;;  %vm2011_vm3 = vweird.f32 %v6178_v39 }
 0x65c   : > { %v1983_v45 = vsel %vm1982_vm9, %v4038_v50, %v1979_v16  ;;  %v1973_v59 = vsel %vm1970_vm2, %v1972_v12, %v1968_v56  ;;  %v1992_v41 = vsub.f32 1.0, %v1991_v43  ;;  %vm2025_vm2 = vweird.f32 %v6171_v2  ;;  %vm6220_vm5 = vmor %vm2010_vm4, %vm2011_vm3 }
 0x65d   : > { %v4048_v24 = vpop.eup %4047  ;;  %v1988_v49 = vsel %vm1985_vm11, %v1987_v26, %v1983_v45  ;;  %v2050_v42 = vmul.f32 %v1973_v59, %v1867_v11  ;;  %v2007_v51 = vsub.f32 1.0, %v2006_v21  ;;  %vm2030_vm11 = vcmp.eq.f32.partialorder %v2029_v19, 8.507059e+37 }
 0x65e   : > { %v2021_v38 = vmul.f32 %v4048_v24, %v6171_v2  ;;  %v6189_v36 = vmul.f32 %v1988_v49, %v1896_v22  ;;  %v1993_v62 = vmul.f32 %v4044_v9, %v1992_v41  ;;  %vm2026_vm6 = vweird.f32 %v4048_v24 }
 0x65f   : > { %2076 = vrot.lane.b32.xlu1 %v2050_v42, %s4858_s26  ;;  %2058 = vrot.lane.b32.xlu2 %v2050_v42, %s4857_s27  ;;  %v2008_v28 = vmul.f32 %v6178_v39, %v2007_v51  ;;  %vm2027_vm9 = vmor %vm2025_vm2, %vm2026_vm6  ;;  %v2046_v4 = vand.u32 2147483648, %v6176_v18  ;;  %v2044_v6 = vand.u32 2147483647, %v6176_v18  ;;  %v2017_v47 = vor.u32 1.1754944e-38, %v2016_v5 }
 0x660   : > { %2062 = vrot.lane.b32.xlu0 %v6189_v36, %s4857_s27  ;;  %v6201_v58 = vadd.f32 %v6189_v36, %v5970_v14  ;;  %v2022_v60 = vsub.f32 1.0, %v2021_v38  ;;  %v1994_v20 = vadd.f32 %v4044_v9, %v1993_v62  ;;  %v1870_v43 = vadd.f32 %v6159_v1, %v6182_v15 }
 0x661   : > { %v4050_v35 = vpop.eup %4049  ;;  %v2009_v46 = vadd.f32 %v6178_v39, %v2008_v28  ;;  %v2047_v61 = vor.u32 1.1754944e-38, %v2046_v4  ;;  %vm2045_vm6 = vcmp.eq.f32.partialorder %v2044_v6, 8.507059e+37  ;;  %vm6878_vm3 = vcmp.lt.s32.totalorder %v5219_v23, 2 }
 0x662   : > { %v2023_v32 = vmul.f32 %v4048_v24, %v2022_v60  ;;  %v1998_v50 = vsel %vm1997_vm12, %v4044_v9, %v1994_v20  ;;  %v2036_v13 = vmul.f32 %v4050_v35, %v6176_v18  ;;  %vm2041_vm15 = vweird.f32 %v4050_v35  ;;  %vm6879_vm2 = vmmov %vm6878_vm3 }
 0x663   : > { %v2003_v14 = vsel %vm2000_vm0, %v2002_v54, %v1998_v50  ;;  %vm2040_vm0 = vweird.f32 %v6176_v18  ;;  %vm2015_vm12 = vcmp.eq.f32.partialorder %v2014_v8, 8.507059e+37  ;;  %v1928_v18 = vadd.f32 %v6163_v37, %v6182_v15 }
 0x664   : > { %v2024_v11 = vadd.f32 %v4048_v24, %v2023_v32  ;;  %v2037_v40 = vsub.f32 1.0, %v2036_v13  ;;  %v2052_v63 = vmul.f32 %v2003_v14, %v6174_v7  ;;  %v2013_v7 = vsel %vm6220_vm5, %v6178_v39, %v2009_v46  ;;  %vm2042_vm4 = vmor %vm2040_vm0, %vm2041_vm15 }
 0x665   : > { %v2018_v12 = vsel %vm2015_vm12, %v2017_v47, %v2013_v7  ;;  %vm6884_vm0 = vmmov %vm6879_vm2  ;;  %v4788_v50 = vmov 0   ;;  %v4792_v13 = vmov 0   ;;  %v4796_v14 = vmov 0  }
 0x666   : > { %v2028_v3 = vsel %vm2027_vm9, %v4048_v24, %v2024_v11  ;;  %v2038_v57 = vmul.f32 %v4050_v35, %v2037_v40  ;;  %v2053_v56 = vmul.f32 %v2018_v12, %v1870_v43  ;;  %vm6880_vm9 = vmmov %vm6879_vm2  ;;  %v4800_v46 = vmov 0  }
 0x667   : > { %v2033_v22 = vsel %vm2030_vm11, %v2032_v44, %v2028_v3  ;;  %2066 = vrot.lane.b32.xlu2 %v2052_v63, %s4857_s27  ;;  %vm6881_vm11 = vcmp.lt.s32.totalorder %v5219_v23, 126  ;;  %vm6886_vm12 = vmmov %vm6884_vm0  ;;  %v4804_v8 = vmov 0   ;;  %v4808_v11 = vmov 0  }
 0x668   : > { %2080 = vrot.lane.b32.xlu0 %v6189_v36, %s4858_s26  ;;  %v6230_v10 = vmul.f32 %v2033_v22, %v1899_v53  ;;  %v2039_v9 = vadd.f32 %v4050_v35, %v2038_v57  ;;  %vm6882_vm15 = vmmov %vm6881_vm11  ;;  %v4812_v40 = vmov 0   ;;  %v4816_v5 = vmov 0  }
 0x669   : > { %vm6883_vm5 = vmmov %vm6881_vm11  ;;  %v4820_v44 = vmov 0   ;;  %v4828_v4 = vmov 0   ;;  %v4832_v3 = vmov 0   ;;  %v4867_v57 = vmov (%p5191_p3), 127  }
 0x66a   : > { %v6235_v16 = vadd.f32 %v6230_v10, %v5991_v52  ;;  %2064 = vrot.lane.b32.xlu1 %v6230_v10, %s4857_s27  ;;  %v2043_v39 = vsel %vm2042_vm4, %v4050_v35, %v2039_v9  ;;  %vm6885_vm4 = vmmov %vm6884_vm0  ;;  %v4868_v6 = vmov (%p5191_p3), 0  }
 0x66b   : > { %v2048_v26 = vsel %vm2045_vm6, %v2047_v61, %v2043_v39  ;;  %vm6887_vm6 = vmmov %vm6883_vm5  ;;  %4052 = vset.pattern.permute.xlu1 (%p5191_p3), %v4867_v57  ;;  %4051 = vset.pattern.permute.xlu0 (%p5191_p3), %v4868_v6 }
 0x66c   : > { %v2055_v45 = vmul.f32 %v2048_v26, %v1928_v18 }
 0x66f   : > { %2060 = vrot.lane.b32.xlu2 %v2053_v56, %s4857_s27 }
 0x670   : > { %2068 = vrot.lane.b32.xlu0 %v2055_v45, %s4857_s27 }
 0x672   : > { %2082 = vrot.lane.b32.xlu1 %v6230_v10, %s4858_s26 }
 0x677   : > { %2078 = vrot.lane.b32.xlu2 %v2053_v56, %s4858_s26 }
 0x678   : > { %2086 = vrot.lane.b32.xlu0 %v2055_v45, %s4858_s26 }
 0x67a   : > { %2126 = vperm.xlu1 (%p5191_p3), %4052, %v6189_v36  }
 0x67f   : > { %2084 = vrot.lane.b32.xlu2 %v2052_v63, %s4858_s26  ;;  %v4824_v63 = vmov 0  }
 0x680   : > { %2105 = vperm.xlu0 (%p5191_p3), %4051, %v6189_v36  }
 0x682   : > { %2130 = vperm.xlu1 (%p5191_p3), %4052, %v6230_v10  }
 0x688   : > { %2110 = vperm.xlu0 (%p5191_p3), %4051, %v6230_v10  }
 0x690   : > { %4053 = vset.pattern.permute.xlu0 (%p5191_p3), %v4867_v57 }
 0x6b9   : > { %v2059_v52 = vpop.permute.xlu2 %2058 }
 0x6c1   : > { %v2067_v1 = vpop.permute.xlu2 %2066 }
 0x6c2   : > { %v6252_v37 = vsel %vm6878_vm3, %v2067_v1, %v2059_v52  ;;  %vm6888_vm3 = vmmov %vm6883_vm5 }
 0x6c9   : > { %v2061_v15 = vpop.permute.xlu2 %2060 }
 0x6d1   : > { %v2079_v59 = vpop.permute.xlu2 %2078  ;;  %v2077_v55 = vpop.permute.xlu1 %2076 }
 0x6d2   : > { %v2063_v41 = vpop.permute.xlu0 %2062 }
 0x6d3   : > { %v6256_v24 = vsel %vm6879_vm2, %v2063_v41, %v2067_v1   ;;  %v6260_v49 = vsel %vm6880_vm9, %v2059_v52, %v2063_v41  ;;  %vm6889_vm2 = vmmov %vm6888_vm3 }
 0x6d4   : > { %v4825_v63 = vmov (%p5191_p3), %v6256_v24  }
 0x6d9   : > { %v2085_v42 = vpop.permute.xlu2 %2084 }
 0x6da   : > { %v2081_v48 = vpop.permute.xlu0 %2080  ;;  %v6264_v21 = vsel %vm6881_vm11, %v2085_v42, %v2077_v55 }
 0x6db   : > { %v6268_v38 = vsel %vm6882_vm15, %v2077_v55, %v2081_v48   ;;  %v6272_v62 = vsel %vm6883_vm5, %v2081_v48, %v2085_v42 }
 0x6dc   : > { %v2065_v53 = vpop.permute.xlu1 %2064  ;;  %v4809_v11 = vmov (%p5191_p3), %v6268_v38  }
 0x6dd   : > { %v6276_v51 = vsel %vm6884_vm0, %v2061_v15, %v2065_v53 }
 0x6e2   : > { %v2069_v60 = vpop.permute.xlu0 %2068 }
 0x6e3   : > { %v6280_v20 = vsel %vm6885_vm4, %v2065_v53, %v2069_v60   ;;  %v6284_v35 = vsel %vm6886_vm12, %v2069_v60, %v2061_v15 }
 0x6e4   : > { %v2083_v19 = vpop.permute.xlu1 %2082  ;;  %v4813_v40 = vmov (%p5191_p3), %v6280_v20  }
 0x6e5   : > { %v6288_v25 = vsel %vm6887_vm6, %v2079_v59, %v2083_v19  }
 0x6e6   : > { %v4797_v14 = vmov (%p5191_p3), %v6288_v25  }
 0x6e7   : > { %2096 = sbr.rel (!%p5191_p3) target bundleno = 1788 (0x6fc), region = 104 }
 0x6ea   : > { %v2087_v54 = vpop.permute.xlu0 %2086 }
 0x6eb   : > { %v6292_v28 = vsel %vm6888_vm3, %v2083_v19, %v2087_v54  ;;  %v6296_v32 = vsel %vm6889_vm2, %v2087_v54, %v2079_v59 }
 0x6ec   : > { %v2127_v2 = vpop.permute.xlu1 %2126 }
 0x6ed   : > { %v2134_v8 = vsel %vm5256_vm13, %v2127_v2, %v6272_v62   ;;  %v2135_v46 = vsel %vm5232_vm7, %v2127_v2, %v6264_v21  }
 0x6f2   : > { %v2106_v22 = vpop.permute.xlu0 %2105 }
 0x6f3   : > { %v2113_v3 = vsel %vm5222_vm1, %v2106_v22, %v6252_v37   ;;  %v2114_v4 = vsel %vm5238_vm8, %v2106_v22, %v6260_v49  }
 0x6f4   : > { %v2131_v36 = vpop.permute.xlu1 %2130 }
 0x6f5   : > { %v2137_v13 = vsel %vm5256_vm13, %v2131_v36, %v6292_v28   ;;  %v2138_v50 = vsel %vm5232_vm7, %v2131_v36, %v6296_v32  }
 0x6fa   : > { %v2111_v7 = vpop.permute.xlu0 %2110 }
 0x6fb   : > { %v2116_v44 = vsel %vm5222_vm1, %v2111_v7, %v6284_v35   ;;  %v2117_v5 = vsel %vm5238_vm8, %v2111_v7, %v6276_v51  }
 0x6fc PF: > { %vm6890_vm1 = vcmp.ne.s32.totalorder %v5361_v17, 0  ;;  %4055 = vset.pattern.permute.xlu1 %v4852_v0  ;;  %s6896_s29 = sld [smem:[#allocation30_spill]]  ;;  %4054 = vset.pattern.permute.xlu0 %v4852_v0  ;;  %vm6904_vm3 = vcmask 261120   ;;  %v4834_v3 = vphi %v4832_v3, %v2113_v3   ;;  %v4830_v4 = vphi %v4828_v4, %v2114_v4   ;;  %v4826_v63 = vphi %v4824_v63, %v4825_v63   ;;  %v4822_v44 = vphi %v4820_v44, %v2116_v44   ;;  %v4818_v5 = vphi %v4816_v5, %v2117_v5   ;;  %v4814_v40 = vphi %v4812_v40, %v4813_v40   ;;  %v4810_v11 = vphi %v4808_v11, %v4809_v11   ;;  %v4806_v8 = vphi %v4804_v8, %v2134_v8   ;;  %v4802_v46 = vphi %v4800_v46, %v2135_v46   ;;  %v4798_v14 = vphi %v4796_v14, %v4797_v14   ;;  %v4794_v13 = vphi %v4792_v13, %v2137_v13   ;;  %v4790_v50 = vphi %v4788_v50, %v2138_v50  }
 0x6fd   : > { %v3183_v27 = vsel %vm6890_vm1, %v6288_v25, %v4798_v14  ;;  %vm6891_vm7 = vmmov %vm6890_vm1  ;;  %s6903_s23 = sld [smem:[#allocation29_spill]] }
 0x6fe   : > { %v3187_v29 = vsel %vm6891_vm7, %v6292_v28, %v4794_v13  ;;  %vm6892_vm8 = vmmov %vm6890_vm1  ;;  %2220 = vmatpush.msrb.mxu3 %v3183_v27 }
 0x6ff   : > { %v3191_v30 = vsel %vm6892_vm8, %v6296_v32, %v4790_v50  ;;  %vm6893_vm13 = vmmov %vm6890_vm1  ;;  %2249 = vmatpush.msra.mxu0 %v3187_v29 }
 0x700   : > { %v3171_v33 = vsel %vm6893_vm13, %v6268_v38, %v4810_v11  ;;  %vm6894_vm9 = vmmov %vm6890_vm1  ;;  %2278 = vmatpush.msra.mxu1 %v3191_v30 }
 0x701   : > { %v3175_v10 = vsel %vm6894_vm9, %v6272_v62, %v4806_v8  ;;  %vm6895_vm11 = vmmov %vm6890_vm1  ;;  %2221 = vmatpush.msrb.mxu3 %v3171_v33 }
 0x702   : > { %v3179_v9 = vsel %vm6895_vm11, %v6264_v21, %v4802_v46  ;;  %v2895_v47 = vld [vmem:[%s6896_s29 + $0x80] sm:$0xff]  ;;  %vm6897_vm15 = vmmov %vm6890_vm1  ;;  %2250 = vmatpush.msra.mxu0 %v3175_v10  ;;  %v2897_v45 = vld [vmem:[%s6896_s29 + $0x90] sm:$0xff] }
 0x703   : > { %v3159_v61 = vsel %vm6897_vm15, %v6284_v35, %v4822_v44  ;;  %vm6898_vm5 = vmmov %vm6890_vm1  ;;  %2279 = vmatpush.msra.mxu1 %v3179_v9  ;;  %2178 = vperm.xlu1 %4055, %v2895_v47   ;;  %v2899_v56 = vld [vmem:[%s6903_s23 + $0x80] sm:$0xff]  ;;  %v2896_v52 = vld [vmem:[%s6896_s29 + $0x88] sm:$0xff] }
 0x704   : > { %v3163_v39 = vsel %vm6898_vm5, %v6276_v51, %v4818_v5  ;;  %vm6899_vm0 = vmmov %vm6890_vm1  ;;  %2222 = vmatpush.msrb.mxu3 %v3159_v61  ;;  %2188 = vperm.xlu0 %4054, %v2897_v45   ;;  %v2900_v1 = vld [vmem:[%s6903_s23 + $0x88] sm:$0xff]  ;;  %v2901_v15 = vld [vmem:[%s6903_s23 + $0x90] sm:$0xff] }
 0x705   : > { %v3167_v12 = vsel %vm6899_vm0, %v6280_v20, %v4814_v40  ;;  %vm6900_vm4 = vmmov %vm6899_vm0  ;;  %2251 = vmatpush.msra.mxu0 %v3163_v39  ;;  %v2902_v59 = vld [vmem:[%s6903_s23 + $0x98] sm:$0xff] }
 0x706   : > { %v3147_v43 = vsel %vm6900_vm4, %v6252_v37, %v4834_v3  ;;  %vm6901_vm12 = vmmov %vm6899_vm0  ;;  %2280 = vmatpush.msra.mxu1 %v3167_v12  ;;  %v2898_v37 = vld [vmem:[%s6896_s29 + $0x98] sm:$0xff] }
 0x707   : > { %v3151_v26 = vsel %vm6901_vm12, %v6260_v49, %v4830_v4  ;;  %vm6902_vm6 = vmmov %vm6899_vm0  ;;  %2223 = vmatpush.msrb.mxu3 %v3147_v43 }
 0x708   : > { %v3155_v18 = vsel %vm6902_vm6, %v6256_v24, %v4826_v63  ;;  %2252 = vmatpush.msra.mxu0 %v3151_v26  ;;  %2903 = vmatmul.msk.f32.vlgmr.msrb.gmra.mxu3 %vm6904_vm3, %v2899_v56  ;;  %vm6905_vm2 = vmmov %vm6904_vm3 }
 0x709   : > { %2281 = vmatpush.msra.mxu1 %v3155_v18  ;;  %2907 = vmatmul.msk.f32.vlgmr.msra.gmra.mxu0 %vm6905_vm2, %v2899_v56  ;;  %vm6906_vm1 = vmmov %vm6905_vm2 }
 0x70a   : > { %2911 = vmatmul.msk.f32.vlgmr.msra.gmra.mxu1 %vm6906_vm1, %v2899_v56  ;;  %vm6907_vm7 = vmmov %vm6906_vm1 }
 0x70b   : > { %2183 = vperm.xlu1 %4055, %v2896_v52   ;;  %vm6908_vm8 = vmmov %vm6906_vm1 }
 0x70c   : > { %vm6909_vm13 = vmmov %vm6906_vm1  ;;  %2193 = vperm.xlu0 %4054, %v2898_v37  }
 0x70d   : > { %vm6910_vm9 = vmmov %vm6906_vm1 }
 0x70e   : > { %vm6911_vm11 = vmmov %vm6906_vm1 }
 0x70f   : > { %vm6912_vm15 = vmmov %vm6906_vm1 }
 0x710   : > { %2904 = vmatmul.msk.f32.gmra.mxu3 %vm6907_vm7, %v2900_v1  ;;  %vm6913_vm5 = vmmov %vm6906_vm1 }
 0x711   : > { %2908 = vmatmul.msk.f32.gmra.mxu0 %vm6908_vm8, %v2900_v1  ;;  %vm6914_vm0 = vmmov %vm6906_vm1 }
 0x712   : > { %2912 = vmatmul.msk.f32.gmra.mxu1 %vm6909_vm13, %v2900_v1  ;;  %vm6915_vm4 = vmmov %vm6914_vm0 }
 0x718   : > { %2905 = vmatmul.msk.f32.gmra.mxu3 %vm6910_vm9, %v2901_v15 }
 0x719   : > { %2909 = vmatmul.msk.f32.gmra.mxu0 %vm6911_vm11, %v2901_v15 }
 0x71a   : > { %2913 = vmatmul.msk.f32.gmra.mxu1 %vm6912_vm15, %v2901_v15 }
 0x720   : > { %2906 = vmatmul.msk.f32.gmra.mxu3 %vm6913_vm5, %v2902_v59 }
 0x721   : > { %2910 = vmatmul.msk.f32.gmra.mxu0 %vm6914_vm0, %v2902_v59 }
 0x722   : > { %2914 = vmatmul.msk.f32.gmra.mxu1 %vm6915_vm4, %v2902_v59 }
 0x775   : > { %v6428_v7 = vpop.permute.xlu1 %2178 }
 0x776   : > { %v2189_v48 = vpop.permute.xlu0 %2188 }
 0x77e   : > { %v2194_v25 = vpop.permute.xlu0 %2193 }
 0x786   : > { %v6406_v41 = vpop.f32.mrf.mxu0 }
 0x787   : > { %v6408_v55 = vpop.f32.mrf.mxu1  ;;  %v2255_v45 = vadd.f32 %v6406_v41, %v6428_v7 }
 0x78b   : > { %v6410_v24 = vpop.f32.mrf.mxu3 }
 0x78e   : > { %v6412_v49 = vpop.f32.mrf.mxu0 }
 0x78f   : > { %v6414_v42 = vpop.f32.mrf.mxu1 }
 0x793   : > { %v6416_v21 = vpop.f32.mrf.mxu3 }
 0x796   : > { %v2260_v38 = vpop.f32.mrf.mxu0 }
 0x797   : > { %v2289_v62 = vpop.f32.mrf.mxu1  ;;  %v2261_v53 = vadd.f32 %v2260_v38, %v2189_v48 }
 0x798   : > { %v2290_v51 = vadd.f32 %v2289_v62, %v2189_v48 }
 0x799   : > { %v2916_v60 = vmul.f32 -1.442695, %v2261_v53 }
 0x79a   : > { %v2917_v20 = vmul.f32 -1.442695, %v2290_v51  ;;  %v6447_v51 = vpop.permute.xlu1 %2183 }
 0x79b   : > { %4056 = vpow2.f32 %v2916_v60  ;;  %v2231_v35 = vpop.f32.mrf.mxu3 }
 0x79c   : > { %4058 = vpow2.f32 %v2917_v20  ;;  %v2232_v19 = vadd.f32 %v2231_v35, %v2189_v48  ;;  %v2226_v48 = vadd.f32 %v6410_v24, %v6428_v7 }
 0x79e   : > { %v2915_v54 = vmul.f32 -1.442695, %v2232_v19  ;;  %v2263_v28 = vpop.f32.mrf.mxu0 }
 0x79f   : > { %v2292_v32 = vpop.f32.mrf.mxu1  ;;  %v2264_v50 = vadd.f32 %v2263_v28, %v2194_v25 }
 0x7a0   : > { %v2293_v13 = vadd.f32 %v2292_v32, %v2194_v25  ;;  %4060 = vpow2.f32 %v2915_v54 }
 0x7a1   : > { %v4057_v14 = vpop.eup %4056  ;;  %v2919_v46 = vmul.f32 -1.442695, %v2264_v50  ;;  %v4840_v50 = vmov 0  }
 0x7a2   : > { %v4059_v8 = vpop.eup %4058  ;;  %v2314_v11 = vadd.f32 1.0, %v4057_v14  ;;  %v2920_v40 = vmul.f32 -1.442695, %v2293_v13  ;;  %v2258_v14 = vadd.f32 %v6412_v49, %v6447_v51 }
 0x7a3   : > { %v6418_v5 = vadd.f32 1.0, %v4059_v8  ;;  %4062 = vpow2.f32 %v2919_v46  ;;  %v2234_v44 = vpop.f32.mrf.mxu3 }
 0x7a4   : > { %4064 = vrcp.f32 %v2314_v11  ;;  %v2235_v63 = vadd.f32 %v2234_v44, %v2194_v25  ;;  %v2343_v9 = vand.u32 2147483647, %v2314_v11  ;;  %v2345_v47 = vand.u32 2147483648, %v2314_v11 }
 0x7a5   : > { %4066 = vrcp.f32 %v6418_v5  ;;  %vm2339_vm6 = vweird.f32 %v2314_v11  ;;  %v2360_v44 = vand.u32 2147483648, %v6418_v5 }
 0x7a6   : > { %v4061_v4 = vpop.eup %4060  ;;  %4068 = vpow2.f32 %v2920_v40  ;;  %v2918_v3 = vmul.f32 -1.442695, %v2235_v63  ;;  %v2346_v52 = vor.u32 1.1754944e-38, %v2345_v47  ;;  %vm2344_vm2 = vcmp.eq.f32.partialorder %v2343_v9, 8.507059e+37 }
 0x7a7   : > { %v6421_v57 = vadd.f32 1.0, %v4061_v4 }
 0x7a8   : > { %4070 = vpow2.f32 %v2918_v3 }
 0x7a9   : > { %v4063_v6 = vpop.eup %4062  ;;  %4072 = vrcp.f32 %v6421_v57  ;;  %vm2324_vm7 = vweird.f32 %v6421_v57  ;;  %v2330_v20 = vand.u32 2147483648, %v6421_v57  ;;  %v2328_v24 = vand.u32 2147483647, %v6421_v57 }
 0x7aa   : > { %v4065_v2 = vpop.eup %4064  ;;  %v6424_v22 = vadd.f32 1.0, %v4063_v6 }
 0x7ab   : > { %v6426_v36 = vpop.eup %4066  ;;  %v2335_v27 = vmul.f32 %v4065_v2, %v2314_v11  ;;  %vm2340_vm12 = vweird.f32 %v4065_v2  ;;  %v2331_v40 = vor.u32 1.1754944e-38, %v2330_v20  ;;  %vm2329_vm15 = vcmp.eq.f32.partialorder %v2328_v24, 8.507059e+37 }
 0x7ac   : > { %v4069_v29 = vpop.eup %4068  ;;  %4074 = vrcp.f32 %v6424_v22  ;;  %v2350_v43 = vmul.f32 %v6426_v36, %v6418_v5  ;;  %vm2341_vm3 = vmor %vm2339_vm6, %vm2340_vm12  ;;  %v2388_v35 = vand.u32 2147483647, %v6424_v22  ;;  %v2390_v19 = vand.u32 2147483648, %v6424_v22 }
 0x7ad   : > { %v6431_v30 = vadd.f32 1.0, %v4069_v29  ;;  %v2336_v33 = vsub.f32 1.0, %v2335_v27  ;;  %vm2384_vm9 = vweird.f32 %v6424_v22  ;;  %vm2355_vm5 = vweird.f32 %v6426_v36 }
 0x7ae   : > { %v4071_v10 = vpop.eup %4070  ;;  %v2351_v59 = vsub.f32 1.0, %v2350_v43  ;;  %v2391_v63 = vor.u32 1.1754944e-38, %v2390_v19  ;;  %vm2389_vm0 = vcmp.eq.f32.partialorder %v2388_v35, 8.507059e+37  ;;  %vm2354_vm12 = vweird.f32 %v6418_v5 }
 0x7af   : > { %v4073_v61 = vpop.eup %4072  ;;  %4076 = vrcp.f32 %v6431_v30  ;;  %v6434_v39 = vadd.f32 1.0, %v4071_v10  ;;  %v2337_v12 = vmul.f32 %v4065_v2, %v2336_v33  ;;  %vm6488_vm6 = vmor %vm2354_vm12, %vm2355_vm5  ;;  %v2361_v43 = vor.u32 1.1754944e-38, %v2360_v44 }
 0x7b0   : > { %v2320_v26 = vmul.f32 %v4073_v61, %v6421_v57  ;;  %vm2325_vm1 = vweird.f32 %v4073_v61  ;;  %v2352_v13 = vmul.f32 %v6426_v36, %v2351_v59  ;;  %v2403_v59 = vand.u32 2147483647, %v6431_v30 }
 0x7b1   : > { %4078 = vrcp.f32 %v6434_v39  ;;  %v2338_v18 = vadd.f32 %v4065_v2, %v2337_v12  ;;  %vm6465_vm13 = vmor %vm2324_vm7, %vm2325_vm1  ;;  %v2375_v33 = vand.u32 2147483648, %v6434_v39 }
 0x7b2   : > { %v4075_v56 = vpop.eup %4074  ;;  %v2321_v1 = vsub.f32 1.0, %v2320_v26  ;;  %v2353_v57 = vadd.f32 %v6426_v36, %v2352_v13  ;;  %v4844_v13 = vmov 0  }
 0x7b3   : > { %v2380_v37 = vmul.f32 %v4075_v56, %v6424_v22  ;;  %v2342_v15 = vsel %vm2341_vm3, %v4065_v2, %v2338_v18  ;;  %vm2385_vm8 = vweird.f32 %v4075_v56  ;;  %v2358_v22 = vand.u32 2147483647, %v6418_v5 }
 0x7b4   : > { %v2347_v38 = vsel %vm2344_vm2, %v2346_v52, %v2342_v15  ;;  %v2322_v62 = vmul.f32 %v4073_v61, %v2321_v1  ;;  %vm2386_vm11 = vmor %vm2384_vm9, %vm2385_vm8  ;;  %vm2369_vm3 = vweird.f32 %v6434_v39  ;;  %v2357_v12 = vsel %vm6488_vm6, %v6426_v36, %v2353_v57 }
 0x7b5   : > { %v6445_v53 = vpop.eup %4076  ;;  %v6449_v60 = vmul.f32 %v2347_v38, %v2255_v45  ;;  %v2381_v41 = vsub.f32 1.0, %v2380_v37  ;;  %vm2359_vm1 = vcmp.eq.f32.partialorder %v2358_v22, 8.507059e+37  ;;  %v2376_v18 = vor.u32 1.1754944e-38, %v2375_v33 }
 0x7b6   : > { %v2323_v25 = vadd.f32 %v4073_v61, %v2322_v62  ;;  %v2395_v8 = vmul.f32 %v6445_v53, %v6431_v30  ;;  %v2229_v52 = vadd.f32 %v6416_v21, %v6447_v51  ;;  %vm2400_vm8 = vweird.f32 %v6445_v53 }
 0x7b7   : > { %v4079_v54 = vpop.eup %4078  ;;  %2427 = vrot.lane.b32.xlu2 %v6449_v60, %s4862_s21  ;;  %v6460_v28 = vadd.f32 %v6449_v60, %v6201_v58  ;;  %2421 = vrot.lane.b32.xlu0 %v6449_v60, %s4861_s12  ;;  %v2382_v32 = vmul.f32 %v4075_v56, %v2381_v41  ;;  %v2405_v37 = vand.u32 2147483648, %v6431_v30 }
 0x7b8   : > { %v2327_v46 = vsel %vm6465_vm13, %v4073_v61, %v2323_v25  ;;  %v2365_v58 = vmul.f32 %v4079_v54, %v6434_v39  ;;  %vm2370_vm4 = vweird.f32 %v4079_v54  ;;  %v2396_v27 = vsub.f32 1.0, %v2395_v8 }
 0x7b9   : > { %v2383_v11 = vadd.f32 %v4075_v56, %v2382_v32  ;;  %v2332_v3 = vsel %vm2329_vm15, %v2331_v40, %v2327_v46  ;;  %v2373_v61 = vand.u32 2147483647, %v6434_v39  ;;  %vm2371_vm2 = vmor %vm2369_vm3, %vm2370_vm4  ;;  %vm2399_vm13 = vweird.f32 %v6431_v30 }
 0x7ba   : > { %v2366_v49 = vsub.f32 1.0, %v2365_v58  ;;  %v2409_v10 = vmul.f32 %v2332_v3, %v2226_v48  ;;  %v2397_v26 = vmul.f32 %v6445_v53, %v2396_v27  ;;  %vm2401_vm9 = vmor %vm2399_vm13, %vm2400_vm8  ;;  %v2406_v21 = vor.u32 1.1754944e-38, %v2405_v37 }
 0x7bb   : > { %v2387_v4 = vsel %vm2386_vm11, %v4075_v56, %v2383_v11  ;;  %v2362_v56 = vsel %vm2359_vm1, %v2361_v43, %v2357_v12  ;;  %vm2374_vm7 = vcmp.eq.f32.partialorder %v2373_v61, 8.507059e+37  ;;  %vm2404_vm11 = vcmp.eq.f32.partialorder %v2403_v59, 8.507059e+37 }
 0x7bc   : > { %v2392_v6 = vsel %vm2389_vm0, %v2391_v63, %v2387_v4  ;;  %v2367_v2 = vmul.f32 %v4079_v54, %v2366_v49  ;;  %v2398_v36 = vadd.f32 %v6445_v53, %v2397_v26  ;;  %v2287_v48 = vadd.f32 %v6414_v42, %v6447_v51 }
 0x7bd   : > { %v6481_v29 = vmul.f32 %v2392_v6, %v2258_v14  ;;  %vm6920_vm15 = vcmp.lt.s32.totalorder %v5219_v23, 4  ;;  %vm6922_vm0 = vcmp.lt.s32.totalorder %v5219_v23, 124  ;;  %v4836_v32 = vmov 0  }
 0x7be   : > { %v2368_v47 = vadd.f32 %v4079_v54, %v2367_v2  ;;  %vm6921_vm5 = vmmov %vm6920_vm15  ;;  %v4848_v14 = vmov 0   ;;  %v4869_v46 = vmov (%p5191_p3), 127   ;;  %v4870_v58 = vmov (%p5191_p3), 0  }
 0x7bf   : > { %2423 = vrot.lane.b32.xlu1 %v6481_v29, %s4861_s12  ;;  %v6498_v5 = vadd.f32 %v6481_v29, %v6235_v16  ;;  %2429 = vrot.lane.b32.xlu0 %v6481_v29, %s4862_s21  ;;  %v2284_v16 = vadd.f32 %v6408_v55, %v6428_v7  ;;  %v2402_v55 = vsel %vm2401_vm9, %v6445_v53, %v2398_v36  ;;  %vm6923_vm4 = vmmov %vm6922_vm0 }
 0x7c0   : > { %2417 = vrot.lane.b32.xlu2 %v2409_v10, %s4861_s12  ;;  %v2372_v39 = vsel %vm2371_vm2, %v4079_v54, %v2368_v47  ;;  %v2407_v7 = vsel %vm2404_vm11, %v2406_v21, %v2402_v55  ;;  %4081 = vset.pattern.permute.xlu1 (%p5191_p3), %v4869_v46 }
 0x7c1   : > { %v2377_v45 = vsel %vm2374_vm7, %v2376_v18, %v2372_v39  ;;  %v2411_v1 = vmul.f32 %v2362_v56, %v2284_v16  ;;  %v2414_v38 = vmul.f32 %v2407_v7, %v2287_v48  ;;  %4080 = vset.pattern.permute.xlu0 (%p5191_p3), %v4870_v58 }
 0x7c2   : > { %v2412_v15 = vmul.f32 %v2377_v45, %v2229_v52 }
 0x7c7   : > { %2431 = vrot.lane.b32.xlu1 %v2411_v1, %s4862_s21  ;;  %2444 = vperm.xlu0 (%p5191_p3), %4080, %v6449_v60  }
 0x7c8   : > { %2419 = vrot.lane.b32.xlu2 %v2412_v15, %s4861_s12 }
 0x7cf   : > { %2457 = vperm.xlu1 (%p5191_p3), %4081, %v6449_v60   ;;  %2449 = vperm.xlu0 (%p5191_p3), %4080, %v6481_v29  }
 0x7d0   : > { %2433 = vrot.lane.b32.xlu2 %v2414_v38, %s4862_s21 }
 0x7d7   : > { %2461 = vperm.xlu1 (%p5191_p3), %4081, %v6481_v29   ;;  %4082 = vset.pattern.permute.xlu0 (%p5191_p3), %v4869_v46 }
 0x811   : > { %v2428_v62 = vpop.permute.xlu2 %2427 }
 0x81a   : > { %v2418_v41 = vpop.permute.xlu2 %2417 }
 0x822   : > { %v2420_v20 = vpop.permute.xlu2 %2419 }
 0x829   : > { %v2422_v30 = vpop.permute.xlu0 %2421 }
 0x82a   : > { %v2425_v35 = vsel %vm6920_vm15, %v2418_v41, %v2422_v30  ;;  %v2434_v19 = vpop.permute.xlu2 %2433 }
 0x831   : > { %v2424_v25 = vpop.permute.xlu1 %2423  ;;  %v2430_v24 = vpop.permute.xlu0 %2429 }
 0x832   : > { %v2426_v53 = vsel %vm6921_vm5, %v2420_v20, %v2424_v25  ;;  %v2436_v54 = vsel %vm6922_vm0, %v2430_v24, %v2434_v19 }
 0x836   : > { %2439 = sbr.rel (!%p5191_p3) target bundleno = 2123 (0x84b), region = 112 }
 0x839   : > { %v2432_v42 = vpop.permute.xlu1 %2431  ;;  %v2445_v8 = vpop.permute.xlu0 (%p5191_p3), %2444 }
 0x83a   : > { %v2435_v51 = vsel %vm6923_vm4, %v2428_v62, %v2432_v42  ;;  %v2452_v14 = vsel (%p5191_p3), %vm5244_vm10, %v2445_v8, %v2425_v35  }
 0x841   : > { %v2458_v23 = vpop.permute.xlu1 %2457  ;;  %v2450_v40 = vpop.permute.xlu0 %2449 }
 0x842   : > { %v2464_v50 = vsel %vm5262_vm14, %v2458_v23, %v2435_v51   ;;  %v2453_v13 = vsel %vm5244_vm10, %v2450_v40, %v2426_v53  }
 0x849   : > { %v2462_v11 = vpop.permute.xlu1 %2461 }
 0x84a   : > { %v2465_v32 = vsel %vm5262_vm14, %v2462_v11, %v2436_v54  }
 0x84b PF: > { %vm6924_vm12 = vcmp.ne.s32.totalorder %v5361_v17, 0  ;;  %4084 = vset.pattern.permute.xlu1 %v4852_v0  ;;  %s6926_s21 = sld [smem:[#allocation30_spill]]  ;;  %4083 = vset.pattern.permute.xlu0 %v4852_v0  ;;  %vm6930_vm3 = vcmask 261120   ;;  %v4850_v14 = vphi %v4848_v14, %v2452_v14   ;;  %v4846_v13 = vphi %v4844_v13, %v2453_v13   ;;  %v4842_v50 = vphi %v4840_v50, %v2464_v50   ;;  %v4838_v32 = vphi %v4836_v32, %v2465_v32  }
 0x84c   : > { %v3208_v60 = vsel %vm6924_vm12, %v2436_v54, %v4838_v32  ;;  %vm6925_vm6 = vmmov %vm6924_vm12  ;;  %4085 = vset.pattern.permute.xlu2 %v4852_v0  ;;  %s6929_s15 = sld [smem:[#allocation29_spill]]  ;;  %vm2597_vm12 = vcmask 130048  }
 0x84d   : > { %v3204_v34 = vsel %vm6925_vm6, %v2435_v51, %v4842_v50  ;;  %2531 = vmatpush.msra.mxu2 %v3208_v60  ;;  %vm6927_vm10 = vmmov %vm6925_vm6  ;;  %s6934_s23 = sld [smem:[#allocation32_spill]] }
 0x84e   : > { %v3200_v44 = vsel %vm6927_vm10, %v2426_v53, %v4846_v13  ;;  %vm6928_vm14 = vmmov %vm6925_vm6  ;;  %s6935_s8 = sld [smem:[#allocation16_spill]] }
 0x84f   : > { %2532 = vmatpush.msra.mxu2 %v3204_v34  ;;  %v3196_v49 = vsel %vm6928_vm14, %v2425_v35, %v4850_v14  ;;  %vm6931_vm2 = vmmov %vm6930_vm3  ;;  %s6936_s1 = sld [smem:[#allocation15_spill]] }
 0x850   : > { %vm6932_vm1 = vmmov %vm6931_vm2  ;;  %s6937_s6 = sld [smem:[#allocation31_spill]] }
 0x851   : > { %v2922_v31 = vld [vmem:[%s6926_s21 + $0xa8] sm:$0xff]  ;;  %v2924_v63 = vld [vmem:[%s6926_s21 + $0xb8] sm:$0xff]  ;;  %2533 = vmatpush.msra.mxu2 %v3200_v44  ;;  %v2921_v3 = vld [vmem:[%s6926_s21 + $0xa0] sm:$0xff]  ;;  %s6938_s5 = sld [smem:[#allocation14_spill]] }
 0x852   : > { %2494 = vperm.xlu1 %4084, %v2922_v31   ;;  %2504 = vperm.xlu0 %4083, %v2924_v63   ;;  %v2925_v4 = vld [vmem:[%s6929_s15 + $0xa0] sm:$0xff]  ;;  %v2923_v0 = vld [vmem:[%s6926_s21 + $0xb0] sm:$0xff]  ;;  %v2926_v17 = vld [vmem:[%s6929_s15 + $0xa8] sm:$0xff]  ;;  %s6940_s12 = sld [smem:[#allocation33_spill]] }
 0x853   : > { %2534 = vmatpush.msra.mxu2 %v3196_v49  ;;  %v2927_v57 = vld [vmem:[%s6929_s15 + $0xb0] sm:$0xff]  ;;  %v2928_v6 = vld [vmem:[%s6929_s15 + $0xb8] sm:$0xff]  ;;  %vm6933_vm7 = vmmov %vm6932_vm1 }
 0x854   : > { %2929 = vmatmul.msk.f32.vlgmr.msra.gmra.mxu2 %vm6930_vm3, %v2925_v4  ;;  %v2591_v26 = vld [vmem:[%s6934_s23] sm:$0xff]  ;;  %s2937_s27 = sshll.u32 %s6935_s8, 2  ;;  %s6942_s23 = scalar_lea.vmem [#allocation8], %s5154_s3 }
 0x855   : > { %2594 = vperm.xlu2 %4085, %v2591_v26   ;;  %s2633_s26 = sadd.s32 %s6936_s1, %s2937_s27  ;;  %s2637_s0 = sshll.u32 %s6942_s23, 4  ;;  %s2638_s0 = int_to_ptr.vmem [resolvable:$true] %s2637_s0 }
 0x856   : > { %v2590_v14 = vld [vmem:[%s6937_s6] sm:$0xff]  ;;  %s2938_s20 = sshll.u32 %s2633_s26, 3  ;;  %s6943_s15 = smov %s6942_s23 }
 0x857   : > { %s6944_s13 = sand.u32 1, %s6938_s5  }
 0x858   : > { %s6941_s29 = smov %s6940_s12  ;;  %s2635_s21 = scalar_lea.hbm %s6940_s12, %s2938_s20 }
 0x859   : > { %s2639_s2 = sshll.u32 %s2635_s21, 4  ;;  %s2623_s6 = scalar_lea.sflag [#allocation4], %s6944_s13  ;;  %s2640_s2 = int_to_ptr.hbm [resolvable:$true] %s2639_s2 }
 0x85a   : > { %2489 = vperm.xlu1 %4084, %v2921_v3   ;;  %2499 = vperm.xlu0 %4083, %v2923_v0   ;;  %s4198_s8 = sshra.s32 %s2640_s2, 4  ;;  %s4204_s20 = scalar_lea.hbm %s6941_s29, 64  ;;  %s4199_s8 = int_to_ptr.hbm [resolvable:$true] %s4198_s8 }
 0x85b   : > { %s4200_s1 = scalar_lea.hbm %s4199_s8, 8  ;;  %p4205_p0 = scmp.lt.s32.totalorder %s4199_s8, %s6941_s29 }
 0x85c   : > { %2930 = vmatmul.msk.f32.gmra.mxu2 %vm6931_vm2, %v2926_v17  ;;  %p4201_p4 = scmp.ne.s32.totalorder %s4199_s8, %s4200_s1  ;;  %p4206_p5 = scmp.lt.s32.totalorder %s4204_s20, %s4200_s1 }
 0x85e   : > { %p4202_p7 = pnand %p4201_p4, %p5028_p9  ;;  %p4207_p13 = por %p4206_p5, %p4205_p0 }
 0x860   : > { %p4203_p12 = pneg %p4202_p7 }
 0x862   : > { %p4208_p6 = pnand %p4207_p13, %p4203_p12 }
 0x864   : > { %2931 = vmatmul.msk.f32.gmra.mxu2 %vm6932_vm1, %v2927_v57 }
 0x86c   : > { %2932 = vmatmul.msk.f32.gmra.mxu2 %vm6933_vm7, %v2928_v6 }
 0x8c4   : > { %v2505_v27 = vpop.permute.xlu0 %2504  ;;  %v2495_v36 = vpop.permute.xlu1 %2494 }
 0x8cc   : > { %v2500_v22 = vpop.permute.xlu0 %2499  ;;  %v2490_v20 = vpop.permute.xlu1 %2489 }
 0x8d7   : > { %v2536_v2 = vpop.f32.mrf.mxu2 }
 0x8d8   : > { %v2537_v24 = vadd.f32 %v2536_v2, %v2490_v20 }
 0x8df   : > { %v2539_v29 = vpop.f32.mrf.mxu2 }
 0x8e0   : > { %v2540_v53 = vadd.f32 %v2539_v29, %v2495_v36 }
 0x8e7   : > { %v2542_v33 = vpop.f32.mrf.mxu2 }
 0x8e8   : > { %v2543_v10 = vadd.f32 %v2542_v33, %v2500_v22 }
 0x8ea   : > { %v2933_v9 = vmul.f32 -1.442695, %v2543_v10 }
 0x8ec   : > { %4086 = vpow2.f32 %v2933_v9 }
 0x8ef   : > { %v2545_v47 = vpop.f32.mrf.mxu2 }
 0x8f0   : > { %v2546_v61 = vadd.f32 %v2545_v47, %v2505_v27 }
 0x8f2   : > { %v4087_v12 = vpop.eup %4086  ;;  %v2934_v43 = vmul.f32 -1.442695, %v2546_v61 }
 0x8f3   : > { %v2554_v39 = vadd.f32 1.0, %v4087_v12 }
 0x8f4   : > { %4088 = vpow2.f32 %v2934_v43 }
 0x8f5   : > { %4090 = vrcp.f32 %v2554_v39  ;;  %v2567_v55 = vand.u32 2147483648, %v2554_v39  ;;  %vm2561_vm13 = vweird.f32 %v2554_v39  ;;  %v2565_v7 = vand.u32 2147483647, %v2554_v39 }
 0x8f7   : > { %v2568_v30 = vor.u32 1.1754944e-38, %v2567_v55  ;;  %vm2566_vm5 = vcmp.eq.f32.partialorder %v2565_v7, 8.507059e+37 }
 0x8fa   : > { %v4089_v18 = vpop.eup %4088 }
 0x8fb   : > { %v4091_v56 = vpop.eup %4090  ;;  %v2555_v16 = vadd.f32 1.0, %v4089_v18 }
 0x8fc   : > { %v2557_v45 = vmul.f32 %v4091_v56, %v2554_v39  ;;  %vm2562_vm8 = vweird.f32 %v4091_v56 }
 0x8fd   : > { %4092 = vrcp.f32 %v2555_v16  ;;  %v2582_v48 = vand.u32 2147483648, %v2555_v16  ;;  %vm2563_vm9 = vmor %vm2561_vm13, %vm2562_vm8  ;;  %v2580_v62 = vand.u32 2147483647, %v2555_v16  ;;  %vm2576_vm15 = vweird.f32 %v2555_v16 }
 0x8fe   : > { %v2558_v52 = vsub.f32 1.0, %v2557_v45 }
 0x8ff   : > { %v2583_v19 = vor.u32 1.1754944e-38, %v2582_v48  ;;  %vm2581_vm4 = vcmp.eq.f32.partialorder %v2580_v62, 8.507059e+37 }
 0x900   : > { %v2559_v1 = vmul.f32 %v4091_v56, %v2558_v52 }
 0x902   : > { %v2560_v59 = vadd.f32 %v4091_v56, %v2559_v1 }
 0x903   : > { %v4093_v37 = vpop.eup %4092 }
 0x904   : > { %v2572_v15 = vmul.f32 %v4093_v37, %v2555_v16  ;;  %vm2577_vm11 = vweird.f32 %v4093_v37  ;;  %v2564_v41 = vsel %vm2563_vm9, %v4091_v56, %v2560_v59 }
 0x905   : > { %vm2578_vm0 = vmor %vm2576_vm15, %vm2577_vm11  ;;  %v2569_v25 = vsel %vm2566_vm5, %v2568_v30, %v2564_v41 }
 0x906   : > { %v2573_v21 = vsub.f32 1.0, %v2572_v15  ;;  %v2586_v32 = vmul.f32 %v2569_v25, %v2537_v24 }
 0x908   : > { %v2574_v38 = vmul.f32 %v4093_v37, %v2573_v21  ;;  %v2588_v13 = vadd.f32 %v2586_v32, %v6460_v28 }
 0x90a   : > { %v2575_v35 = vadd.f32 %v4093_v37, %v2574_v38 }
 0x90c   : > { %v2579_v54 = vsel %vm2578_vm0, %v4093_v37, %v2575_v35 }
 0x90d   : > { %v2584_v42 = vsel %vm2581_vm4, %v2583_v19, %v2579_v54 }
 0x90e   : > { %v2587_v51 = vmul.f32 %v2584_v42, %v2540_v53 }
 0x910   : > { %v2589_v50 = vadd.f32 %v2587_v51, %v6498_v5  ;;  %v2595_v5 = vpop.permute.xlu2 %2594 }
 0x912   : > { %2615 = vmatpush.msra.mxu3 %v2589_v50 }
 0x914   : > { %2616 = vmatpush.msra.mxu3 %v2588_v13 }
 0x915   : > { %2935 = vmatmul.msk.f32.vlgmr.msra.gmra.mxu3 %vm2597_vm12, %v2590_v14 }
 0x998   : > { %v2618_v28 = vpop.f32.mrf.mxu3 }
 0x999   : > { %v2619_v46 = vadd.f32 %v2618_v28, %v2595_v5 }
 0x99b   : > { %2621 = vst [vmem:[%s6943_s15] sm:$0xff] %v2619_v46 }
 0x99c   : > { %4211 = shalt.err (!%p4208_p6)
}
 0x99d   : > { %3209 = dma.vmem_to_hbm [thread:$0]  (%p5028_p9), %s2638_s0, 128, %s2640_s2, %s2623_s6  }
 0x99e PF: > { %s6945_s3 = sld [smem:[#allocation13_spill]]  ;;  %p3290_p1 = scmp.ge.s32.totalorder %s4594_s22, 2 }
 0x9a0   : > { %p3222_p2 = pnand %p3290_p1, %p5032_p10 }
 0x9a2   : > { %p3223_p8 = pneg %p3222_p2 }
 0x9a4   : > { %s2651_s12 = sand.u32 1, %s6945_s3  }
 0x9a5   : > { %s2652_s21 = scalar_lea.sflag [#allocation4], %s2651_s12 }
 0x9a6   : > { %4537 = dma.done.wait (%p3223_p8), %s2652_s21, 128  }
 0x9a7   : > { %4539 = vsyncadd (%p3223_p8), %s2652_s21, 4294967168  ;;  %s28_s22 = sadd.s32 1, %s4594_s22   ;;  %s6948_s0 = smov %s5133_s30 }
 0x9a8   : > { %p6618_p11 = scmp.ge.s32.totalorder %s28_s22, 10   ;;  %s6949_s12 = sld [smem:[#allocation14_spill]] }
 0x9a9   : > { %s6950_s2 = sld [smem:[#allocation17_spill]]  ;;  %s6953_s30 = smov %s4546_s10 }
 0x9aa   : > { %s6951_s19 = sld [smem:[#allocation18_spill]]  ;;  %s6954_s10 = smov %s4550_s11 }
 0x9ab   : > { %s6952_s21 = sld [smem:[#allocation22_spill]]  ;;  %s6955_s11 = smov %s6948_s0 }
 0x9ac   : > { %s6956_s13 = smov %s4562_s14  ;;  %s6957_s14 = smov %s5099_s18 }
 0x9ad   : > { %s6958_s15 = smov %s4570_s16  ;;  %s6959_s16 = smov %s4574_s17 }
 0x9ae   : > { %s6960_s17 = smov %s5094_s7  ;;  %s6962_s20 = smov %s5004_s28 }
 0x9af   : > { %s6961_s18 = smov %s6950_s2  ;;  %27 = sbr.rel (!%p6618_p11) target bundleno = 23 (0x17), region = 183 }
 0x9b4   :  { %2658 = vsyncpa [#allocation3], 1 }
 0x9b5   :  { %2660 = vsyncpa [#allocation3 + $0x1], 1 }
 0x9b6   :  { %2661 = vsyncpa [#allocation6], 1 }
 0x9b7   :  { %2663 = vsyncpa [#allocation6 + $0x1], 1 }
 0x9b8   :  { %2664 = vsyncpa [#allocation4], 1 }
 0x9b9   :  { %2666 = vsyncpa [#allocation4 + $0x1], 1 }

</bundles_post_ra>
